<compile_context>
chip_gen: v6e
topology: v6e:2x2x1
jax: 0.10.0
libtpu: 0.0.40
codegen_flags: <defaults>
</compile_context>

<pallas_src>
import functools

import jax
import jax.numpy as jnp
from jax.experimental import pallas as pl
from jax.experimental.pallas import tpu as pltpu


# ------------------------------- helpers --------------------------------------

def _pad_up(d, m=128):
    return ((d + m - 1) // m) * m


def _uniform(key, shape, fan_in):
    s = 1.0 / jnp.sqrt(jnp.float32(fan_in))
    return jax.random.uniform(key, shape, dtype=jnp.float32, minval=-s, maxval=s)


def _zero_pad(a, shape):
    return jnp.zeros(shape, a.dtype).at[tuple(slice(0, s) for s in a.shape)].set(a)


# ------------------------------ fused kernel ----------------------------------

def _fused_gnn_kernel(*refs, layout, slab_widths):
    """Whole GNN_7 forward for one super-batch (block-diagonal stack of graphs).

    refs layout: adj, x, pool, <one bf16 weight slab per lane width>, bias_slab, out.
    All layer weights are carved out of the VMEM-resident slabs with static slices;
    only the final (1, G, 128) logits block is written back.
    """
    adj_ref, x_ref, pool_ref = refs[0], refs[1], refs[2]
    slab_refs = {w: refs[3 + i] for i, w in enumerate(slab_widths)}
    b_ref = refs[3 + len(slab_widths)]
    out_ref = refs[4 + len(slab_widths)]

    adj = adj_ref[0]                       # (N, N)   bf16
    h = x_ref[0]                           # (N, F0p) f32

    # 7x GraphConv: relu( (A@h) @ W_rel + h @ W_root + b )  -- two accumulated MXU dots.
    for m in layout["gcn"]:
        w_slab = slab_refs[m["fop"]]
        w_rel = w_slab[m["rel_off"]:m["rel_off"] + m["fip"], :]    # static views into slab
        w_root = w_slab[m["root_off"]:m["root_off"] + m["fip"], :]
        b = b_ref[m["b_row"]:m["b_row"] + 1, :m["fop"]]
        h_bf = h.astype(jnp.bfloat16)
        agg = jnp.dot(adj, h_bf, preferred_element_type=jnp.float32)
        h = (jnp.dot(agg.astype(jnp.bfloat16), w_rel, preferred_element_type=jnp.float32)
             + jnp.dot(h_bf, w_root, preferred_element_type=jnp.float32)
             + b)
        h = jnp.maximum(h, 0.0)            # f32 epilogue (v5e has no bf16 VALU)

    # global_mean_pool as a matmul with the pre-normalized pooling matrix (f32, exact mean).
    h = jnp.dot(pool_ref[0], h, preferred_element_type=jnp.float32)   # (G, F)

    # 4x Linear MLP (ReLU on all but the last).
    n_mlp = len(layout["mlp"])
    for i, m in enumerate(layout["mlp"]):
        w = slab_refs[m["fop"]][m["off"]:m["off"] + m["fip"], :]
        b = b_ref[m["b_row"]:m["b_row"] + 1, :m["fop"]]
        h = jnp.dot(h.astype(jnp.bfloat16), w, preferred_element_type=jnp.float32) + b
        if i < n_mlp - 1:
            h = jnp.maximum(h, 0.0)

    out_ref[0] = h                         # (G, 128) lane-dense store


# ------------------------------ parameter init --------------------------------

def init_params(key,
                num_node_features=4,
                hidden_gcn=(32, 128, 256, 512, 512, 256, 256),
                hidden_mlp=(256, 128, 64),
                num_classes=1):
    """Packed bf16 weight slabs (one per padded lane width) + one f32 bias slab, plus a
    static `layout` describing each layer's slab / row offset / padded dims."""
    out_dims = list(hidden_gcn) + list(hidden_mlp) + [num_classes]
    slab_widths = tuple(sorted({_pad_up(d) for d in out_dims}))
    bias_width = max(slab_widths)

    blocks = {w: [] for w in slab_widths}
    offs = {w: 0 for w in slab_widths}
    bias_rows = []

    def add_w(w_padded):
        width = int(w_padded.shape[1])
        off = offs[width]
        blocks[width].append(w_padded)
        offs[width] += int(w_padded.shape[0])
        return off

    def add_b(b_vec):
        row = len(bias_rows)
        bias_rows.append(_zero_pad(b_vec, (bias_width,)))
        return row

    layout = {"gcn": [], "mlp": []}

    dims = (num_node_features,) + tuple(hidden_gcn)
    for i in range(len(hidden_gcn)):
        key, k1, k2, k3 = jax.random.split(key, 4)
        fi, fo = dims[i], dims[i + 1]
        fip, fop = _pad_up(fi), _pad_up(fo)
        # PyG GraphConv(aggr='add'):  h' = (A @ h) @ W_rel + h @ W_root + b
        w_rel = _zero_pad(_uniform(k1, (fi, fo), fi), (fip, fop))
        w_root = _zero_pad(_uniform(k2, (fi, fo), fi), (fip, fop))
        layout["gcn"].append({
            "fip": fip, "fop": fop,
            "rel_off": add_w(w_rel),
            "root_off": add_w(w_root),
            "b_row": add_b(_uniform(k3, (fo,), fi)),
        })

    mlp_dims = (hidden_gcn[-1],) + tuple(hidden_mlp) + (num_classes,)
    for i in range(len(mlp_dims) - 1):
        key, k1, k2 = jax.random.split(key, 3)
        fi, fo = mlp_dims[i], mlp_dims[i + 1]
        fip, fop = _pad_up(fi), _pad_up(fo)
        w = _zero_pad(_uniform(k1, (fi, fo), fi), (fip, fop))
        layout["mlp"].append({
            "fip": fip, "fop": fop,
            "off": add_w(w),
            "b_row": add_b(_uniform(k2, (fo,), fi)),
        })

    slabs = {}
    for w in slab_widths:
        if blocks[w]:
            slabs[w] = jnp.concatenate(blocks[w], axis=0).astype(jnp.bfloat16)
        else:  # keep the ref list static even for unused widths
            slabs[w] = jnp.zeros((16, w), jnp.bfloat16)
    bias_slab = jnp.stack(bias_rows, axis=0)            # (num_layers, bias_width) f32

    return {"slabs": slabs, "bias": bias_slab, "layout": layout,
            "slab_widths": slab_widths, "num_classes": num_classes}


# ------------------------------ forward pass -----------------------------------

def _cost_estimate(layout, num_steps, n, g, inputs, out_bytes):
    flops = 0
    for m in layout["gcn"]:
        flops += 2 * n * n * m["fip"]                     # A @ h
        flops += 2 * 2 * n * m["fip"] * m["fop"]          # agg@W_rel + h@W_root
    flops += 2 * g * n * layout["gcn"][-1]["fop"]         # mean pool
    for m in layout["mlp"]:
        flops += 2 * g * m["fip"] * m["fop"]
    flops *= num_steps
    bytes_accessed = sum(int(a.size) * a.dtype.itemsize for a in inputs) + int(out_bytes)
    return pl.CostEstimate(flops=int(flops), transcendentals=0,
                           bytes_accessed=bytes_accessed)


def gnn7_forward(params, x, edge_index, edge_attr, batch, num_graphs, *, nodes_per_step=128):
    """Batched forward.  Nodes are assumed grouped so that every contiguous block of
    `nodes_per_step` nodes contains whole graphs (standard PyG node ordering)."""
    layout, slab_widths = params["layout"], params["slab_widths"]
    n_total = x.shape[0]
    assert n_total % nodes_per_step == 0
    num_steps = n_total // nodes_per_step
    assert num_graphs % num_steps == 0
    n, g = nodes_per_step, num_graphs // num_steps

    # Block-diagonal dense adjacency, one (n, n) block per grid step:
    # A[b, dst_local, src_local] = sum of edge weights  (scatter is glue, not the hot path).
    src, dst = edge_index[0], edge_index[1]
    estep = dst // n
    adj = (jnp.zeros((num_steps, n, n), jnp.float32)
           .at[estep, dst % n, src % n].add(edge_attr)).astype(jnp.bfloat16)

    # Per-step mean-pooling matrices P[b, g_local, i_local] = 1/|V_g|  (f32 for exact mean).
    node = jnp.arange(n_total)
    nstep, nloc = node // n, node % n
    gloc = batch - nstep * g
    onehot = jnp.zeros((num_steps, g, n), jnp.float32).at[nstep, gloc, nloc].add(1.0)
    pool = onehot / jnp.maximum(onehot.sum(axis=-1, keepdims=True), 1.0)

    # Zero-pad node features to the padded input width of the first GCN layer.
    f0p = layout["gcn"][0]["fip"]
    x_pad = jnp.zeros((n_total, f0p), jnp.float32).at[:, :x.shape[1]].set(x)
    x_steps = x_pad.reshape(num_steps, n, f0p)

    out_pad = layout["mlp"][-1]["fop"]                  # lane-dense (128-wide) output block
    w_slabs = [params["slabs"][w] for w in slab_widths]
    inputs = [adj, x_steps, pool] + w_slabs + [params["bias"]]

    grid_spec = pltpu.PrefetchScalarGridSpec(
        num_scalar_prefetch=0,
        grid=(num_steps,),
        in_specs=[
            pl.BlockSpec((1, n, n), lambda b: (b, 0, 0)),
            pl.BlockSpec((1, n, f0p), lambda b: (b, 0, 0)),
            pl.BlockSpec((1, g, n), lambda b: (b, 0, 0)),
        ] + [
            # constant block index -> weights/biases DMA'd once, VMEM-resident across the grid
            pl.BlockSpec(a.shape, lambda b: (0, 0)) for a in w_slabs + [params["bias"]]
        ],
        out_specs=pl.BlockSpec((1, g, out_pad), lambda b: (b, 0, 0)),
    )

    cost = _cost_estimate(layout, num_steps, n, g, inputs, num_steps * g * out_pad * 4)
    kernel = functools.partial(_fused_gnn_kernel, layout=layout, slab_widths=slab_widths)

    out = pl.pallas_call(
        kernel,
        out_shape=jax.ShapeDtypeStruct((num_steps, g, out_pad), jnp.float32),
        grid_spec=grid_spec,
        compiler_params=pltpu.CompilerParams(
            dimension_semantics=("parallel",),          # shard batch steps across v7x's 2 TCs
            vmem_limit_bytes=32 * 1024 * 1024),         # safe on v7x's 64 MiB physical VMEM
        cost_estimate=cost,
    )(*inputs)

    num_classes = params["num_classes"]
    return out[:, :, :num_classes].reshape(num_graphs, num_classes)


# ------------------------------------ main --------------------------------------

if __name__ == "__main__":
    key = jax.random.PRNGKey(0)
    k_params, k_x, k_src, k_dst, k_ew = jax.random.split(key, 5)

    num_node_features = 4
    nodes_per_graph = 8
    graphs_per_step = 16                      # -> 128 nodes per grid step (MXU M dim = 128)
    num_steps = 2                             # grid size (one step per TensorCore on v7x)
    num_graphs = graphs_per_step * num_steps              # 32
    nodes_per_step = nodes_per_graph * graphs_per_step    # 128
    total_nodes = nodes_per_step * num_steps               # 256
    edges_per_graph = 16
    num_edges = edges_per_graph * num_graphs               # 512

    params = init_params(k_params, num_node_features=num_node_features)

    x = jax.random.normal(k_x, (total_nodes, num_node_features), dtype=jnp.float32)

    # Edges constrained within each graph (nodes of graph g are g*8 .. g*8+7).
    g_base = jnp.repeat(jnp.arange(num_graphs, dtype=jnp.int32) * nodes_per_graph,
                        edges_per_graph)
    src = g_base + jax.random.randint(k_src, (num_edges,), 0, nodes_per_graph, dtype=jnp.int32)
    dst = g_base + jax.random.randint(k_dst, (num_edges,), 0, nodes_per_graph, dtype=jnp.int32)
    edge_index = jnp.stack([src, dst], axis=0)
    edge_attr = jax.random.uniform(k_ew, (num_edges,), dtype=jnp.float32)
    batch = jnp.repeat(jnp.arange(num_graphs, dtype=jnp.int32), nodes_per_graph)

    out = gnn7_forward(params, x, edge_index, edge_attr, batch, num_graphs,
                       nodes_per_step=nodes_per_step)
    out = jax.block_until_ready(out)
    assert out.shape == (num_graphs, 1)
    assert bool(jnp.all(jnp.isfinite(out)))
    print("KERNEL_OK")
</pallas_src>

<mosaic_0001>
module attributes {stable_mosaic.version = 11 : i64} {
  func.func @_fused_gnn_kernel(%arg0: i32, %arg1: memref<1x128x128xbf16, #tpu.memory_space<vmem>>, %arg2: memref<1x128x128xf32, #tpu.memory_space<vmem>>, %arg3: memref<1x16x128xf32, #tpu.memory_space<vmem>>, %arg4: memref<1024x128xbf16, #tpu.memory_space<vmem>>, %arg5: memref<2048x256xbf16, #tpu.memory_space<vmem>>, %arg6: memref<1536x512xbf16, #tpu.memory_space<vmem>>, %arg7: memref<11x512xf32, #tpu.memory_space<vmem>>, %arg8: memref<1x16x128xf32, #tpu.memory_space<vmem>>) attributes {dimension_semantics = [#tpu.dimension_semantics<parallel>], iteration_bounds = array<i64: 2>, scalar_prefetch = 0 : i64, scratch_operands = 0 : i64, tpu.core_type = #tpu.core_type<tc>, window_params = [{transform_indices = @transform_0, window_bounds = array<i64: 1, 128, 128>}, {transform_indices = @transform_1, window_bounds = array<i64: 1, 128, 128>}, {transform_indices = @transform_2, window_bounds = array<i64: 1, 16, 128>}, {pipeline_mode = #tpu.pipeline_mode<synchronous>, transform_indices = @transform_3, window_bounds = array<i64: 1024, 128>}, {pipeline_mode = #tpu.pipeline_mode<synchronous>, transform_indices = @transform_4, window_bounds = array<i64: 2048, 256>}, {pipeline_mode = #tpu.pipeline_mode<synchronous>, transform_indices = @transform_5, window_bounds = array<i64: 1536, 512>}, {pipeline_mode = #tpu.pipeline_mode<synchronous>, transform_indices = @transform_6, window_bounds = array<i64: 11, 512>}, {transform_indices = @transform_7, window_bounds = array<i64: 1, 16, 128>}]} {
    %c0 = arith.constant 0 : index
    %c0_0 = arith.constant 0 : index
    %c0_1 = arith.constant 0 : index
    %0 = vector.load %arg1[%c0, %c0_0, %c0_1] : memref<1x128x128xbf16, #tpu.memory_space<vmem>>, vector<1x128x128xbf16>
    %1 = vector.shape_cast %0 : vector<1x128x128xbf16> to vector<128x128xbf16>
    %c0_2 = arith.constant 0 : index
    %c0_3 = arith.constant 0 : index
    %c0_4 = arith.constant 0 : index
    %2 = vector.load %arg2[%c0_2, %c0_3, %c0_4] : memref<1x128x128xf32, #tpu.memory_space<vmem>>, vector<1x128x128xf32>
    %3 = vector.shape_cast %2 : vector<1x128x128xf32> to vector<128x128xf32>
    %c0_5 = arith.constant 0 : index
    %c0_6 = arith.constant 0 : index
    %4 = vector.load %arg4[%c0_5, %c0_6] : memref<1024x128xbf16, #tpu.memory_space<vmem>>, vector<128x128xbf16>
    %c128 = arith.constant 128 : index
    %c0_7 = arith.constant 0 : index
    %5 = vector.load %arg4[%c128, %c0_7] : memref<1024x128xbf16, #tpu.memory_space<vmem>>, vector<128x128xbf16>
    %c0_8 = arith.constant 0 : index
    %c0_9 = arith.constant 0 : index
    %6 = vector.load %arg7[%c0_8, %c0_9] : memref<11x512xf32, #tpu.memory_space<vmem>>, vector<1x128xf32>
    %7 = arith.truncf %3 : vector<128x128xf32> to vector<128x128xbf16>
    %cst = arith.constant dense<0.000000e+00> : vector<128x128xf32>
    %8 = tpu.matmul %1, %7, %cst {dimension_numbers = #tpu.dot_dimension_numbers<[1], [0], [0], [1], [0, 0, 1, 1], [], []>} : vector<128x128xbf16>, vector<128x128xbf16>, vector<128x128xf32> -> vector<128x128xf32>
    %9 = arith.truncf %8 : vector<128x128xf32> to vector<128x128xbf16>
    %cst_10 = arith.constant dense<0.000000e+00> : vector<128x128xf32>
    %10 = tpu.matmul %9, %4, %cst_10 {dimension_numbers = #tpu.dot_dimension_numbers<[1], [0], [0], [1], [0, 0, 1, 1], [], []>} : vector<128x128xbf16>, vector<128x128xbf16>, vector<128x128xf32> -> vector<128x128xf32>
    %cst_11 = arith.constant dense<0.000000e+00> : vector<128x128xf32>
    %11 = tpu.matmul %7, %5, %cst_11 {dimension_numbers = #tpu.dot_dimension_numbers<[1], [0], [0], [1], [0, 0, 1, 1], [], []>} : vector<128x128xbf16>, vector<128x128xbf16>, vector<128x128xf32> -> vector<128x128xf32>
    %12 = arith.addf %10, %11 : vector<128x128xf32>
    %13 = vector.broadcast %6 : vector<1x128xf32> to vector<128x128xf32>
    %14 = arith.addf %12, %13 : vector<128x128xf32>
    %cst_12 = arith.constant 0.000000e+00 : f32
    %15 = vector.broadcast %cst_12 : f32 to vector<128x128xf32>
    %16 = arith.maximumf %14, %15 : vector<128x128xf32>
    %c256 = arith.constant 256 : index
    %c0_13 = arith.constant 0 : index
    %17 = vector.load %arg4[%c256, %c0_13] : memref<1024x128xbf16, #tpu.memory_space<vmem>>, vector<128x128xbf16>
    %c384 = arith.constant 384 : index
    %c0_14 = arith.constant 0 : index
    %18 = vector.load %arg4[%c384, %c0_14] : memref<1024x128xbf16, #tpu.memory_space<vmem>>, vector<128x128xbf16>
    %c1 = arith.constant 1 : index
    %c0_15 = arith.constant 0 : index
    %19 = vector.load %arg7[%c1, %c0_15] : memref<11x512xf32, #tpu.memory_space<vmem>>, vector<1x128xf32>
    %20 = arith.truncf %16 : vector<128x128xf32> to vector<128x128xbf16>
    %cst_16 = arith.constant dense<0.000000e+00> : vector<128x128xf32>
    %21 = tpu.matmul %1, %20, %cst_16 {dimension_numbers = #tpu.dot_dimension_numbers<[1], [0], [0], [1], [0, 0, 1, 1], [], []>} : vector<128x128xbf16>, vector<128x128xbf16>, vector<128x128xf32> -> vector<128x128xf32>
    %22 = arith.truncf %21 : vector<128x128xf32> to vector<128x128xbf16>
    %cst_17 = arith.constant dense<0.000000e+00> : vector<128x128xf32>
    %23 = tpu.matmul %22, %17, %cst_17 {dimension_numbers = #tpu.dot_dimension_numbers<[1], [0], [0], [1], [0, 0, 1, 1], [], []>} : vector<128x128xbf16>, vector<128x128xbf16>, vector<128x128xf32> -> vector<128x128xf32>
    %cst_18 = arith.constant dense<0.000000e+00> : vector<128x128xf32>
    %24 = tpu.matmul %20, %18, %cst_18 {dimension_numbers = #tpu.dot_dimension_numbers<[1], [0], [0], [1], [0, 0, 1, 1], [], []>} : vector<128x128xbf16>, vector<128x128xbf16>, vector<128x128xf32> -> vector<128x128xf32>
    %25 = arith.addf %23, %24 : vector<128x128xf32>
    %26 = vector.broadcast %19 : vector<1x128xf32> to vector<128x128xf32>
    %27 = arith.addf %25, %26 : vector<128x128xf32>
    %cst_19 = arith.constant 0.000000e+00 : f32
    %28 = vector.broadcast %cst_19 : f32 to vector<128x128xf32>
    %29 = arith.maximumf %27, %28 : vector<128x128xf32>
    %c0_20 = arith.constant 0 : index
    %c0_21 = arith.constant 0 : index
    %30 = vector.load %arg5[%c0_20, %c0_21] : memref<2048x256xbf16, #tpu.memory_space<vmem>>, vector<128x256xbf16>
    %c128_22 = arith.constant 128 : index
    %c0_23 = arith.constant 0 : index
    %31 = vector.load %arg5[%c128_22, %c0_23] : memref<2048x256xbf16, #tpu.memory_space<vmem>>, vector<128x256xbf16>
    %c2 = arith.constant 2 : index
    %c0_24 = arith.constant 0 : index
    %32 = vector.load %arg7[%c2, %c0_24] : memref<11x512xf32, #tpu.memory_space<vmem>>, vector<1x256xf32>
    %33 = arith.truncf %29 : vector<128x128xf32> to vector<128x128xbf16>
    %cst_25 = arith.constant dense<0.000000e+00> : vector<128x128xf32>
    %34 = tpu.matmul %1, %33, %cst_25 {dimension_numbers = #tpu.dot_dimension_numbers<[1], [0], [0], [1], [0, 0, 1, 1], [], []>} : vector<128x128xbf16>, vector<128x128xbf16>, vector<128x128xf32> -> vector<128x128xf32>
    %35 = arith.truncf %34 : vector<128x128xf32> to vector<128x128xbf16>
    %cst_26 = arith.constant dense<0.000000e+00> : vector<128x256xf32>
    %36 = tpu.matmul %35, %30, %cst_26 {dimension_numbers = #tpu.dot_dimension_numbers<[1], [0], [0], [1], [0, 0, 1, 1], [], []>} : vector<128x128xbf16>, vector<128x256xbf16>, vector<128x256xf32> -> vector<128x256xf32>
    %cst_27 = arith.constant dense<0.000000e+00> : vector<128x256xf32>
    %37 = tpu.matmul %33, %31, %cst_27 {dimension_numbers = #tpu.dot_dimension_numbers<[1], [0], [0], [1], [0, 0, 1, 1], [], []>} : vector<128x128xbf16>, vector<128x256xbf16>, vector<128x256xf32> -> vector<128x256xf32>
    %38 = arith.addf %36, %37 : vector<128x256xf32>
    %39 = vector.broadcast %32 : vector<1x256xf32> to vector<128x256xf32>
    %40 = arith.addf %38, %39 : vector<128x256xf32>
    %cst_28 = arith.constant 0.000000e+00 : f32
    %41 = vector.broadcast %cst_28 : f32 to vector<128x256xf32>
    %42 = arith.maximumf %40, %41 : vector<128x256xf32>
    %c0_29 = arith.constant 0 : index
    %c0_30 = arith.constant 0 : index
    %43 = vector.load %arg6[%c0_29, %c0_30] : memref<1536x512xbf16, #tpu.memory_space<vmem>>, vector<256x512xbf16>
    %c256_31 = arith.constant 256 : index
    %c0_32 = arith.constant 0 : index
    %44 = vector.load %arg6[%c256_31, %c0_32] : memref<1536x512xbf16, #tpu.memory_space<vmem>>, vector<256x512xbf16>
    %c3 = arith.constant 3 : index
    %c0_33 = arith.constant 0 : index
    %45 = vector.load %arg7[%c3, %c0_33] : memref<11x512xf32, #tpu.memory_space<vmem>>, vector<1x512xf32>
    %46 = arith.truncf %42 : vector<128x256xf32> to vector<128x256xbf16>
    %cst_34 = arith.constant dense<0.000000e+00> : vector<128x256xf32>
    %47 = tpu.matmul %1, %46, %cst_34 {dimension_numbers = #tpu.dot_dimension_numbers<[1], [0], [0], [1], [0, 0, 1, 1], [], []>} : vector<128x128xbf16>, vector<128x256xbf16>, vector<128x256xf32> -> vector<128x256xf32>
    %48 = arith.truncf %47 : vector<128x256xf32> to vector<128x256xbf16>
    %cst_35 = arith.constant dense<0.000000e+00> : vector<128x512xf32>
    %49 = tpu.matmul %48, %43, %cst_35 {dimension_numbers = #tpu.dot_dimension_numbers<[1], [0], [0], [1], [0, 0, 1, 1], [], []>} : vector<128x256xbf16>, vector<256x512xbf16>, vector<128x512xf32> -> vector<128x512xf32>
    %cst_36 = arith.constant dense<0.000000e+00> : vector<128x512xf32>
    %50 = tpu.matmul %46, %44, %cst_36 {dimension_numbers = #tpu.dot_dimension_numbers<[1], [0], [0], [1], [0, 0, 1, 1], [], []>} : vector<128x256xbf16>, vector<256x512xbf16>, vector<128x512xf32> -> vector<128x512xf32>
    %51 = arith.addf %49, %50 : vector<128x512xf32>
    %52 = vector.broadcast %45 : vector<1x512xf32> to vector<128x512xf32>
    %53 = arith.addf %51, %52 : vector<128x512xf32>
    %cst_37 = arith.constant 0.000000e+00 : f32
    %54 = vector.broadcast %cst_37 : f32 to vector<128x512xf32>
    %55 = arith.maximumf %53, %54 : vector<128x512xf32>
    %c512 = arith.constant 512 : index
    %c0_38 = arith.constant 0 : index
    %56 = vector.load %arg6[%c512, %c0_38] : memref<1536x512xbf16, #tpu.memory_space<vmem>>, vector<512x512xbf16>
    %c1024 = arith.constant 1024 : index
    %c0_39 = arith.constant 0 : index
    %57 = vector.load %arg6[%c1024, %c0_39] : memref<1536x512xbf16, #tpu.memory_space<vmem>>, vector<512x512xbf16>
    %c4 = arith.constant 4 : index
    %c0_40 = arith.constant 0 : index
    %58 = vector.load %arg7[%c4, %c0_40] : memref<11x512xf32, #tpu.memory_space<vmem>>, vector<1x512xf32>
    %59 = arith.truncf %55 : vector<128x512xf32> to vector<128x512xbf16>
    %cst_41 = arith.constant dense<0.000000e+00> : vector<128x512xf32>
    %60 = tpu.matmul %1, %59, %cst_41 {dimension_numbers = #tpu.dot_dimension_numbers<[1], [0], [0], [1], [0, 0, 1, 1], [], []>} : vector<128x128xbf16>, vector<128x512xbf16>, vector<128x512xf32> -> vector<128x512xf32>
    %61 = arith.truncf %60 : vector<128x512xf32> to vector<128x512xbf16>
    %cst_42 = arith.constant dense<0.000000e+00> : vector<128x512xf32>
    %62 = tpu.matmul %61, %56, %cst_42 {dimension_numbers = #tpu.dot_dimension_numbers<[1], [0], [0], [1], [0, 0, 1, 1], [], []>} : vector<128x512xbf16>, vector<512x512xbf16>, vector<128x512xf32> -> vector<128x512xf32>
    %cst_43 = arith.constant dense<0.000000e+00> : vector<128x512xf32>
    %63 = tpu.matmul %59, %57, %cst_43 {dimension_numbers = #tpu.dot_dimension_numbers<[1], [0], [0], [1], [0, 0, 1, 1], [], []>} : vector<128x512xbf16>, vector<512x512xbf16>, vector<128x512xf32> -> vector<128x512xf32>
    %64 = arith.addf %62, %63 : vector<128x512xf32>
    %65 = vector.broadcast %58 : vector<1x512xf32> to vector<128x512xf32>
    %66 = arith.addf %64, %65 : vector<128x512xf32>
    %cst_44 = arith.constant 0.000000e+00 : f32
    %67 = vector.broadcast %cst_44 : f32 to vector<128x512xf32>
    %68 = arith.maximumf %66, %67 : vector<128x512xf32>
    %c256_45 = arith.constant 256 : index
    %c0_46 = arith.constant 0 : index
    %69 = vector.load %arg5[%c256_45, %c0_46] : memref<2048x256xbf16, #tpu.memory_space<vmem>>, vector<512x256xbf16>
    %c768 = arith.constant 768 : index
    %c0_47 = arith.constant 0 : index
    %70 = vector.load %arg5[%c768, %c0_47] : memref<2048x256xbf16, #tpu.memory_space<vmem>>, vector<512x256xbf16>
    %c5 = arith.constant 5 : index
    %c0_48 = arith.constant 0 : index
    %71 = vector.load %arg7[%c5, %c0_48] : memref<11x512xf32, #tpu.memory_space<vmem>>, vector<1x256xf32>
    %72 = arith.truncf %68 : vector<128x512xf32> to vector<128x512xbf16>
    %cst_49 = arith.constant dense<0.000000e+00> : vector<128x512xf32>
    %73 = tpu.matmul %1, %72, %cst_49 {dimension_numbers = #tpu.dot_dimension_numbers<[1], [0], [0], [1], [0, 0, 1, 1], [], []>} : vector<128x128xbf16>, vector<128x512xbf16>, vector<128x512xf32> -> vector<128x512xf32>
    %74 = arith.truncf %73 : vector<128x512xf32> to vector<128x512xbf16>
    %cst_50 = arith.constant dense<0.000000e+00> : vector<128x256xf32>
    %75 = tpu.matmul %74, %69, %cst_50 {dimension_numbers = #tpu.dot_dimension_numbers<[1], [0], [0], [1], [0, 0, 1, 1], [], []>} : vector<128x512xbf16>, vector<512x256xbf16>, vector<128x256xf32> -> vector<128x256xf32>
    %cst_51 = arith.constant dense<0.000000e+00> : vector<128x256xf32>
    %76 = tpu.matmul %72, %70, %cst_51 {dimension_numbers = #tpu.dot_dimension_numbers<[1], [0], [0], [1], [0, 0, 1, 1], [], []>} : vector<128x512xbf16>, vector<512x256xbf16>, vector<128x256xf32> -> vector<128x256xf32>
    %77 = arith.addf %75, %76 : vector<128x256xf32>
    %78 = vector.broadcast %71 : vector<1x256xf32> to vector<128x256xf32>
    %79 = arith.addf %77, %78 : vector<128x256xf32>
    %cst_52 = arith.constant 0.000000e+00 : f32
    %80 = vector.broadcast %cst_52 : f32 to vector<128x256xf32>
    %81 = arith.maximumf %79, %80 : vector<128x256xf32>
    %c1280 = arith.constant 1280 : index
    %c0_53 = arith.constant 0 : index
    %82 = vector.load %arg5[%c1280, %c0_53] : memref<2048x256xbf16, #tpu.memory_space<vmem>>, vector<256x256xbf16>
    %c1536 = arith.constant 1536 : index
    %c0_54 = arith.constant 0 : index
    %83 = vector.load %arg5[%c1536, %c0_54] : memref<2048x256xbf16, #tpu.memory_space<vmem>>, vector<256x256xbf16>
    %c6 = arith.constant 6 : index
    %c0_55 = arith.constant 0 : index
    %84 = vector.load %arg7[%c6, %c0_55] : memref<11x512xf32, #tpu.memory_space<vmem>>, vector<1x256xf32>
    %85 = arith.truncf %81 : vector<128x256xf32> to vector<128x256xbf16>
    %cst_56 = arith.constant dense<0.000000e+00> : vector<128x256xf32>
    %86 = tpu.matmul %1, %85, %cst_56 {dimension_numbers = #tpu.dot_dimension_numbers<[1], [0], [0], [1], [0, 0, 1, 1], [], []>} : vector<128x128xbf16>, vector<128x256xbf16>, vector<128x256xf32> -> vector<128x256xf32>
    %87 = arith.truncf %86 : vector<128x256xf32> to vector<128x256xbf16>
    %cst_57 = arith.constant dense<0.000000e+00> : vector<128x256xf32>
    %88 = tpu.matmul %87, %82, %cst_57 {dimension_numbers = #tpu.dot_dimension_numbers<[1], [0], [0], [1], [0, 0, 1, 1], [], []>} : vector<128x256xbf16>, vector<256x256xbf16>, vector<128x256xf32> -> vector<128x256xf32>
    %cst_58 = arith.constant dense<0.000000e+00> : vector<128x256xf32>
    %89 = tpu.matmul %85, %83, %cst_58 {dimension_numbers = #tpu.dot_dimension_numbers<[1], [0], [0], [1], [0, 0, 1, 1], [], []>} : vector<128x256xbf16>, vector<256x256xbf16>, vector<128x256xf32> -> vector<128x256xf32>
    %90 = arith.addf %88, %89 : vector<128x256xf32>
    %91 = vector.broadcast %84 : vector<1x256xf32> to vector<128x256xf32>
    %92 = arith.addf %90, %91 : vector<128x256xf32>
    %cst_59 = arith.constant 0.000000e+00 : f32
    %93 = vector.broadcast %cst_59 : f32 to vector<128x256xf32>
    %94 = arith.maximumf %92, %93 : vector<128x256xf32>
    %c0_60 = arith.constant 0 : index
    %c0_61 = arith.constant 0 : index
    %c0_62 = arith.constant 0 : index
    %95 = vector.load %arg3[%c0_60, %c0_61, %c0_62] : memref<1x16x128xf32, #tpu.memory_space<vmem>>, vector<1x16x128xf32>
    %96 = vector.shape_cast %95 : vector<1x16x128xf32> to vector<16x128xf32>
    %cst_63 = arith.constant dense<0.000000e+00> : vector<16x256xf32>
    %97 = tpu.matmul %96, %94, %cst_63 {dimension_numbers = #tpu.dot_dimension_numbers<[1], [0], [0], [1], [0, 0, 1, 1], [], []>} : vector<16x128xf32>, vector<128x256xf32>, vector<16x256xf32> -> vector<16x256xf32>
    %c1792 = arith.constant 1792 : index
    %c0_64 = arith.constant 0 : index
    %98 = vector.load %arg5[%c1792, %c0_64] : memref<2048x256xbf16, #tpu.memory_space<vmem>>, vector<256x256xbf16>
    %c7 = arith.constant 7 : index
    %c0_65 = arith.constant 0 : index
    %99 = vector.load %arg7[%c7, %c0_65] : memref<11x512xf32, #tpu.memory_space<vmem>>, vector<1x256xf32>
    %100 = arith.truncf %97 : vector<16x256xf32> to vector<16x256xbf16>
    %cst_66 = arith.constant dense<0.000000e+00> : vector<16x256xf32>
    %101 = tpu.matmul %100, %98, %cst_66 {dimension_numbers = #tpu.dot_dimension_numbers<[1], [0], [0], [1], [0, 0, 1, 1], [], []>} : vector<16x256xbf16>, vector<256x256xbf16>, vector<16x256xf32> -> vector<16x256xf32>
    %102 = vector.broadcast %99 : vector<1x256xf32> to vector<16x256xf32>
    %103 = arith.addf %101, %102 : vector<16x256xf32>
    %cst_67 = arith.constant 0.000000e+00 : f32
    %104 = vector.broadcast %cst_67 : f32 to vector<16x256xf32>
    %105 = arith.maximumf %103, %104 : vector<16x256xf32>
    %c512_68 = arith.constant 512 : index
    %c0_69 = arith.constant 0 : index
    %106 = vector.load %arg4[%c512_68, %c0_69] : memref<1024x128xbf16, #tpu.memory_space<vmem>>, vector<256x128xbf16>
    %c8 = arith.constant 8 : index
    %c0_70 = arith.constant 0 : index
    %107 = vector.load %arg7[%c8, %c0_70] : memref<11x512xf32, #tpu.memory_space<vmem>>, vector<1x128xf32>
    %108 = arith.truncf %105 : vector<16x256xf32> to vector<16x256xbf16>
    %cst_71 = arith.constant dense<0.000000e+00> : vector<16x128xf32>
    %109 = tpu.matmul %108, %106, %cst_71 {dimension_numbers = #tpu.dot_dimension_numbers<[1], [0], [0], [1], [0, 0, 1, 1], [], []>} : vector<16x256xbf16>, vector<256x128xbf16>, vector<16x128xf32> -> vector<16x128xf32>
    %110 = vector.broadcast %107 : vector<1x128xf32> to vector<16x128xf32>
    %111 = arith.addf %109, %110 : vector<16x128xf32>
    %cst_72 = arith.constant 0.000000e+00 : f32
    %112 = vector.broadcast %cst_72 : f32 to vector<16x128xf32>
    %113 = arith.maximumf %111, %112 : vector<16x128xf32>
    %c768_73 = arith.constant 768 : index
    %c0_74 = arith.constant 0 : index
    %114 = vector.load %arg4[%c768_73, %c0_74] : memref<1024x128xbf16, #tpu.memory_space<vmem>>, vector<128x128xbf16>
    %c9 = arith.constant 9 : index
    %c0_75 = arith.constant 0 : index
    %115 = vector.load %arg7[%c9, %c0_75] : memref<11x512xf32, #tpu.memory_space<vmem>>, vector<1x128xf32>
    %116 = arith.truncf %113 : vector<16x128xf32> to vector<16x128xbf16>
    %cst_76 = arith.constant dense<0.000000e+00> : vector<16x128xf32>
    %117 = tpu.matmul %116, %114, %cst_76 {dimension_numbers = #tpu.dot_dimension_numbers<[1], [0], [0], [1], [0, 0, 1, 1], [], []>} : vector<16x128xbf16>, vector<128x128xbf16>, vector<16x128xf32> -> vector<16x128xf32>
    %118 = vector.broadcast %115 : vector<1x128xf32> to vector<16x128xf32>
    %119 = arith.addf %117, %118 : vector<16x128xf32>
    %cst_77 = arith.constant 0.000000e+00 : f32
    %120 = vector.broadcast %cst_77 : f32 to vector<16x128xf32>
    %121 = arith.maximumf %119, %120 : vector<16x128xf32>
    %c896 = arith.constant 896 : index
    %c0_78 = arith.constant 0 : index
    %122 = vector.load %arg4[%c896, %c0_78] : memref<1024x128xbf16, #tpu.memory_space<vmem>>, vector<128x128xbf16>
    %c10 = arith.constant 10 : index
    %c0_79 = arith.constant 0 : index
    %123 = vector.load %arg7[%c10, %c0_79] : memref<11x512xf32, #tpu.memory_space<vmem>>, vector<1x128xf32>
    %124 = arith.truncf %121 : vector<16x128xf32> to vector<16x128xbf16>
    %cst_80 = arith.constant dense<0.000000e+00> : vector<16x128xf32>
    %125 = tpu.matmul %124, %122, %cst_80 {dimension_numbers = #tpu.dot_dimension_numbers<[1], [0], [0], [1], [0, 0, 1, 1], [], []>} : vector<16x128xbf16>, vector<128x128xbf16>, vector<16x128xf32> -> vector<16x128xf32>
    %126 = vector.broadcast %123 : vector<1x128xf32> to vector<16x128xf32>
    %127 = arith.addf %125, %126 : vector<16x128xf32>
    %c0_81 = arith.constant 0 : index
    %c0_82 = arith.constant 0 : index
    %c0_83 = arith.constant 0 : index
    %128 = vector.load %arg8[%c0_81, %c0_82, %c0_83] : memref<1x16x128xf32, #tpu.memory_space<vmem>>, vector<1x16x128xf32>
    %129 = vector.shape_cast %128 : vector<1x16x128xf32> to vector<16x128xf32>
    %130 = vector.shape_cast %127 : vector<16x128xf32> to vector<1x16x128xf32>
    tpu.vector_store %arg8[%c0_81, %c0_82, %c0_83], %130 {strides = array<i32>} : memref<1x16x128xf32, #tpu.memory_space<vmem>>, vector<1x16x128xf32>,
    return
  }
  func.func @transform_0(%arg0: i32) -> (i32, i32, i32) {
    %c0_i32 = arith.constant 0 : i32
    %c0_i32_0 = arith.constant 0 : i32
    %c0_i32_1 = arith.constant 0 : i32
    return %arg0, %c0_i32, %c0_i32_0 : i32, i32, i32
  }
  func.func @transform_1(%arg0: i32) -> (i32, i32, i32) {
    %c0_i32 = arith.constant 0 : i32
    %c0_i32_0 = arith.constant 0 : i32
    %c0_i32_1 = arith.constant 0 : i32
    return %arg0, %c0_i32, %c0_i32_0 : i32, i32, i32
  }
  func.func @transform_2(%arg0: i32) -> (i32, i32, i32) {
    %c0_i32 = arith.constant 0 : i32
    %c0_i32_0 = arith.constant 0 : i32
    %c0_i32_1 = arith.constant 0 : i32
    return %arg0, %c0_i32, %c0_i32_0 : i32, i32, i32
  }
  func.func @transform_3(%arg0: i32) -> (i32, i32) {
    %c0_i32 = arith.constant 0 : i32
    %c0_i32_0 = arith.constant 0 : i32
    %c0_i32_1 = arith.constant 0 : i32
    return %c0_i32, %c0_i32_0 : i32, i32
  }
  func.func @transform_4(%arg0: i32) -> (i32, i32) {
    %c0_i32 = arith.constant 0 : i32
    %c0_i32_0 = arith.constant 0 : i32
    %c0_i32_1 = arith.constant 0 : i32
    return %c0_i32, %c0_i32_0 : i32, i32
  }
  func.func @transform_5(%arg0: i32) -> (i32, i32) {
    %c0_i32 = arith.constant 0 : i32
    %c0_i32_0 = arith.constant 0 : i32
    %c0_i32_1 = arith.constant 0 : i32
    return %c0_i32, %c0_i32_0 : i32, i32
  }
  func.func @transform_6(%arg0: i32) -> (i32, i32) {
    %c0_i32 = arith.constant 0 : i32
    %c0_i32_0 = arith.constant 0 : i32
    %c0_i32_1 = arith.constant 0 : i32
    return %c0_i32, %c0_i32_0 : i32, i32
  }
  func.func @transform_7(%arg0: i32) -> (i32, i32, i32) {
    %c0_i32 = arith.constant 0 : i32
    %c0_i32_0 = arith.constant 0 : i32
    %c0_i32_1 = arith.constant 0 : i32
    return %arg0, %c0_i32, %c0_i32_0 : i32, i32, i32
  }
}

</mosaic_0001>

<bundles_post_ra>
// kernel: tpu_custom_call.1
= control target key start
LH: loop header
LB: loop body
LE: loop exit
PB: predicated region body
PF: predicated region fallthrough
CT: control target
= control target key end

     0   :  { %s14883_s0 = inlined_call_operand.hbm [shape: bf16[2,128,128], index: 0, kind: input, shape index: {}]   ;;  %s14884_s1 = inlined_call_operand.hbm [shape: f32[2,128,128], index: 1, kind: input, shape index: {}]   ;;  %s14885_s2 = inlined_call_operand.hbm [shape: f32[2,16,128], index: 2, kind: input, shape index: {}]   ;;  %s14886_s3 = inlined_call_operand.hbm [shape: bf16[1024,128], index: 3, kind: input, shape index: {}]   ;;  %s14887_s4 = inlined_call_operand.hbm [shape: bf16[2048,256], index: 4, kind: input, shape index: {}]   ;;  %s14888_s5 = inlined_call_operand.hbm [shape: bf16[1536,512], index: 5, kind: input, shape index: {}]   ;;  %s14889_s6 = inlined_call_operand.hbm [shape: f32[11,512], index: 6, kind: input, shape index: {}]   ;;  %s14890_s7 = inlined_call_operand.hbm [shape: f32[2,16,128], index: 7, kind: output, shape index: {}]  }
   0x1   :  { %14944 = sst [smem:[#allocation81_spill]] %s14884_s1 }
   0x2   :  { %14945 = sst [smem:[#allocation82_spill]] %s14886_s3 }
   0x3   :  { %14946 = sst [smem:[#allocation83_spill]] %s14887_s4 }
   0x4   :  { %14947 = sst [smem:[#allocation84_spill]] %s14888_s5 }
   0x5   :  { %12 = vsyncpa [#allocation3], 0 }
   0x6   :  { %14 = vsyncpa [#allocation3 + $0x1], 0 }
   0x7   :  { %15 = vsyncpa [#allocation6], 0 }
   0x8   :  { %17 = vsyncpa [#allocation6 + $0x1], 0 }
   0x9   :  { %18 = vsyncpa [#allocation9], 0 }
   0xa   :  { %19 = vsyncpa [#allocation12], 0 }
   0xb   :  { %20 = vsyncpa [#allocation4], 0 }
   0xc   :  { %22 = vsyncpa [#allocation4 + $0x1], 0  ;;  %s12437_s24 = smov 0   ;;  %s12439_s25 = smov 0  }
   0xd   :  { %s12441_s26 = smov 0   ;;  %s12443_s27 = smov 0  }
   0xe LB: > { %14948 = sst [smem:[#allocation20_spill]] %s12370_s26  ;;  %s12458_s28 = sadd.s32 4294967295, %s12374_s27   ;;  %s12374_s27 = sphi %s12443_s27, %s15266_s27   ;;  %s12370_s26 = sphi %s12441_s26, %s15268_s26   ;;  %s12366_s25 = sphi %s12439_s25, %s15270_s25   ;;  %s12362_s24 = sphi %s12437_s24, %s15269_s24  }
   0xf   : > { %s9766_s29 = sadd.s32 4294967294, %s12374_s27   ;;  %p48_p0 = scmp.ne.s32.totalorder %s12366_s25, %s12362_s24 }
  0x10   : > { %p14894_p1 = scmp.eq.s32.totalorder %s12458_s28, 0  ;;  %p208_p2 = scmp.eq.s32.totalorder %s12458_s28, 1 }
  0x11   : > { %p214_p3 = scmp.eq.s32.totalorder %s9766_s29, 1  ;;  %p9767_p5 = scmp.ge.s32.totalorder %s12374_s27, 1 }
  0x12   : > { %p12467_p4 = por %p14894_p1, %p48_p0  ;;  %p221_p7 = scmp.lt.s32.totalorder %s12374_s27, 3 }
  0x13   : > { %p12472_p6 = por %p214_p3, %p48_p0  ;;  %s12376_s10 = smov [#allocation8]  }
  0x14   : > { %s14949_s30 = scalar_select %p12467_p4, 1, 0 }
  0x15   : > { %s14950_s8 = scalar_select %p12472_p6, 1, 0 }
  0x16   : > { %p12477_p8 = pnand %p9767_p5, %p221_p7  ;;  %s233_s11 = sshll.u32 %s12376_s10, 4  ;;  %s234_s11 = int_to_ptr.vmem [resolvable:$true] %s233_s11 }
  0x17   : > { %s12377_s13 = smov [#allocation11]   ;;  %s12121_s15 = scalar_lea.vmem %s234_s11, 8192 }
  0x18   : > { %s14951_s9 = scalar_select %p12477_p8, 1, 0 }
  0x19   : > { %p10952_p9 = pneg %p12477_p8  ;;  %s259_s14 = sshll.u32 %s12377_s13, 4  ;;  %s260_s14 = int_to_ptr.vmem [resolvable:$true] %s259_s14 }
  0x1a   : > { %p12122_p13 = scmp.ne.s32.totalorder %s234_s11, %s12121_s15  ;;  %p12129_p5 = scmp.lt.s32.totalorder %s234_s11, %s234_s11 }
  0x1b   : > { %p12486_p11 = pnand %p10952_p9, %p14894_p1  ;;  %p12130_p7 = scmp.lt.s32.totalorder %s12121_s15, %s12121_s15 }
  0x1d   : > { %s14952_s12 = scalar_select %p12486_p11, 1, 0 }
  0x1e   : > { %p14895_p12 = pneg %p12486_p11  ;;  %p12131_p10 = por %p12130_p7, %p12129_p5 }
  0x20   : > { %p12124_p0 = pnand %p12122_p13, %p14895_p12 }
  0x22   : > { %p12125_p3 = pneg %p12124_p0 }
  0x24   : > { %p12132_p9 = pnand %p12131_p10, %p12125_p3 }
  0x26   : > { %12135 = shalt.err (!%p12132_p9)
}
  0x27   : > { %s14891_s16 = smov 64   ;;  %s14892_s17 = smov 4  }
  0x28   : > { %s14953_s3 = sld [smem:[#allocation82_spill]]  ;;  %s12147_s20 = scalar_lea.vmem %s260_s14, 49152 }
  0x29   : > { %p12148_p13 = scmp.ne.s32.totalorder %s260_s14, %s12147_s20  ;;  %p12155_p10 = scmp.lt.s32.totalorder %s260_s14, %s260_s14 }
  0x2a   : > { %p12156_p3 = scmp.lt.s32.totalorder %s12147_s20, %s12147_s20 }
  0x2b   : > { %p12150_p0 = pnand %p12148_p13, %p14895_p12 }
  0x2c   : > { %p12157_p7 = por %p12156_p3, %p12155_p10 }
  0x2d   : > { %p12151_p5 = pneg %p12150_p0 }
  0x2e   : > { %10955 = dma.hbm_to_vmem [thread:$0]  (!%p12486_p11), %s14953_s3, 8192, %s234_s11, [#allocation9], %s14891_s16, %s14891_s16, %s14892_s17  }
  0x2f   : > { %p12158_p9 = pnand %p12157_p7, %p12151_p5 }
  0x31   : > { %12161 = shalt.err (!%p12158_p9)
}
  0x32   : > { %s12380_s21 = smov 256   ;;  %s12381_s22 = smov 16  }
  0x33   : > { %s14954_s5 = sld [smem:[#allocation84_spill]]  ;;  %s12512_s10 = sadd.s32 1, %s12374_s27  }
  0x34   : > { %14955 = sst [smem:[#allocation21_spill]] %s12512_s10  ;;  %s32_s11 = ssub.s32 %s12374_s27, %s12512_s10 }
  0x35   : > { %p33_p13 = scmp.eq.s32.totalorder %s32_s11, 0  ;;  %s35_s13 = sadd.s32 1, %s12370_s26 }
  0x36   : > { %p42_p0 = scmp.ne.s32.totalorder %s12370_s26, %s12366_s25  ;;  %p43_p5 = scmp.eq.s32.totalorder %s12374_s27, 0 }
  0x37   : > { %s12521_s15 = scalar_select %p33_p13, %s12370_s26, %s35_s13  }
  0x38   : > { %p44_p10 = por %p43_p5, %p42_p0  ;;  %p12525_p3 = por %p208_p2, %p42_p0 }
  0x39   : > { %10961 = dma.hbm_to_vmem [thread:$0]  (!%p12486_p11), %s14954_s5, 49152, %s260_s14, [#allocation12], %s12380_s21, %s12380_s21, %s12381_s22  }
  0x3a   : > { %14956 = sst [smem:[#allocation22_spill]] %s12521_s15  ;;  %p10983_p7 = scmp.lt.s32.totalorder %s12374_s27, 2 }
  0x3b   : > { %s14957_s18 = scalar_select %p12525_p3, 1, 0 }
  0x3c   : > { %s12531_s19 = sand.u32 1, %s12370_s26   ;;  %s307_s14 = sand.u32 1, %s12374_s27  }
  0x3d   : > { %s9776_s20 = sshll.u32 %s12531_s19, 7  ;;  %p12535_p9 = pnand %p10983_p7, %p44_p10 }
  0x3e   : > { %s10509_s22 = sshll.u32 %s12374_s27, 11  ;;  %s14959_s1 = sld [smem:[#allocation81_spill]] }
  0x3f   : > { %s311_s13 = scalar_lea.vmem [#allocation5], %s9776_s20  ;;  %s12382_s17 = smov [#allocation10]  }
  0x40   : > { %s318_s16 = sshll.u32 %s311_s13, 4  ;;  %s12547_s3 = sshll.u32 %s12382_s17, 4  ;;  %s12545_s16 = int_to_ptr.vmem [resolvable:$true] %s318_s16  ;;  %s247_s3 = int_to_ptr.vmem [resolvable:$true] %s12547_s3 }
  0x41   : > { %s12549_s5 = scalar_lea.sflag [#allocation6], %s307_s14  ;;  %p12555_p13 = pneg %p12535_p9 }
  0x44   : > { %s12543_s11 = scalar_lea.hbm %s14959_s1, %s10509_s22  ;;  %s12167_s23 = scalar_lea.hbm %s14959_s1, 4096 }
  0x45   : > { %s12162_s15 = scalar_lea.hbm %s12543_s11, 2048  ;;  %p12168_p10 = scmp.lt.s32.totalorder %s12543_s11, %s14959_s1 }
  0x46   : > { %p12163_p2 = scmp.ne.s32.totalorder %s12543_s11, %s12162_s15  ;;  %p12169_p7 = scmp.lt.s32.totalorder %s12167_s23, %s12162_s15 }
  0x48   : > { %p12165_p0 = pnand %p12555_p13, %p12163_p2  ;;  %p12170_p1 = por %p12169_p7, %p12168_p10 }
  0x4a   : > { %p12166_p5 = pneg %p12165_p0 }
  0x4c   : > { %p12171_p12 = pnand %p12170_p1, %p12166_p5 }
  0x4e   : > { %12174 = shalt.err (!%p12171_p12)
}
  0x4f   : > { %s12175_s14 = scalar_lea.vmem %s12545_s16, 2048  ;;  %s12383_s13 = smov [#allocation5]  }
  0x50   : > { %p12176_p6 = scmp.ne.s32.totalorder %s12545_s16, %s12175_s14  ;;  %s12180_s20 = sshll.u32 %s12383_s13, 4  ;;  %s12181_s20 = int_to_ptr.vmem [resolvable:$false] %s12180_s20 }
  0x51   : > { %s12182_s22 = scalar_lea.vmem %s12181_s20, 4096  ;;  %p12183_p3 = scmp.lt.s32.totalorder %s12545_s16, %s12181_s20 }
  0x52   : > { %p12178_p2 = pnand %p12176_p6, %p12555_p13  ;;  %p12184_p4 = scmp.lt.s32.totalorder %s12182_s22, %s12175_s14 }
  0x54   : > { %p12179_p0 = pneg %p12178_p2  ;;  %p12185_p8 = por %p12184_p4, %p12183_p3 }
  0x56   : > { %p12186_p11 = pnand %p12185_p8, %p12179_p0 }
  0x58   : > { %12189 = shalt.err (!%p12186_p11)
}
  0x59   : > { %s14901_s15 = smov 128   ;;  %s14902_s23 = smov 8  }
  0x5a   : > { %10971 = dma.hbm_to_vmem [thread:$0]  (!%p12535_p9), %s12543_s11, 2048, %s12545_s16, %s12549_s5, %s14901_s15, %s14901_s15, %s14902_s23  }
  0x5b   : > { %s12201_s29 = scalar_lea.vmem %s247_s3, 32768  ;;  %p14961_p6 = scmp.ne.s32.totalorder %s14952_s12, 0 }
  0x5c   : > { %p12202_p1 = scmp.ne.s32.totalorder %s247_s3, %s12201_s29  ;;  %p12209_p12 = scmp.lt.s32.totalorder %s247_s3, %s247_s3 }
  0x5d   : > { %p14962_p4 = pneg %p14961_p6  ;;  %p12210_p3 = scmp.lt.s32.totalorder %s12201_s29, %s12201_s29 }
  0x5f   : > { %p12204_p8 = pnand %p12202_p1, %p14962_p4  ;;  %p12211_p5 = por %p12210_p3, %p12209_p12 }
  0x61   : > { %p12205_p11 = pneg %p12204_p8 }
  0x63   : > { %p12212_p10 = pnand %p12211_p5, %p12205_p11 }
  0x65   : > { %12215 = shalt.err (!%p12212_p10)
}
  0x66   : > { %s14963_s4 = sld [smem:[#allocation83_spill]]  ;;  %s12386_s16 = smov [#allocation13]  }
  0x67   : > { %s272_s11 = sshll.u32 %s12386_s16, 4  ;;  %p14964_p2 = pmov %p14962_p4  ;;  %s273_s11 = int_to_ptr.vmem [resolvable:$true] %s272_s11 }
  0x68   : > { %s12227_s13 = scalar_lea.vmem %s273_s11, 1024  ;;  %p12235_p4 = scmp.lt.s32.totalorder %s273_s11, %s273_s11 }
  0x69   : > { %p12228_p7 = scmp.ne.s32.totalorder %s273_s11, %s12227_s13  ;;  %p12236_p8 = scmp.lt.s32.totalorder %s12227_s13, %s12227_s13 }
  0x6b   : > { %p12230_p0 = pnand %p12228_p7, %p14964_p2  ;;  %p12237_p11 = por %p12236_p8, %p12235_p4 }
  0x6c   : > { %10958 = dma.hbm_to_vmem [thread:$0]  (!%p14961_p6), %s14963_s4, 32768, %s247_s3, [#allocation9], %s14901_s15, %s14901_s15, %s14902_s23  }
  0x6d   : > { %p12231_p1 = pneg %p12230_p0 }
  0x6f   : > { %p12238_p12 = pnand %p12237_p11, %p12231_p1 }
  0x71   : > { %12241 = shalt.err (!%p12238_p12)
}
  0x72   : > { %s12387_s20 = smov 512   ;;  %s12388_s3 = smov 32  }
  0x73   : > { %10964 = dma.hbm_to_vmem [thread:$0]  (!%p14961_p6), %s14889_s6, 1024, %s273_s11, [#allocation12], %s12387_s20, %s12387_s20, %s12388_s3  }
  0x74   : > { %s9773_s17 = sshll.u32 %s12531_s19, 6  ;;  %s10508_s14 = sshll.u32 %s12374_s27, 10 }
  0x75   : > { %s12606_s15 = scalar_lea.hbm %s14883_s0, %s10508_s14  ;;  %s290_s23 = scalar_lea.vmem [#allocation2], %s9773_s17 }
  0x76   : > { %s297_s1 = sshll.u32 %s290_s23, 4  ;;  %s9779_s4 = sshll.u32 %s12531_s19, 4  ;;  %s12608_s1 = int_to_ptr.vmem [resolvable:$true] %s297_s1 }
  0x77   : > { %s287_s12 = scalar_lea.sflag [#allocation3], %s12531_s19  ;;  %s12242_s10 = scalar_lea.hbm %s12606_s15, 1024 }
  0x78   : > { %p12243_p3 = scmp.ne.s32.totalorder %s12606_s15, %s12242_s10  ;;  %s12247_s3 = scalar_lea.hbm %s14883_s0, 2048 }
  0x79   : > { %p12248_p10 = scmp.lt.s32.totalorder %s12606_s15, %s14883_s0  ;;  %p12249_p7 = scmp.lt.s32.totalorder %s12247_s3, %s12242_s10 }
  0x7a   : > { %p12245_p6 = pnand %p12243_p3, %p12555_p13 }
  0x7b   : > { %p12250_p2 = por %p12249_p7, %p12248_p10 }
  0x7c   : > { %p12246_p5 = pneg %p12245_p6 }
  0x7e   : > { %p12251_p0 = pnand %p12250_p2, %p12246_p5 }
  0x80   : > { %12254 = shalt.err (!%p12251_p0)
}
  0x81   : > { %s12255_s23 = scalar_lea.vmem %s12608_s1, 1024  ;;  %s12389_s17 = smov [#allocation2]  }
  0x82   : > { %p12256_p1 = scmp.ne.s32.totalorder %s12608_s1, %s12255_s23  ;;  %s12260_s14 = sshll.u32 %s12389_s17, 4  ;;  %s12261_s14 = int_to_ptr.vmem [resolvable:$false] %s12260_s14 }
  0x83   : > { %s12262_s16 = scalar_lea.vmem %s12261_s14, 2048  ;;  %p12263_p11 = scmp.lt.s32.totalorder %s12608_s1, %s12261_s14 }
  0x84   : > { %p12258_p4 = pnand %p12256_p1, %p12555_p13  ;;  %p12264_p12 = scmp.lt.s32.totalorder %s12262_s16, %s12255_s23 }
  0x86   : > { %p12259_p8 = pneg %p12258_p4  ;;  %p12265_p3 = por %p12264_p12, %p12263_p11 }
  0x88   : > { %p12266_p6 = pnand %p12265_p3, %p12259_p8 }
  0x8a   : > { %12269 = shalt.err (!%p12266_p6)
}
  0x8b   : > { %s14965_s10 = smov 4   ;;  %s14966_s13 = smov 64  }
  0x8c   : > { %10968 = dma.hbm_to_vmem [thread:$0]  (!%p12535_p9), %s12606_s15, 1024, %s12608_s1, %s287_s12, %s14966_s13, %s14966_s13, %s14965_s10  }
  0x8d   : > { %s10510_s11 = sshll.u32 %s12374_s27, 8  ;;  %s332_s29 = scalar_lea.vmem [#allocation7], %s9779_s4 }
  0x8e   : > { %s12639_s22 = scalar_lea.hbm %s14885_s2, %s10510_s11  ;;  %s339_s23 = sshll.u32 %s332_s29, 4  ;;  %s340_s23 = int_to_ptr.vmem [resolvable:$true] %s339_s23 }
  0x8f   : > { %s12270_s17 = scalar_lea.hbm %s12639_s22, 256  ;;  %s12275_s15 = scalar_lea.hbm %s14885_s2, 512 }
  0x90   : > { %p12271_p5 = scmp.ne.s32.totalorder %s12639_s22, %s12270_s17  ;;  %p12276_p2 = scmp.lt.s32.totalorder %s12639_s22, %s14885_s2 }
  0x91   : > { %p12277_p0 = scmp.lt.s32.totalorder %s12275_s15, %s12270_s17 }
  0x92   : > { %p12273_p10 = pnand %p12271_p5, %p12555_p13 }
  0x93   : > { %p12278_p1 = por %p12277_p0, %p12276_p2 }
  0x94   : > { %p12274_p7 = pneg %p12273_p10 }
  0x96   : > { %p12279_p4 = pnand %p12278_p1, %p12274_p7 }
  0x98   : > { %12282 = shalt.err (!%p12279_p4)
}
  0x99   : > { %s12283_s4 = scalar_lea.vmem %s340_s23, 256  ;;  %s12390_s19 = smov [#allocation7]  }
  0x9a   : > { %p12284_p8 = scmp.ne.s32.totalorder %s340_s23, %s12283_s4  ;;  %s12288_s10 = sshll.u32 %s12390_s19, 4  ;;  %s12289_s10 = int_to_ptr.vmem [resolvable:$false] %s12288_s10 }
  0x9b   : > { %s12290_s13 = scalar_lea.vmem %s12289_s10, 512  ;;  %p12291_p3 = scmp.lt.s32.totalorder %s340_s23, %s12289_s10 }
  0x9c   : > { %p12286_p11 = pnand %p12284_p8, %p12555_p13  ;;  %p12292_p6 = scmp.lt.s32.totalorder %s12290_s13, %s12283_s4 }
  0x9e   : > { %p12287_p12 = pneg %p12286_p11  ;;  %p12293_p5 = por %p12292_p6, %p12291_p3 }
  0xa0   : > { %p12294_p10 = pnand %p12293_p5, %p12287_p12 }
  0xa2   : > { %12297 = shalt.err (!%p12294_p10)
}
  0xa3   : > { %s14967_s11 = smov 8   ;;  %s14968_s20 = smov 128  }
  0xa4   : > { %10974 = dma.hbm_to_vmem [thread:$0]  (!%p12535_p9), %s12639_s22, 256, %s340_s23, %s12549_s5, %s14968_s20, %s14968_s20, %s14967_s11  }
  0xa5   : > { %p14969_p13 = scmp.ne.s32.totalorder %s14951_s9, 0 }
  0xa7   : > { %351 = sbr.rel (%p14969_p13) target bundleno = 4726 (0x1276), region = 48 }
  0xac   : > { %s12666_s26 = sand.u32 1, %s12366_s25   ;;  %p14970_p7 = scmp.ne.s32.totalorder %s14949_s30, 0 }
  0xad   : > { %s9783_s3 = sshll.u32 %s12666_s26, 6  ;;  %s354_s29 = scalar_lea.sflag [#allocation3], %s12666_s26 }
  0xae   : > { %s12670_s17 = scalar_lea.vmem [#allocation2], %s9783_s3 }
  0xaf   : > { %12341 = dma.done.wait (%p14970_p7), %s354_s29, 1024  }
  0xb0   : > { %12343 = vsyncadd (%p14970_p7), %s354_s29, 4294966272  ;;  %s362_s5 = sand.u32 1, %s12458_s28   ;;  %s9784_s9 = sshll.u32 %s12666_s26, 7 }
  0xb1   : > { %s363_s21 = scalar_lea.sflag [#allocation6], %s362_s5  ;;  %s12678_s22 = scalar_lea.vmem [#allocation5], %s9784_s9 }
  0xb2   : > { %12345 = dma.done.wait (%p14970_p7), %s363_s21, 2304  }
  0xb3   : > { %12347 = vsyncadd (%p14970_p7), %s363_s21, 4294964992  ;;  %s9785_s23 = sshll.u32 %s12666_s26, 4  ;;  %p14971_p9 = scmp.eq.s32.totalorder %s12458_s28, 0 }
  0xb4   : > { %s12687_s14 = scalar_lea.vmem [#allocation7], %s9785_s23 }
  0xb5   : > { %12349 = dma.done.wait (%p14971_p9), [#allocation9], 40960   ;;  %p14972_p2 = pmov %p14971_p9 }
  0xb7   : > { %12351 = vsyncadd (%p14972_p2), [#allocation9], 4294926336  ;;  %p14973_p0 = pmov %p14972_p2 }
  0xb9   : > { %12353 = dma.done.wait (%p14973_p0), [#allocation12], 50176   ;;  %p14974_p1 = pmov %p14973_p0 }
  0xba   : > { %v463_v0 = vld [vmem:[%s12678_s22 + $0x70] sm:$0xff]  ;;  %v464_v1 = vld [vmem:[%s12678_s22 + $0x78] sm:$0xff]  ;;  %v461_v2 = vld [vmem:[%s12678_s22 + $0x60] sm:$0xff]  ;;  %vm12393_vm0 = vmmov 0   ;;  %s431_s30 = scalar_lea.vmem [#allocation14], %s9785_s23  ;;  %s10511_s15 = sshll.u32 %s12458_s28, 8 }
  0xbb   : > { %12355 = vsyncadd (%p14974_p1), [#allocation12], 4294917120  ;;  %v12700_v3 = vpack.c.bf16 %v464_v1, %v463_v0  ;;  %v462_v4 = vld [vmem:[%s12678_s22 + $0x68] sm:$0xff]  ;;  %v459_v6 = vld [vmem:[%s12678_s22 + $0x50] sm:$0xff]  ;;  %s9612_s1 = sshll.u32 %s431_s30, 4  ;;  %s14840_s4 = scalar_lea.hbm %s14890_s7, %s10511_s15  ;;  %s14835_s1 = int_to_ptr.vmem [resolvable:$true] %s9612_s1 }
  0xbc   : > { %v12703_v5 = vpack.c.bf16 %v462_v4, %v461_v2  ;;  %v460_v7 = vld [vmem:[%s12678_s22 + $0x58] sm:$0xff]  ;;  %v457_v8 = vld [vmem:[%s12678_s22 + $0x40] sm:$0xff]  ;;  %v458_v9 = vld [vmem:[%s12678_s22 + $0x48] sm:$0xff]  ;;  %s9599_s19 = scalar_lea.sflag [#allocation4], %s12666_s26  ;;  %s12298_s10 = scalar_lea.vmem %s14835_s1, 256 }
  0xbd   : > { %10664 = vmatprep.subr.bf16.mxu0 %v12700_v3  ;;  %v449_v10 = vld [vmem:[%s12678_s22] sm:$0xff]  ;;  %v12713_v11 = vpack.c.bf16 %v460_v7, %v459_v6  ;;  %v450_v12 = vld [vmem:[%s12678_s22 + $0x8] sm:$0xff]  ;;  %v12722_v15 = vpack.c.bf16 %v458_v9, %v457_v8  ;;  %v455_v16 = vld [vmem:[%s12678_s22 + $0x30] sm:$0xff]  ;;  %p12299_p4 = scmp.ne.s32.totalorder %s14835_s1, %s12298_s10  ;;  %p15263_p8 = scmp.ne.s32.totalorder %s14957_s18, 0 }
  0xbe   : > { %10665 = vmatpush3.bf16.msra.mxu0 %v12700_v3  ;;  %v12717_v13 = vld [vmem:[%s12670_s17] sm:$0xff]   ;;  %v498_v14 = vpack.c.bf16 %v450_v12, %v449_v10  ;;  %v456_v17 = vld [vmem:[%s12678_s22 + $0x38] sm:$0xff]  ;;  %v454_v20 = vld [vmem:[%s12678_s22 + $0x28] sm:$0xff]  ;;  %s12394_s28 = smov [#allocation14]  }
  0xbf   : > { %10666 = vmatprep.subr.bf16.mxu0 %v12703_v5  ;;  %10680 = vmatprep.mubr.bf16.mxu0 %v12717_v13  ;;  %v453_v18 = vld [vmem:[%s12678_s22 + $0x20] sm:$0xff]  ;;  %v12729_v19 = vpack.c.bf16 %v456_v17, %v455_v16  ;;  %v11046_v21 = vld [vmem:[#allocation8 + $0x78] sm:$0xff]   ;;  %v11047_v22 = vld [vmem:[#allocation8 + $0x70] sm:$0xff]   ;;  %p12300_p11 = pnand %p12299_p4, %p15263_p8  ;;  %s12302_s13 = sshll.u32 %s12394_s28, 4  ;;  %s12303_s13 = int_to_ptr.vmem [resolvable:$false] %s12302_s13 }
  0xc0   : > { %10712 = vmatprep.mubr.bf16.mxu1 %v498_v14  ;;  %v451_v23 = vld [vmem:[%s12678_s22 + $0x10] sm:$0xff]  ;;  %10696 = vmatprep.subr.bf16.mxu1 %v11046_v21  ;;  %v12735_v24 = vpack.c.bf16 %v454_v20, %v453_v18  ;;  %v452_v25 = vld [vmem:[%s12678_s22 + $0x18] sm:$0xff]  ;;  %v11049_v26 = vld [vmem:[#allocation8 + $0x68] sm:$0xff]   ;;  %s12304_s11 = scalar_lea.vmem %s12303_s13, 512  ;;  %p12305_p3 = scmp.lt.s32.totalorder %s14835_s1, %s12303_s13 }
  0xc1   : > { %10697 = vmatpush3.bf16.msra.mxu1 %v11046_v21  ;;  %v499_v27 = vpack.c.bf16 %v452_v25, %v451_v23  ;;  %v11051_v28 = vld [vmem:[#allocation8 + $0x60] sm:$0xff]   ;;  %v11053_v29 = vld [vmem:[#allocation8 + $0x58] sm:$0xff]   ;;  %v11055_v31 = vld [vmem:[#allocation8 + $0x50] sm:$0xff]   ;;  %p12301_p12 = pneg %p12300_p11  ;;  %p12306_p6 = scmp.lt.s32.totalorder %s12304_s11, %s12298_s10 }
  0xc2   : > { %10667 = vmatpush3.bf16.msra.mxu0 %v12703_v5  ;;  %10698 = vmatprep.subr.bf16.mxu1 %v11047_v22  ;;  %v11048_v30 = vld [vmem:[#allocation8 + $0x38] sm:$0xff]   ;;  %v11039_v32 = vld [vmem:[%s12670_s17 + $0x8] sm:$0xff]   ;;  %v11040_v33 = vld [vmem:[%s12670_s17 + $0x10] sm:$0xff]  }
  0xc3   : > { %10668 = vmatprep.subr.bf16.mxu0 %v12713_v11  ;;  %v11050_v34 = vld [vmem:[#allocation8 + $0x30] sm:$0xff]   ;;  %v11057_v35 = vld [vmem:[#allocation8 + $0x48] sm:$0xff]   ;;  %v11041_v37 = vld [vmem:[%s12670_s17 + $0x18] sm:$0xff]   ;;  %p12307_p5 = por %p12306_p6, %p12305_p3 }
  0xc4   : > { %v11052_v36 = vld [vmem:[#allocation8 + $0x28] sm:$0xff]   ;;  %v11042_v38 = vld [vmem:[%s12670_s17 + $0x20] sm:$0xff]   ;;  %v11056_v40 = vld [vmem:[#allocation8 + $0x18] sm:$0xff]  }
  0xc5   : > { %10699 = vmatpush3.bf16.msra.mxu1 %v11047_v22  ;;  %v11054_v39 = vld [vmem:[#allocation8 + $0x20] sm:$0xff]   ;;  %v11043_v41 = vld [vmem:[%s12670_s17 + $0x28] sm:$0xff]   ;;  %v11044_v42 = vld [vmem:[%s12670_s17 + $0x30] sm:$0xff]   ;;  %p12308_p10 = pnand %p12307_p5, %p12301_p12 }
  0xc6   : > { %10669 = vmatpush3.bf16.msra.mxu0 %v12713_v11  ;;  %10700 = vmatprep.subr.bf16.mxu1 %v11049_v26  ;;  %v11058_v43 = vld [vmem:[#allocation8 + $0x10] sm:$0xff]   ;;  %v11045_v44 = vld [vmem:[%s12670_s17 + $0x38] sm:$0xff]   ;;  %v11059_v45 = vld [vmem:[#allocation8 + $0x40] sm:$0xff]  }
  0xc7   : > { %10670 = vmatprep.subr.bf16.mxu0 %v12722_v15  ;;  %v11060_v46 = vld [vmem:[#allocation8 + $0x8] sm:$0xff]   ;;  %v11061_v47 = vld [vmem:[#allocation8] sm:$0xff]   ;;  %v11062_v48 = vld [vmem:[#allocation8 + $0xf8] sm:$0xff]  }
  0xc8   : > { %v11063_v53 = vld [vmem:[#allocation8 + $0xf0] sm:$0xff]   ;;  %v11064_v58 = vld [vmem:[#allocation8 + $0xe8] sm:$0xff]   ;;  %v11065_v61 = vld [vmem:[#allocation8 + $0xe0] sm:$0xff]  }
  0xc9   : > { %10701 = vmatpush3.bf16.msra.mxu1 %v11049_v26  ;;  %v11066_v12 = vld [vmem:[#allocation8 + $0xd8] sm:$0xff]  }
  0xca   : > { %10671 = vmatpush3.bf16.msra.mxu0 %v12722_v15  ;;  %10702 = vmatprep.subr.bf16.mxu1 %v11051_v28 }
  0xcb   : > { %10672 = vmatprep.subr.bf16.mxu0 %v12729_v19 }
  0xcd   : > { %10703 = vmatpush3.bf16.msra.mxu1 %v11051_v28 }
  0xce   : > { %10673 = vmatpush3.bf16.msra.mxu0 %v12729_v19  ;;  %10704 = vmatprep.subr.bf16.mxu1 %v11053_v29 }
  0xcf   : > { %10674 = vmatprep.subr.bf16.mxu0 %v12735_v24 }
  0xd1   : > { %10705 = vmatpush3.bf16.msra.mxu1 %v11053_v29 }
  0xd2   : > { %10675 = vmatpush3.bf16.msra.mxu0 %v12735_v24  ;;  %10706 = vmatprep.subr.bf16.mxu1 %v11055_v31 }
  0xd3   : > { %10676 = vmatprep.subr.bf16.mxu0 %v499_v27 }
  0xd5   : > { %10707 = vmatpush3.bf16.msra.mxu1 %v11055_v31 }
  0xd6   : > { %10677 = vmatpush3.bf16.msra.mxu0 %v499_v27  ;;  %10708 = vmatprep.subr.bf16.mxu1 %v11057_v35 }
  0xd7   : > { %10678 = vmatprep.subr.bf16.mxu0 %v498_v14 }
  0xd9   : > { %10709 = vmatpush3.bf16.msra.mxu1 %v11057_v35 }
  0xda   : > { %10679 = vmatpush3.bf16.msra.mxu0 %v498_v14  ;;  %10710 = vmatprep.subr.bf16.mxu1 %v11059_v45  ;;  %v11068_v14 = vld [vmem:[#allocation8 + $0xc8] sm:$0xff]  }
  0xdb   : > { %10728 = vmatprep.subr.bf16.mxu0 %v11048_v30 }
  0xdd   : > { %10681 = vmatmul.mubr.bf16.vlgmr.msra.gmra.mxu0 %v11039_v32  ;;  %10711 = vmatpush3.bf16.msra.mxu1 %v11059_v45 }
  0xde   : > { %10684 = vmatprep.mubr.bf16.mxu0 %v11040_v33  ;;  %10729 = vmatpush3.bf16.msra.mxu0 %v11048_v30  ;;  %v12755_v30 = vld [vmem:[#allocation13] ss:$0 sm:$0xff] }
  0xdf   : > { %10730 = vmatprep.subr.bf16.mxu0 %v11050_v34 }
  0xe0   : > { %10713 = vmatmul.mubr.bf16.vlgmr.msra.gmra.mxu1 %v499_v27 }
  0xe1   : > { %10716 = vmatprep.mubr.bf16.mxu1 %v12735_v24 }
  0xe2   : > { %10731 = vmatpush3.bf16.msra.mxu0 %v11050_v34 }
  0xe3   : > { %10732 = vmatprep.subr.bf16.mxu0 %v11052_v36 }
  0xe5   : > { %10685 = vmatmul.mubr.bf16.gmra.mxu0 %v11041_v37 }
  0xe6   : > { %10688 = vmatprep.mubr.bf16.mxu0 %v11042_v38  ;;  %10733 = vmatpush3.bf16.msra.mxu0 %v11052_v36 }
  0xe7   : > { %10734 = vmatprep.subr.bf16.mxu0 %v11054_v39 }
  0xe8   : > { %10717 = vmatmul.mubr.bf16.gmra.mxu1 %v12729_v19 }
  0xe9   : > { %10720 = vmatprep.mubr.bf16.mxu1 %v12722_v15  ;;  %v11069_v15 = vld [vmem:[#allocation8 + $0xc0] sm:$0xff]  }
  0xea   : > { %10735 = vmatpush3.bf16.msra.mxu0 %v11054_v39 }
  0xeb   : > { %10736 = vmatprep.subr.bf16.mxu0 %v11056_v40 }
  0xed   : > { %10689 = vmatmul.mubr.bf16.gmra.mxu0 %v11043_v41 }
  0xee   : > { %10692 = vmatprep.mubr.bf16.mxu0 %v11044_v42  ;;  %10737 = vmatpush3.bf16.msra.mxu0 %v11056_v40 }
  0xef   : > { %10738 = vmatprep.subr.bf16.mxu0 %v11058_v43 }
  0xf0   : > { %10721 = vmatmul.mubr.bf16.gmra.mxu1 %v12713_v11 }
  0xf1   : > { %10724 = vmatprep.mubr.bf16.mxu1 %v12703_v5 }
  0xf2   : > { %10739 = vmatpush3.bf16.msra.mxu0 %v11058_v43 }
  0xf3   : > { %10740 = vmatprep.subr.bf16.mxu0 %v11060_v46 }
  0xf5   : > { %10693 = vmatmul.mubr.bf16.gmra.mxu0 %v11045_v44 }
  0xf6   : > { %10741 = vmatpush3.bf16.msra.mxu0 %v11060_v46 }
  0xf7   : > { %10742 = vmatprep.subr.bf16.mxu0 %v11061_v47 }
  0xf8   : > { %10725 = vmatmul.mubr.bf16.gmra.mxu1 %v12700_v3 }
  0xf9   : > { %10776 = vmatprep.mubr.bf16.mxu1 %v12717_v13  ;;  %v11067_v13 = vld [vmem:[#allocation8 + $0xd0] sm:$0xff]  }
  0xfa   : > { %10743 = vmatpush3.bf16.msra.mxu0 %v11061_v47 }
  0xfb   : > { %10792 = vmatprep.subr.bf16.mxu0 %v11062_v48 }
 0x19d   : > { %v10682_v49 = vpop.f32.mrf.mxu0 }
 0x19f   : > { %v588_v50 = vpop.f32.mrf.mxu0 }
 0x1a0   : > { %v10714_v16 = vpop.f32.mrf.mxu1 }
 0x1a1   : > { %v10683_v51 = vpop.f32.mrf.mxu0 }
 0x1a2   : > { %v652_v55 = vpack.c.bf16 %v10683_v51, %v10682_v49  ;;  %v741_v17 = vpop.f32.mrf.mxu1 }
 0x1a3   : > { %v591_v52 = vpop.f32.mrf.mxu0 }
 0x1a4   : > { %v651_v54 = vpack.c.bf16 %v591_v52, %v588_v50  ;;  %v10715_v18 = vpop.f32.mrf.mxu1 }
 0x1a5   : > { %v10686_v56 = vpop.f32.mrf.mxu0 }
 0x1a6   : > { %10744 = vmatprep.mubr.bf16.mxu0 %v651_v54  ;;  %v744_v19 = vpop.f32.mrf.mxu1 }
 0x1a7   : > { %v604_v57 = vpop.f32.mrf.mxu0  ;;  %10745 = vmatmul.mubr.bf16.vlgmr.msra.gmra.mxu0 %v652_v55 }
 0x1a8   : > { %10793 = vmatpush3.bf16.msra.mxu0 %v11062_v48  ;;  %v10718_v20 = vpop.f32.mrf.mxu1 }
 0x1a9   : > { %v10687_v59 = vpop.f32.mrf.mxu0  ;;  %10794 = vmatprep.subr.bf16.mxu0 %v11063_v53 }
 0x1aa   : > { %v654_v63 = vpack.c.bf16 %v10687_v59, %v10686_v56  ;;  %v757_v21 = vpop.f32.mrf.mxu1 }
 0x1ab   : > { %v607_v60 = vpop.f32.mrf.mxu0 }
 0x1ac   : > { %v653_v62 = vpack.c.bf16 %v607_v60, %v604_v57  ;;  %10795 = vmatpush3.bf16.msra.mxu0 %v11063_v53  ;;  %v10719_v22 = vpop.f32.mrf.mxu1 }
 0x1ad   : > { %v10690_v0 = vpop.f32.mrf.mxu0  ;;  %10796 = vmatprep.subr.bf16.mxu0 %v11064_v58 }
 0x1ae   : > { %10748 = vmatprep.mubr.bf16.mxu0 %v653_v62  ;;  %v760_v23 = vpop.f32.mrf.mxu1 }
 0x1af   : > { %v620_v1 = vpop.f32.mrf.mxu0  ;;  %10749 = vmatmul.mubr.bf16.gmra.mxu0 %v654_v63 }
 0x1b0   : > { %10797 = vmatpush3.bf16.msra.mxu0 %v11064_v58  ;;  %v10722_v26 = vpop.f32.mrf.mxu1 }
 0x1b1   : > { %v10691_v2 = vpop.f32.mrf.mxu0  ;;  %10798 = vmatprep.subr.bf16.mxu0 %v11065_v61 }
 0x1b2   : > { %v656_v5 = vpack.c.bf16 %v10691_v2, %v10690_v0  ;;  %v773_v33 = vpop.f32.mrf.mxu1 }
 0x1b3   : > { %v623_v3 = vpop.f32.mrf.mxu0 }
 0x1b4   : > { %v655_v4 = vpack.c.bf16 %v623_v3, %v620_v1  ;;  %10799 = vmatpush3.bf16.msra.mxu0 %v11065_v61  ;;  %v10723_v42 = vpop.f32.mrf.mxu1 }
 0x1b5   : > { %v10694_v6 = vpop.f32.mrf.mxu0  ;;  %10800 = vmatprep.subr.bf16.mxu0 %v11066_v12 }
 0x1b6   : > { %10752 = vmatprep.mubr.bf16.mxu0 %v655_v4  ;;  %v776_v53 = vpop.f32.mrf.mxu1 }
 0x1b7   : > { %v636_v7 = vpop.f32.mrf.mxu0  ;;  %10753 = vmatmul.mubr.bf16.gmra.mxu0 %v656_v5 }
 0x1b8   : > { %10801 = vmatpush3.bf16.msra.mxu0 %v11066_v12  ;;  %v10726_v61 = vpop.f32.mrf.mxu1 }
 0x1b9   : > { %v10695_v8 = vpop.f32.mrf.mxu0  ;;  %10802 = vmatprep.subr.bf16.mxu0 %v11067_v13 }
 0x1ba   : > { %v658_v11 = vpack.c.bf16 %v10695_v8, %v10694_v6 }
 0x1bb   : > { %v639_v9 = vpop.f32.mrf.mxu0 }
 0x1bc   : > { %v657_v10 = vpack.c.bf16 %v639_v9, %v636_v7  ;;  %10803 = vmatpush3.bf16.msra.mxu0 %v11067_v13  ;;  %v789_v7 = vpop.f32.mrf.mxu1 }
 0x1bd   : > { %10804 = vmatprep.subr.bf16.mxu0 %v11068_v14 }
 0x1be   : > { %10756 = vmatprep.mubr.bf16.mxu0 %v657_v10 }
 0x1bf   : > { %10757 = vmatmul.mubr.bf16.gmra.mxu0 %v658_v11 }
 0x1c0   : > { %10805 = vmatpush3.bf16.msra.mxu0 %v11068_v14 }
 0x1c1   : > { %10806 = vmatprep.subr.bf16.mxu0 %v11069_v15 }
 0x1c4   : > { %10807 = vmatpush3.bf16.msra.mxu0 %v11069_v15 }
 0x267   : > { %v10746_v24 = vpop.f32.mrf.mxu0 }
 0x268   : > { %v895_v28 = vadd.f32 %v10746_v24, %v10714_v16 }
 0x269   : > { %v886_v25 = vpop.f32.mrf.mxu0 }
 0x26a   : > { %v887_v27 = vadd.f32 %v886_v25, %v741_v17  ;;  %v951_v37 = vadd.f32 %v895_v28, %v12755_v30 }
 0x26b   : > { %v10747_v29 = vpop.f32.mrf.mxu0 }
 0x26c   : > { %v898_v31 = vadd.f32 %v10747_v29, %v10715_v18  ;;  %v949_v34 = vadd.f32 %v887_v27, %v12755_v30  ;;  %v967_v46 = vmax.f32 %v951_v37, 0.0  ;;  %v10727_v18 = vpop.f32.mrf.mxu1 }
 0x26d   : > { %v889_v32 = vpop.f32.mrf.mxu0 }
 0x26e   : > { %v952_v35 = vadd.f32 %v898_v31, %v12755_v30  ;;  %v890_v36 = vadd.f32 %v889_v32, %v744_v19  ;;  %v965_v43 = vmax.f32 %v949_v34, 0.0  ;;  %v792_v28 = vpop.f32.mrf.mxu1 }
 0x26f   : > { %v10750_v38 = vpop.f32.mrf.mxu0 }
 0x270   : > { %v950_v39 = vadd.f32 %v890_v36, %v12755_v30  ;;  %v968_v40 = vmax.f32 %v952_v35, 0.0  ;;  %v911_v47 = vadd.f32 %v10750_v38, %v10718_v20 }
 0x271   : > { %v902_v41 = vpop.f32.mrf.mxu0 }
 0x272   : > { %v966_v44 = vmax.f32 %v950_v39, 0.0  ;;  %v903_v45 = vadd.f32 %v902_v41, %v757_v21  ;;  %v12763_v51 = vpack.c.bf16 %v968_v40, %v967_v46  ;;  %v955_v57 = vadd.f32 %v911_v47, %v12755_v30  ;;  %v12801_v46 = vld [vmem:[%s12670_s17 + $0x28] sm:$0xff]   ;;  %v12805_v47 = vld [vmem:[%s12670_s17 + $0x30] sm:$0xff]  }
 0x273   : > { %v10751_v48 = vpop.f32.mrf.mxu0 }
 0x274   : > { %v914_v49 = vadd.f32 %v10751_v48, %v10719_v22  ;;  %v12761_v50 = vpack.c.bf16 %v966_v44, %v965_v43  ;;  %v953_v54 = vadd.f32 %v903_v45, %v12755_v30  ;;  %v971_v2 = vmax.f32 %v955_v57, 0.0  ;;  %v12789_v43 = vld [vmem:[%s12670_s17 + $0x10] sm:$0xff]   ;;  %v12793_v44 = vld [vmem:[%s12670_s17 + $0x18] sm:$0xff]   ;;  %v12797_v45 = vld [vmem:[%s12670_s17 + $0x20] sm:$0xff]  }
 0x275   : > { %v905_v52 = vpop.f32.mrf.mxu0  ;;  %v12809_v48 = vld [vmem:[%s12670_s17 + $0x38] sm:$0xff]  }
 0x276   : > { %v956_v55 = vadd.f32 %v914_v49, %v12755_v30  ;;  %v906_v56 = vadd.f32 %v905_v52, %v760_v23  ;;  %10808 = vmatprep.mubr.bf16.mxu0 %v12761_v50  ;;  %v969_v63 = vmax.f32 %v953_v54, 0.0  ;;  %v11070_v49 = vld [vmem:[#allocation8 + $0xb8] sm:$0xff]   ;;  %v11073_v52 = vld [vmem:[#allocation8 + $0xa0] sm:$0xff]   ;;  %v11075_v54 = vld [vmem:[#allocation8 + $0x90] sm:$0xff]  }
 0x277   : > { %v10754_v58 = vpop.f32.mrf.mxu0  ;;  %10809 = vmatmul.mubr.bf16.vlgmr.msra.gmra.mxu0 %v12763_v51  ;;  %v11080_v57 = vld [vmem:[#allocation10 + $0xf4] ss:$8 sps:$4 sm:$0xff]  }
 0x278   : > { %v954_v59 = vadd.f32 %v906_v56, %v12755_v30  ;;  %v972_v60 = vmax.f32 %v956_v55, 0.0  ;;  %v927_v3 = vadd.f32 %v10754_v58, %v10722_v26  ;;  %v11076_v55 = vld [vmem:[#allocation8 + $0x88] sm:$0xff]   ;;  %v11077_v56 = vld [vmem:[#allocation8 + $0x80] sm:$0xff]  }
 0x279   : > { %v918_v62 = vpop.f32.mrf.mxu0 }
 0x27a   : > { %v970_v0 = vmax.f32 %v954_v59, 0.0  ;;  %v919_v1 = vadd.f32 %v918_v62, %v773_v33  ;;  %v1017_v9 = vpack.c.bf16 %v972_v60, %v971_v2  ;;  %v959_v13 = vadd.f32 %v927_v3, %v12755_v30  ;;  %v11083_v2 = vld [vmem:[#allocation10 + $0xe4] ss:$8 sps:$4 sm:$0xff]  }
 0x27b   : > { %v10755_v4 = vpop.f32.mrf.mxu0 }
 0x27c   : > { %v930_v5 = vadd.f32 %v10755_v4, %v10723_v42  ;;  %v1016_v6 = vpack.c.bf16 %v970_v0, %v969_v63  ;;  %v957_v10 = vadd.f32 %v919_v1, %v12755_v30  ;;  %v975_v23 = vmax.f32 %v959_v13, 0.0  ;;  %v12070_v42 = vld [vmem:[%s12670_s17] sm:$0xff]   ;;  %v11078_v63 = vld [vmem:[#allocation10 + $0xf0] ss:$8 sps:$4 sm:$0xff]  }
 0x27d   : > { %v921_v8 = vpop.f32.mrf.mxu0  ;;  %v11081_v4 = vld [vmem:[#allocation10 + $0xe0] ss:$8 sps:$4 sm:$0xff]  }
 0x27e   : > { %v960_v11 = vadd.f32 %v930_v5, %v12755_v30  ;;  %v922_v12 = vadd.f32 %v921_v8, %v776_v53  ;;  %10812 = vmatprep.mubr.bf16.mxu0 %v1016_v6  ;;  %v973_v20 = vmax.f32 %v957_v10, 0.0  ;;  %v11074_v53 = vld [vmem:[#allocation8 + $0x98] sm:$0xff]  }
 0x27f   : > { %v10758_v14 = vpop.f32.mrf.mxu0  ;;  %10813 = vmatmul.mubr.bf16.gmra.mxu0 %v1017_v9 }
 0x280   : > { %v958_v15 = vadd.f32 %v922_v12, %v12755_v30  ;;  %v943_v16 = vadd.f32 %v10758_v14, %v10726_v61  ;;  %v976_v17 = vmax.f32 %v960_v11, 0.0  ;;  %v11089_v12 = vld [vmem:[#allocation10 + $0xc4] ss:$8 sps:$4 sm:$0xff]   ;;  %v11087_v14 = vld [vmem:[#allocation10 + $0xc0] ss:$8 sps:$4 sm:$0xff]  }
 0x281   : > { %v934_v19 = vpop.f32.mrf.mxu0 }
 0x282   : > { %v974_v21 = vmax.f32 %v958_v15, 0.0  ;;  %v935_v22 = vadd.f32 %v934_v19, %v789_v7  ;;  %v963_v25 = vadd.f32 %v943_v16, %v12755_v30  ;;  %v1019_v31 = vpack.c.bf16 %v976_v17, %v975_v23  ;;  %v11092_v16 = vld [vmem:[#allocation10 + $0xb4] ss:$8 sps:$4 sm:$0xff]   ;;  %v11090_v19 = vld [vmem:[#allocation10 + $0xb0] ss:$8 sps:$4 sm:$0xff]  }
 0x283   : > { %v10759_v24 = vpop.f32.mrf.mxu0 }
 0x284   : > { %v946_v26 = vadd.f32 %v10759_v24, %v10727_v18  ;;  %v1018_v27 = vpack.c.bf16 %v974_v21, %v973_v20  ;;  %v961_v32 = vadd.f32 %v935_v22, %v12755_v30  ;;  %v979_v35 = vmax.f32 %v963_v25, 0.0 }
 0x285   : > { %v937_v29 = vpop.f32.mrf.mxu0 }
 0x286   : > { %v964_v33 = vadd.f32 %v946_v26, %v12755_v30  ;;  %v938_v34 = vadd.f32 %v937_v29, %v792_v28  ;;  %10816 = vmatprep.mubr.bf16.mxu0 %v1018_v27  ;;  %v977_v38 = vmax.f32 %v961_v32, 0.0  ;;  %v11093_v28 = vld [vmem:[#allocation10 + $0xa0] ss:$8 sps:$4 sm:$0xff]   ;;  %v11098_v29 = vld [vmem:[#allocation10 + $0x94] ss:$8 sps:$4 sm:$0xff]  }
 0x287   : > { %10817 = vmatmul.mubr.bf16.gmra.mxu0 %v1019_v31  ;;  %v11101_v32 = vld [vmem:[#allocation10 + $0x84] ss:$8 sps:$4 sm:$0xff]  }
 0x288   : > { %v980_v36 = vmax.f32 %v964_v33, 0.0  ;;  %v962_v37 = vadd.f32 %v938_v34, %v12755_v30  ;;  %v12785_v30 = vld [vmem:[%s12670_s17 + $0x8] sm:$0xff]   ;;  %v14905_v34 = vmov 0  }
 0x289   : > { %v11099_v33 = vld [vmem:[#allocation10 + $0x80] ss:$8 sps:$4 sm:$0xff]  }
 0x28a   : > { %v978_v39 = vmax.f32 %v962_v37, 0.0  ;;  %v1021_v40 = vpack.c.bf16 %v980_v36, %v979_v35 }
 0x28c   : > { %10760 = vmatprep.subr.bf16.mxu1 %v1021_v40  ;;  %v1020_v41 = vpack.c.bf16 %v978_v39, %v977_v38 }
 0x28d   : > { %10761 = vmatpush3.bf16.msra.mxu1 %v1021_v40 }
 0x28e   : > { %10762 = vmatprep.subr.bf16.mxu1 %v1020_v41  ;;  %10820 = vmatprep.mubr.bf16.mxu0 %v1020_v41 }
 0x28f   : > { %10821 = vmatmul.mubr.bf16.gmra.mxu0 %v1021_v40 }
 0x290   : > { %10872 = vmatprep.mubr.bf16.mxu0 %v12070_v42 }
 0x291   : > { %10763 = vmatpush3.bf16.msra.mxu1 %v1020_v41 }
 0x292   : > { %10764 = vmatprep.subr.bf16.mxu1 %v1019_v31 }
 0x295   : > { %10765 = vmatpush3.bf16.msra.mxu1 %v1019_v31  ;;  %v11096_v31 = vld [vmem:[#allocation10 + $0x90] ss:$8 sps:$4 sm:$0xff]  }
 0x296   : > { %10766 = vmatprep.subr.bf16.mxu1 %v1018_v27 }
 0x299   : > { %10767 = vmatpush3.bf16.msra.mxu1 %v1018_v27  ;;  %v11095_v27 = vld [vmem:[#allocation10 + $0xa4] ss:$8 sps:$4 sm:$0xff]  }
 0x29a   : > { %10768 = vmatprep.subr.bf16.mxu1 %v1017_v9 }
 0x29d   : > { %10769 = vmatpush3.bf16.msra.mxu1 %v1017_v9  ;;  %v11084_v9 = vld [vmem:[#allocation10 + $0xd0] ss:$8 sps:$4 sm:$0xff]  }
 0x29e   : > { %10770 = vmatprep.subr.bf16.mxu1 %v1016_v6 }
 0x2a1   : > { %10771 = vmatpush3.bf16.msra.mxu1 %v1016_v6  ;;  %v11086_v6 = vld [vmem:[#allocation10 + $0xd4] ss:$8 sps:$4 sm:$0xff]  }
 0x2a2   : > { %10772 = vmatprep.subr.bf16.mxu1 %v12763_v51 }
 0x2a5   : > { %10773 = vmatpush3.bf16.msra.mxu1 %v12763_v51  ;;  %v11072_v51 = vld [vmem:[#allocation8 + $0xa8] sm:$0xff]  }
 0x2a6   : > { %10774 = vmatprep.subr.bf16.mxu1 %v12761_v50 }
 0x2a9   : > { %10775 = vmatpush3.bf16.msra.mxu1 %v12761_v50  ;;  %v11071_v50 = vld [vmem:[#allocation8 + $0xb0] sm:$0xff]  }
 0x2aa   : > { %10824 = vmatprep.subr.bf16.mxu1 %v11070_v49 }
 0x2ac   : > { %10777 = vmatmul.mubr.bf16.vlgmr.msra.gmra.mxu1 %v12785_v30 }
 0x2ad   : > { %10780 = vmatprep.mubr.bf16.mxu1 %v12789_v43  ;;  %10825 = vmatpush3.bf16.msra.mxu1 %v11070_v49 }
 0x2ae   : > { %10826 = vmatprep.subr.bf16.mxu1 %v11071_v50 }
 0x2b1   : > { %10827 = vmatpush3.bf16.msra.mxu1 %v11071_v50 }
 0x2b2   : > { %10828 = vmatprep.subr.bf16.mxu1 %v11072_v51 }
 0x2b4   : > { %10781 = vmatmul.mubr.bf16.gmra.mxu1 %v12793_v44 }
 0x2b5   : > { %10784 = vmatprep.mubr.bf16.mxu1 %v12797_v45  ;;  %10829 = vmatpush3.bf16.msra.mxu1 %v11072_v51 }
 0x2b6   : > { %10830 = vmatprep.subr.bf16.mxu1 %v11073_v52 }
 0x2b9   : > { %10831 = vmatpush3.bf16.msra.mxu1 %v11073_v52 }
 0x2ba   : > { %10832 = vmatprep.subr.bf16.mxu1 %v11074_v53 }
 0x2bc   : > { %10785 = vmatmul.mubr.bf16.gmra.mxu1 %v12801_v46 }
 0x2bd   : > { %10788 = vmatprep.mubr.bf16.mxu1 %v12805_v47  ;;  %10833 = vmatpush3.bf16.msra.mxu1 %v11074_v53 }
 0x2be   : > { %10834 = vmatprep.subr.bf16.mxu1 %v11075_v54 }
 0x2c1   : > { %10835 = vmatpush3.bf16.msra.mxu1 %v11075_v54 }
 0x2c2   : > { %10836 = vmatprep.subr.bf16.mxu1 %v11076_v55 }
 0x2c4   : > { %10789 = vmatmul.mubr.bf16.gmra.mxu1 %v12809_v48 }
 0x2c5   : > { %10837 = vmatpush3.bf16.msra.mxu1 %v11076_v55  ;;  %v12815_v55 = vld [vmem:[#allocation13 + $0x1] ss:$0 sm:$0xff] }
 0x2c6   : > { %10838 = vmatprep.subr.bf16.mxu1 %v11077_v56 }
 0x2c9   : > { %10839 = vmatpush3.bf16.msra.mxu1 %v11077_v56 }
 0x2ca   : > { %1676 = vmatprep.subr.bf16.mxu1 %v11080_v57 }
 0x337   : > { %v10810_v35 = vpop.f32.mrf.mxu0 }
 0x339   : > { %v1209_v36 = vpop.f32.mrf.mxu0 }
 0x33b   : > { %v10811_v37 = vpop.f32.mrf.mxu0 }
 0x33d   : > { %v1212_v38 = vpop.f32.mrf.mxu0 }
 0x33f   : > { %v10814_v39 = vpop.f32.mrf.mxu0 }
 0x341   : > { %v1225_v40 = vpop.f32.mrf.mxu0 }
 0x343   : > { %v10815_v41 = vpop.f32.mrf.mxu0 }
 0x345   : > { %v1228_v42 = vpop.f32.mrf.mxu0 }
 0x347   : > { %v10818_v50 = vpop.f32.mrf.mxu0 }
 0x349   : > { %v12813_v54 = vpop.f32.mrf.mxu0 }
 0x36c   : > { %v10778_v58 = vpop.f32.mrf.mxu1 }
 0x36e   : > { %v1056_v59 = vpop.f32.mrf.mxu1 }
 0x370   : > { %v10779_v60 = vpop.f32.mrf.mxu1 }
 0x371   : > { %v1120_v0 = vpack.c.bf16 %v10779_v60, %v10778_v58 }
 0x372   : > { %v1059_v61 = vpop.f32.mrf.mxu1 }
 0x373   : > { %v1119_v62 = vpack.c.bf16 %v1059_v61, %v1056_v59 }
 0x374   : > { %v10782_v1 = vpop.f32.mrf.mxu1 }
 0x375   : > { %10840 = vmatprep.mubr.bf16.mxu1 %v1119_v62  ;;  %v10819_v62 = vpop.f32.mrf.mxu0 }
 0x376   : > { %v1072_v3 = vpop.f32.mrf.mxu1  ;;  %10841 = vmatmul.mubr.bf16.vlgmr.msra.gmra.mxu1 %v1120_v0 }
 0x377   : > { %1677 = vmatpush1.bf16.msra.mxu1 %v11078_v63 }
 0x378   : > { %v10783_v5 = vpop.f32.mrf.mxu1  ;;  %1678 = vmatprep.subr.bf16.mxu1 %v11083_v2 }
 0x379   : > { %v1122_v10 = vpack.c.bf16 %v10783_v5, %v10782_v1 }
 0x37a   : > { %v1075_v7 = vpop.f32.mrf.mxu1 }
 0x37b   : > { %v1121_v8 = vpack.c.bf16 %v1075_v7, %v1072_v3  ;;  %1679 = vmatpush1.bf16.msra.mxu1 %v11081_v4 }
 0x37c   : > { %v10786_v11 = vpop.f32.mrf.mxu1  ;;  %1680 = vmatprep.subr.bf16.mxu1 %v11086_v6  ;;  %v1244_v6 = vpop.f32.mrf.mxu0 }
 0x37d   : > { %10844 = vmatprep.mubr.bf16.mxu1 %v1121_v8 }
 0x37e   : > { %v1088_v13 = vpop.f32.mrf.mxu1  ;;  %10845 = vmatmul.mubr.bf16.gmra.mxu1 %v1122_v10 }
 0x37f   : > { %1681 = vmatpush1.bf16.msra.mxu1 %v11084_v9 }
 0x380   : > { %v10787_v15 = vpop.f32.mrf.mxu1  ;;  %1682 = vmatprep.subr.bf16.mxu1 %v11089_v12  ;;  %v10822_v12 = vpop.f32.mrf.mxu0 }
 0x381   : > { %v1124_v20 = vpack.c.bf16 %v10787_v15, %v10786_v11 }
 0x382   : > { %v1091_v17 = vpop.f32.mrf.mxu1 }
 0x383   : > { %v1123_v18 = vpack.c.bf16 %v1091_v17, %v1088_v13  ;;  %1683 = vmatpush1.bf16.msra.mxu1 %v11087_v14 }
 0x384   : > { %v10790_v21 = vpop.f32.mrf.mxu1  ;;  %1684 = vmatprep.subr.bf16.mxu1 %v11092_v16 }
 0x385   : > { %10848 = vmatprep.mubr.bf16.mxu1 %v1123_v18 }
 0x386   : > { %v1104_v22 = vpop.f32.mrf.mxu1  ;;  %10849 = vmatmul.mubr.bf16.gmra.mxu1 %v1124_v20 }
 0x387   : > { %1685 = vmatpush1.bf16.msra.mxu1 %v11090_v19  ;;  %v1257_v19 = vpop.f32.mrf.mxu0 }
 0x388   : > { %v10791_v23 = vpop.f32.mrf.mxu1  ;;  %1686 = vmatprep.subr.bf16.mxu1 %v11095_v27 }
 0x389   : > { %v1126_v26 = vpack.c.bf16 %v10791_v23, %v10790_v21 }
 0x38a   : > { %v1107_v24 = vpop.f32.mrf.mxu1 }
 0x38b   : > { %v1125_v25 = vpack.c.bf16 %v1107_v24, %v1104_v22  ;;  %1687 = vmatpush1.bf16.msra.mxu1 %v11093_v28 }
 0x38c   : > { %1688 = vmatprep.subr.bf16.mxu1 %v11098_v29 }
 0x38d   : > { %10852 = vmatprep.mubr.bf16.mxu1 %v1125_v25 }
 0x38e   : > { %10853 = vmatmul.mubr.bf16.gmra.mxu1 %v1126_v26  ;;  %v10823_v26 = vpop.f32.mrf.mxu0 }
 0x38f   : > { %1689 = vmatpush1.bf16.msra.mxu1 %v11096_v31  ;;  %1708 = vmatprep.mubr.bf16.mxu1 %v14905_v34 }
 0x390   : > { %1690 = vmatprep.subr.bf16.mxu1 %v11101_v32 }
 0x393   : > { %1691 = vmatpush1.bf16.msra.mxu1 %v11099_v33 }
 0x436   : > { %v10842_v49 = vpop.f32.mrf.mxu1 }
 0x437   : > { %v1363_v0 = vadd.f32 %v10842_v49, %v10810_v35 }
 0x438   : > { %v1354_v51 = vpop.f32.mrf.mxu1 }
 0x439   : > { %v1355_v52 = vadd.f32 %v1354_v51, %v1209_v36  ;;  %v1419_v8 = vadd.f32 %v1363_v0, %v12815_v55 }
 0x43a   : > { %v10843_v53 = vpop.f32.mrf.mxu1 }
 0x43b   : > { %v1417_v57 = vadd.f32 %v1355_v52, %v12815_v55  ;;  %v1366_v60 = vadd.f32 %v10843_v53, %v10811_v37  ;;  %v1435_v14 = vmax.f32 %v1419_v8, 0.0 }
 0x43c   : > { %v1357_v56 = vpop.f32.mrf.mxu1 }
 0x43d   : > { %v1358_v58 = vadd.f32 %v1357_v56, %v1212_v38  ;;  %v1433_v1 = vmax.f32 %v1417_v57, 0.0  ;;  %v1420_v4 = vadd.f32 %v1366_v60, %v12815_v55 }
 0x43e   : > { %v10846_v59 = vpop.f32.mrf.mxu1 }
 0x43f   : > { %v1418_v61 = vadd.f32 %v1358_v58, %v12815_v55  ;;  %v1436_v10 = vmax.f32 %v1420_v4, 0.0  ;;  %v1379_v27 = vadd.f32 %v10846_v59, %v10814_v39 }
 0x440   : > { %v1370_v63 = vpop.f32.mrf.mxu1 }
 0x441   : > { %v1434_v2 = vmax.f32 %v1418_v61, 0.0  ;;  %v1371_v15 = vadd.f32 %v1370_v63, %v1225_v40  ;;  %v12826_v18 = vpack.c.bf16 %v1436_v10, %v1435_v14  ;;  %v1260_v40 = vpop.f32.mrf.mxu0  ;;  %v11117_v14 = vld [vmem:[#allocation10 + $0x20] ss:$8 sps:$4 sm:$0xff]  }
 0x442   : > { %v10847_v3 = vpop.f32.mrf.mxu1 }
 0x443   : > { %v12820_v5 = vpack.c.bf16 %v1434_v2, %v1433_v1  ;;  %v1421_v21 = vadd.f32 %v1371_v15, %v12815_v55  ;;  %v1382_v22 = vadd.f32 %v10847_v3, %v10815_v41  ;;  %v1423_v41 = vadd.f32 %v1379_v27, %v12815_v55  ;;  %v11122_v15 = vld [vmem:[#allocation10 + $0x14] ss:$8 sps:$4 sm:$0xff]  }
 0x444   : > { %v1373_v7 = vpop.f32.mrf.mxu1 }
 0x445   : > { %1709 = vmatmul.mubr.bf16.vlgmr.msra.gmra.mxu1 %v12820_v5  ;;  %v1374_v11 = vadd.f32 %v1373_v7, %v1228_v42  ;;  %v1437_v29 = vmax.f32 %v1421_v21, 0.0  ;;  %v1424_v32 = vadd.f32 %v1382_v22, %v12815_v55  ;;  %v1439_v61 = vmax.f32 %v1423_v41, 0.0  ;;  %v11138_v41 = vld [vmem:[#allocation11 + $0x260] ss:$16 sps:$4 sm:$0xff]  }
 0x446   : > { %v10850_v9 = vpop.f32.mrf.mxu1  ;;  %1718 = vmatprep.mubr.bf16.mxu1 %v14905_v34 }
 0x447   : > { %v1422_v17 = vadd.f32 %v1374_v11, %v12815_v55  ;;  %v1395_v42 = vadd.f32 %v10850_v9, %v10818_v50  ;;  %v1440_v53 = vmax.f32 %v1424_v32, 0.0  ;;  %v11132_v32 = vld [vmem:[#allocation11 + $0x2a0] ss:$16 sps:$4 sm:$0xff]  }
 0x448   : > { %v1386_v13 = vpop.f32.mrf.mxu1 }
 0x449   : > { %v1438_v24 = vmax.f32 %v1422_v17, 0.0  ;;  %v1427_v50 = vadd.f32 %v1395_v42, %v12815_v55  ;;  %v1486_v7 = vpack.c.bf16 %v1440_v53, %v1439_v61  ;;  %v11125_v17 = vld [vmem:[#allocation10 + $0x4] ss:$8 sps:$4 sm:$0xff]  }
 0x44a   : > { %v10851_v16 = vpop.f32.mrf.mxu1  ;;  %v11152_v61 = vld [vmem:[#allocation11 + $0x3e4] ss:$16 sps:$4 sm:$0xff]  }
 0x44b   : > { %v1398_v33 = vadd.f32 %v10851_v16, %v10819_v62  ;;  %v1485_v38 = vpack.c.bf16 %v1438_v24, %v1437_v29  ;;  %v1387_v62 = vadd.f32 %v1386_v13, %v12813_v54  ;;  %v11119_v13 = vld [vmem:[#allocation10 + $0x24] ss:$8 sps:$4 sm:$0xff]   ;;  %v11120_v16 = vld [vmem:[#allocation10 + $0x10] ss:$8 sps:$4 sm:$0xff]  }
 0x44c   : > { %v1389_v20 = vpop.f32.mrf.mxu1  ;;  %v11126_v24 = vld [vmem:[#allocation11 + $0x2e0] ss:$16 sps:$4 sm:$0xff]   ;;  %v11134_v29 = vld [vmem:[#allocation11 + $0x2a4] ss:$16 sps:$4 sm:$0xff]  }
 0x44d   : > { %1719 = vmatmul.mubr.bf16.gmra.mxu1 %v12826_v18  ;;  %v1428_v56 = vadd.f32 %v1398_v33, %v12815_v55  ;;  %v1390_v57 = vadd.f32 %v1389_v20, %v1244_v6  ;;  %v1443_v6 = vmax.f32 %v1427_v50, 0.0  ;;  %v1425_v8 = vadd.f32 %v1387_v62, %v12815_v55  ;;  %v11150_v62 = vld [vmem:[#allocation11 + $0x3e0] ss:$16 sps:$4 sm:$0xff]  }
 0x44e   : > { %v10854_v23 = vpop.f32.mrf.mxu1  ;;  %1728 = vmatprep.mubr.bf16.mxu1 %v14905_v34 }
 0x44f   : > { %v1411_v25 = vadd.f32 %v10854_v23, %v10822_v12  ;;  %v1444_v2 = vmax.f32 %v1428_v56, 0.0  ;;  %v1426_v3 = vadd.f32 %v1390_v57, %v12815_v55  ;;  %v1441_v54 = vmax.f32 %v1425_v8, 0.0  ;;  %v11110_v12 = vld [vmem:[#allocation10 + $0x54] ss:$8 sps:$4 sm:$0xff]   ;;  %v11144_v56 = vld [vmem:[#allocation11 + $0x220] ss:$16 sps:$4 sm:$0xff]  }
 0x450   : > { %v1402_v28 = vpop.f32.mrf.mxu1  ;;  %v11161_v8 = vld [vmem:[#allocation11 + $0x384] ss:$16 sps:$4 sm:$0xff]  }
 0x451   : > { %v1403_v31 = vadd.f32 %v1402_v28, %v1257_v19  ;;  %v1431_v36 = vadd.f32 %v1411_v25, %v12815_v55  ;;  %v1442_v9 = vmax.f32 %v1426_v3, 0.0  ;;  %v1488_v10 = vpack.c.bf16 %v1444_v2, %v1443_v6  ;;  %v11128_v19 = vld [vmem:[#allocation11 + $0x2e4] ss:$16 sps:$4 sm:$0xff]   ;;  %v11129_v28 = vld [vmem:[#allocation11 + $0x2c0] ss:$16 sps:$4 sm:$0xff]  }
 0x452   : > { %v10855_v35 = vpop.f32.mrf.mxu1  ;;  %v11153_v2 = vld [vmem:[#allocation11 + $0x3c0] ss:$16 sps:$4 sm:$0xff]   ;;  %v11158_v3 = vld [vmem:[#allocation11 + $0x3a4] ss:$16 sps:$4 sm:$0xff]  }
 0x453   : > { %v1414_v37 = vadd.f32 %v10855_v35, %v10823_v26  ;;  %v1429_v51 = vadd.f32 %v1403_v31, %v12815_v55  ;;  %v1447_v58 = vmax.f32 %v1431_v36, 0.0  ;;  %v1487_v11 = vpack.c.bf16 %v1442_v9, %v1441_v54  ;;  %v11131_v26 = vld [vmem:[#allocation11 + $0x2c4] ss:$16 sps:$4 sm:$0xff]  }
 0x454   : > { %v1405_v49 = vpop.f32.mrf.mxu1  ;;  %v11137_v35 = vld [vmem:[#allocation11 + $0x284] ss:$16 sps:$4 sm:$0xff]  }
 0x455   : > { %v1432_v39 = vadd.f32 %v1414_v37, %v12815_v55  ;;  %v1406_v52 = vadd.f32 %v1405_v49, %v1260_v40  ;;  %1729 = vmatmul.mubr.bf16.gmra.mxu1 %v1485_v38  ;;  %v1445_v63 = vmax.f32 %v1429_v51, 0.0  ;;  %v11135_v37 = vld [vmem:[#allocation11 + $0x280] ss:$16 sps:$4 sm:$0xff]   ;;  %v11143_v49 = vld [vmem:[#allocation11 + $0x244] ss:$16 sps:$4 sm:$0xff]  }
 0x456   : > { %1738 = vmatprep.mubr.bf16.mxu1 %v14905_v34 }
 0x457   : > { %v1448_v59 = vmax.f32 %v1432_v39, 0.0  ;;  %v1430_v60 = vadd.f32 %v1406_v52, %v12815_v55  ;;  %v11104_v55 = vld [vmem:[#allocation10 + $0x74] ss:$8 sps:$4 sm:$0xff]   ;;  %v11141_v39 = vld [vmem:[#allocation11 + $0x240] ss:$16 sps:$4 sm:$0xff]  }
 0x458   : > { %v11146_v52 = vld [vmem:[#allocation11 + $0x224] ss:$16 sps:$4 sm:$0xff]  }
 0x459   : > { %v1446_v0 = vmax.f32 %v1430_v60, 0.0  ;;  %v1490_v1 = vpack.c.bf16 %v1448_v59, %v1447_v58  ;;  %v11149_v58 = vld [vmem:[#allocation11 + $0x204] ss:$16 sps:$4 sm:$0xff]   ;;  %v11147_v60 = vld [vmem:[#allocation11 + $0x200] ss:$16 sps:$4 sm:$0xff]  }
 0x45b   : > { %10856 = vmatprep.subr.bf16.mxu0 %v1490_v1  ;;  %v1489_v4 = vpack.c.bf16 %v1446_v0, %v1445_v63  ;;  %v11155_v0 = vld [vmem:[#allocation11 + $0x3c4] ss:$16 sps:$4 sm:$0xff]  }
 0x45c   : > { %10857 = vmatpush3.bf16.msra.mxu0 %v1490_v1 }
 0x45d   : > { %10858 = vmatprep.subr.bf16.mxu0 %v1489_v4  ;;  %1739 = vmatmul.mubr.bf16.gmra.mxu1 %v1486_v7 }
 0x45e   : > { %1748 = vmatprep.mubr.bf16.mxu1 %v14905_v34 }
 0x460   : > { %10859 = vmatpush3.bf16.msra.mxu0 %v1489_v4 }
 0x461   : > { %10860 = vmatprep.subr.bf16.mxu0 %v1488_v10 }
 0x464   : > { %10861 = vmatpush3.bf16.msra.mxu0 %v1488_v10 }
 0x465   : > { %10862 = vmatprep.subr.bf16.mxu0 %v1487_v11  ;;  %1749 = vmatmul.mubr.bf16.gmra.mxu1 %v1487_v11 }
 0x466   : > { %1758 = vmatprep.mubr.bf16.mxu1 %v14905_v34 }
 0x468   : > { %10863 = vmatpush3.bf16.msra.mxu0 %v1487_v11 }
 0x469   : > { %10864 = vmatprep.subr.bf16.mxu0 %v1486_v7 }
 0x46c   : > { %10865 = vmatpush3.bf16.msra.mxu0 %v1486_v7  ;;  %v11156_v7 = vld [vmem:[#allocation11 + $0x3a0] ss:$16 sps:$4 sm:$0xff]  }
 0x46d   : > { %10866 = vmatprep.subr.bf16.mxu0 %v1485_v38  ;;  %1759 = vmatmul.mubr.bf16.gmra.mxu1 %v1488_v10  ;;  %v11159_v10 = vld [vmem:[#allocation11 + $0x380] ss:$16 sps:$4 sm:$0xff]  }
 0x46e   : > { %1768 = vmatprep.mubr.bf16.mxu1 %v14905_v34 }
 0x470   : > { %10867 = vmatpush3.bf16.msra.mxu0 %v1485_v38  ;;  %v11140_v38 = vld [vmem:[#allocation11 + $0x264] ss:$16 sps:$4 sm:$0xff]  }
 0x471   : > { %10868 = vmatprep.subr.bf16.mxu0 %v12826_v18 }
 0x474   : > { %10869 = vmatpush3.bf16.msra.mxu0 %v12826_v18  ;;  %v11123_v18 = vld [vmem:[#allocation10] ss:$8 sps:$4 sm:$0xff]  }
 0x475   : > { %10870 = vmatprep.subr.bf16.mxu0 %v12820_v5  ;;  %1769 = vmatmul.mubr.bf16.gmra.mxu1 %v1489_v4 }
 0x476   : > { %1778 = vmatprep.mubr.bf16.mxu1 %v14905_v34 }
 0x478   : > { %10871 = vmatpush3.bf16.msra.mxu0 %v12820_v5  ;;  %v11102_v5 = vld [vmem:[#allocation10 + $0x70] ss:$8 sps:$4 sm:$0xff]  }
 0x479   : > { %1869 = vmatprep.subr.bf16.mxu0 %v11104_v55 }
 0x47b   : > { %10873 = vmatmul.mubr.bf16.vlgmr.msra.gmra.mxu0 %v12785_v30  ;;  %v11107_v30 = vld [vmem:[#allocation10 + $0x64] ss:$8 sps:$4 sm:$0xff]  }
 0x47c   : > { %10876 = vmatprep.mubr.bf16.mxu0 %v12789_v43  ;;  %1870 = vmatpush1.bf16.msra.mxu0 %v11102_v5  ;;  %v11105_v43 = vld [vmem:[#allocation10 + $0x60] ss:$8 sps:$4 sm:$0xff]   ;;  %v11164_v5 = vld [vmem:[#allocation11 + $0x364] ss:$16 sps:$4 sm:$0xff]  }
 0x47d   : > { %1779 = vmatmul.mubr.bf16.gmra.mxu1 %v1490_v1  ;;  %1871 = vmatprep.subr.bf16.mxu0 %v11107_v30  ;;  %v11162_v30 = vld [vmem:[#allocation11 + $0x360] ss:$16 sps:$4 sm:$0xff]  }
 0x47e   : > { %2235 = vmatprep.mubr.bf16.mxu1 %v14905_v34 }
 0x480   : > { %1872 = vmatpush1.bf16.msra.mxu0 %v11105_v43  ;;  %v11167_v43 = vld [vmem:[#allocation11 + $0x344] ss:$16 sps:$4 sm:$0xff]  }
 0x481   : > { %1873 = vmatprep.subr.bf16.mxu0 %v11110_v12  ;;  %v11165_v12 = vld [vmem:[#allocation11 + $0x340] ss:$16 sps:$4 sm:$0xff]  }
 0x483   : > { %10877 = vmatmul.mubr.bf16.gmra.mxu0 %v12793_v44  ;;  %v11108_v44 = vld [vmem:[#allocation10 + $0x50] ss:$8 sps:$4 sm:$0xff]  }
 0x484   : > { %10880 = vmatprep.mubr.bf16.mxu0 %v12797_v45  ;;  %1874 = vmatpush1.bf16.msra.mxu0 %v11108_v44  ;;  %v11113_v45 = vld [vmem:[#allocation10 + $0x44] ss:$8 sps:$4 sm:$0xff]  }
 0x485   : > { %1875 = vmatprep.subr.bf16.mxu0 %v11113_v45  ;;  %v11170_v44 = vld [vmem:[#allocation11 + $0x324] ss:$16 sps:$4 sm:$0xff]   ;;  %v11168_v45 = vld [vmem:[#allocation11 + $0x320] ss:$16 sps:$4 sm:$0xff]  }
 0x48b   : > { %10881 = vmatmul.mubr.bf16.gmra.mxu0 %v12801_v46  ;;  %v11111_v46 = vld [vmem:[#allocation10 + $0x40] ss:$8 sps:$4 sm:$0xff]  }
 0x48c   : > { %10884 = vmatprep.mubr.bf16.mxu0 %v12805_v47  ;;  %1876 = vmatpush1.bf16.msra.mxu0 %v11111_v46  ;;  %v11116_v47 = vld [vmem:[#allocation10 + $0x34] ss:$8 sps:$4 sm:$0xff]  }
 0x48d   : > { %1877 = vmatprep.subr.bf16.mxu0 %v11116_v47  ;;  %v11173_v46 = vld [vmem:[#allocation11 + $0x304] ss:$16 sps:$4 sm:$0xff]   ;;  %v11171_v47 = vld [vmem:[#allocation11 + $0x300] ss:$16 sps:$4 sm:$0xff]  }
 0x493   : > { %10885 = vmatmul.mubr.bf16.gmra.mxu0 %v12809_v48  ;;  %v11114_v48 = vld [vmem:[#allocation10 + $0x30] ss:$8 sps:$4 sm:$0xff]  }
 0x494   : > { %1901 = vmatprep.mubr.bf16.mxu0 %v14905_v34  ;;  %1878 = vmatpush1.bf16.msra.mxu0 %v11114_v48 }
 0x495   : > { %1879 = vmatprep.subr.bf16.mxu0 %v11119_v13 }
 0x498   : > { %1880 = vmatpush1.bf16.msra.mxu0 %v11117_v14 }
 0x499   : > { %1881 = vmatprep.subr.bf16.mxu0 %v11122_v15 }
 0x49c   : > { %1882 = vmatpush1.bf16.msra.mxu0 %v11120_v16 }
 0x49d   : > { %1883 = vmatprep.subr.bf16.mxu0 %v11125_v17 }
 0x4a0   : > { %1884 = vmatpush1.bf16.msra.mxu0 %v11123_v18 }
 0x4a1   : > { %2652 = vmatprep.subr.bf16.mxu0 %v11128_v19 }
 0x505   : > { %v1710_v48 = vpop.f32.mrf.mxu1 }
 0x507   : > { %v1712_v13 = vpop.f32.mrf.mxu1 }
 0x509   : > { %v1714_v14 = vpop.f32.mrf.mxu1 }
 0x50b   : > { %v1716_v15 = vpop.f32.mrf.mxu1 }
 0x50d   : > { %v1720_v16 = vpop.f32.mrf.mxu1 }
 0x50f   : > { %v1722_v17 = vpop.f32.mrf.mxu1 }
 0x511   : > { %v1724_v18 = vpop.f32.mrf.mxu1 }
 0x513   : > { %v1726_v19 = vpop.f32.mrf.mxu1 }
 0x53b   : > { %v10874_v20 = vpop.f32.mrf.mxu0 }
 0x53d   : > { %v1525_v21 = vpop.f32.mrf.mxu0 }
 0x53f   : > { %v10875_v22 = vpop.f32.mrf.mxu0 }
 0x540   : > { %v1589_v33 = vpack.c.bf16 %v10875_v22, %v10874_v20  ;;  %v1730_v20 = vpop.f32.mrf.mxu1 }
 0x541   : > { %v1528_v23 = vpop.f32.mrf.mxu0 }
 0x542   : > { %v1588_v25 = vpack.c.bf16 %v1528_v23, %v1525_v21  ;;  %v1732_v21 = vpop.f32.mrf.mxu1 }
 0x543   : > { %v10878_v27 = vpop.f32.mrf.mxu0 }
 0x544   : > { %1902 = vmatmul.mubr.bf16.vlgmr.msra.gmra.mxu0 %v1588_v25  ;;  %v1734_v22 = vpop.f32.mrf.mxu1 }
 0x545   : > { %1911 = vmatprep.mubr.bf16.mxu0 %v14905_v34  ;;  %2653 = vmatpush1.bf16.msra.mxu0 %v11126_v24  ;;  %v1541_v31 = vpop.f32.mrf.mxu0 }
 0x546   : > { %2654 = vmatprep.subr.bf16.mxu0 %v11131_v26  ;;  %v12867_v23 = vpop.f32.mrf.mxu1  ;;  %v1983_v26 = vlaneseq }
 0x547   : > { %v10879_v36 = vpop.f32.mrf.mxu0 }
 0x548   : > { %v1591_v57 = vpack.c.bf16 %v10879_v36, %v10878_v27  ;;  %v12869_v24 = vpop.f32.mrf.mxu1 }
 0x549   : > { %2655 = vmatpush1.bf16.msra.mxu0 %v11129_v28  ;;  %v1544_v40 = vpop.f32.mrf.mxu0  ;;  %v12875_v28 = vshrl.u32 %v1983_v26, 7 }
 0x54a   : > { %2656 = vmatprep.subr.bf16.mxu0 %v11134_v29  ;;  %v1590_v42 = vpack.c.bf16 %v1544_v40, %v1541_v31  ;;  %v12871_v25 = vpop.f32.mrf.mxu1 }
 0x54b   : > { %v10882_v51 = vpop.f32.mrf.mxu0  ;;  %14975 = vst [vmem:[#allocation23_spill] sm:$0xff] %v12875_v28  ;;  %v12880_v31 = vsub.s32 1, %v12875_v28 }
 0x54c   : > { %1912 = vmatmul.mubr.bf16.gmra.mxu0 %v1589_v33  ;;  %v12873_v27 = vpop.f32.mrf.mxu1  ;;  %v12883_v33 = vsub.s32 0, %v12875_v28 }
 0x54d   : > { %1921 = vmatprep.mubr.bf16.mxu0 %v14905_v34  ;;  %2657 = vmatpush1.bf16.msra.mxu0 %v11132_v32  ;;  %v1557_v53 = vpop.f32.mrf.mxu0  ;;  %14976 = vst [vmem:[#allocation24_spill] sm:$0xff] %v12880_v31 }
 0x54e   : > { %2658 = vmatprep.subr.bf16.mxu0 %v11137_v35  ;;  %v12877_v29 = vpop.f32.mrf.mxu1  ;;  %14977 = vst [vmem:[#allocation25_spill] sm:$0xff] %v12883_v33  ;;  %v1482_v35 = vld [vmem:[#allocation13 + $0x2] ss:$8 sm:$0x3] }
 0x54f   : > { %v10883_v59 = vpop.f32.mrf.mxu0  ;;  %v12888_v40 = vrot.slane %v1482_v35, %v12880_v31 }
 0x550   : > { %v1593_v6 = vpack.c.bf16 %v10883_v59, %v10882_v51  ;;  %v12885_v36 = vpop.f32.mrf.mxu1 }
 0x551   : > { %2659 = vmatpush1.bf16.msra.mxu0 %v11135_v37  ;;  %v1560_v50 = vpop.f32.mrf.mxu0 }
 0x552   : > { %2660 = vmatprep.subr.bf16.mxu0 %v11140_v38  ;;  %v1592_v63 = vpack.c.bf16 %v1560_v50, %v1557_v53 }
 0x553   : > { %v10886_v1 = vpop.f32.mrf.mxu0 }
 0x554   : > { %1922 = vmatmul.mubr.bf16.gmra.mxu0 %v1590_v42  ;;  %v12891_v42 = vrot.slane %v1482_v35, %v12883_v33 }
 0x555   : > { %1931 = vmatprep.mubr.bf16.mxu0 %v14905_v34  ;;  %2661 = vmatpush1.bf16.msra.mxu0 %v11138_v41  ;;  %v1573_v4 = vpop.f32.mrf.mxu0 }
 0x556   : > { %2662 = vmatprep.subr.bf16.mxu0 %v11143_v49 }
 0x557   : > { %v10887_v9 = vpop.f32.mrf.mxu0 }
 0x558   : > { %v1595_v55 = vpack.c.bf16 %v10887_v9, %v10886_v1 }
 0x559   : > { %2663 = vmatpush1.bf16.msra.mxu0 %v11141_v39  ;;  %v1576_v54 = vpop.f32.mrf.mxu0  ;;  %v12893_v39 = vpop.f32.mrf.mxu1 }
 0x55a   : > { %2664 = vmatprep.subr.bf16.mxu0 %v11146_v52  ;;  %v1594_v11 = vpack.c.bf16 %v1576_v54, %v1573_v4 }
 0x55c   : > { %1932 = vmatmul.mubr.bf16.gmra.mxu0 %v1591_v57 }
 0x55d   : > { %1941 = vmatprep.mubr.bf16.mxu0 %v14905_v34  ;;  %2665 = vmatpush1.bf16.msra.mxu0 %v11144_v56 }
 0x55e   : > { %2666 = vmatprep.subr.bf16.mxu0 %v11149_v58 }
 0x561   : > { %2667 = vmatpush1.bf16.msra.mxu0 %v11147_v60 }
 0x562   : > { %2668 = vmatprep.subr.bf16.mxu0 %v11152_v61  ;;  %v12899_v61 = vpop.f32.mrf.mxu1 }
 0x564   : > { %1942 = vmatmul.mubr.bf16.gmra.mxu0 %v1592_v63 }
 0x565   : > { %1951 = vmatprep.mubr.bf16.mxu0 %v14905_v34  ;;  %2669 = vmatpush2.bf16.msra.mxu0 %v11150_v62 }
 0x566   : > { %2670 = vmatprep.subr.bf16.mxu0 %v11155_v0 }
 0x569   : > { %2671 = vmatpush2.bf16.msra.mxu0 %v11153_v2 }
 0x56a   : > { %2672 = vmatprep.subr.bf16.mxu0 %v11158_v3 }
 0x56c   : > { %1952 = vmatmul.mubr.bf16.gmra.mxu0 %v1593_v6 }
 0x56d   : > { %1961 = vmatprep.mubr.bf16.mxu0 %v14905_v34  ;;  %2673 = vmatpush2.bf16.msra.mxu0 %v11156_v7 }
 0x56e   : > { %2674 = vmatprep.subr.bf16.mxu0 %v11161_v8  ;;  %v12903_v8 = vpop.f32.mrf.mxu1 }
 0x571   : > { %2675 = vmatpush2.bf16.msra.mxu0 %v11159_v10 }
 0x572   : > { %2676 = vmatprep.subr.bf16.mxu0 %v11164_v5 }
 0x574   : > { %1962 = vmatmul.mubr.bf16.gmra.mxu0 %v1594_v11 }
 0x575   : > { %1971 = vmatprep.mubr.bf16.mxu0 %v14905_v34  ;;  %2677 = vmatpush2.bf16.msra.mxu0 %v11162_v30 }
 0x576   : > { %2678 = vmatprep.subr.bf16.mxu0 %v11167_v43 }
 0x579   : > { %2679 = vmatpush2.bf16.msra.mxu0 %v11165_v12  ;;  %v12913_v12 = vpop.f32.mrf.mxu1 }
 0x57a   : > { %2680 = vmatprep.subr.bf16.mxu0 %v11170_v44 }
 0x57c   : > { %1972 = vmatmul.mubr.bf16.gmra.mxu0 %v1595_v55 }
 0x57d   : > { %2681 = vmatpush2.bf16.msra.mxu0 %v11168_v45 }
 0x57e   : > { %2682 = vmatprep.subr.bf16.mxu0 %v11173_v46 }
 0x581   : > { %2683 = vmatpush2.bf16.msra.mxu0 %v11171_v47 }
 0x604   : > { %v1903_v32 = vpop.f32.mrf.mxu0 }
 0x605   : > { %v1904_v41 = vadd.f32 %v1903_v32, %v1710_v48 }
 0x606   : > { %v1905_v37 = vpop.f32.mrf.mxu0 }
 0x607   : > { %v1906_v38 = vadd.f32 %v1905_v37, %v1712_v13  ;;  %v1993_v58 = vadd.f32 %v12891_v42, %v1904_v41 }
 0x608   : > { %v1907_v49 = vpop.f32.mrf.mxu0 }
 0x609   : > { %v1908_v51 = vadd.f32 %v1907_v49, %v1714_v14  ;;  %v1994_v53 = vadd.f32 %v12888_v40, %v1906_v38  ;;  %v2025_v2 = vmax.f32 %v1993_v58, 0.0 }
 0x60a   : > { %v1909_v52 = vpop.f32.mrf.mxu0 }
 0x60b   : > { %v1995_v56 = vadd.f32 %v12891_v42, %v1908_v51  ;;  %v1910_v57 = vadd.f32 %v1909_v52, %v1716_v15  ;;  %v2026_v63 = vmax.f32 %v1994_v53, 0.0 }
 0x60c   : > { %v1913_v59 = vpop.f32.mrf.mxu0 }
 0x60d   : > { %v1996_v60 = vadd.f32 %v12888_v40, %v1910_v57  ;;  %v2027_v50 = vmax.f32 %v1995_v56, 0.0  ;;  %v1914_v3 = vadd.f32 %v1913_v59, %v1720_v16 }
 0x60e   : > { %v1915_v62 = vpop.f32.mrf.mxu0 }
 0x60f   : > { %v2028_v0 = vmax.f32 %v1996_v60, 0.0  ;;  %v1916_v1 = vadd.f32 %v1915_v62, %v1722_v17  ;;  %v12905_v9 = vpack.c.bf16 %v2027_v50, %v2025_v2  ;;  %v1997_v5 = vadd.f32 %v12891_v42, %v1914_v3 }
 0x610   : > { %v1917_v4 = vpop.f32.mrf.mxu0 }
 0x611   : > { %v1918_v7 = vadd.f32 %v1917_v4, %v1724_v18  ;;  %v12901_v6 = vpack.c.bf16 %v2028_v0, %v2026_v63  ;;  %v1998_v54 = vadd.f32 %v12888_v40, %v1916_v1  ;;  %v2029_v13 = vmax.f32 %v1997_v5, 0.0  ;;  %v1762_v18 = vpop.f32.mrf.mxu1 }
 0x612   : > { %v1919_v10 = vpop.f32.mrf.mxu0 }
 0x613   : > { %v1999_v11 = vadd.f32 %v12891_v42, %v1918_v7  ;;  %v1920_v55 = vadd.f32 %v1919_v10, %v1726_v19  ;;  %2684 = vmatprep.mubr.bf16.mxu0 %v12901_v6  ;;  %v2030_v46 = vmax.f32 %v1998_v54, 0.0 }
 0x614   : > { %v1923_v30 = vpop.f32.mrf.mxu0  ;;  %2685 = vmatmul.mubr.bf16.vlgmr.msra.gmra.mxu0 %v12905_v9 }
 0x615   : > { %v2000_v43 = vadd.f32 %v12888_v40, %v1920_v55  ;;  %v2031_v44 = vmax.f32 %v1999_v11, 0.0  ;;  %v1924_v14 = vadd.f32 %v1923_v30, %v1730_v20 }
 0x616   : > { %v1925_v45 = vpop.f32.mrf.mxu0 }
 0x617   : > { %v2032_v47 = vmax.f32 %v2000_v43, 0.0  ;;  %v1926_v48 = vadd.f32 %v1925_v45, %v1732_v21  ;;  %v12917_v26 = vpack.c.bf16 %v2031_v44, %v2029_v13  ;;  %v2001_v21 = vadd.f32 %v12891_v42, %v1924_v14 }
 0x618   : > { %v1927_v15 = vpop.f32.mrf.mxu0 }
 0x619   : > { %v1928_v16 = vadd.f32 %v1927_v15, %v1734_v22  ;;  %v12915_v17 = vpack.c.bf16 %v2032_v47, %v2030_v46  ;;  %v2002_v32 = vadd.f32 %v12888_v40, %v1926_v48  ;;  %v1764_v22 = vpop.f32.mrf.mxu1  ;;  %v2033_v56 = vmax.f32 %v2001_v21, 0.0 }
 0x61a   : > { %v1929_v19 = vpop.f32.mrf.mxu0 }
 0x61b   : > { %v2003_v35 = vadd.f32 %v12891_v42, %v1928_v16  ;;  %v1930_v37 = vadd.f32 %v1929_v19, %v12867_v23  ;;  %2694 = vmatprep.mubr.bf16.mxu0 %v12915_v17  ;;  %v2034_v51 = vmax.f32 %v2002_v32, 0.0  ;;  %v1766_v60 = vpop.f32.mrf.mxu1 }
 0x61c   : > { %v1933_v38 = vpop.f32.mrf.mxu0  ;;  %2695 = vmatmul.mubr.bf16.gmra.mxu0 %v12917_v26 }
 0x61d   : > { %v2004_v20 = vadd.f32 %v12888_v40, %v1930_v37  ;;  %v2035_v41 = vmax.f32 %v2003_v35, 0.0  ;;  %v1934_v57 = vadd.f32 %v1933_v38, %v12869_v24  ;;  %v1770_v2 = vpop.f32.mrf.mxu1 }
 0x61e   : > { %v1935_v49 = vpop.f32.mrf.mxu0 }
 0x61f   : > { %v2036_v52 = vmax.f32 %v2004_v20, 0.0  ;;  %v1936_v53 = vadd.f32 %v1935_v49, %v12871_v25  ;;  %v12931_v62 = vpack.c.bf16 %v2035_v41, %v2033_v56  ;;  %v2005_v25 = vadd.f32 %v12891_v42, %v1934_v57  ;;  %v1772_v43 = vpop.f32.mrf.mxu1 }
 0x620   : > { %v1937_v23 = vpop.f32.mrf.mxu0 }
 0x621   : > { %v1938_v58 = vadd.f32 %v1937_v23, %v12873_v27  ;;  %v12929_v59 = vpack.c.bf16 %v2036_v52, %v2034_v51  ;;  %v2006_v63 = vadd.f32 %v12888_v40, %v1936_v53  ;;  %v2037_v11 = vmax.f32 %v2005_v25, 0.0  ;;  %v1774_v13 = vpop.f32.mrf.mxu1 }
 0x622   : > { %v1939_v50 = vpop.f32.mrf.mxu0 }
 0x623   : > { %v2007_v0 = vadd.f32 %v12891_v42, %v1938_v58  ;;  %v1940_v1 = vadd.f32 %v1939_v50, %v12877_v29  ;;  %2704 = vmatprep.mubr.bf16.mxu0 %v12929_v59  ;;  %v2038_v7 = vmax.f32 %v2006_v63, 0.0  ;;  %v1776_v20 = vpop.f32.mrf.mxu1 }
 0x624   : > { %v1943_v24 = vpop.f32.mrf.mxu0  ;;  %2705 = vmatmul.mubr.bf16.gmra.mxu0 %v12931_v62 }
 0x625   : > { %v2008_v27 = vadd.f32 %v12888_v40, %v1940_v1  ;;  %v2039_v3 = vmax.f32 %v2007_v0, 0.0  ;;  %v1944_v55 = vadd.f32 %v1943_v24, %v12885_v36 }
 0x626   : > { %v1945_v4 = vpop.f32.mrf.mxu0 }
 0x627   : > { %v2040_v10 = vmax.f32 %v2008_v27, 0.0  ;;  %v1946_v54 = vadd.f32 %v1945_v4, %v12893_v39  ;;  %v12945_v45 = vpack.c.bf16 %v2039_v3, %v2037_v11  ;;  %v2009_v39 = vadd.f32 %v12891_v42, %v1944_v55 }
 0x628   : > { %v1947_v29 = vpop.f32.mrf.mxu0 }
 0x629   : > { %v1948_v5 = vadd.f32 %v1947_v29, %v12899_v61  ;;  %v12943_v30 = vpack.c.bf16 %v2040_v10, %v2038_v7  ;;  %v2010_v46 = vadd.f32 %v12888_v40, %v1946_v54  ;;  %v2041_v35 = vmax.f32 %v2009_v39, 0.0 }
 0x62a   : > { %v1949_v44 = vpop.f32.mrf.mxu0 }
 0x62b   : > { %v2011_v47 = vadd.f32 %v12891_v42, %v1948_v5  ;;  %v1950_v48 = vadd.f32 %v1949_v44, %v12903_v8  ;;  %2714 = vmatprep.mubr.bf16.mxu0 %v12943_v30  ;;  %v2042_v16 = vmax.f32 %v2010_v46, 0.0 }
 0x62c   : > { %v1953_v36 = vpop.f32.mrf.mxu0  ;;  %2715 = vmatmul.mubr.bf16.gmra.mxu0 %v12945_v45 }
 0x62d   : > { %v2012_v61 = vadd.f32 %v12888_v40, %v1950_v48  ;;  %v2043_v14 = vmax.f32 %v2011_v47, 0.0  ;;  %v1954_v37 = vadd.f32 %v1953_v36, %v12913_v12 }
 0x62e   : > { %v1955_v15 = vpop.f32.mrf.mxu0 }
 0x62f   : > { %v2044_v19 = vmax.f32 %v2012_v61, 0.0  ;;  %v1956_v32 = vadd.f32 %v1955_v15, %v1762_v18  ;;  %v12957_v41 = vpack.c.bf16 %v2043_v14, %v2041_v35  ;;  %v2013_v18 = vadd.f32 %v12891_v42, %v1954_v37 }
 0x630   : > { %v1957_v21 = vpop.f32.mrf.mxu0 }
 0x631   : > { %v1958_v8 = vadd.f32 %v1957_v21, %v1764_v22  ;;  %v12955_v38 = vpack.c.bf16 %v2044_v19, %v2042_v16  ;;  %v2014_v51 = vadd.f32 %v12888_v40, %v1956_v32  ;;  %v1780_v22 = vpop.f32.mrf.mxu1  ;;  %v2045_v0 = vmax.f32 %v2013_v18, 0.0  ;;  %v11179_v18 = vld [vmem:[#allocation11 + $0x2cc] ss:$16 sps:$4 sm:$0xff]  }
 0x632   : > { %v1959_v49 = vpop.f32.mrf.mxu0 }
 0x633   : > { %v2015_v52 = vadd.f32 %v12891_v42, %v1958_v8  ;;  %v1960_v53 = vadd.f32 %v1959_v49, %v1766_v60  ;;  %2724 = vmatprep.mubr.bf16.mxu0 %v12955_v38  ;;  %v2046_v58 = vmax.f32 %v2014_v51, 0.0  ;;  %v1782_v27 = vpop.f32.mrf.mxu1 }
 0x634   : > { %v1963_v56 = vpop.f32.mrf.mxu0  ;;  %2725 = vmatmul.mubr.bf16.gmra.mxu0 %v12957_v41 }
 0x635   : > { %v2016_v12 = vadd.f32 %v12888_v40, %v1960_v53  ;;  %v2047_v57 = vmax.f32 %v2015_v52, 0.0  ;;  %v1964_v1 = vadd.f32 %v1963_v56, %v1770_v2  ;;  %v1784_v29 = vpop.f32.mrf.mxu1  ;;  %v12078_v56 = vld [vmem:[%s12670_s17] sm:$0xff]  }
 0x636   : > { %v1965_v23 = vpop.f32.mrf.mxu0 }
 0x637   : > { %v2048_v50 = vmax.f32 %v2016_v12, 0.0  ;;  %v1966_v63 = vadd.f32 %v1965_v23, %v1772_v43  ;;  %v12967_v3 = vpack.c.bf16 %v2047_v57, %v2045_v0  ;;  %v2017_v11 = vadd.f32 %v12891_v42, %v1964_v1  ;;  %v1786_v14 = vpop.f32.mrf.mxu1  ;;  %v11177_v12 = vld [vmem:[#allocation11 + $0x2c8] ss:$16 sps:$4 sm:$0xff]   ;;  %v11185_v23 = vld [vmem:[#allocation11 + $0x28c] ss:$16 sps:$4 sm:$0xff]  }
 0x638   : > { %v1967_v25 = vpop.f32.mrf.mxu0  ;;  %v11180_v57 = vld [vmem:[#allocation11 + $0x2a8] ss:$16 sps:$4 sm:$0xff]   ;;  %v11222_v0 = vld [vmem:[#allocation11 + $0xe0] ss:$16 sps:$4 sm:$0xff]   ;;  %v11188_v1 = vld [vmem:[#allocation11 + $0x26c] ss:$16 sps:$4 sm:$0xff]  }
 0x639   : > { %v1968_v24 = vadd.f32 %v1967_v25, %v1774_v13  ;;  %v12965_v60 = vpack.c.bf16 %v2048_v50, %v2046_v58  ;;  %v2018_v7 = vadd.f32 %v12888_v40, %v1966_v63  ;;  %v2049_v48 = vmax.f32 %v2017_v11, 0.0  ;;  %v12079_v58 = vld [vmem:[%s12670_s17 + $0x8] sm:$0xff]   ;;  %v11224_v50 = vld [vmem:[#allocation11 + $0xe4] ss:$16 sps:$4 sm:$0xff]   ;;  %v11234_v11 = vld [vmem:[#allocation11 + $0xa0] ss:$16 sps:$4 sm:$0xff]  }
 0x63a   : > { %v1969_v4 = vpop.f32.mrf.mxu0  ;;  %v11183_v63 = vld [vmem:[#allocation11 + $0x288] ss:$16 sps:$4 sm:$0xff]   ;;  %3198 = vmatprep.subr.bf16.mxu0 %v11224_v50  ;;  %v11230_v25 = vld [vmem:[#allocation11 + $0xc4] ss:$16 sps:$4 sm:$0xff]   ;;  %v11215_v50 = vld [vmem:[#allocation11 + $0x34c] ss:$16 sps:$4 sm:$0xff]  }
 0x63b   : > { %v2019_v10 = vadd.f32 %v12891_v42, %v1968_v24  ;;  %v1970_v54 = vadd.f32 %v1969_v4, %v1776_v20  ;;  %2734 = vmatprep.mubr.bf16.mxu0 %v12965_v60  ;;  %v2050_v44 = vmax.f32 %v2018_v7, 0.0  ;;  %3199 = vmatpush1.bf16.msra.mxu0 %v11222_v0  ;;  %v11186_v24 = vld [vmem:[#allocation11 + $0x268] ss:$16 sps:$4 sm:$0xff]   ;;  %v11191_v4 = vld [vmem:[#allocation11 + $0x24c] ss:$16 sps:$4 sm:$0xff]   ;;  %v12080_v7 = vld [vmem:[%s12670_s17 + $0x10] sm:$0xff]  }
 0x63c   : > { %v1973_v55 = vpop.f32.mrf.mxu0  ;;  %2735 = vmatmul.mubr.bf16.gmra.mxu0 %v12967_v3  ;;  %3200 = vmatprep.subr.bf16.mxu0 %v11230_v25  ;;  %v12084_v0 = vld [vmem:[%s12670_s17 + $0x30] sm:$0xff]   ;;  %v11213_v25 = vld [vmem:[#allocation11 + $0x348] ss:$16 sps:$4 sm:$0xff]  }
 0x63d   : > { %v2020_v2 = vadd.f32 %v12888_v40, %v1970_v54  ;;  %v2051_v5 = vmax.f32 %v2019_v10, 0.0  ;;  %v1974_v39 = vadd.f32 %v1973_v55, %v1780_v22  ;;  %v11182_v22 = vld [vmem:[#allocation11 + $0x2ac] ss:$16 sps:$4 sm:$0xff]   ;;  %v11236_v10 = vld [vmem:[#allocation11 + $0xa4] ss:$16 sps:$4 sm:$0xff]  }
 0x63e   : > { %v1975_v43 = vpop.f32.mrf.mxu0  ;;  %v11189_v54 = vld [vmem:[#allocation11 + $0x248] ss:$16 sps:$4 sm:$0xff]   ;;  %v11194_v55 = vld [vmem:[#allocation11 + $0x22c] ss:$16 sps:$4 sm:$0xff]  }
 0x63f   : > { %v2052_v46 = vmax.f32 %v2020_v2, 0.0  ;;  %v1976_v47 = vadd.f32 %v1975_v43, %v1782_v27  ;;  %v12977_v15 = vpack.c.bf16 %v2051_v5, %v2049_v48  ;;  %v2021_v37 = vadd.f32 %v12891_v42, %v1974_v39  ;;  %v11228_v27 = vld [vmem:[#allocation11 + $0xc0] ss:$16 sps:$4 sm:$0xff]   ;;  %v11242_v2 = vld [vmem:[#allocation11 + $0x84] ss:$16 sps:$4 sm:$0xff]  }
 0x640   : > { %v1977_v36 = vpop.f32.mrf.mxu0  ;;  %3201 = vmatpush1.bf16.msra.mxu0 %v11228_v27  ;;  %v11240_v5 = vld [vmem:[#allocation11 + $0x80] ss:$16 sps:$4 sm:$0xff]   ;;  %v11197_v43 = vld [vmem:[#allocation11 + $0x20c] ss:$16 sps:$4 sm:$0xff]  }
 0x641   : > { %v1978_v61 = vadd.f32 %v1977_v36, %v1784_v29  ;;  %v12975_v13 = vpack.c.bf16 %v2052_v46, %v2050_v44  ;;  %v2022_v19 = vadd.f32 %v12888_v40, %v1976_v47  ;;  %v2053_v51 = vmax.f32 %v2021_v37, 0.0  ;;  %3202 = vmatprep.subr.bf16.mxu0 %v11236_v10  ;;  %v11192_v29 = vld [vmem:[#allocation11 + $0x228] ss:$16 sps:$4 sm:$0xff]   ;;  %v11248_v46 = vld [vmem:[#allocation11 + $0x64] ss:$16 sps:$4 sm:$0xff]  }
 0x642   : > { %v1979_v16 = vpop.f32.mrf.mxu0  ;;  %v12081_v44 = vld [vmem:[%s12670_s17 + $0x18] sm:$0xff]   ;;  %v11246_v48 = vld [vmem:[#allocation11 + $0x60] ss:$16 sps:$4 sm:$0xff]   ;;  %v11254_v36 = vld [vmem:[#allocation11 + $0x44] ss:$16 sps:$4 sm:$0xff]  }
 0x643   : > { %v2023_v32 = vadd.f32 %v12891_v42, %v1978_v61  ;;  %v1980_v35 = vadd.f32 %v1979_v16, %v1786_v14  ;;  %2744 = vmatprep.mubr.bf16.mxu0 %v12975_v13  ;;  %v2054_v20 = vmax.f32 %v2022_v19, 0.0  ;;  %v11174_v42 = vld [vmem:[#allocation11 + $0x2e8] ss:$16 sps:$4 sm:$0xff]   ;;  %v11200_v39 = vld [vmem:[#allocation11 + $0x3ec] ss:$16 sps:$4 sm:$0xff]   ;;  %v12082_v19 = vld [vmem:[%s12670_s17 + $0x20] sm:$0xff]  }
 0x644   : > { %2745 = vmatmul.mubr.bf16.gmra.mxu0 %v12977_v15  ;;  %v11195_v47 = vld [vmem:[#allocation11 + $0x208] ss:$16 sps:$4 sm:$0xff]   ;;  %v11252_v14 = vld [vmem:[#allocation11 + $0x40] ss:$16 sps:$4 sm:$0xff]   ;;  %v11203_v16 = vld [vmem:[#allocation11 + $0x3cc] ss:$16 sps:$4 sm:$0xff]  }
 0x645   : > { %v2024_v21 = vadd.f32 %v12888_v40, %v1980_v35  ;;  %v2055_v8 = vmax.f32 %v2023_v32, 0.0  ;;  %v11176_v40 = vld [vmem:[#allocation11 + $0x2ec] ss:$16 sps:$4 sm:$0xff]   ;;  %3203 = vmatpush1.bf16.msra.mxu0 %v11234_v11  ;;  %v11198_v61 = vld [vmem:[#allocation11 + $0x3e8] ss:$16 sps:$4 sm:$0xff]  }
 0x646   : > { %3204 = vmatprep.subr.bf16.mxu0 %v11242_v2  ;;  %v11260_v32 = vld [vmem:[#allocation11 + $0x24] ss:$16 sps:$4 sm:$0xff]   ;;  %v11201_v35 = vld [vmem:[#allocation11 + $0x3c8] ss:$16 sps:$4 sm:$0xff]   ;;  %v11258_v37 = vld [vmem:[#allocation11 + $0x20] ss:$16 sps:$4 sm:$0xff]  }
 0x647   : > { %v2056_v49 = vmax.f32 %v2024_v21, 0.0  ;;  %v12987_v53 = vpack.c.bf16 %v2055_v8, %v2053_v51  ;;  %v11206_v21 = vld [vmem:[#allocation11 + $0x3ac] ss:$16 sps:$4 sm:$0xff]   ;;  %v11266_v8 = vld [vmem:[#allocation11 + $0x4] ss:$16 sps:$4 sm:$0xff]  }
 0x648   : > { %v11209_v51 = vld [vmem:[#allocation11 + $0x38c] ss:$16 sps:$4 sm:$0xff]   ;;  %v11288_v27 = vld [vmem:[#allocation11 + $0x180] ss:$16 sps:$4 sm:$0xff]   ;;  %v11219_v2 = vld [vmem:[#allocation11 + $0x308] ss:$16 sps:$4 sm:$0xff]  }
 0x649   : > { %v12985_v52 = vpack.c.bf16 %v2056_v49, %v2054_v20  ;;  %3205 = vmatpush1.bf16.msra.mxu0 %v11240_v5  ;;  %v11204_v20 = vld [vmem:[#allocation11 + $0x3a8] ss:$16 sps:$4 sm:$0xff]   ;;  %v11264_v49 = vld [vmem:[#allocation11] ss:$16 sps:$4 sm:$0xff]   ;;  %v11221_v10 = vld [vmem:[#allocation11 + $0x30c] ss:$16 sps:$4 sm:$0xff]  }
 0x64a   : > { %3206 = vmatprep.subr.bf16.mxu0 %v11248_v46  ;;  %v12085_v11 = vld [vmem:[%s12670_s17 + $0x38] sm:$0xff]   ;;  %v11300_v5 = vld [vmem:[#allocation11 + $0x140] ss:$16 sps:$4 sm:$0xff]   ;;  %v11308_v46 = vld [vmem:[#allocation11 + $0x124] ss:$16 sps:$4 sm:$0xff]  }
 0x64b   : > { %2203 = vmatprep.subr.bf16.mxu1 %v12985_v52  ;;  %2754 = vmatprep.mubr.bf16.mxu0 %v12985_v52 }
 0x64c   : > { %2204 = vmatpush1.bf16.msra.mxu1 %v12987_v53  ;;  %2755 = vmatmul.mubr.bf16.gmra.mxu0 %v12987_v53 }
 0x64d   : > { %2205 = vmatprep.subr.bf16.mxu1 %v12975_v13  ;;  %3207 = vmatpush1.bf16.msra.mxu0 %v11246_v48  ;;  %v11306_v48 = vld [vmem:[#allocation11 + $0x120] ss:$16 sps:$4 sm:$0xff]  }
 0x64e   : > { %3208 = vmatprep.subr.bf16.mxu0 %v11254_v36  ;;  %v11237_v36 = vld [vmem:[#allocation11 + $0xa8] ss:$16 sps:$4 sm:$0xff]  }
 0x650   : > { %2206 = vmatpush1.bf16.msra.mxu1 %v12977_v15 }
 0x651   : > { %2207 = vmatprep.subr.bf16.mxu1 %v12965_v60  ;;  %3209 = vmatpush1.bf16.msra.mxu0 %v11252_v14  ;;  %v11245_v14 = vld [vmem:[#allocation11 + $0x8c] ss:$16 sps:$4 sm:$0xff]  }
 0x652   : > { %3210 = vmatprep.subr.bf16.mxu0 %v11260_v32  ;;  %v11255_v32 = vld [vmem:[#allocation11 + $0x48] ss:$16 sps:$4 sm:$0xff]  }
 0x654   : > { %2208 = vmatpush1.bf16.msra.mxu1 %v12967_v3 }
 0x655   : > { %2209 = vmatprep.subr.bf16.mxu1 %v12955_v38  ;;  %3211 = vmatpush1.bf16.msra.mxu0 %v11258_v37  ;;  %v11267_v37 = vld [vmem:[#allocation11 + $0x8] ss:$16 sps:$4 sm:$0xff]  }
 0x656   : > { %3212 = vmatprep.subr.bf16.mxu0 %v11266_v8  ;;  %v11279_v8 = vld [vmem:[#allocation11 + $0x1c8] ss:$16 sps:$4 sm:$0xff]  }
 0x658   : > { %2210 = vmatpush1.bf16.msra.mxu1 %v12957_v41 }
 0x659   : > { %2211 = vmatprep.subr.bf16.mxu1 %v12943_v30  ;;  %3213 = vmatpush1.bf16.msra.mxu0 %v11264_v49  ;;  %v11291_v49 = vld [vmem:[#allocation11 + $0x188] ss:$16 sps:$4 sm:$0xff]  }
 0x65c   : > { %2212 = vmatpush1.bf16.msra.mxu1 %v12945_v45 }
 0x65d   : > { %2213 = vmatprep.subr.bf16.mxu1 %v12929_v59 }
 0x660   : > { %2214 = vmatpush1.bf16.msra.mxu1 %v12931_v62 }
 0x661   : > { %2215 = vmatprep.subr.bf16.mxu1 %v12915_v17 }
 0x664   : > { %2216 = vmatpush1.bf16.msra.mxu1 %v12917_v26 }
 0x665   : > { %2217 = vmatprep.subr.bf16.mxu1 %v12901_v6 }
 0x668   : > { %2218 = vmatpush1.bf16.msra.mxu1 %v12905_v9 }
 0x669   : > { %2765 = vmatprep.subr.bf16.mxu1 %v11176_v40  ;;  %v11270_v40 = vld [vmem:[#allocation11 + $0x1e0] ss:$16 sps:$4 sm:$0xff]  }
 0x66b   : > { %2236 = vmatmul.mubr.bf16.vlgmr.msra.gmra.mxu1 %v12078_v56  ;;  %v11278_v56 = vld [vmem:[#allocation11 + $0x1c4] ss:$16 sps:$4 sm:$0xff]  }
 0x66c   : > { %2766 = vmatpush1.bf16.msra.mxu1 %v11174_v42  ;;  %2245 = vmatprep.mubr.bf16.mxu1 %v14905_v34  ;;  %v11272_v42 = vld [vmem:[#allocation11 + $0x1e4] ss:$16 sps:$4 sm:$0xff]  }
 0x66d   : > { %2767 = vmatprep.subr.bf16.mxu1 %v11179_v18  ;;  %v12083_v18 = vld [vmem:[%s12670_s17 + $0x28] sm:$0xff]   ;;  %3214 = vmatprep.subr.bf16.mxu0 %v11272_v42 }
 0x66e   : > { %3215 = vmatpush2.bf16.msra.mxu0 %v11270_v40  ;;  %v11303_v40 = vld [vmem:[#allocation11 + $0x148] ss:$16 sps:$4 sm:$0xff]   ;;  %v11311_v42 = vld [vmem:[#allocation11 + $0x12c] ss:$16 sps:$4 sm:$0xff]  }
 0x66f   : > { %3216 = vmatprep.subr.bf16.mxu0 %v11278_v56 }
 0x670   : > { %2768 = vmatpush1.bf16.msra.mxu1 %v11177_v12  ;;  %v11207_v12 = vld [vmem:[#allocation11 + $0x388] ss:$16 sps:$4 sm:$0xff]  }
 0x671   : > { %2769 = vmatprep.subr.bf16.mxu1 %v11182_v22  ;;  %v11212_v22 = vld [vmem:[#allocation11 + $0x36c] ss:$16 sps:$4 sm:$0xff]  }
 0x673   : > { %2246 = vmatmul.mubr.bf16.gmra.mxu1 %v12079_v58  ;;  %v11210_v58 = vld [vmem:[#allocation11 + $0x368] ss:$16 sps:$4 sm:$0xff]  }
 0x674   : > { %2770 = vmatpush1.bf16.msra.mxu1 %v11180_v57  ;;  %2255 = vmatprep.mubr.bf16.mxu1 %v14905_v34  ;;  %v11276_v57 = vld [vmem:[#allocation11 + $0x1c0] ss:$16 sps:$4 sm:$0xff]  }
 0x675   : > { %2771 = vmatprep.subr.bf16.mxu1 %v11185_v23  ;;  %v11284_v23 = vld [vmem:[#allocation11 + $0x1a4] ss:$16 sps:$4 sm:$0xff]   ;;  %3217 = vmatpush2.bf16.msra.mxu0 %v11276_v57 }
 0x676   : > { %3218 = vmatprep.subr.bf16.mxu0 %v11284_v23 }
 0x678   : > { %2772 = vmatpush1.bf16.msra.mxu1 %v11183_v63  ;;  %v11282_v63 = vld [vmem:[#allocation11 + $0x1a0] ss:$16 sps:$4 sm:$0xff]  }
 0x679   : > { %2773 = vmatprep.subr.bf16.mxu1 %v11188_v1  ;;  %v11290_v1 = vld [vmem:[#allocation11 + $0x184] ss:$16 sps:$4 sm:$0xff]   ;;  %3219 = vmatpush2.bf16.msra.mxu0 %v11282_v63 }
 0x67a   : > { %3220 = vmatprep.subr.bf16.mxu0 %v11290_v1 }
 0x67b   : > { %2256 = vmatmul.mubr.bf16.gmra.mxu1 %v12080_v7  ;;  %v11216_v7 = vld [vmem:[#allocation11 + $0x328] ss:$16 sps:$4 sm:$0xff]  }
 0x67c   : > { %2774 = vmatpush1.bf16.msra.mxu1 %v11186_v24  ;;  %2265 = vmatprep.mubr.bf16.mxu1 %v14905_v34  ;;  %v11218_v24 = vld [vmem:[#allocation11 + $0x32c] ss:$16 sps:$4 sm:$0xff]  }
 0x67d   : > { %2775 = vmatprep.subr.bf16.mxu1 %v11191_v4  ;;  %v11296_v4 = vld [vmem:[#allocation11 + $0x164] ss:$16 sps:$4 sm:$0xff]   ;;  %3221 = vmatpush2.bf16.msra.mxu0 %v11288_v27 }
 0x67e   : > { %3222 = vmatprep.subr.bf16.mxu0 %v11296_v4 }
 0x680   : > { %2776 = vmatpush1.bf16.msra.mxu1 %v11189_v54  ;;  %v11294_v54 = vld [vmem:[#allocation11 + $0x160] ss:$16 sps:$4 sm:$0xff]  }
 0x681   : > { %2777 = vmatprep.subr.bf16.mxu1 %v11194_v55  ;;  %v11302_v55 = vld [vmem:[#allocation11 + $0x144] ss:$16 sps:$4 sm:$0xff]   ;;  %3223 = vmatpush2.bf16.msra.mxu0 %v11294_v54 }
 0x682   : > { %3224 = vmatprep.subr.bf16.mxu0 %v11302_v55 }
 0x683   : > { %2266 = vmatmul.mubr.bf16.gmra.mxu1 %v12081_v44  ;;  %v11233_v44 = vld [vmem:[#allocation11 + $0xcc] ss:$16 sps:$4 sm:$0xff]  }
 0x684   : > { %2778 = vmatpush1.bf16.msra.mxu1 %v11192_v29  ;;  %2275 = vmatprep.mubr.bf16.mxu1 %v14905_v34  ;;  %v11227_v29 = vld [vmem:[#allocation11 + $0xec] ss:$16 sps:$4 sm:$0xff]  }
 0x685   : > { %2779 = vmatprep.subr.bf16.mxu1 %v11197_v43  ;;  %v11225_v43 = vld [vmem:[#allocation11 + $0xe8] ss:$16 sps:$4 sm:$0xff]   ;;  %3225 = vmatpush2.bf16.msra.mxu0 %v11300_v5 }
 0x686   : > { %3226 = vmatprep.subr.bf16.mxu0 %v11308_v46 }
 0x688   : > { %2780 = vmatpush1.bf16.msra.mxu1 %v11195_v47  ;;  %v11231_v47 = vld [vmem:[#allocation11 + $0xc8] ss:$16 sps:$4 sm:$0xff]  }
 0x689   : > { %2781 = vmatprep.subr.bf16.mxu1 %v11200_v39  ;;  %3227 = vmatpush2.bf16.msra.mxu0 %v11306_v48  ;;  %v11314_v39 = vld [vmem:[#allocation11 + $0x104] ss:$16 sps:$4 sm:$0xff]  }
 0x68a   : > { %3228 = vmatprep.subr.bf16.mxu0 %v11314_v39 }
 0x68b   : > { %2276 = vmatmul.mubr.bf16.gmra.mxu1 %v12082_v19  ;;  %v11257_v19 = vld [vmem:[#allocation11 + $0x4c] ss:$16 sps:$4 sm:$0xff]  }
 0x68c   : > { %2782 = vmatpush2.bf16.msra.mxu1 %v11198_v61  ;;  %2285 = vmatprep.mubr.bf16.mxu1 %v14905_v34  ;;  %v11312_v61 = vld [vmem:[#allocation11 + $0x100] ss:$16 sps:$4 sm:$0xff]  }
 0x68d   : > { %2783 = vmatprep.subr.bf16.mxu1 %v11203_v16  ;;  %3229 = vmatpush2.bf16.msra.mxu0 %v11312_v61  ;;  %v11249_v16 = vld [vmem:[#allocation11 + $0x68] ss:$16 sps:$4 sm:$0xff]  }
 0x690   : > { %2784 = vmatpush2.bf16.msra.mxu1 %v11201_v35  ;;  %v11263_v35 = vld [vmem:[#allocation11 + $0x2c] ss:$16 sps:$4 sm:$0xff]  }
 0x691   : > { %2785 = vmatprep.subr.bf16.mxu1 %v11206_v21  ;;  %v11275_v21 = vld [vmem:[#allocation11 + $0x1ec] ss:$16 sps:$4 sm:$0xff]  }
 0x693   : > { %2286 = vmatmul.mubr.bf16.gmra.mxu1 %v12083_v18  ;;  %v11315_v18 = vld [vmem:[#allocation11 + $0x108] ss:$16 sps:$4 sm:$0xff]  }
 0x694   : > { %2786 = vmatpush2.bf16.msra.mxu1 %v11204_v20  ;;  %2295 = vmatprep.mubr.bf16.mxu1 %v14905_v34  ;;  %v11287_v20 = vld [vmem:[#allocation11 + $0x1ac] ss:$16 sps:$4 sm:$0xff]  }
 0x695   : > { %2787 = vmatprep.subr.bf16.mxu1 %v11209_v51  ;;  %v11299_v51 = vld [vmem:[#allocation11 + $0x16c] ss:$16 sps:$4 sm:$0xff]  }
 0x698   : > { %2788 = vmatpush2.bf16.msra.mxu1 %v11207_v12 }
 0x699   : > { %2789 = vmatprep.subr.bf16.mxu1 %v11212_v22 }
 0x69b   : > { %2296 = vmatmul.mubr.bf16.gmra.mxu1 %v12084_v0 }
 0x69c   : > { %2790 = vmatpush2.bf16.msra.mxu1 %v11210_v58  ;;  %2305 = vmatprep.mubr.bf16.mxu1 %v14905_v34 }
 0x69d   : > { %2791 = vmatprep.subr.bf16.mxu1 %v11215_v50 }
 0x6a0   : > { %2792 = vmatpush2.bf16.msra.mxu1 %v11213_v25 }
 0x6a1   : > { %2793 = vmatprep.subr.bf16.mxu1 %v11218_v24 }
 0x6a3   : > { %2306 = vmatmul.mubr.bf16.gmra.mxu1 %v12085_v11 }
 0x6a4   : > { %2794 = vmatpush2.bf16.msra.mxu1 %v11216_v7  ;;  %2797 = vmatprep.mubr.bf16.mxu1 %v12901_v6  ;;  %v11239_v6 = vld [vmem:[#allocation11 + $0xac] ss:$16 sps:$4 sm:$0xff]  }
 0x6a5   : > { %2795 = vmatprep.subr.bf16.mxu1 %v11221_v10 }
 0x6a8   : > { %2796 = vmatpush2.bf16.msra.mxu1 %v11219_v2 }
 0x6a9   : > { %3311 = vmatprep.subr.bf16.mxu1 %v11227_v29 }
 0x6ab   : > { %2798 = vmatmul.mubr.bf16.vlgmr.msra.gmra.mxu1 %v12905_v9  ;;  %v11243_v9 = vld [vmem:[#allocation11 + $0x88] ss:$16 sps:$4 sm:$0xff]  }
 0x6ac   : > { %2807 = vmatprep.mubr.bf16.mxu1 %v12915_v17  ;;  %3312 = vmatpush1.bf16.msra.mxu1 %v11225_v43  ;;  %v11251_v17 = vld [vmem:[#allocation11 + $0x6c] ss:$16 sps:$4 sm:$0xff]  }
 0x6ad   : > { %3313 = vmatprep.subr.bf16.mxu1 %v11233_v44 }
 0x6b0   : > { %3314 = vmatpush1.bf16.msra.mxu1 %v11231_v47 }
 0x6b1   : > { %3315 = vmatprep.subr.bf16.mxu1 %v11239_v6 }
 0x6b3   : > { %2808 = vmatmul.mubr.bf16.gmra.mxu1 %v12917_v26  ;;  %v11261_v26 = vld [vmem:[#allocation11 + $0x28] ss:$16 sps:$4 sm:$0xff]  }
 0x6b4   : > { %2817 = vmatprep.mubr.bf16.mxu1 %v12929_v59  ;;  %3316 = vmatpush1.bf16.msra.mxu1 %v11237_v36  ;;  %v11269_v59 = vld [vmem:[#allocation11 + $0xc] ss:$16 sps:$4 sm:$0xff]  }
 0x6b5   : > { %3317 = vmatprep.subr.bf16.mxu1 %v11245_v14 }
 0x6b8   : > { %3318 = vmatpush1.bf16.msra.mxu1 %v11243_v9 }
 0x6b9   : > { %3319 = vmatprep.subr.bf16.mxu1 %v11251_v17 }
 0x6bb   : > { %2818 = vmatmul.mubr.bf16.gmra.mxu1 %v12931_v62  ;;  %v11273_v62 = vld [vmem:[#allocation11 + $0x1e8] ss:$16 sps:$4 sm:$0xff]  }
 0x6bc   : > { %2827 = vmatprep.mubr.bf16.mxu1 %v12943_v30  ;;  %3320 = vmatpush1.bf16.msra.mxu1 %v11249_v16  ;;  %v11281_v30 = vld [vmem:[#allocation11 + $0x1cc] ss:$16 sps:$4 sm:$0xff]  }
 0x6bd   : > { %3321 = vmatprep.subr.bf16.mxu1 %v11257_v19 }
 0x6c0   : > { %3322 = vmatpush1.bf16.msra.mxu1 %v11255_v32 }
 0x6c1   : > { %3323 = vmatprep.subr.bf16.mxu1 %v11263_v35 }
 0x6c3   : > { %2828 = vmatmul.mubr.bf16.gmra.mxu1 %v12945_v45  ;;  %v11285_v45 = vld [vmem:[#allocation11 + $0x1a8] ss:$16 sps:$4 sm:$0xff]  }
 0x6c4   : > { %2837 = vmatprep.mubr.bf16.mxu1 %v12955_v38  ;;  %3324 = vmatpush1.bf16.msra.mxu1 %v11261_v26  ;;  %v11293_v38 = vld [vmem:[#allocation11 + $0x18c] ss:$16 sps:$4 sm:$0xff]  }
 0x6c5   : > { %3325 = vmatprep.subr.bf16.mxu1 %v11269_v59 }
 0x6c8   : > { %3326 = vmatpush1.bf16.msra.mxu1 %v11267_v37 }
 0x6c9   : > { %3327 = vmatprep.subr.bf16.mxu1 %v11275_v21 }
 0x6cb   : > { %2838 = vmatmul.mubr.bf16.gmra.mxu1 %v12957_v41  ;;  %v11297_v41 = vld [vmem:[#allocation11 + $0x168] ss:$16 sps:$4 sm:$0xff]  }
 0x6cc   : > { %2847 = vmatprep.mubr.bf16.mxu1 %v12965_v60  ;;  %3328 = vmatpush2.bf16.msra.mxu1 %v11273_v62  ;;  %v11305_v60 = vld [vmem:[#allocation11 + $0x14c] ss:$16 sps:$4 sm:$0xff]  }
 0x6cd   : > { %3329 = vmatprep.subr.bf16.mxu1 %v11281_v30 }
 0x6d0   : > { %3330 = vmatpush2.bf16.msra.mxu1 %v11279_v8 }
 0x6d1   : > { %3331 = vmatprep.subr.bf16.mxu1 %v11287_v20 }
 0x6d3   : > { %2848 = vmatmul.mubr.bf16.gmra.mxu1 %v12967_v3  ;;  %v11309_v3 = vld [vmem:[#allocation11 + $0x128] ss:$16 sps:$4 sm:$0xff]  }
 0x6d4   : > { %2857 = vmatprep.mubr.bf16.mxu1 %v12975_v13  ;;  %3332 = vmatpush2.bf16.msra.mxu1 %v11285_v45  ;;  %v11317_v13 = vld [vmem:[#allocation11 + $0x10c] ss:$16 sps:$4 sm:$0xff]   ;;  %v13040_v20 = vpop.f32.mrf.mxu0 }
 0x6d5   : > { %3333 = vmatprep.subr.bf16.mxu1 %v11293_v38 }
 0x6d6   : > { %v13044_v38 = vpop.f32.mrf.mxu0 }
 0x6d8   : > { %3334 = vmatpush2.bf16.msra.mxu1 %v11291_v49 }
 0x6d9   : > { %3335 = vmatprep.subr.bf16.mxu1 %v11299_v51  ;;  %v13048_v51 = vpop.f32.mrf.mxu0 }
 0x6db   : > { %2858 = vmatmul.mubr.bf16.gmra.mxu1 %v12977_v15 }
 0x6dc   : > { %2867 = vmatprep.mubr.bf16.mxu1 %v12985_v52  ;;  %3336 = vmatpush2.bf16.msra.mxu1 %v11297_v41 }
 0x6dd   : > { %3337 = vmatprep.subr.bf16.mxu1 %v11305_v60  ;;  %v13052_v60 = vpop.f32.mrf.mxu0 }
 0x6e0   : > { %3338 = vmatpush2.bf16.msra.mxu1 %v11303_v40 }
 0x6e1   : > { %3339 = vmatprep.subr.bf16.mxu1 %v11311_v42  ;;  %v13056_v42 = vpop.f32.mrf.mxu0 }
 0x6e3   : > { %2868 = vmatmul.mubr.bf16.gmra.mxu1 %v12987_v53 }
 0x6e4   : > { %3340 = vmatpush2.bf16.msra.mxu1 %v11309_v3 }
 0x6e5   : > { %3341 = vmatprep.subr.bf16.mxu1 %v11317_v13  ;;  %v13060_v13 = vpop.f32.mrf.mxu0 }
 0x6e8   : > { %3342 = vmatpush2.bf16.msra.mxu1 %v11315_v18 }
 0x72b   : > { %v2237_v56 = vpop.f32.mrf.mxu1 }
 0x72d   : > { %v2239_v12 = vpop.f32.mrf.mxu1 }
 0x72f   : > { %v2241_v22 = vpop.f32.mrf.mxu1 }
 0x730   : > { %v2316_v52 = vpack.c.bf16 %v2241_v22, %v2237_v56  ;;  %v13064_v56 = vpop.f32.mrf.mxu0 }
 0x731   : > { %v2243_v15 = vpop.f32.mrf.mxu1 }
 0x732   : > { %v2317_v57 = vpack.c.bf16 %v2243_v15, %v2239_v12  ;;  %v13068_v22 = vpop.f32.mrf.mxu0 }
 0x733   : > { %v2247_v23 = vpop.f32.mrf.mxu1 }
 0x734   : > { %3230 = vmatprep.mubr.bf16.mxu0 %v2317_v57  ;;  %3343 = vmatprep.mubr.bf16.mxu1 %v2317_v57  ;;  %v13072_v57 = vpop.f32.mrf.mxu0 }
 0x735   : > { %v2249_v58 = vpop.f32.mrf.mxu1  ;;  %3231 = vmatmul.mubr.bf16.vlgmr.msra.gmra.mxu0 %v2316_v52  ;;  %3344 = vmatmul.mubr.bf16.vlgmr.msra.gmra.mxu1 %v2316_v52 }
 0x737   : > { %v2251_v50 = vpop.f32.mrf.mxu1 }
 0x738   : > { %v2318_v53 = vpack.c.bf16 %v2251_v50, %v2247_v23  ;;  %v13076_v23 = vpop.f32.mrf.mxu0 }
 0x739   : > { %v2253_v63 = vpop.f32.mrf.mxu1 }
 0x73a   : > { %v2319_v0 = vpack.c.bf16 %v2253_v63, %v2249_v58  ;;  %v13080_v50 = vpop.f32.mrf.mxu0 }
 0x73b   : > { %v2257_v1 = vpop.f32.mrf.mxu1 }
 0x73c   : > { %3240 = vmatprep.mubr.bf16.mxu0 %v2319_v0  ;;  %3353 = vmatprep.mubr.bf16.mxu1 %v2319_v0  ;;  %v13084_v0 = vpop.f32.mrf.mxu0 }
 0x73d   : > { %v2259_v25 = vpop.f32.mrf.mxu1  ;;  %3241 = vmatmul.mubr.bf16.gmra.mxu0 %v2318_v53  ;;  %3354 = vmatmul.mubr.bf16.gmra.mxu1 %v2318_v53 }
 0x73f   : > { %v2261_v24 = vpop.f32.mrf.mxu1 }
 0x740   : > { %v2320_v7 = vpack.c.bf16 %v2261_v24, %v2257_v1  ;;  %v13088_v1 = vpop.f32.mrf.mxu0 }
 0x741   : > { %v2263_v27 = vpop.f32.mrf.mxu1 }
 0x742   : > { %v2321_v4 = vpack.c.bf16 %v2263_v27, %v2259_v25  ;;  %v13092_v24 = vpop.f32.mrf.mxu0 }
 0x743   : > { %v2267_v10 = vpop.f32.mrf.mxu1 }
 0x744   : > { %3250 = vmatprep.mubr.bf16.mxu0 %v2321_v4  ;;  %3363 = vmatprep.mubr.bf16.mxu1 %v2321_v4  ;;  %v13096_v4 = vpop.f32.mrf.mxu0 }
 0x745   : > { %v2269_v54 = vpop.f32.mrf.mxu1  ;;  %3251 = vmatmul.mubr.bf16.gmra.mxu0 %v2320_v7  ;;  %3364 = vmatmul.mubr.bf16.gmra.mxu1 %v2320_v7 }
 0x747   : > { %v2271_v11 = vpop.f32.mrf.mxu1 }
 0x748   : > { %v2322_v29 = vpack.c.bf16 %v2271_v11, %v2267_v10  ;;  %v13100_v10 = vpop.f32.mrf.mxu0 }
 0x749   : > { %v2273_v55 = vpop.f32.mrf.mxu1 }
 0x74a   : > { %v2323_v2 = vpack.c.bf16 %v2273_v55, %v2269_v54  ;;  %v13104_v11 = vpop.f32.mrf.mxu0 }
 0x74b   : > { %v2277_v5 = vpop.f32.mrf.mxu1  ;;  %14978 = vst [vmem:[#allocation26_spill] sm:$0xff] %v13104_v11 }
 0x74c   : > { %3260 = vmatprep.mubr.bf16.mxu0 %v2323_v2  ;;  %3373 = vmatprep.mubr.bf16.mxu1 %v2323_v2  ;;  %v13108_v2 = vpop.f32.mrf.mxu0 }
 0x74d   : > { %v2279_v43 = vpop.f32.mrf.mxu1  ;;  %3261 = vmatmul.mubr.bf16.gmra.mxu0 %v2322_v29  ;;  %3374 = vmatmul.mubr.bf16.gmra.mxu1 %v2322_v29  ;;  %14980 = vst [vmem:[#allocation28_spill] sm:$0xff] %v13108_v2 }
 0x74f   : > { %v2281_v44 = vpop.f32.mrf.mxu1 }
 0x750   : > { %v2324_v48 = vpack.c.bf16 %v2281_v44, %v2277_v5  ;;  %v13112_v5 = vpop.f32.mrf.mxu0 }
 0x751   : > { %v2283_v46 = vpop.f32.mrf.mxu1  ;;  %14982 = vst [vmem:[#allocation30_spill] sm:$0xff] %v13112_v5 }
 0x752   : > { %v2325_v47 = vpack.c.bf16 %v2283_v46, %v2279_v43  ;;  %v13116_v44 = vpop.f32.mrf.mxu0 }
 0x753   : > { %v2287_v6 = vpop.f32.mrf.mxu1  ;;  %14984 = vst [vmem:[#allocation32_spill] sm:$0xff] %v13116_v44 }
 0x754   : > { %3270 = vmatprep.mubr.bf16.mxu0 %v2325_v47  ;;  %3383 = vmatprep.mubr.bf16.mxu1 %v2325_v47  ;;  %v13120_v47 = vpop.f32.mrf.mxu0 }
 0x755   : > { %v2289_v39 = vpop.f32.mrf.mxu1  ;;  %3271 = vmatmul.mubr.bf16.gmra.mxu0 %v2324_v48  ;;  %3384 = vmatmul.mubr.bf16.gmra.mxu1 %v2324_v48  ;;  %14986 = vst [vmem:[#allocation34_spill] sm:$0xff] %v13120_v47 }
 0x757   : > { %v2291_v36 = vpop.f32.mrf.mxu1 }
 0x758   : > { %v2326_v9 = vpack.c.bf16 %v2291_v36, %v2287_v6  ;;  %v13124_v6 = vpop.f32.mrf.mxu0 }
 0x759   : > { %v2293_v61 = vpop.f32.mrf.mxu1  ;;  %14988 = vst [vmem:[#allocation36_spill] sm:$0xff] %v13124_v6 }
 0x75a   : > { %v2327_v14 = vpack.c.bf16 %v2293_v61, %v2289_v39  ;;  %v13128_v36 = vpop.f32.mrf.mxu0 }
 0x75b   : > { %v2297_v17 = vpop.f32.mrf.mxu1  ;;  %14990 = vst [vmem:[#allocation38_spill] sm:$0xff] %v13128_v36 }
 0x75c   : > { %3280 = vmatprep.mubr.bf16.mxu0 %v2327_v14  ;;  %3393 = vmatprep.mubr.bf16.mxu1 %v2327_v14  ;;  %v13132_v14 = vpop.f32.mrf.mxu0 }
 0x75d   : > { %v2299_v16 = vpop.f32.mrf.mxu1  ;;  %3281 = vmatmul.mubr.bf16.gmra.mxu0 %v2326_v9  ;;  %3394 = vmatmul.mubr.bf16.gmra.mxu1 %v2326_v9  ;;  %14992 = vst [vmem:[#allocation40_spill] sm:$0xff] %v13132_v14 }
 0x75f   : > { %v2301_v19 = vpop.f32.mrf.mxu1 }
 0x760   : > { %v2328_v26 = vpack.c.bf16 %v2301_v19, %v2297_v17  ;;  %v13136_v17 = vpop.f32.mrf.mxu0 }
 0x761   : > { %v2303_v32 = vpop.f32.mrf.mxu1  ;;  %14994 = vst [vmem:[#allocation42_spill] sm:$0xff] %v13136_v17 }
 0x762   : > { %v2329_v35 = vpack.c.bf16 %v2303_v32, %v2299_v16  ;;  %v13140_v19 = vpop.f32.mrf.mxu0 }
 0x763   : > { %v2307_v59 = vpop.f32.mrf.mxu1  ;;  %14996 = vst [vmem:[#allocation44_spill] sm:$0xff] %v13140_v19 }
 0x764   : > { %3290 = vmatprep.mubr.bf16.mxu0 %v2329_v35  ;;  %3403 = vmatprep.mubr.bf16.mxu1 %v2329_v35  ;;  %v13144_v35 = vpop.f32.mrf.mxu0 }
 0x765   : > { %v2309_v37 = vpop.f32.mrf.mxu1  ;;  %3291 = vmatmul.mubr.bf16.gmra.mxu0 %v2328_v26  ;;  %3404 = vmatmul.mubr.bf16.gmra.mxu1 %v2328_v26  ;;  %14998 = vst [vmem:[#allocation46_spill] sm:$0xff] %v13144_v35 }
 0x767   : > { %v2311_v21 = vpop.f32.mrf.mxu1 }
 0x768   : > { %v2330_v8 = vpack.c.bf16 %v2311_v21, %v2307_v59  ;;  %v13148_v59 = vpop.f32.mrf.mxu0 }
 0x769   : > { %v2313_v62 = vpop.f32.mrf.mxu1  ;;  %15000 = vst [vmem:[#allocation48_spill] sm:$0xff] %v13148_v59 }
 0x76a   : > { %v2331_v30 = vpack.c.bf16 %v2313_v62, %v2309_v37  ;;  %v13152_v21 = vpop.f32.mrf.mxu0 }
 0x76b   : > { %v13042_v45 = vpop.f32.mrf.mxu1  ;;  %15002 = vst [vmem:[#allocation50_spill] sm:$0xff] %v13152_v21 }
 0x76c   : > { %3300 = vmatprep.mubr.bf16.mxu0 %v2331_v30  ;;  %3413 = vmatprep.mubr.bf16.mxu1 %v2331_v30  ;;  %v13156_v30 = vpop.f32.mrf.mxu0 }
 0x76d   : > { %3301 = vmatmul.mubr.bf16.gmra.mxu0 %v2330_v8  ;;  %3414 = vmatmul.mubr.bf16.gmra.mxu1 %v2330_v8  ;;  %v13046_v49 = vpop.f32.mrf.mxu1  ;;  %15004 = vst [vmem:[#allocation52_spill] sm:$0xff] %v13156_v30 }
 0x76e   : > { %3895 = vmatprep.mubr.bf16.mxu0 %v14905_v34  ;;  %4008 = vmatprep.mubr.bf16.mxu1 %v14905_v34  ;;  %v13160_v34 = vpop.f32.mrf.mxu0 }
 0x76f   : > { %v13050_v41 = vpop.f32.mrf.mxu1  ;;  %15006 = vst [vmem:[#allocation54_spill] sm:$0xff] %v13160_v34 }
 0x771   : > { %v13054_v40 = vpop.f32.mrf.mxu1 }
 0x773   : > { %v13058_v3 = vpop.f32.mrf.mxu1 }
 0x775   : > { %v13062_v18 = vpop.f32.mrf.mxu1 }
 0x777   : > { %v13066_v12 = vpop.f32.mrf.mxu1 }
 0x779   : > { %v13070_v15 = vpop.f32.mrf.mxu1 }
 0x77b   : > { %v13074_v52 = vpop.f32.mrf.mxu1 }
 0x77d   : > { %v13078_v58 = vpop.f32.mrf.mxu1 }
 0x77f   : > { %v13082_v63 = vpop.f32.mrf.mxu1 }
 0x781   : > { %v13086_v53 = vpop.f32.mrf.mxu1 }
 0x783   : > { %v13090_v25 = vpop.f32.mrf.mxu1 }
 0x785   : > { %v13094_v27 = vpop.f32.mrf.mxu1 }
 0x787   : > { %v13098_v7 = vpop.f32.mrf.mxu1 }
 0x789   : > { %v13102_v54 = vpop.f32.mrf.mxu1 }
 0x78b   : > { %v13106_v55 = vpop.f32.mrf.mxu1 }
 0x78c   : > { %14979 = vst [vmem:[#allocation27_spill] sm:$0xff] %v13106_v55 }
 0x78d   : > { %v13110_v29 = vpop.f32.mrf.mxu1 }
 0x78e   : > { %14981 = vst [vmem:[#allocation29_spill] sm:$0xff] %v13110_v29 }
 0x78f   : > { %v13114_v43 = vpop.f32.mrf.mxu1 }
 0x790   : > { %14983 = vst [vmem:[#allocation31_spill] sm:$0xff] %v13114_v43 }
 0x791   : > { %v13118_v46 = vpop.f32.mrf.mxu1 }
 0x792   : > { %14985 = vst [vmem:[#allocation33_spill] sm:$0xff] %v13118_v46 }
 0x793   : > { %v13122_v48 = vpop.f32.mrf.mxu1 }
 0x794   : > { %14987 = vst [vmem:[#allocation35_spill] sm:$0xff] %v13122_v48 }
 0x795   : > { %v13126_v39 = vpop.f32.mrf.mxu1 }
 0x796   : > { %14989 = vst [vmem:[#allocation37_spill] sm:$0xff] %v13126_v39 }
 0x797   : > { %v13130_v61 = vpop.f32.mrf.mxu1 }
 0x798   : > { %14991 = vst [vmem:[#allocation39_spill] sm:$0xff] %v13130_v61 }
 0x799   : > { %v13134_v9 = vpop.f32.mrf.mxu1 }
 0x79a   : > { %14993 = vst [vmem:[#allocation41_spill] sm:$0xff] %v13134_v9 }
 0x79b   : > { %v13138_v16 = vpop.f32.mrf.mxu1 }
 0x79c   : > { %14995 = vst [vmem:[#allocation43_spill] sm:$0xff] %v13138_v16  ;;  %v13169_v16 = vld [vmem:[#allocation13 + $0x3] ss:$8 sm:$0xf] }
 0x79d   : > { %v13142_v32 = vpop.f32.mrf.mxu1  ;;  %v13174_v30 = vrot.slane %v13169_v16, %v12883_v33 }
 0x79e   : > { %14997 = vst [vmem:[#allocation45_spill] sm:$0xff] %v13142_v32  ;;  %v13164_v32 = vpop.f32.mrf.mxu0 }
 0x79f   : > { %v13146_v26 = vpop.f32.mrf.mxu1  ;;  %15008 = vst [vmem:[#allocation56_spill] sm:$0xff] %v13164_v32  ;;  %15010 = vst [vmem:[#allocation58_spill] sm:$0xff] %v13174_v30 }
 0x7a0   : > { %14999 = vst [vmem:[#allocation47_spill] sm:$0xff] %v13146_v26  ;;  %v14909_v26 = vsub.s32 2, %v12875_v28 }
 0x7a1   : > { %v13150_v37 = vpop.f32.mrf.mxu1 }
 0x7a2   : > { %15001 = vst [vmem:[#allocation49_spill] sm:$0xff] %v13150_v37  ;;  %v13180_v32 = vrot.slane %v13169_v16, %v14909_v26 }
 0x7a3   : > { %v13154_v62 = vpop.f32.mrf.mxu1 }
 0x7a4   : > { %15003 = vst [vmem:[#allocation51_spill] sm:$0xff] %v13154_v62  ;;  %15011 = vst [vmem:[#allocation59_spill] sm:$0xff] %v13180_v32 }
 0x7a5   : > { %v13158_v8 = vpop.f32.mrf.mxu1 }
 0x7a6   : > { %15005 = vst [vmem:[#allocation53_spill] sm:$0xff] %v13158_v8 }
 0x7a7   : > { %v13162_v19 = vpop.f32.mrf.mxu1 }
 0x7a8   : > { %15007 = vst [vmem:[#allocation55_spill] sm:$0xff] %v13162_v19 }
 0x7a9   : > { %v13166_v35 = vpop.f32.mrf.mxu1 }
 0x7aa   : > { %15009 = vst [vmem:[#allocation57_spill] sm:$0xff] %v13166_v35 }
 0x7f5   : > { %v3232_v17 = vpop.f32.mrf.mxu0  ;;  %v3345_v21 = vpop.f32.mrf.mxu1 }
 0x7f6   : > { %v3233_v62 = vadd.f32 %v3232_v17, %v13040_v20  ;;  %v3346_v34 = vadd.f32 %v3345_v21, %v13042_v45 }
 0x7f7   : > { %v13182_v35 = vpop.f32.mrf.mxu0  ;;  %v13184_v19 = vpop.f32.mrf.mxu1 }
 0x7f8   : > { %v3445_v59 = vadd.f32 %v13174_v30, %v3233_v62  ;;  %v3447_v20 = vadd.f32 %v13180_v32, %v3346_v34 }
 0x7f9   : > { %v3236_v8 = vpop.f32.mrf.mxu0  ;;  %v3349_v37 = vpop.f32.mrf.mxu1 }
 0x7fa   : > { %v3237_v17 = vadd.f32 %v3236_v8, %v13048_v51  ;;  %v3350_v33 = vadd.f32 %v3349_v37, %v13050_v41  ;;  %v3509_v14 = vmax.f32 %v3445_v59, 0.0  ;;  %v3511_v62 = vmax.f32 %v3447_v20, 0.0 }
 0x7fb   : > { %v3238_v45 = vpop.f32.mrf.mxu0  ;;  %v3351_v21 = vpop.f32.mrf.mxu1 }
 0x7fc   : > { %v3449_v48 = vadd.f32 %v13174_v30, %v3237_v17  ;;  %v3451_v26 = vadd.f32 %v13180_v32, %v3350_v33  ;;  %v3239_v46 = vadd.f32 %v3238_v45, %v13052_v60  ;;  %v3352_v44 = vadd.f32 %v3351_v21, %v13054_v40 }
 0x7fd   : > { %v3242_v47 = vpop.f32.mrf.mxu0  ;;  %v3355_v43 = vpop.f32.mrf.mxu1  ;;  %v13240_v40 = vadd.f32 %v13182_v35, %v13044_v38  ;;  %v13244_v21 = vadd.f32 %v13184_v19, %v13046_v49 }
 0x7fe   : > { %v3243_v5 = vadd.f32 %v3242_v47, %v13056_v42  ;;  %v3356_v9 = vadd.f32 %v3355_v43, %v13058_v3  ;;  %v3513_v55 = vmax.f32 %v3449_v48, 0.0  ;;  %v3515_v34 = vmax.f32 %v3451_v26, 0.0 }
 0x7ff   : > { %v13194_v11 = vpop.f32.mrf.mxu0  ;;  %v13196_v51 = vpop.f32.mrf.mxu1  ;;  %15020 = vst [vmem:[#allocation68_spill] sm:$0xff] %v13240_v40  ;;  %15021 = vst [vmem:[#allocation69_spill] sm:$0xff] %v13244_v21  ;;  %v15058_v21 = vld [vmem:[#allocation43_spill] sm:$0xff]  ;;  %v15059_v40 = vld [vmem:[#allocation44_spill] sm:$0xff] }
 0x800   : > { %v13198_v41 = vpack.c.bf16 %v3513_v55, %v3509_v14  ;;  %v13200_v37 = vpack.c.bf16 %v3515_v34, %v3511_v62  ;;  %v3453_v17 = vadd.f32 %v13174_v30, %v3243_v5  ;;  %v3455_v42 = vadd.f32 %v13180_v32, %v3356_v9 }
 0x801   : > { %v3246_v8 = vpop.f32.mrf.mxu0  ;;  %v3359_v33 = vpop.f32.mrf.mxu1  ;;  %v13258_v49 = vadd.f32 %v13194_v11, %v13060_v13 }
 0x802   : > { %15012 = vst [vmem:[#allocation60_spill] sm:$0xff] %v13198_v41  ;;  %15013 = vst [vmem:[#allocation61_spill] sm:$0xff] %v13200_v37  ;;  %v3247_v3 = vadd.f32 %v3246_v8, %v13064_v56  ;;  %v3360_v43 = vadd.f32 %v3359_v33, %v13066_v12  ;;  %v3517_v20 = vmax.f32 %v3453_v17, 0.0  ;;  %v3519_v62 = vmax.f32 %v3455_v42, 0.0 }
 0x803   : > { %v3248_v47 = vpop.f32.mrf.mxu0  ;;  %v3361_v48 = vpop.f32.mrf.mxu1  ;;  %15024 = vst [vmem:[#allocation72_spill] sm:$0xff] %v13258_v49 }
 0x804   : > { %v3457_v26 = vadd.f32 %v13174_v30, %v3247_v3  ;;  %v3459_v59 = vadd.f32 %v13180_v32, %v3360_v43 }
 0x805   : > { %v3252_v55 = vpop.f32.mrf.mxu0  ;;  %v3365_v14 = vpop.f32.mrf.mxu1 }
 0x806   : > { %v3521_v34 = vmax.f32 %v3457_v26, 0.0  ;;  %v3523_v37 = vmax.f32 %v3459_v59, 0.0 }
 0x807   : > { %v3254_v41 = vpop.f32.mrf.mxu0  ;;  %v3367_v5 = vpop.f32.mrf.mxu1 }
 0x808   : > { %v13208_v61 = vpack.c.bf16 %v3521_v34, %v3517_v20  ;;  %v13210_v9 = vpack.c.bf16 %v3523_v37, %v3519_v62 }
 0x809   : > { %v3256_v56 = vpop.f32.mrf.mxu0  ;;  %v3369_v12 = vpop.f32.mrf.mxu1 }
 0x80a   : > { %15014 = vst [vmem:[#allocation62_spill] sm:$0xff] %v13208_v61  ;;  %15015 = vst [vmem:[#allocation63_spill] sm:$0xff] %v13210_v9  ;;  %v14920_v9 = vsub.s32 3, %v12875_v28  ;;  %v13282_v35 = vadd.f32 %v3369_v12, %v13082_v63 }
 0x80b   : > { %v3258_v8 = vpop.f32.mrf.mxu0  ;;  %v3371_v33 = vpop.f32.mrf.mxu1 }
 0x80c   : > { %v3372_v38 = vadd.f32 %v3371_v33, %v13086_v53  ;;  %v13274_v53 = vadd.f32 %v3365_v14, %v13074_v52 }
 0x80d   : > { %v3262_v36 = vpop.f32.mrf.mxu0  ;;  %v3375_v3 = vpop.f32.mrf.mxu1 }
 0x80e   : > { %15029 = vst [vmem:[#allocation77_spill] sm:$0xff] %v13274_v53  ;;  %v13299_v63 = vadd.f32 %v3262_v36, %v13088_v1  ;;  %v15034_v36 = vld [vmem:[#allocation29_spill] sm:$0xff] }
 0x80f   : > { %v3264_v30 = vpop.f32.mrf.mxu0  ;;  %v3377_v43 = vpop.f32.mrf.mxu1  ;;  %v15064_v53 = vld [vmem:[#allocation53_spill] sm:$0xff] }
 0x810   : > { %v3265_v13 = vadd.f32 %v3264_v30, %v13092_v24  ;;  %v3378_v11 = vadd.f32 %v3377_v43, %v13094_v27  ;;  %v13302_v27 = vadd.f32 %v3375_v3, %v13090_v25 }
 0x811   : > { %v3266_v32 = vpop.f32.mrf.mxu0  ;;  %v3379_v39 = vpop.f32.mrf.mxu1 }
 0x813   : > { %v3268_v17 = vpop.f32.mrf.mxu0  ;;  %v3381_v42 = vpop.f32.mrf.mxu1 }
 0x815   : > { %v13212_v26 = vpop.f32.mrf.mxu0  ;;  %v13214_v59 = vpop.f32.mrf.mxu1 }
 0x816   : > { %15016 = vst [vmem:[#allocation64_spill] sm:$0xff] %v13212_v26  ;;  %15017 = vst [vmem:[#allocation65_spill] sm:$0xff] %v13214_v59  ;;  %v13229_v59 = vrot.slane %v13169_v16, %v12880_v31  ;;  %v3362_v26 = vadd.f32 %v3361_v48, %v13070_v15  ;;  %v3255_v15 = vadd.f32 %v3254_v41, %v13076_v23 }
 0x817   : > { %v3274_v20 = vpop.f32.mrf.mxu0  ;;  %v3387_v34 = vpop.f32.mrf.mxu1  ;;  %v3259_v48 = vadd.f32 %v3258_v8, %v13084_v0  ;;  %v13271_v0 = vadd.f32 %v3252_v55, %v13072_v57  ;;  %v3382_v41 = vadd.f32 %v3381_v42, %v13102_v54  ;;  %v13308_v54 = vadd.f32 %v3379_v39, %v13098_v7  ;;  %v15033_v8 = vld [vmem:[#allocation28_spill] sm:$0xff] }
 0x818   : > { %v13247_v31 = vadd.f32 %v13229_v59, %v3239_v46  ;;  %v13262_v46 = vadd.f32 %v13196_v51, %v13062_v18  ;;  %v13279_v18 = vadd.f32 %v3256_v56, %v13080_v50  ;;  %v3269_v51 = vadd.f32 %v3268_v17, %v13100_v10  ;;  %v15035_v7 = vld [vmem:[#allocation32_spill] sm:$0xff] }
 0x819   : > { %v13216_v37 = vpop.f32.mrf.mxu0  ;;  %v13218_v62 = vpop.f32.mrf.mxu1  ;;  %15028 = vst [vmem:[#allocation76_spill] sm:$0xff] %v13271_v0  ;;  %v13287_v55 = vadd.f32 %v13229_v59, %v3255_v15  ;;  %v13293_v24 = vadd.f32 %v13229_v59, %v3259_v48  ;;  %v13305_v10 = vadd.f32 %v3266_v32, %v13096_v4  ;;  %v13311_v56 = vadd.f32 %v13229_v59, %v3265_v13  ;;  %v15036_v32 = vld [vmem:[#allocation33_spill] sm:$0xff]  ;;  %v15037_v42 = vld [vmem:[#allocation36_spill] sm:$0xff]  ;;  %v15040_v48 = vld [vmem:[#allocation39_spill] sm:$0xff] }
 0x81a   : > { %15018 = vst [vmem:[#allocation66_spill] sm:$0xff] %v13216_v37  ;;  %15019 = vst [vmem:[#allocation67_spill] sm:$0xff] %v13218_v62  ;;  %v13234_v62 = vrot.slane %v13169_v16, %v14920_v9  ;;  %v3249_v37 = vadd.f32 %v3248_v47, %v13068_v22  ;;  %v3368_v47 = vadd.f32 %v3367_v5, %v13078_v58 }
 0x81b   : > { %v3278_v61 = vpop.f32.mrf.mxu0  ;;  %v3391_v6 = vpop.f32.mrf.mxu1  ;;  %15022 = vst [vmem:[#allocation70_spill] sm:$0xff] %v13247_v31  ;;  %15025 = vst [vmem:[#allocation73_spill] sm:$0xff] %v13262_v46  ;;  %v3275_v1 = vadd.f32 %v3274_v20, %v15033_v8  ;;  %v3388_v33 = vadd.f32 %v3387_v34, %v15034_v36  ;;  %v13319_v25 = vadd.f32 %v13229_v59, %v3269_v51  ;;  %v15043_v51 = vld [vmem:[#allocation27_spill] sm:$0xff]  ;;  %v15046_v36 = vld [vmem:[#allocation41_spill] sm:$0xff] }
 0x81c   : > { %v13250_v16 = vadd.f32 %v13234_v62, %v3352_v44  ;;  %v13265_v44 = vadd.f32 %v13229_v59, %v3249_v37  ;;  %v13268_v19 = vadd.f32 %v13234_v62, %v3362_v26  ;;  %15030 = vst [vmem:[#allocation78_spill] sm:$0xff] %v13287_v55  ;;  %v13290_v52 = vadd.f32 %v13234_v62, %v3368_v47  ;;  %v15038_v37 = vld [vmem:[#allocation37_spill] sm:$0xff]  ;;  %v15039_v47 = vld [vmem:[#allocation38_spill] sm:$0xff]  ;;  %v15062_v55 = vld [vmem:[#allocation51_spill] sm:$0xff] }
 0x81d   : > { %v13223_v29 = vpop.f32.mrf.mxu0  ;;  %v13225_v2 = vpop.f32.mrf.mxu1  ;;  %v13296_v50 = vadd.f32 %v13234_v62, %v3372_v38  ;;  %v13314_v12 = vadd.f32 %v13234_v62, %v3378_v11  ;;  %v13322_v4 = vadd.f32 %v13234_v62, %v3382_v41  ;;  %v3279_v39 = vadd.f32 %v3278_v61, %v15035_v7  ;;  %v15041_v38 = vld [vmem:[#allocation26_spill] sm:$0xff]  ;;  %v15042_v13 = vld [vmem:[#allocation64_spill] sm:$0xff]  ;;  %v15044_v41 = vld [vmem:[#allocation65_spill] sm:$0xff] }
 0x81e   : > { %15023 = vst [vmem:[#allocation71_spill] sm:$0xff] %v13250_v16  ;;  %15026 = vst [vmem:[#allocation74_spill] sm:$0xff] %v13265_v44  ;;  %v3392_v3 = vadd.f32 %v3391_v6, %v15036_v32  ;;  %v13332_v11 = vadd.f32 %v15042_v13, %v15041_v38  ;;  %v13336_v8 = vadd.f32 %v15044_v41, %v15043_v51  ;;  %v15045_v61 = vld [vmem:[#allocation40_spill] sm:$0xff]  ;;  %v15051_v13 = vld [vmem:[#allocation34_spill] sm:$0xff] }
 0x81f   : > { %v3284_v60 = vpop.f32.mrf.mxu0  ;;  %v3397_v45 = vpop.f32.mrf.mxu1  ;;  %15027 = vst [vmem:[#allocation75_spill] sm:$0xff] %v13268_v19  ;;  %15031 = vst [vmem:[#allocation79_spill] sm:$0xff] %v13290_v52  ;;  %v15061_v52 = vld [vmem:[#allocation50_spill] sm:$0xff] }
 0x820   : > { %15032 = vst [vmem:[#allocation80_spill] sm:$0xff] %v13296_v50  ;;  %v3285_v26 = vadd.f32 %v3284_v60, %v15037_v42  ;;  %v3398_v15 = vadd.f32 %v3397_v45, %v15038_v37  ;;  %v13341_v45 = vadd.f32 %v13229_v59, %v3275_v1  ;;  %v13362_v1 = vadd.f32 %v13223_v29, %v15051_v13  ;;  %v15066_v50 = vld [vmem:[#allocation47_spill] sm:$0xff] }
 0x821   : > { %v3286_v9 = vpop.f32.mrf.mxu0  ;;  %v3399_v22 = vpop.f32.mrf.mxu1  ;;  %v15048_v42 = vld [vmem:[#allocation66_spill] sm:$0xff] }
 0x822   : > { %v3287_v20 = vadd.f32 %v3286_v9, %v15039_v47  ;;  %v3400_v34 = vadd.f32 %v3399_v22, %v15040_v48  ;;  %v13344_v9 = vadd.f32 %v13234_v62, %v3388_v33  ;;  %v15047_v22 = vld [vmem:[#allocation30_spill] sm:$0xff]  ;;  %v15049_v47 = vld [vmem:[#allocation31_spill] sm:$0xff] }
 0x823   : > { %v3288_v23 = vpop.f32.mrf.mxu0  ;;  %v3401_v58 = vpop.f32.mrf.mxu1  ;;  %v13348_v37 = vadd.f32 %v15048_v42, %v15047_v22  ;;  %v15050_v48 = vld [vmem:[#allocation67_spill] sm:$0xff]  ;;  %v13372_v22 = vadd.f32 %v13234_v62, %v3398_v15  ;;  %v15057_v15 = vld [vmem:[#allocation42_spill] sm:$0xff] }
 0x824   : > { %v3289_v6 = vadd.f32 %v3288_v23, %v15045_v61  ;;  %v3402_v7 = vadd.f32 %v3401_v58, %v15046_v36  ;;  %v13352_v38 = vadd.f32 %v15050_v48, %v15049_v47  ;;  %v13355_v23 = vadd.f32 %v13229_v59, %v3279_v39  ;;  %v15052_v33 = vld [vmem:[#allocation35_spill] sm:$0xff]  ;;  %v15053_v39 = vld [vmem:[#allocation58_spill] sm:$0xff]  ;;  %v15055_v48 = vld [vmem:[#allocation48_spill] sm:$0xff] }
 0x825   : > { %v3292_v5 = vpop.f32.mrf.mxu0  ;;  %v3405_v57 = vpop.f32.mrf.mxu1  ;;  %v13358_v58 = vadd.f32 %v13234_v62, %v3392_v3  ;;  %v13366_v51 = vadd.f32 %v13225_v2, %v15052_v33  ;;  %v13369_v36 = vadd.f32 %v13229_v59, %v3285_v26  ;;  %v13375_v42 = vadd.f32 %v15053_v39, %v3287_v20  ;;  %v15054_v3 = vld [vmem:[#allocation59_spill] sm:$0xff]  ;;  %v15056_v33 = vld [vmem:[#allocation49_spill] sm:$0xff] }
 0x826   : > { %v13378_v47 = vadd.f32 %v15054_v3, %v3400_v34  ;;  %v13381_v29 = vadd.f32 %v13229_v59, %v3289_v6  ;;  %v13384_v2 = vadd.f32 %v13234_v62, %v3402_v7  ;;  %v3293_v31 = vadd.f32 %v3292_v5, %v15057_v15  ;;  %v15060_v34 = vld [vmem:[#allocation45_spill] sm:$0xff]  ;;  %v15063_v7 = vld [vmem:[#allocation52_spill] sm:$0xff]  ;;  %v15067_v15 = vld [vmem:[#allocation54_spill] sm:$0xff] }
 0x827   : > { %v3294_v30 = vpop.f32.mrf.mxu0  ;;  %v3407_v14 = vpop.f32.mrf.mxu1  ;;  %v3406_v20 = vadd.f32 %v3405_v57, %v15058_v21  ;;  %v15068_v57 = vld [vmem:[#allocation55_spill] sm:$0xff] }
 0x828   : > { %v3295_v19 = vadd.f32 %v3294_v30, %v15059_v40  ;;  %v3408_v44 = vadd.f32 %v3407_v14, %v15060_v34 }
 0x829   : > { %v3296_v43 = vpop.f32.mrf.mxu0  ;;  %v3409_v17 = vpop.f32.mrf.mxu1 }
 0x82a   : > { %v3410_v5 = vadd.f32 %v3409_v17, %v15066_v50  ;;  %v15070_v17 = vld [vmem:[#allocation57_spill] sm:$0xff]  ;;  %v3494_v34 = vadd.f32 %v13229_v59, %v3295_v19 }
 0x82b   : > { %v3298_v32 = vpop.f32.mrf.mxu0  ;;  %v3411_v60 = vpop.f32.mrf.mxu1 }
 0x82c   : > { %v3299_v13 = vadd.f32 %v3298_v32, %v15055_v48  ;;  %v3412_v26 = vadd.f32 %v3411_v60, %v15056_v33  ;;  %v15065_v33 = vld [vmem:[#allocation46_spill] sm:$0xff] }
 0x82d   : > { %v3302_v41 = vpop.f32.mrf.mxu0  ;;  %v3415_v61 = vpop.f32.mrf.mxu1  ;;  %v3297_v0 = vadd.f32 %v3296_v43, %v15065_v33 }
 0x82e   : > { %v3303_v6 = vadd.f32 %v3302_v41, %v15061_v52  ;;  %v3416_v46 = vadd.f32 %v3415_v61, %v15062_v55  ;;  %v3498_v30 = vadd.f32 %v13229_v59, %v3299_v13  ;;  %v3500_v52 = vadd.f32 %v13234_v62, %v3412_v26  ;;  %v15069_v41 = vld [vmem:[#allocation56_spill] sm:$0xff] }
 0x82f   : > { %v3304_v28 = vpop.f32.mrf.mxu0  ;;  %v3417_v16 = vpop.f32.mrf.mxu1  ;;  %v3496_v13 = vadd.f32 %v13234_v62, %v3408_v44 }
 0x830   : > { %v3305_v49 = vadd.f32 %v3304_v28, %v15063_v7  ;;  %v3418_v32 = vadd.f32 %v3417_v16, %v15064_v53  ;;  %v3501_v26 = vadd.f32 %v15053_v39, %v3303_v6  ;;  %v3497_v7 = vadd.f32 %v15053_v39, %v3297_v0 }
 0x831   : > { %v3306_v48 = vpop.f32.mrf.mxu0  ;;  %v3419_v60 = vpop.f32.mrf.mxu1  ;;  %v3562_v33 = vmax.f32 %v3498_v30, 0.0  ;;  %v3493_v6 = vadd.f32 %v15053_v39, %v3293_v31  ;;  %v3556_v31 = vmax.f32 %v13384_v2, 0.0  ;;  %v3483_v2 = vadd.f32 %v15054_v3, %v13352_v38 }
 0x832   : > { %v3307_v21 = vadd.f32 %v3306_v48, %v15067_v15  ;;  %v3420_v40 = vadd.f32 %v3419_v60, %v15068_v57  ;;  %v3502_v55 = vadd.f32 %v13229_v59, %v3305_v49  ;;  %v3504_v28 = vadd.f32 %v13234_v62, %v3418_v32 }
 0x833   : > { %v3308_v14 = vpop.f32.mrf.mxu0  ;;  %v3421_v16 = vpop.f32.mrf.mxu1  ;;  %v3503_v49 = vadd.f32 %v15054_v3, %v3416_v46  ;;  %v3499_v32 = vadd.f32 %v15054_v3, %v3410_v5  ;;  %v3564_v15 = vmax.f32 %v3500_v52, 0.0  ;;  %v3495_v46 = vadd.f32 %v15054_v3, %v3406_v20 }
 0x834   : > { %v3505_v53 = vadd.f32 %v15053_v39, %v3307_v21  ;;  %v3507_v43 = vadd.f32 %v15054_v3, %v3420_v40  ;;  %v3309_v50 = vadd.f32 %v3308_v14, %v15069_v41  ;;  %v3422_v61 = vadd.f32 %v3421_v16, %v15070_v17 }
 0x835   : > { %v3566_v40 = vmax.f32 %v3502_v55, 0.0  ;;  %v3568_v19 = vmax.f32 %v3504_v28, 0.0  ;;  %v3565_v16 = vmax.f32 %v3501_v26, 0.0  ;;  %v3567_v0 = vmax.f32 %v3503_v49, 0.0 }
 0x836   : > { %v3506_v48 = vadd.f32 %v13229_v59, %v3309_v50  ;;  %v3508_v60 = vadd.f32 %v13234_v62, %v3422_v61  ;;  %v3569_v21 = vmax.f32 %v3505_v53, 0.0  ;;  %v3571_v57 = vmax.f32 %v3507_v43, 0.0 }
 0x837   : > { %v3558_v41 = vmax.f32 %v3494_v34, 0.0  ;;  %v3560_v5 = vmax.f32 %v3496_v13, 0.0  ;;  %v3561_v30 = vmax.f32 %v3497_v7, 0.0  ;;  %v3563_v52 = vmax.f32 %v3499_v32, 0.0 }
 0x838   : > { %v3570_v14 = vmax.f32 %v3506_v48, 0.0  ;;  %v3572_v44 = vmax.f32 %v3508_v60, 0.0  ;;  %v13422_v53 = vpack.c.bf16 %v3569_v21, %v3565_v16  ;;  %v13424_v55 = vpack.c.bf16 %v3571_v57, %v3567_v0 }
 0x839   : > { %v3554_v28 = vmax.f32 %v13381_v29, 0.0  ;;  %v13430_v20 = vpack.c.bf16 %v3562_v33, %v3558_v41  ;;  %v13432_v43 = vpack.c.bf16 %v3564_v15, %v3560_v5  ;;  %v3485_v61 = vadd.f32 %v15053_v39, %v13362_v1 }
 0x83a   : > { %v13418_v17 = vpack.c.bf16 %v3570_v14, %v3566_v40  ;;  %v13420_v50 = vpack.c.bf16 %v3572_v44, %v3568_v19  ;;  %v3487_v34 = vadd.f32 %v15054_v3, %v13366_v51  ;;  %v3557_v13 = vmax.f32 %v3493_v6, 0.0 }
 0x83b   : > { %v3559_v26 = vmax.f32 %v3495_v46, 0.0  ;;  %v3481_v29 = vadd.f32 %v15053_v39, %v13348_v37  ;;  %v3550_v49 = vmax.f32 %v13369_v36, 0.0  ;;  %v3552_v7 = vmax.f32 %v13372_v22, 0.0 }
 0x83c   : > { %3863 = vmatprep.subr.bf16.mxu0 %v13418_v17  ;;  %3976 = vmatprep.subr.bf16.mxu1 %v13420_v50  ;;  %v3553_v1 = vmax.f32 %v13375_v42, 0.0  ;;  %v3555_v51 = vmax.f32 %v13378_v47, 0.0  ;;  %v13450_v32 = vpack.c.bf16 %v3561_v30, %v3557_v13  ;;  %v3546_v37 = vmax.f32 %v13355_v23, 0.0  ;;  %v15074_v13 = vld [vmem:[#allocation72_spill] sm:$0xff] }
 0x83d   : > { %3864 = vmatpush1.bf16.msra.mxu0 %v13422_v53  ;;  %3977 = vmatpush1.bf16.msra.mxu1 %v13424_v55  ;;  %v13452_v48 = vpack.c.bf16 %v3563_v52, %v3559_v26  ;;  %v3548_v38 = vmax.f32 %v13358_v58, 0.0  ;;  %v13456_v60 = vpack.c.bf16 %v3554_v28, %v3550_v49  ;;  %v13458_v36 = vpack.c.bf16 %v3556_v31, %v3552_v7  ;;  %v15073_v28 = vld [vmem:[#allocation77_spill] sm:$0xff]  ;;  %v15077_v7 = vld [vmem:[#allocation79_spill] sm:$0xff] }
 0x83e   : > { %3865 = vmatprep.subr.bf16.mxu0 %v13430_v20  ;;  %3978 = vmatprep.subr.bf16.mxu1 %v13432_v43  ;;  %v3477_v22 = vadd.f32 %v15053_v39, %v13332_v11  ;;  %v3479_v42 = vadd.f32 %v15054_v3, %v13336_v8  ;;  %v3549_v33 = vmax.f32 %v3485_v61, 0.0  ;;  %v3551_v47 = vmax.f32 %v3487_v34, 0.0  ;;  %v15075_v26 = vld [vmem:[#allocation73_spill] sm:$0xff] }
 0x83f   : > { %v3473_v23 = vadd.f32 %v15053_v39, %v13305_v10  ;;  %v3475_v58 = vadd.f32 %v15054_v3, %v13308_v54  ;;  %v3542_v15 = vmax.f32 %v13341_v45, 0.0  ;;  %v3544_v21 = vmax.f32 %v13344_v9, 0.0 }
 0x840   : > { %v3545_v11 = vmax.f32 %v3481_v29, 0.0  ;;  %v3547_v8 = vmax.f32 %v3483_v2, 0.0  ;;  %v13474_v57 = vpack.c.bf16 %v3553_v1, %v3549_v33  ;;  %v13476_v40 = vpack.c.bf16 %v3555_v51, %v3551_v47  ;;  %v15076_v2 = vld [vmem:[#allocation78_spill] sm:$0xff] }
 0x841   : > { %3866 = vmatpush1.bf16.msra.mxu0 %v13450_v32  ;;  %3979 = vmatpush1.bf16.msra.mxu1 %v13452_v48  ;;  %v3538_v19 = vmax.f32 %v13319_v25, 0.0  ;;  %v3540_v10 = vmax.f32 %v13322_v4, 0.0  ;;  %v13480_v14 = vpack.c.bf16 %v3546_v37, %v3542_v15  ;;  %v13482_v54 = vpack.c.bf16 %v3548_v38, %v3544_v21  ;;  %v15078_v38 = vld [vmem:[#allocation74_spill] sm:$0xff]  ;;  %v15080_v21 = vld [vmem:[#allocation68_spill] sm:$0xff] }
 0x842   : > { %3867 = vmatprep.subr.bf16.mxu0 %v13456_v60  ;;  %3980 = vmatprep.subr.bf16.mxu1 %v13458_v36  ;;  %v3469_v45 = vadd.f32 %v15053_v39, %v13299_v63  ;;  %v3471_v9 = vadd.f32 %v15054_v3, %v13302_v27  ;;  %v3541_v44 = vmax.f32 %v3477_v22, 0.0  ;;  %v3543_v6 = vmax.f32 %v3479_v42, 0.0  ;;  %v15079_v42 = vld [vmem:[#allocation75_spill] sm:$0xff] }
 0x843   : > { %v3465_v25 = vadd.f32 %v15053_v39, %v13279_v18  ;;  %v3467_v4 = vadd.f32 %v15054_v3, %v13282_v35  ;;  %v3534_v46 = vmax.f32 %v13311_v56, 0.0  ;;  %v3536_v16 = vmax.f32 %v13314_v12, 0.0  ;;  %v15071_v18 = vld [vmem:[#allocation80_spill] sm:$0xff] }
 0x844   : > { %v3537_v63 = vmax.f32 %v3473_v23, 0.0  ;;  %v3539_v27 = vmax.f32 %v3475_v58, 0.0  ;;  %v13498_v0 = vpack.c.bf16 %v3545_v11, %v3541_v44  ;;  %v13500_v41 = vpack.c.bf16 %v3547_v8, %v3543_v6  ;;  %v15072_v56 = vld [vmem:[#allocation76_spill] sm:$0xff]  ;;  %v15081_v8 = vld [vmem:[#allocation69_spill] sm:$0xff]  ;;  %v15082_v6 = vld [vmem:[#allocation70_spill] sm:$0xff] }
 0x845   : > { %3868 = vmatpush1.bf16.msra.mxu0 %v13474_v57  ;;  %3981 = vmatpush1.bf16.msra.mxu1 %v13476_v40  ;;  %v3530_v5 = vmax.f32 %v13293_v24, 0.0  ;;  %v3532_v30 = vmax.f32 %v15071_v18, 0.0  ;;  %v13504_v52 = vpack.c.bf16 %v3538_v19, %v3534_v46  ;;  %v13506_v35 = vpack.c.bf16 %v3540_v10, %v3536_v16  ;;  %v15084_v18 = vld [vmem:[#allocation62_spill] sm:$0xff] }
 0x846   : > { %3869 = vmatprep.subr.bf16.mxu0 %v13480_v14  ;;  %3982 = vmatprep.subr.bf16.mxu1 %v13482_v54  ;;  %v3461_v12 = vadd.f32 %v15053_v39, %v15072_v56  ;;  %v3463_v31 = vadd.f32 %v15054_v3, %v15073_v28  ;;  %v3533_v61 = vmax.f32 %v3469_v45, 0.0  ;;  %v3535_v34 = vmax.f32 %v3471_v9, 0.0  ;;  %v11320_v56 = vld [vmem:[#allocation11 + $0x8e4] ss:$16 sps:$4 sm:$0xff]   ;;  %v15086_v28 = vld [vmem:[#allocation60_spill] sm:$0xff] }
 0x847   : > { %v3454_v24 = vadd.f32 %v13229_v59, %v15074_v13  ;;  %v3456_v29 = vadd.f32 %v13234_v62, %v15075_v26  ;;  %v3526_v49 = vmax.f32 %v15076_v2, 0.0  ;;  %v3528_v1 = vmax.f32 %v15077_v7, 0.0  ;;  %v11326_v13 = vld [vmem:[#allocation11 + $0x8c4] ss:$16 sps:$4 sm:$0xff]   ;;  %v11327_v2 = vld [vmem:[#allocation11 + $0xac0] ss:$16 sps:$4 sm:$0xff]  }
 0x848   : > { %v3529_v39 = vmax.f32 %v3465_v25, 0.0  ;;  %v3531_v3 = vmax.f32 %v3467_v4, 0.0  ;;  %v13522_v51 = vpack.c.bf16 %v3537_v63, %v3533_v61  ;;  %v13524_v37 = vpack.c.bf16 %v3539_v27, %v3535_v34  ;;  %v15083_v4 = vld [vmem:[#allocation71_spill] sm:$0xff] }
 0x849   : > { %3870 = vmatpush1.bf16.msra.mxu0 %v13498_v0  ;;  %3983 = vmatpush1.bf16.msra.mxu1 %v13500_v41  ;;  %v3522_v22 = vmax.f32 %v15078_v38, 0.0  ;;  %v3524_v33 = vmax.f32 %v15079_v42, 0.0  ;;  %v13528_v47 = vpack.c.bf16 %v3530_v5, %v3526_v49  ;;  %v13530_v23 = vpack.c.bf16 %v3532_v30, %v3528_v1  ;;  %v15085_v30 = vld [vmem:[#allocation63_spill] sm:$0xff]  ;;  %v12087_v42 = vld [vmem:[%s12670_s17 + $0x8] sm:$0xff]  }
 0x84a   : > { %3871 = vmatprep.subr.bf16.mxu0 %v13504_v52  ;;  %3984 = vmatprep.subr.bf16.mxu1 %v13506_v35  ;;  %v3525_v58 = vmax.f32 %v3461_v12, 0.0  ;;  %v3527_v15 = vmax.f32 %v3463_v31, 0.0  ;;  %v3446_v11 = vadd.f32 %v13229_v59, %v15080_v21  ;;  %v3448_v19 = vadd.f32 %v13234_v62, %v15081_v8  ;;  %v11323_v12 = vld [vmem:[#allocation11 + $0xae4] ss:$16 sps:$4 sm:$0xff]   ;;  %v11318_v61 = vld [vmem:[#allocation11 + $0x8e0] ss:$16 sps:$4 sm:$0xff]  }
 0x84b   : > { %v3518_v10 = vmax.f32 %v3454_v24, 0.0  ;;  %v3520_v45 = vmax.f32 %v3456_v29, 0.0  ;;  %v3514_v25 = vmax.f32 %v15082_v6, 0.0  ;;  %v3516_v46 = vmax.f32 %v15083_v4, 0.0  ;;  %v15087_v31 = vld [vmem:[#allocation61_spill] sm:$0xff]  ;;  %v12086_v26 = vld [vmem:[%s12670_s17] sm:$0xff]  }
 0x84c   : > { %v13540_v9 = vpack.c.bf16 %v3529_v39, %v3525_v58  ;;  %v13542_v44 = vpack.c.bf16 %v3531_v3, %v3527_v15  ;;  %v3510_v62 = vmax.f32 %v3446_v11, 0.0  ;;  %v3512_v63 = vmax.f32 %v3448_v19, 0.0  ;;  %v11321_v34 = vld [vmem:[#allocation11 + $0xae0] ss:$16 sps:$4 sm:$0xff]   ;;  %v11329_v24 = vld [vmem:[#allocation11 + $0xac4] ss:$16 sps:$4 sm:$0xff]  }
 0x84d   : > { %3872 = vmatpush1.bf16.msra.mxu0 %v13522_v51  ;;  %3985 = vmatpush1.bf16.msra.mxu1 %v13524_v37  ;;  %v13546_v16 = vpack.c.bf16 %v3522_v22, %v3518_v10  ;;  %v13548_v59 = vpack.c.bf16 %v3524_v33, %v3520_v45  ;;  %v11324_v29 = vld [vmem:[#allocation11 + $0x8c0] ss:$16 sps:$4 sm:$0xff]   ;;  %v11332_v49 = vld [vmem:[#allocation11 + $0x8a4] ss:$16 sps:$4 sm:$0xff]   ;;  %v15088_v1 = vmov 0  }
 0x84e   : > { %3873 = vmatprep.subr.bf16.mxu0 %v13528_v47  ;;  %3986 = vmatprep.subr.bf16.mxu1 %v13530_v23  ;;  %v13554_v27 = vpack.c.bf16 %v3514_v25, %v3510_v62  ;;  %v13556_v5 = vpack.c.bf16 %v3516_v46, %v3512_v63  ;;  %v11335_v7 = vld [vmem:[#allocation11 + $0xaa4] ss:$16 sps:$4 sm:$0xff]   ;;  %v11330_v39 = vld [vmem:[#allocation11 + $0x8a0] ss:$16 sps:$4 sm:$0xff]  }
 0x84f   : > { %v11333_v3 = vld [vmem:[#allocation11 + $0xaa0] ss:$16 sps:$4 sm:$0xff]   ;;  %v11338_v38 = vld [vmem:[#allocation11 + $0x884] ss:$16 sps:$4 sm:$0xff]  }
 0x850   : > { %v11341_v22 = vld [vmem:[#allocation11 + $0xa84] ss:$16 sps:$4 sm:$0xff]   ;;  %v11336_v33 = vld [vmem:[#allocation11 + $0x880] ss:$16 sps:$4 sm:$0xff]  }
 0x851   : > { %3874 = vmatpush1.bf16.msra.mxu0 %v13540_v9  ;;  %3987 = vmatpush1.bf16.msra.mxu1 %v13542_v44  ;;  %v11339_v58 = vld [vmem:[#allocation11 + $0xa80] ss:$16 sps:$4 sm:$0xff]   ;;  %v11344_v15 = vld [vmem:[#allocation11 + $0x864] ss:$16 sps:$4 sm:$0xff]  }
 0x852   : > { %3875 = vmatprep.subr.bf16.mxu0 %v13546_v16  ;;  %3988 = vmatprep.subr.bf16.mxu1 %v13548_v59  ;;  %v11347_v21 = vld [vmem:[#allocation11 + $0xa64] ss:$16 sps:$4 sm:$0xff]   ;;  %v11342_v11 = vld [vmem:[#allocation11 + $0x860] ss:$16 sps:$4 sm:$0xff]  }
 0x853   : > { %v11345_v8 = vld [vmem:[#allocation11 + $0xa60] ss:$16 sps:$4 sm:$0xff]   ;;  %v11350_v19 = vld [vmem:[#allocation11 + $0x844] ss:$16 sps:$4 sm:$0xff]  }
 0x854   : > { %v11353_v10 = vld [vmem:[#allocation11 + $0xa44] ss:$16 sps:$4 sm:$0xff]   ;;  %v11348_v6 = vld [vmem:[#allocation11 + $0x840] ss:$16 sps:$4 sm:$0xff]  }
 0x855   : > { %3876 = vmatpush1.bf16.msra.mxu0 %v15084_v18  ;;  %3989 = vmatpush1.bf16.msra.mxu1 %v15085_v30  ;;  %v12088_v45 = vld [vmem:[%s12670_s17 + $0x10] sm:$0xff]  }
 0x856   : > { %3877 = vmatprep.subr.bf16.mxu0 %v13554_v27  ;;  %3990 = vmatprep.subr.bf16.mxu1 %v13556_v5  ;;  %v11351_v25 = vld [vmem:[#allocation11 + $0xa40] ss:$16 sps:$4 sm:$0xff]   ;;  %v11356_v4 = vld [vmem:[#allocation11 + $0x824] ss:$16 sps:$4 sm:$0xff]  }
 0x857   : > { %v11359_v46 = vld [vmem:[#allocation11 + $0xa24] ss:$16 sps:$4 sm:$0xff]   ;;  %v11354_v62 = vld [vmem:[#allocation11 + $0x820] ss:$16 sps:$4 sm:$0xff]  }
 0x858   : > { %v11357_v63 = vld [vmem:[#allocation11 + $0xa20] ss:$16 sps:$4 sm:$0xff]  }
 0x859   : > { %3878 = vmatpush1.bf16.msra.mxu0 %v15086_v28  ;;  %3991 = vmatpush1.bf16.msra.mxu1 %v15087_v31 }
 0x85a   : > { %4761 = vmatprep.subr.bf16.mxu0 %v11320_v56  ;;  %4874 = vmatprep.subr.bf16.mxu1 %v11323_v12  ;;  %v11362_v56 = vld [vmem:[#allocation11 + $0x804] ss:$16 sps:$4 sm:$0xff]  }
 0x85b   : > { %v11365_v12 = vld [vmem:[#allocation11 + $0xa04] ss:$16 sps:$4 sm:$0xff]  }
 0x85c   : > { %3896 = vmatmul.mubr.bf16.vlgmr.msra.gmra.mxu0 %v12086_v26  ;;  %4009 = vmatmul.mubr.bf16.vlgmr.msra.gmra.mxu1 %v12086_v26  ;;  %v11371_v26 = vld [vmem:[#allocation11 + $0xbe4] ss:$16 sps:$4 sm:$0xff]  }
 0x85d   : > { %4762 = vmatpush1.bf16.msra.mxu0 %v11318_v61  ;;  %4875 = vmatpush1.bf16.msra.mxu1 %v11321_v34  ;;  %v12089_v61 = vld [vmem:[%s12670_s17 + $0x18] sm:$0xff]   ;;  %v11360_v34 = vld [vmem:[#allocation11 + $0x800] ss:$16 sps:$4 sm:$0xff]  }
 0x85e   : > { %4763 = vmatprep.subr.bf16.mxu0 %v11326_v13  ;;  %4876 = vmatprep.subr.bf16.mxu1 %v11329_v24  ;;  %v11363_v13 = vld [vmem:[#allocation11 + $0xa00] ss:$16 sps:$4 sm:$0xff]   ;;  %v11368_v24 = vld [vmem:[#allocation11 + $0x9e4] ss:$16 sps:$4 sm:$0xff]  }
 0x85f   : > { %3905 = vmatprep.mubr.bf16.mxu0 %v15088_v1  ;;  %4018 = vmatprep.mubr.bf16.mxu1 %v15088_v1 }
 0x861   : > { %4764 = vmatpush1.bf16.msra.mxu0 %v11324_v29  ;;  %4877 = vmatpush1.bf16.msra.mxu1 %v11327_v2  ;;  %v11366_v29 = vld [vmem:[#allocation11 + $0x9e0] ss:$16 sps:$4 sm:$0xff]  }
 0x862   : > { %4765 = vmatprep.subr.bf16.mxu0 %v11332_v49  ;;  %4878 = vmatprep.subr.bf16.mxu1 %v11335_v7  ;;  %v11369_v2 = vld [vmem:[#allocation11 + $0xbe0] ss:$16 sps:$4 sm:$0xff]   ;;  %v11374_v49 = vld [vmem:[#allocation11 + $0x9c4] ss:$16 sps:$4 sm:$0xff]  }
 0x863   : > { %v11377_v7 = vld [vmem:[#allocation11 + $0xbc4] ss:$16 sps:$4 sm:$0xff]  }
 0x864   : > { %3906 = vmatmul.mubr.bf16.gmra.mxu0 %v12087_v42  ;;  %4019 = vmatmul.mubr.bf16.gmra.mxu1 %v12087_v42  ;;  %v11383_v42 = vld [vmem:[#allocation11 + $0xba4] ss:$16 sps:$4 sm:$0xff]  }
 0x865   : > { %4766 = vmatpush1.bf16.msra.mxu0 %v11330_v39  ;;  %4879 = vmatpush1.bf16.msra.mxu1 %v11333_v3  ;;  %v12090_v39 = vld [vmem:[%s12670_s17 + $0x20] sm:$0xff]  }
 0x866   : > { %4767 = vmatprep.subr.bf16.mxu0 %v11338_v38  ;;  %4880 = vmatprep.subr.bf16.mxu1 %v11341_v22  ;;  %v11372_v3 = vld [vmem:[#allocation11 + $0x9c0] ss:$16 sps:$4 sm:$0xff]   ;;  %v11380_v22 = vld [vmem:[#allocation11 + $0x9a4] ss:$16 sps:$4 sm:$0xff]  }
 0x867   : > { %3915 = vmatprep.mubr.bf16.mxu0 %v15088_v1  ;;  %4028 = vmatprep.mubr.bf16.mxu1 %v15088_v1  ;;  %v11375_v38 = vld [vmem:[#allocation11 + $0xbc0] ss:$16 sps:$4 sm:$0xff]  }
 0x869   : > { %4768 = vmatpush1.bf16.msra.mxu0 %v11336_v33  ;;  %4881 = vmatpush1.bf16.msra.mxu1 %v11339_v58  ;;  %v11378_v33 = vld [vmem:[#allocation11 + $0x9a0] ss:$16 sps:$4 sm:$0xff]  }
 0x86a   : > { %4769 = vmatprep.subr.bf16.mxu0 %v11344_v15  ;;  %4882 = vmatprep.subr.bf16.mxu1 %v11347_v21  ;;  %v11381_v58 = vld [vmem:[#allocation11 + $0xba0] ss:$16 sps:$4 sm:$0xff]   ;;  %v11386_v15 = vld [vmem:[#allocation11 + $0x984] ss:$16 sps:$4 sm:$0xff]  }
 0x86b   : > { %v11389_v21 = vld [vmem:[#allocation11 + $0xb84] ss:$16 sps:$4 sm:$0xff]  }
 0x86c   : > { %3916 = vmatmul.mubr.bf16.gmra.mxu0 %v12088_v45  ;;  %4029 = vmatmul.mubr.bf16.gmra.mxu1 %v12088_v45  ;;  %v11395_v45 = vld [vmem:[#allocation11 + $0xb64] ss:$16 sps:$4 sm:$0xff]  }
 0x86d   : > { %4770 = vmatpush1.bf16.msra.mxu0 %v11342_v11  ;;  %4883 = vmatpush1.bf16.msra.mxu1 %v11345_v8  ;;  %v12091_v11 = vld [vmem:[%s12670_s17 + $0x28] sm:$0xff]   ;;  %v11384_v8 = vld [vmem:[#allocation11 + $0x980] ss:$16 sps:$4 sm:$0xff]  }
 0x86e   : > { %4771 = vmatprep.subr.bf16.mxu0 %v11350_v19  ;;  %4884 = vmatprep.subr.bf16.mxu1 %v11353_v10  ;;  %v11387_v19 = vld [vmem:[#allocation11 + $0xb80] ss:$16 sps:$4 sm:$0xff]   ;;  %v11392_v10 = vld [vmem:[#allocation11 + $0x964] ss:$16 sps:$4 sm:$0xff]  }
 0x86f   : > { %3925 = vmatprep.mubr.bf16.mxu0 %v15088_v1  ;;  %4038 = vmatprep.mubr.bf16.mxu1 %v15088_v1 }
 0x871   : > { %4772 = vmatpush1.bf16.msra.mxu0 %v11348_v6  ;;  %4885 = vmatpush1.bf16.msra.mxu1 %v11351_v25  ;;  %v11390_v6 = vld [vmem:[#allocation11 + $0x960] ss:$16 sps:$4 sm:$0xff]  }
 0x872   : > { %4773 = vmatprep.subr.bf16.mxu0 %v11356_v4  ;;  %4886 = vmatprep.subr.bf16.mxu1 %v11359_v46  ;;  %v11393_v25 = vld [vmem:[#allocation11 + $0xb60] ss:$16 sps:$4 sm:$0xff]   ;;  %v11398_v4 = vld [vmem:[#allocation11 + $0x944] ss:$16 sps:$4 sm:$0xff]  }
 0x873   : > { %v11401_v46 = vld [vmem:[#allocation11 + $0xb44] ss:$16 sps:$4 sm:$0xff]  }
 0x874   : > { %3926 = vmatmul.mubr.bf16.gmra.mxu0 %v12089_v61  ;;  %4039 = vmatmul.mubr.bf16.gmra.mxu1 %v12089_v61  ;;  %v11407_v61 = vld [vmem:[#allocation11 + $0xb24] ss:$16 sps:$4 sm:$0xff]  }
 0x875   : > { %4774 = vmatpush1.bf16.msra.mxu0 %v11354_v62  ;;  %4887 = vmatpush1.bf16.msra.mxu1 %v11357_v63  ;;  %v12092_v62 = vld [vmem:[%s12670_s17 + $0x30] sm:$0xff]  }
 0x876   : > { %4775 = vmatprep.subr.bf16.mxu0 %v11362_v56  ;;  %4888 = vmatprep.subr.bf16.mxu1 %v11365_v12  ;;  %v11396_v63 = vld [vmem:[#allocation11 + $0x940] ss:$16 sps:$4 sm:$0xff]   ;;  %v11404_v12 = vld [vmem:[#allocation11 + $0x924] ss:$16 sps:$4 sm:$0xff]  }
 0x877   : > { %3935 = vmatprep.mubr.bf16.mxu0 %v15088_v1  ;;  %4048 = vmatprep.mubr.bf16.mxu1 %v15088_v1  ;;  %v11399_v56 = vld [vmem:[#allocation11 + $0xb40] ss:$16 sps:$4 sm:$0xff]  }
 0x879   : > { %4776 = vmatpush1.bf16.msra.mxu0 %v11360_v34  ;;  %4889 = vmatpush1.bf16.msra.mxu1 %v11363_v13  ;;  %v11402_v34 = vld [vmem:[#allocation11 + $0x920] ss:$16 sps:$4 sm:$0xff]  }
 0x87a   : > { %4777 = vmatprep.subr.bf16.mxu0 %v11368_v24  ;;  %4890 = vmatprep.subr.bf16.mxu1 %v11371_v26  ;;  %v11405_v13 = vld [vmem:[#allocation11 + $0xb20] ss:$16 sps:$4 sm:$0xff]   ;;  %v11410_v24 = vld [vmem:[#allocation11 + $0x904] ss:$16 sps:$4 sm:$0xff]  }
 0x87b   : > { %v11413_v26 = vld [vmem:[#allocation11 + $0xb04] ss:$16 sps:$4 sm:$0xff]  }
 0x87c   : > { %3936 = vmatmul.mubr.bf16.gmra.mxu0 %v12090_v39  ;;  %4049 = vmatmul.mubr.bf16.gmra.mxu1 %v12090_v39  ;;  %v11419_v39 = vld [vmem:[#allocation11 + $0xaec] ss:$16 sps:$4 sm:$0xff]  }
 0x87d   : > { %4778 = vmatpush2.bf16.msra.mxu0 %v11366_v29  ;;  %4891 = vmatpush2.bf16.msra.mxu1 %v11369_v2  ;;  %v12093_v29 = vld [vmem:[%s12670_s17 + $0x38] sm:$0xff]   ;;  %v11408_v2 = vld [vmem:[#allocation11 + $0x900] ss:$16 sps:$4 sm:$0xff]  }
 0x87e   : > { %4779 = vmatprep.subr.bf16.mxu0 %v11374_v49  ;;  %4892 = vmatprep.subr.bf16.mxu1 %v11377_v7  ;;  %v11411_v49 = vld [vmem:[#allocation11 + $0xb00] ss:$16 sps:$4 sm:$0xff]   ;;  %v11416_v7 = vld [vmem:[#allocation11 + $0x8ec] ss:$16 sps:$4 sm:$0xff]  }
 0x87f   : > { %3945 = vmatprep.mubr.bf16.mxu0 %v15088_v1  ;;  %4058 = vmatprep.mubr.bf16.mxu1 %v15088_v1 }
 0x881   : > { %4780 = vmatpush2.bf16.msra.mxu0 %v11372_v3  ;;  %4893 = vmatpush2.bf16.msra.mxu1 %v11375_v38  ;;  %v11414_v3 = vld [vmem:[#allocation11 + $0x8e8] ss:$16 sps:$4 sm:$0xff]  }
 0x882   : > { %4781 = vmatprep.subr.bf16.mxu0 %v11380_v22  ;;  %4894 = vmatprep.subr.bf16.mxu1 %v11383_v42  ;;  %v11417_v38 = vld [vmem:[#allocation11 + $0xae8] ss:$16 sps:$4 sm:$0xff]   ;;  %v11422_v22 = vld [vmem:[#allocation11 + $0x8cc] ss:$16 sps:$4 sm:$0xff]  }
 0x883   : > { %v11425_v42 = vld [vmem:[#allocation11 + $0xacc] ss:$16 sps:$4 sm:$0xff]  }
 0x884   : > { %3946 = vmatmul.mubr.bf16.gmra.mxu0 %v12091_v11  ;;  %4059 = vmatmul.mubr.bf16.gmra.mxu1 %v12091_v11  ;;  %v11426_v11 = vld [vmem:[#allocation11 + $0x8a8] ss:$16 sps:$4 sm:$0xff]  }
 0x885   : > { %4782 = vmatpush2.bf16.msra.mxu0 %v11378_v33  ;;  %4895 = vmatpush2.bf16.msra.mxu1 %v11381_v58  ;;  %v11420_v33 = vld [vmem:[#allocation11 + $0x8c8] ss:$16 sps:$4 sm:$0xff]  }
 0x886   : > { %4783 = vmatprep.subr.bf16.mxu0 %v11386_v15  ;;  %4896 = vmatprep.subr.bf16.mxu1 %v11389_v21  ;;  %v11423_v58 = vld [vmem:[#allocation11 + $0xac8] ss:$16 sps:$4 sm:$0xff]   ;;  %v11428_v15 = vld [vmem:[#allocation11 + $0x8ac] ss:$16 sps:$4 sm:$0xff]  }
 0x887   : > { %3955 = vmatprep.mubr.bf16.mxu0 %v15088_v1  ;;  %4068 = vmatprep.mubr.bf16.mxu1 %v15088_v1  ;;  %v11431_v21 = vld [vmem:[#allocation11 + $0xaac] ss:$16 sps:$4 sm:$0xff]  }
 0x889   : > { %4784 = vmatpush2.bf16.msra.mxu0 %v11384_v8  ;;  %4897 = vmatpush2.bf16.msra.mxu1 %v11387_v19  ;;  %v11429_v8 = vld [vmem:[#allocation11 + $0xaa8] ss:$16 sps:$4 sm:$0xff]   ;;  %v11434_v19 = vld [vmem:[#allocation11 + $0x88c] ss:$16 sps:$4 sm:$0xff]  }
 0x88a   : > { %4785 = vmatprep.subr.bf16.mxu0 %v11392_v10  ;;  %4898 = vmatprep.subr.bf16.mxu1 %v11395_v45  ;;  %v11437_v10 = vld [vmem:[#allocation11 + $0xa8c] ss:$16 sps:$4 sm:$0xff]   ;;  %v11432_v45 = vld [vmem:[#allocation11 + $0x888] ss:$16 sps:$4 sm:$0xff]  }
 0x88c   : > { %3956 = vmatmul.mubr.bf16.gmra.mxu0 %v12092_v62  ;;  %4069 = vmatmul.mubr.bf16.gmra.mxu1 %v12092_v62  ;;  %v11441_v62 = vld [vmem:[#allocation11 + $0xa68] ss:$16 sps:$4 sm:$0xff]  }
 0x88d   : > { %4786 = vmatpush2.bf16.msra.mxu0 %v11390_v6  ;;  %4899 = vmatpush2.bf16.msra.mxu1 %v11393_v25  ;;  %v11435_v6 = vld [vmem:[#allocation11 + $0xa88] ss:$16 sps:$4 sm:$0xff]   ;;  %v11440_v25 = vld [vmem:[#allocation11 + $0x86c] ss:$16 sps:$4 sm:$0xff]  }
 0x88e   : > { %4787 = vmatprep.subr.bf16.mxu0 %v11398_v4  ;;  %4900 = vmatprep.subr.bf16.mxu1 %v11401_v46  ;;  %v11443_v4 = vld [vmem:[#allocation11 + $0xa6c] ss:$16 sps:$4 sm:$0xff]   ;;  %v11438_v46 = vld [vmem:[#allocation11 + $0x868] ss:$16 sps:$4 sm:$0xff]  }
 0x88f   : > { %3965 = vmatprep.mubr.bf16.mxu0 %v15088_v1  ;;  %4078 = vmatprep.mubr.bf16.mxu1 %v15088_v1 }
 0x891   : > { %4788 = vmatpush2.bf16.msra.mxu0 %v11396_v63  ;;  %4901 = vmatpush2.bf16.msra.mxu1 %v11399_v56  ;;  %v11446_v63 = vld [vmem:[#allocation11 + $0x84c] ss:$16 sps:$4 sm:$0xff]  }
 0x892   : > { %4789 = vmatprep.subr.bf16.mxu0 %v11404_v12  ;;  %4902 = vmatprep.subr.bf16.mxu1 %v11407_v61  ;;  %v11449_v56 = vld [vmem:[#allocation11 + $0xa4c] ss:$16 sps:$4 sm:$0xff]   ;;  %v11444_v12 = vld [vmem:[#allocation11 + $0x848] ss:$16 sps:$4 sm:$0xff]  }
 0x893   : > { %v11447_v61 = vld [vmem:[#allocation11 + $0xa48] ss:$16 sps:$4 sm:$0xff]  }
 0x894   : > { %3966 = vmatmul.mubr.bf16.gmra.mxu0 %v12093_v29  ;;  %4079 = vmatmul.mubr.bf16.gmra.mxu1 %v12093_v29  ;;  %v11458_v29 = vld [vmem:[#allocation11 + $0x80c] ss:$16 sps:$4 sm:$0xff]  }
 0x895   : > { %4790 = vmatpush2.bf16.msra.mxu0 %v11402_v34  ;;  %4793 = vmatprep.mubr.bf16.mxu0 %v13554_v27  ;;  %v11452_v34 = vld [vmem:[#allocation11 + $0x82c] ss:$16 sps:$4 sm:$0xff]  }
 0x896   : > { %4903 = vmatpush2.bf16.msra.mxu1 %v11405_v13  ;;  %4906 = vmatprep.mubr.bf16.mxu1 %v13556_v5  ;;  %v11455_v13 = vld [vmem:[#allocation11 + $0xa2c] ss:$16 sps:$4 sm:$0xff]  }
 0x897   : > { %4791 = vmatprep.subr.bf16.mxu0 %v11410_v24  ;;  %4904 = vmatprep.subr.bf16.mxu1 %v11413_v26  ;;  %v11450_v24 = vld [vmem:[#allocation11 + $0x828] ss:$16 sps:$4 sm:$0xff]  }
 0x898   : > { %v11453_v26 = vld [vmem:[#allocation11 + $0xa28] ss:$16 sps:$4 sm:$0xff]  }
 0x899   : > { %4792 = vmatpush2.bf16.msra.mxu0 %v11408_v2  ;;  %v11461_v2 = vld [vmem:[#allocation11 + $0xa0c] ss:$16 sps:$4 sm:$0xff]  }
 0x89a   : > { %4905 = vmatpush2.bf16.msra.mxu1 %v11411_v49  ;;  %4987 = vmatprep.subr.bf16.mxu0 %v11416_v7  ;;  %v11456_v49 = vld [vmem:[#allocation11 + $0x808] ss:$16 sps:$4 sm:$0xff]  }
 0x89b   : > { %5100 = vmatprep.subr.bf16.mxu1 %v11419_v39  ;;  %v11459_v7 = vld [vmem:[#allocation11 + $0xa08] ss:$16 sps:$4 sm:$0xff]   ;;  %v11464_v39 = vld [vmem:[#allocation11 + $0x9ec] ss:$16 sps:$4 sm:$0xff]  }
 0x89c   : > { %4794 = vmatmul.mubr.bf16.vlgmr.msra.gmra.mxu0 %v15086_v28 }
 0x89d   : > { %4907 = vmatmul.mubr.bf16.vlgmr.msra.gmra.mxu1 %v15087_v31  ;;  %4803 = vmatprep.mubr.bf16.mxu0 %v13546_v16 }
 0x89e   : > { %4916 = vmatprep.mubr.bf16.mxu1 %v13548_v59  ;;  %4988 = vmatpush1.bf16.msra.mxu0 %v11414_v3  ;;  %v11467_v3 = vld [vmem:[#allocation11 + $0xbec] ss:$16 sps:$4 sm:$0xff]  }
 0x89f   : > { %5101 = vmatpush1.bf16.msra.mxu1 %v11417_v38  ;;  %4989 = vmatprep.subr.bf16.mxu0 %v11422_v22  ;;  %v11462_v38 = vld [vmem:[#allocation11 + $0x9e8] ss:$16 sps:$4 sm:$0xff]  }
 0x8a0   : > { %5102 = vmatprep.subr.bf16.mxu1 %v11425_v42  ;;  %v11465_v22 = vld [vmem:[#allocation11 + $0xbe8] ss:$16 sps:$4 sm:$0xff]   ;;  %v11470_v42 = vld [vmem:[#allocation11 + $0x9cc] ss:$16 sps:$4 sm:$0xff]  }
 0x8a2   : > { %4990 = vmatpush1.bf16.msra.mxu0 %v11420_v33  ;;  %v11473_v33 = vld [vmem:[#allocation11 + $0xbcc] ss:$16 sps:$4 sm:$0xff]  }
 0x8a3   : > { %5103 = vmatpush1.bf16.msra.mxu1 %v11423_v58  ;;  %4991 = vmatprep.subr.bf16.mxu0 %v11428_v15  ;;  %v11468_v58 = vld [vmem:[#allocation11 + $0x9c8] ss:$16 sps:$4 sm:$0xff]  }
 0x8a4   : > { %4804 = vmatmul.mubr.bf16.gmra.mxu0 %v15084_v18  ;;  %5104 = vmatprep.subr.bf16.mxu1 %v11431_v21  ;;  %v11471_v15 = vld [vmem:[#allocation11 + $0xbc8] ss:$16 sps:$4 sm:$0xff]   ;;  %v11476_v21 = vld [vmem:[#allocation11 + $0x9ac] ss:$16 sps:$4 sm:$0xff]  }
 0x8a5   : > { %4917 = vmatmul.mubr.bf16.gmra.mxu1 %v15085_v30  ;;  %4813 = vmatprep.mubr.bf16.mxu0 %v13528_v47 }
 0x8a6   : > { %4926 = vmatprep.mubr.bf16.mxu1 %v13530_v23  ;;  %4992 = vmatpush1.bf16.msra.mxu0 %v11426_v11  ;;  %v11479_v11 = vld [vmem:[#allocation11 + $0xbac] ss:$16 sps:$4 sm:$0xff]  }
 0x8a7   : > { %5105 = vmatpush1.bf16.msra.mxu1 %v11429_v8  ;;  %4993 = vmatprep.subr.bf16.mxu0 %v11434_v19  ;;  %v11474_v8 = vld [vmem:[#allocation11 + $0x9a8] ss:$16 sps:$4 sm:$0xff]  }
 0x8a8   : > { %5106 = vmatprep.subr.bf16.mxu1 %v11437_v10  ;;  %v11477_v19 = vld [vmem:[#allocation11 + $0xba8] ss:$16 sps:$4 sm:$0xff]   ;;  %v11482_v10 = vld [vmem:[#allocation11 + $0x98c] ss:$16 sps:$4 sm:$0xff]  }
 0x8aa   : > { %4994 = vmatpush1.bf16.msra.mxu0 %v11432_v45  ;;  %v11485_v45 = vld [vmem:[#allocation11 + $0xb8c] ss:$16 sps:$4 sm:$0xff]  }
 0x8ab   : > { %5107 = vmatpush1.bf16.msra.mxu1 %v11435_v6  ;;  %4995 = vmatprep.subr.bf16.mxu0 %v11440_v25  ;;  %v11480_v6 = vld [vmem:[#allocation11 + $0x988] ss:$16 sps:$4 sm:$0xff]  }
 0x8ac   : > { %4814 = vmatmul.mubr.bf16.gmra.mxu0 %v13540_v9  ;;  %5108 = vmatprep.subr.bf16.mxu1 %v11443_v4  ;;  %v11483_v25 = vld [vmem:[#allocation11 + $0xb88] ss:$16 sps:$4 sm:$0xff]   ;;  %v11488_v4 = vld [vmem:[#allocation11 + $0x96c] ss:$16 sps:$4 sm:$0xff]  }
 0x8ad   : > { %4927 = vmatmul.mubr.bf16.gmra.mxu1 %v13542_v44  ;;  %4823 = vmatprep.mubr.bf16.mxu0 %v13504_v52 }
 0x8ae   : > { %4936 = vmatprep.mubr.bf16.mxu1 %v13506_v35  ;;  %4996 = vmatpush1.bf16.msra.mxu0 %v11438_v46  ;;  %v11491_v46 = vld [vmem:[#allocation11 + $0xb6c] ss:$16 sps:$4 sm:$0xff]  }
 0x8af   : > { %5109 = vmatpush1.bf16.msra.mxu1 %v11441_v62  ;;  %4997 = vmatprep.subr.bf16.mxu0 %v11446_v63  ;;  %v11486_v62 = vld [vmem:[#allocation11 + $0x968] ss:$16 sps:$4 sm:$0xff]  }
 0x8b0   : > { %5110 = vmatprep.subr.bf16.mxu1 %v11449_v56  ;;  %v11489_v63 = vld [vmem:[#allocation11 + $0xb68] ss:$16 sps:$4 sm:$0xff]   ;;  %v11494_v56 = vld [vmem:[#allocation11 + $0x94c] ss:$16 sps:$4 sm:$0xff]  }
 0x8b2   : > { %4998 = vmatpush1.bf16.msra.mxu0 %v11444_v12  ;;  %v11497_v12 = vld [vmem:[#allocation11 + $0xb4c] ss:$16 sps:$4 sm:$0xff]  }
 0x8b3   : > { %5111 = vmatpush1.bf16.msra.mxu1 %v11447_v61  ;;  %4999 = vmatprep.subr.bf16.mxu0 %v11452_v34  ;;  %v11492_v61 = vld [vmem:[#allocation11 + $0x948] ss:$16 sps:$4 sm:$0xff]  }
 0x8b4   : > { %4824 = vmatmul.mubr.bf16.gmra.mxu0 %v13522_v51  ;;  %5112 = vmatprep.subr.bf16.mxu1 %v11455_v13  ;;  %v11495_v34 = vld [vmem:[#allocation11 + $0xb48] ss:$16 sps:$4 sm:$0xff]   ;;  %v11500_v13 = vld [vmem:[#allocation11 + $0x92c] ss:$16 sps:$4 sm:$0xff]  }
 0x8b5   : > { %4937 = vmatmul.mubr.bf16.gmra.mxu1 %v13524_v37  ;;  %4833 = vmatprep.mubr.bf16.mxu0 %v13480_v14 }
 0x8b6   : > { %4946 = vmatprep.mubr.bf16.mxu1 %v13482_v54  ;;  %5000 = vmatpush1.bf16.msra.mxu0 %v11450_v24  ;;  %v11503_v24 = vld [vmem:[#allocation11 + $0xb2c] ss:$16 sps:$4 sm:$0xff]  }
 0x8b7   : > { %5113 = vmatpush1.bf16.msra.mxu1 %v11453_v26  ;;  %5001 = vmatprep.subr.bf16.mxu0 %v11458_v29  ;;  %v11498_v26 = vld [vmem:[#allocation11 + $0x928] ss:$16 sps:$4 sm:$0xff]  }
 0x8b8   : > { %5114 = vmatprep.subr.bf16.mxu1 %v11461_v2  ;;  %v11501_v29 = vld [vmem:[#allocation11 + $0xb28] ss:$16 sps:$4 sm:$0xff]   ;;  %v11506_v2 = vld [vmem:[#allocation11 + $0x90c] ss:$16 sps:$4 sm:$0xff]  }
 0x8ba   : > { %5002 = vmatpush1.bf16.msra.mxu0 %v11456_v49  ;;  %v11509_v49 = vld [vmem:[#allocation11 + $0xb0c] ss:$16 sps:$4 sm:$0xff]  }
 0x8bb   : > { %5115 = vmatpush1.bf16.msra.mxu1 %v11459_v7  ;;  %5003 = vmatprep.subr.bf16.mxu0 %v11464_v39  ;;  %v11504_v7 = vld [vmem:[#allocation11 + $0x908] ss:$16 sps:$4 sm:$0xff]  }
 0x8bc   : > { %4834 = vmatmul.mubr.bf16.gmra.mxu0 %v13498_v0  ;;  %5116 = vmatprep.subr.bf16.mxu1 %v11467_v3  ;;  %v11507_v39 = vld [vmem:[#allocation11 + $0xb08] ss:$16 sps:$4 sm:$0xff]   ;;  %v11512_v3 = vld [vmem:[#allocation11 + $0x4e4] ss:$16 sps:$4 sm:$0xff]  }
 0x8bd   : > { %4947 = vmatmul.mubr.bf16.gmra.mxu1 %v13500_v41  ;;  %4843 = vmatprep.mubr.bf16.mxu0 %v13456_v60 }
 0x8be   : > { %4956 = vmatprep.mubr.bf16.mxu1 %v13458_v36  ;;  %5004 = vmatpush2.bf16.msra.mxu0 %v11462_v38  ;;  %v11515_v38 = vld [vmem:[#allocation11 + $0x6e4] ss:$16 sps:$4 sm:$0xff]  }
 0x8bf   : > { %5117 = vmatpush2.bf16.msra.mxu1 %v11465_v22  ;;  %5005 = vmatprep.subr.bf16.mxu0 %v11470_v42  ;;  %v11510_v22 = vld [vmem:[#allocation11 + $0x4e0] ss:$16 sps:$4 sm:$0xff]  }
 0x8c0   : > { %5118 = vmatprep.subr.bf16.mxu1 %v11473_v33  ;;  %v11513_v42 = vld [vmem:[#allocation11 + $0x6e0] ss:$16 sps:$4 sm:$0xff]   ;;  %v11518_v33 = vld [vmem:[#allocation11 + $0x4c4] ss:$16 sps:$4 sm:$0xff]  }
 0x8c2   : > { %5006 = vmatpush2.bf16.msra.mxu0 %v11468_v58  ;;  %v11519_v58 = vld [vmem:[#allocation11 + $0x6c0] ss:$16 sps:$4 sm:$0xff]  }
 0x8c3   : > { %5119 = vmatpush2.bf16.msra.mxu1 %v11471_v15  ;;  %5007 = vmatprep.subr.bf16.mxu0 %v11476_v21  ;;  %v11524_v15 = vld [vmem:[#allocation11 + $0x4a4] ss:$16 sps:$4 sm:$0xff]  }
 0x8c4   : > { %4844 = vmatmul.mubr.bf16.gmra.mxu0 %v13474_v57  ;;  %5120 = vmatprep.subr.bf16.mxu1 %v11479_v11  ;;  %v11527_v21 = vld [vmem:[#allocation11 + $0x6a4] ss:$16 sps:$4 sm:$0xff]   ;;  %v11522_v11 = vld [vmem:[#allocation11 + $0x4a0] ss:$16 sps:$4 sm:$0xff]  }
 0x8c5   : > { %4957 = vmatmul.mubr.bf16.gmra.mxu1 %v13476_v40  ;;  %4853 = vmatprep.mubr.bf16.mxu0 %v13430_v20 }
 0x8c6   : > { %4966 = vmatprep.mubr.bf16.mxu1 %v13432_v43  ;;  %5008 = vmatpush2.bf16.msra.mxu0 %v11474_v8  ;;  %v11530_v8 = vld [vmem:[#allocation11 + $0x484] ss:$16 sps:$4 sm:$0xff]  }
 0x8c7   : > { %5121 = vmatpush2.bf16.msra.mxu1 %v11477_v19  ;;  %5009 = vmatprep.subr.bf16.mxu0 %v11482_v10  ;;  %v11536_v19 = vld [vmem:[#allocation11 + $0x464] ss:$16 sps:$4 sm:$0xff]  }
 0x8c8   : > { %5122 = vmatprep.subr.bf16.mxu1 %v11485_v45  ;;  %v11539_v10 = vld [vmem:[#allocation11 + $0x664] ss:$16 sps:$4 sm:$0xff]   ;;  %v11534_v45 = vld [vmem:[#allocation11 + $0x460] ss:$16 sps:$4 sm:$0xff]  }
 0x8ca   : > { %5010 = vmatpush2.bf16.msra.mxu0 %v11480_v6  ;;  %v11542_v6 = vld [vmem:[#allocation11 + $0x444] ss:$16 sps:$4 sm:$0xff]  }
 0x8cb   : > { %5123 = vmatpush2.bf16.msra.mxu1 %v11483_v25  ;;  %5011 = vmatprep.subr.bf16.mxu0 %v11488_v4  ;;  %v11548_v25 = vld [vmem:[#allocation11 + $0x424] ss:$16 sps:$4 sm:$0xff]  }
 0x8cc   : > { %4854 = vmatmul.mubr.bf16.gmra.mxu0 %v13450_v32  ;;  %5124 = vmatprep.subr.bf16.mxu1 %v11491_v46  ;;  %v11551_v4 = vld [vmem:[#allocation11 + $0x624] ss:$16 sps:$4 sm:$0xff]   ;;  %v11546_v46 = vld [vmem:[#allocation11 + $0x420] ss:$16 sps:$4 sm:$0xff]  }
 0x8cd   : > { %4967 = vmatmul.mubr.bf16.gmra.mxu1 %v13452_v48  ;;  %4863 = vmatprep.mubr.bf16.mxu0 %v13418_v17 }
 0x8ce   : > { %4976 = vmatprep.mubr.bf16.mxu1 %v13420_v50  ;;  %5012 = vmatpush2.bf16.msra.mxu0 %v11486_v62  ;;  %v11554_v62 = vld [vmem:[#allocation11 + $0x404] ss:$16 sps:$4 sm:$0xff]  }
 0x8cf   : > { %5125 = vmatpush2.bf16.msra.mxu1 %v11489_v63  ;;  %5013 = vmatprep.subr.bf16.mxu0 %v11494_v56  ;;  %v11560_v63 = vld [vmem:[#allocation11 + $0x5e4] ss:$16 sps:$4 sm:$0xff]  }
 0x8d0   : > { %5126 = vmatprep.subr.bf16.mxu1 %v11497_v12  ;;  %v11563_v56 = vld [vmem:[#allocation11 + $0x7e4] ss:$16 sps:$4 sm:$0xff]   ;;  %v11558_v12 = vld [vmem:[#allocation11 + $0x5e0] ss:$16 sps:$4 sm:$0xff]  }
 0x8d2   : > { %5014 = vmatpush2.bf16.msra.mxu0 %v11492_v61  ;;  %v11566_v61 = vld [vmem:[#allocation11 + $0x5c4] ss:$16 sps:$4 sm:$0xff]  }
 0x8d3   : > { %5127 = vmatpush2.bf16.msra.mxu1 %v11495_v34  ;;  %5015 = vmatprep.subr.bf16.mxu0 %v11500_v13  ;;  %v11572_v34 = vld [vmem:[#allocation11 + $0x5a4] ss:$16 sps:$4 sm:$0xff]  }
 0x8d4   : > { %4864 = vmatmul.mubr.bf16.gmra.mxu0 %v13422_v53  ;;  %5128 = vmatprep.subr.bf16.mxu1 %v11503_v24  ;;  %v11575_v13 = vld [vmem:[#allocation11 + $0x7a4] ss:$16 sps:$4 sm:$0xff]   ;;  %v11570_v24 = vld [vmem:[#allocation11 + $0x5a0] ss:$16 sps:$4 sm:$0xff]  }
 0x8d5   : > { %4977 = vmatmul.mubr.bf16.gmra.mxu1 %v13424_v55  ;;  %5019 = vmatprep.mubr.bf16.mxu0 %v13554_v27  ;;  %v11521_v27 = vld [vmem:[#allocation11 + $0x6c4] ss:$16 sps:$4 sm:$0xff]  }
 0x8d6   : > { %5016 = vmatpush2.bf16.msra.mxu0 %v11498_v26  ;;  %5132 = vmatprep.mubr.bf16.mxu1 %v13556_v5  ;;  %v11516_v5 = vld [vmem:[#allocation11 + $0x4c0] ss:$16 sps:$4 sm:$0xff]   ;;  %v11578_v26 = vld [vmem:[#allocation11 + $0x584] ss:$16 sps:$4 sm:$0xff]  }
 0x8d7   : > { %5129 = vmatpush2.bf16.msra.mxu1 %v11501_v29  ;;  %5017 = vmatprep.subr.bf16.mxu0 %v11506_v2  ;;  %v11584_v29 = vld [vmem:[#allocation11 + $0x564] ss:$16 sps:$4 sm:$0xff]  }
 0x8d8   : > { %5130 = vmatprep.subr.bf16.mxu1 %v11509_v49  ;;  %v11587_v2 = vld [vmem:[#allocation11 + $0x764] ss:$16 sps:$4 sm:$0xff]   ;;  %v11582_v49 = vld [vmem:[#allocation11 + $0x560] ss:$16 sps:$4 sm:$0xff]  }
 0x8da   : > { %5018 = vmatpush2.bf16.msra.mxu0 %v11504_v7  ;;  %v11590_v7 = vld [vmem:[#allocation11 + $0x544] ss:$16 sps:$4 sm:$0xff]  }
 0x8db   : > { %5131 = vmatpush2.bf16.msra.mxu1 %v11507_v39  ;;  %5853 = vmatprep.subr.bf16.mxu0 %v11512_v3  ;;  %v11596_v39 = vld [vmem:[#allocation11 + $0x524] ss:$16 sps:$4 sm:$0xff]  }
 0x8dc   : > { %5966 = vmatprep.subr.bf16.mxu1 %v11515_v38  ;;  %v11599_v3 = vld [vmem:[#allocation11 + $0x724] ss:$16 sps:$4 sm:$0xff]   ;;  %v11594_v38 = vld [vmem:[#allocation11 + $0x520] ss:$16 sps:$4 sm:$0xff]  }
 0x8dd   : > { %5020 = vmatmul.mubr.bf16.vlgmr.msra.gmra.mxu0 %v15086_v28  ;;  %v11525_v28 = vld [vmem:[#allocation11 + $0x6a0] ss:$16 sps:$4 sm:$0xff]  }
 0x8de   : > { %5133 = vmatmul.mubr.bf16.vlgmr.msra.gmra.mxu1 %v15087_v31  ;;  %5029 = vmatprep.mubr.bf16.mxu0 %v13546_v16  ;;  %v11533_v16 = vld [vmem:[#allocation11 + $0x684] ss:$16 sps:$4 sm:$0xff]   ;;  %v11531_v31 = vld [vmem:[#allocation11 + $0x680] ss:$16 sps:$4 sm:$0xff]  }
 0x8df   : > { %5142 = vmatprep.mubr.bf16.mxu1 %v13548_v59  ;;  %5854 = vmatpush1.bf16.msra.mxu0 %v11510_v22  ;;  %v11528_v59 = vld [vmem:[#allocation11 + $0x480] ss:$16 sps:$4 sm:$0xff]   ;;  %v11602_v22 = vld [vmem:[#allocation11 + $0x504] ss:$16 sps:$4 sm:$0xff]  }
 0x8e0   : > { %5967 = vmatpush1.bf16.msra.mxu1 %v11513_v42  ;;  %5855 = vmatprep.subr.bf16.mxu0 %v11518_v33  ;;  %v11608_v42 = vld [vmem:[#allocation11 + $0x4ec] ss:$16 sps:$4 sm:$0xff]  }
 0x8e1   : > { %5968 = vmatprep.subr.bf16.mxu1 %v11521_v27  ;;  %v11611_v33 = vld [vmem:[#allocation11 + $0x6ec] ss:$16 sps:$4 sm:$0xff]  }
 0x8e3   : > { %5856 = vmatpush1.bf16.msra.mxu0 %v11516_v5 }
 0x8e4   : > { %5969 = vmatpush1.bf16.msra.mxu1 %v11519_v58  ;;  %5857 = vmatprep.subr.bf16.mxu0 %v11524_v15 }
 0x8e5   : > { %5030 = vmatmul.mubr.bf16.gmra.mxu0 %v15084_v18  ;;  %5970 = vmatprep.subr.bf16.mxu1 %v11527_v21  ;;  %v11537_v18 = vld [vmem:[#allocation11 + $0x660] ss:$16 sps:$4 sm:$0xff]  }
 0x8e6   : > { %5143 = vmatmul.mubr.bf16.gmra.mxu1 %v15085_v30  ;;  %5039 = vmatprep.mubr.bf16.mxu0 %v13528_v47  ;;  %v11545_v47 = vld [vmem:[#allocation11 + $0x644] ss:$16 sps:$4 sm:$0xff]   ;;  %v11543_v30 = vld [vmem:[#allocation11 + $0x640] ss:$16 sps:$4 sm:$0xff]  }
 0x8e7   : > { %5152 = vmatprep.mubr.bf16.mxu1 %v13530_v23  ;;  %5858 = vmatpush1.bf16.msra.mxu0 %v11522_v11  ;;  %v11540_v23 = vld [vmem:[#allocation11 + $0x440] ss:$16 sps:$4 sm:$0xff]  }
 0x8e8   : > { %5971 = vmatpush1.bf16.msra.mxu1 %v11525_v28  ;;  %5859 = vmatprep.subr.bf16.mxu0 %v11530_v8 }
 0x8e9   : > { %5972 = vmatprep.subr.bf16.mxu1 %v11533_v16  ;;  %v11606_v16 = vld [vmem:[#allocation11 + $0x4e8] ss:$16 sps:$4 sm:$0xff]  }
 0x8eb   : > { %5860 = vmatpush1.bf16.msra.mxu0 %v11528_v59  ;;  %v11609_v59 = vld [vmem:[#allocation11 + $0x6e8] ss:$16 sps:$4 sm:$0xff]  }
 0x8ec   : > { %5973 = vmatpush1.bf16.msra.mxu1 %v11531_v31  ;;  %5861 = vmatprep.subr.bf16.mxu0 %v11536_v19 }
 0x8ed   : > { %5040 = vmatmul.mubr.bf16.gmra.mxu0 %v13540_v9  ;;  %5974 = vmatprep.subr.bf16.mxu1 %v11539_v10  ;;  %v11549_v9 = vld [vmem:[#allocation11 + $0x620] ss:$16 sps:$4 sm:$0xff]  }
 0x8ee   : > { %5153 = vmatmul.mubr.bf16.gmra.mxu1 %v13542_v44  ;;  %5049 = vmatprep.mubr.bf16.mxu0 %v13504_v52  ;;  %v11557_v52 = vld [vmem:[#allocation11 + $0x604] ss:$16 sps:$4 sm:$0xff]   ;;  %v11555_v44 = vld [vmem:[#allocation11 + $0x600] ss:$16 sps:$4 sm:$0xff]  }
 0x8ef   : > { %5162 = vmatprep.mubr.bf16.mxu1 %v13506_v35  ;;  %5862 = vmatpush1.bf16.msra.mxu0 %v11534_v45  ;;  %v11552_v35 = vld [vmem:[#allocation11 + $0x400] ss:$16 sps:$4 sm:$0xff]  }
 0x8f0   : > { %5975 = vmatpush1.bf16.msra.mxu1 %v11537_v18  ;;  %5863 = vmatprep.subr.bf16.mxu0 %v11542_v6  ;;  %v11614_v18 = vld [vmem:[#allocation11 + $0x4cc] ss:$16 sps:$4 sm:$0xff]  }
 0x8f1   : > { %5976 = vmatprep.subr.bf16.mxu1 %v11545_v47  ;;  %v11617_v6 = vld [vmem:[#allocation11 + $0x6cc] ss:$16 sps:$4 sm:$0xff]  }
 0x8f3   : > { %5864 = vmatpush1.bf16.msra.mxu0 %v11540_v23 }
 0x8f4   : > { %5977 = vmatpush1.bf16.msra.mxu1 %v11543_v30  ;;  %5865 = vmatprep.subr.bf16.mxu0 %v11548_v25  ;;  %v11612_v30 = vld [vmem:[#allocation11 + $0x4c8] ss:$16 sps:$4 sm:$0xff]  }
 0x8f5   : > { %5050 = vmatmul.mubr.bf16.gmra.mxu0 %v13522_v51  ;;  %5978 = vmatprep.subr.bf16.mxu1 %v11551_v4  ;;  %v11561_v51 = vld [vmem:[#allocation11 + $0x7e0] ss:$16 sps:$4 sm:$0xff]   ;;  %v11615_v25 = vld [vmem:[#allocation11 + $0x6c8] ss:$16 sps:$4 sm:$0xff]  }
 0x8f6   : > { %5163 = vmatmul.mubr.bf16.gmra.mxu1 %v13524_v37  ;;  %5059 = vmatprep.mubr.bf16.mxu0 %v13480_v14  ;;  %v11569_v14 = vld [vmem:[#allocation11 + $0x7c4] ss:$16 sps:$4 sm:$0xff]   ;;  %v11567_v37 = vld [vmem:[#allocation11 + $0x7c0] ss:$16 sps:$4 sm:$0xff]  }
 0x8f7   : > { %5172 = vmatprep.mubr.bf16.mxu1 %v13482_v54  ;;  %5866 = vmatpush1.bf16.msra.mxu0 %v11546_v46  ;;  %v11564_v54 = vld [vmem:[#allocation11 + $0x5c0] ss:$16 sps:$4 sm:$0xff]  }
 0x8f8   : > { %5979 = vmatpush1.bf16.msra.mxu1 %v11549_v9  ;;  %5867 = vmatprep.subr.bf16.mxu0 %v11554_v62  ;;  %v11620_v9 = vld [vmem:[#allocation11 + $0x4ac] ss:$16 sps:$4 sm:$0xff]  }
 0x8f9   : > { %5980 = vmatprep.subr.bf16.mxu1 %v11557_v52  ;;  %v11623_v62 = vld [vmem:[#allocation11 + $0x6ac] ss:$16 sps:$4 sm:$0xff]  }
 0x8fb   : > { %5868 = vmatpush1.bf16.msra.mxu0 %v11552_v35 }
 0x8fc   : > { %5981 = vmatpush1.bf16.msra.mxu1 %v11555_v44  ;;  %5869 = vmatprep.subr.bf16.mxu0 %v11560_v63 }
 0x8fd   : > { %5060 = vmatmul.mubr.bf16.gmra.mxu0 %v13498_v0  ;;  %5982 = vmatprep.subr.bf16.mxu1 %v11563_v56  ;;  %v11573_v0 = vld [vmem:[#allocation11 + $0x7a0] ss:$16 sps:$4 sm:$0xff]   ;;  %v11618_v56 = vld [vmem:[#allocation11 + $0x4a8] ss:$16 sps:$4 sm:$0xff]  }
 0x8fe   : > { %5173 = vmatmul.mubr.bf16.gmra.mxu1 %v13500_v41  ;;  %5069 = vmatprep.mubr.bf16.mxu0 %v13456_v60  ;;  %v11581_v60 = vld [vmem:[#allocation11 + $0x784] ss:$16 sps:$4 sm:$0xff]   ;;  %v11579_v41 = vld [vmem:[#allocation11 + $0x780] ss:$16 sps:$4 sm:$0xff]  }
 0x8ff   : > { %5182 = vmatprep.mubr.bf16.mxu1 %v13458_v36  ;;  %5870 = vmatpush2.bf16.msra.mxu0 %v11558_v12  ;;  %v11576_v36 = vld [vmem:[#allocation11 + $0x580] ss:$16 sps:$4 sm:$0xff]   ;;  %v11621_v12 = vld [vmem:[#allocation11 + $0x6a8] ss:$16 sps:$4 sm:$0xff]  }
 0x900   : > { %5983 = vmatpush2.bf16.msra.mxu1 %v11561_v51  ;;  %5871 = vmatprep.subr.bf16.mxu0 %v11566_v61 }
 0x901   : > { %5984 = vmatprep.subr.bf16.mxu1 %v11569_v14 }
 0x903   : > { %5872 = vmatpush2.bf16.msra.mxu0 %v11564_v54 }
 0x904   : > { %5985 = vmatpush2.bf16.msra.mxu1 %v11567_v37  ;;  %5873 = vmatprep.subr.bf16.mxu0 %v11572_v34  ;;  %v11626_v37 = vld [vmem:[#allocation11 + $0x48c] ss:$16 sps:$4 sm:$0xff]  }
 0x905   : > { %5070 = vmatmul.mubr.bf16.gmra.mxu0 %v13474_v57  ;;  %5986 = vmatprep.subr.bf16.mxu1 %v11575_v13  ;;  %v11585_v57 = vld [vmem:[#allocation11 + $0x760] ss:$16 sps:$4 sm:$0xff]   ;;  %v11629_v34 = vld [vmem:[#allocation11 + $0x68c] ss:$16 sps:$4 sm:$0xff]  }
 0x906   : > { %5183 = vmatmul.mubr.bf16.gmra.mxu1 %v13476_v40  ;;  %5079 = vmatprep.mubr.bf16.mxu0 %v13430_v20  ;;  %v11593_v20 = vld [vmem:[#allocation11 + $0x744] ss:$16 sps:$4 sm:$0xff]   ;;  %v11591_v40 = vld [vmem:[#allocation11 + $0x740] ss:$16 sps:$4 sm:$0xff]  }
 0x907   : > { %5192 = vmatprep.mubr.bf16.mxu1 %v13432_v43  ;;  %5874 = vmatpush2.bf16.msra.mxu0 %v11570_v24  ;;  %v11588_v43 = vld [vmem:[#allocation11 + $0x540] ss:$16 sps:$4 sm:$0xff]  }
 0x908   : > { %5987 = vmatpush2.bf16.msra.mxu1 %v11573_v0  ;;  %5875 = vmatprep.subr.bf16.mxu0 %v11578_v26  ;;  %v11624_v0 = vld [vmem:[#allocation11 + $0x488] ss:$16 sps:$4 sm:$0xff]  }
 0x909   : > { %5988 = vmatprep.subr.bf16.mxu1 %v11581_v60  ;;  %v11627_v26 = vld [vmem:[#allocation11 + $0x688] ss:$16 sps:$4 sm:$0xff]  }
 0x90b   : > { %5876 = vmatpush2.bf16.msra.mxu0 %v11576_v36 }
 0x90c   : > { %5989 = vmatpush2.bf16.msra.mxu1 %v11579_v41  ;;  %5877 = vmatprep.subr.bf16.mxu0 %v11584_v29  ;;  %v11632_v41 = vld [vmem:[#allocation11 + $0x46c] ss:$16 sps:$4 sm:$0xff]  }
 0x90d   : > { %5080 = vmatmul.mubr.bf16.gmra.mxu0 %v13450_v32  ;;  %5990 = vmatprep.subr.bf16.mxu1 %v11587_v2  ;;  %v11597_v32 = vld [vmem:[#allocation11 + $0x720] ss:$16 sps:$4 sm:$0xff]   ;;  %v11635_v29 = vld [vmem:[#allocation11 + $0x66c] ss:$16 sps:$4 sm:$0xff]  }
 0x90e   : > { %5193 = vmatmul.mubr.bf16.gmra.mxu1 %v13452_v48  ;;  %5089 = vmatprep.mubr.bf16.mxu0 %v13418_v17  ;;  %v11605_v17 = vld [vmem:[#allocation11 + $0x704] ss:$16 sps:$4 sm:$0xff]   ;;  %v11603_v48 = vld [vmem:[#allocation11 + $0x700] ss:$16 sps:$4 sm:$0xff]  }
 0x90f   : > { %5202 = vmatprep.mubr.bf16.mxu1 %v13420_v50  ;;  %5878 = vmatpush2.bf16.msra.mxu0 %v11582_v49  ;;  %v11600_v50 = vld [vmem:[#allocation11 + $0x500] ss:$16 sps:$4 sm:$0xff]  }
 0x910   : > { %5991 = vmatpush2.bf16.msra.mxu1 %v11585_v57  ;;  %5879 = vmatprep.subr.bf16.mxu0 %v11590_v7 }
 0x911   : > { %5992 = vmatprep.subr.bf16.mxu1 %v11593_v20  ;;  %v11630_v20 = vld [vmem:[#allocation11 + $0x468] ss:$16 sps:$4 sm:$0xff]  }
 0x913   : > { %5880 = vmatpush2.bf16.msra.mxu0 %v11588_v43  ;;  %v11633_v43 = vld [vmem:[#allocation11 + $0x668] ss:$16 sps:$4 sm:$0xff]  }
 0x914   : > { %5993 = vmatpush2.bf16.msra.mxu1 %v11591_v40  ;;  %5881 = vmatprep.subr.bf16.mxu0 %v11596_v39 }
 0x915   : > { %5090 = vmatmul.mubr.bf16.gmra.mxu0 %v13422_v53  ;;  %5994 = vmatprep.subr.bf16.mxu1 %v11599_v3 }
 0x916   : > { %5203 = vmatmul.mubr.bf16.gmra.mxu1 %v13424_v55 }
 0x917   : > { %5882 = vmatpush2.bf16.msra.mxu0 %v11594_v38 }
 0x918   : > { %5995 = vmatpush2.bf16.msra.mxu1 %v11597_v32  ;;  %5883 = vmatprep.subr.bf16.mxu0 %v11602_v22  ;;  %v11638_v32 = vld [vmem:[#allocation11 + $0x44c] ss:$16 sps:$4 sm:$0xff]  }
 0x919   : > { %5996 = vmatprep.subr.bf16.mxu1 %v11605_v17  ;;  %v11641_v22 = vld [vmem:[#allocation11 + $0x64c] ss:$16 sps:$4 sm:$0xff]  }
 0x91b   : > { %5884 = vmatpush2.bf16.msra.mxu0 %v11600_v50 }
 0x91c   : > { %v3897_v27 = vpop.f32.mrf.mxu0  ;;  %v4010_v5 = vpop.f32.mrf.mxu1  ;;  %5997 = vmatpush2.bf16.msra.mxu1 %v11603_v48  ;;  %6079 = vmatprep.subr.bf16.mxu0 %v11608_v42  ;;  %v11636_v48 = vld [vmem:[#allocation11 + $0x448] ss:$16 sps:$4 sm:$0xff]  }
 0x91d   : > { %6192 = vmatprep.subr.bf16.mxu1 %v11611_v33  ;;  %v11639_v42 = vld [vmem:[#allocation11 + $0x648] ss:$16 sps:$4 sm:$0xff]  }
 0x91e   : > { %v3899_v58 = vpop.f32.mrf.mxu0  ;;  %v4012_v53 = vpop.f32.mrf.mxu1 }
 0x920   : > { %v3901_v15 = vpop.f32.mrf.mxu0  ;;  %v4014_v21 = vpop.f32.mrf.mxu1 }
 0x921   : > { %v13654_v31 = vpack.c.bf16 %v3901_v15, %v3897_v27  ;;  %v13656_v19 = vpack.c.bf16 %v4014_v21, %v4010_v5  ;;  %v11644_v5 = vld [vmem:[#allocation11 + $0x42c] ss:$16 sps:$4 sm:$0xff]  }
 0x922   : > { %v3903_v11 = vpop.f32.mrf.mxu0  ;;  %v4016_v55 = vpop.f32.mrf.mxu1 }
 0x923   : > { %v13650_v28 = vpack.c.bf16 %v3903_v11, %v3899_v58  ;;  %v13652_v8 = vpack.c.bf16 %v4016_v55, %v4012_v53  ;;  %v11647_v58 = vld [vmem:[#allocation11 + $0x62c] ss:$16 sps:$4 sm:$0xff]   ;;  %v11642_v55 = vld [vmem:[#allocation11 + $0x428] ss:$16 sps:$4 sm:$0xff]  }
 0x924   : > { %v3907_v10 = vpop.f32.mrf.mxu0  ;;  %v4020_v45 = vpop.f32.mrf.mxu1 }
 0x925   : > { %5885 = vmatprep.mubr.bf16.mxu0 %v13650_v28  ;;  %5998 = vmatprep.mubr.bf16.mxu1 %v13652_v8 }
 0x926   : > { %v3909_v47 = vpop.f32.mrf.mxu0  ;;  %v4022_v23 = vpop.f32.mrf.mxu1  ;;  %5886 = vmatmul.mubr.bf16.vlgmr.msra.gmra.mxu0 %v13654_v31  ;;  %5999 = vmatmul.mubr.bf16.vlgmr.msra.gmra.mxu1 %v13656_v19 }
 0x927   : > { %6080 = vmatpush1.bf16.msra.mxu0 %v11606_v16  ;;  %6193 = vmatpush1.bf16.msra.mxu1 %v11609_v59  ;;  %v11645_v16 = vld [vmem:[#allocation11 + $0x628] ss:$16 sps:$4 sm:$0xff]  }
 0x928   : > { %v3911_v4 = vpop.f32.mrf.mxu0  ;;  %v4024_v46 = vpop.f32.mrf.mxu1  ;;  %6081 = vmatprep.subr.bf16.mxu0 %v11614_v18  ;;  %6194 = vmatprep.subr.bf16.mxu1 %v11617_v6  ;;  %v11650_v6 = vld [vmem:[#allocation11 + $0x40c] ss:$16 sps:$4 sm:$0xff]  }
 0x929   : > { %v13666_v51 = vpack.c.bf16 %v3911_v4, %v3907_v10  ;;  %v13668_v61 = vpack.c.bf16 %v4024_v46, %v4020_v45  ;;  %v11651_v4 = vld [vmem:[#allocation11 + $0x608] ss:$16 sps:$4 sm:$0xff]  }
 0x92a   : > { %v3913_v52 = vpop.f32.mrf.mxu0  ;;  %v4026_v35 = vpop.f32.mrf.mxu1 }
 0x92b   : > { %v13662_v44 = vpack.c.bf16 %v3913_v52, %v3909_v47  ;;  %v13664_v63 = vpack.c.bf16 %v4026_v35, %v4022_v23  ;;  %6082 = vmatpush1.bf16.msra.mxu0 %v11612_v30  ;;  %6195 = vmatpush1.bf16.msra.mxu1 %v11615_v25  ;;  %v11653_v47 = vld [vmem:[#allocation11 + $0x60c] ss:$16 sps:$4 sm:$0xff]   ;;  %v11648_v25 = vld [vmem:[#allocation11 + $0x408] ss:$16 sps:$4 sm:$0xff]  }
 0x92c   : > { %v3917_v14 = vpop.f32.mrf.mxu0  ;;  %v4030_v54 = vpop.f32.mrf.mxu1  ;;  %6083 = vmatprep.subr.bf16.mxu0 %v11620_v9  ;;  %6196 = vmatprep.subr.bf16.mxu1 %v11623_v62  ;;  %v11656_v62 = vld [vmem:[#allocation11 + $0x5ec] ss:$16 sps:$4 sm:$0xff]  }
 0x92d   : > { %5895 = vmatprep.mubr.bf16.mxu0 %v13662_v44  ;;  %6008 = vmatprep.mubr.bf16.mxu1 %v13664_v63  ;;  %v11659_v52 = vld [vmem:[#allocation11 + $0x7ec] ss:$16 sps:$4 sm:$0xff]  }
 0x92e   : > { %v3919_v13 = vpop.f32.mrf.mxu0  ;;  %v4032_v24 = vpop.f32.mrf.mxu1  ;;  %5896 = vmatmul.mubr.bf16.gmra.mxu0 %v13666_v51  ;;  %6009 = vmatmul.mubr.bf16.gmra.mxu1 %v13668_v61 }
 0x92f   : > { %6084 = vmatpush1.bf16.msra.mxu0 %v11618_v56  ;;  %6197 = vmatpush1.bf16.msra.mxu1 %v11621_v12 }
 0x930   : > { %v3921_v60 = vpop.f32.mrf.mxu0  ;;  %v4034_v36 = vpop.f32.mrf.mxu1  ;;  %6085 = vmatprep.subr.bf16.mxu0 %v11626_v37  ;;  %6198 = vmatprep.subr.bf16.mxu1 %v11629_v34  ;;  %v11657_v37 = vld [vmem:[#allocation11 + $0x7e8] ss:$16 sps:$4 sm:$0xff]  }
 0x931   : > { %v13678_v40 = vpack.c.bf16 %v3921_v60, %v3917_v14  ;;  %v13680_v39 = vpack.c.bf16 %v4034_v36, %v4030_v54  ;;  %v11654_v54 = vld [vmem:[#allocation11 + $0x5e8] ss:$16 sps:$4 sm:$0xff]   ;;  %v11665_v60 = vld [vmem:[#allocation11 + $0x7cc] ss:$16 sps:$4 sm:$0xff]  }
 0x932   : > { %v3923_v2 = vpop.f32.mrf.mxu0  ;;  %v4036_v49 = vpop.f32.mrf.mxu1 }
 0x933   : > { %v13674_v57 = vpack.c.bf16 %v3923_v2, %v3919_v13  ;;  %v13676_v7 = vpack.c.bf16 %v4036_v49, %v4032_v24  ;;  %6086 = vmatpush1.bf16.msra.mxu0 %v11624_v0  ;;  %6199 = vmatpush1.bf16.msra.mxu1 %v11627_v26  ;;  %v11662_v26 = vld [vmem:[#allocation11 + $0x5cc] ss:$16 sps:$4 sm:$0xff]   ;;  %v11663_v2 = vld [vmem:[#allocation11 + $0x7c8] ss:$16 sps:$4 sm:$0xff]  }
 0x934   : > { %v3927_v3 = vpop.f32.mrf.mxu0  ;;  %v4040_v38 = vpop.f32.mrf.mxu1  ;;  %6087 = vmatprep.subr.bf16.mxu0 %v11632_v41  ;;  %6200 = vmatprep.subr.bf16.mxu1 %v11635_v29  ;;  %v11660_v29 = vld [vmem:[#allocation11 + $0x5c8] ss:$16 sps:$4 sm:$0xff]  }
 0x935   : > { %5905 = vmatprep.mubr.bf16.mxu0 %v13674_v57  ;;  %6018 = vmatprep.mubr.bf16.mxu1 %v13676_v7 }
 0x936   : > { %v3929_v17 = vpop.f32.mrf.mxu0  ;;  %v4042_v50 = vpop.f32.mrf.mxu1  ;;  %5906 = vmatmul.mubr.bf16.gmra.mxu0 %v13678_v40  ;;  %6019 = vmatmul.mubr.bf16.gmra.mxu1 %v13680_v39 }
 0x937   : > { %6088 = vmatpush1.bf16.msra.mxu0 %v11630_v20  ;;  %6201 = vmatpush1.bf16.msra.mxu1 %v11633_v43  ;;  %v11668_v43 = vld [vmem:[#allocation11 + $0x5ac] ss:$16 sps:$4 sm:$0xff]  }
 0x938   : > { %v3931_v33 = vpop.f32.mrf.mxu0  ;;  %v4044_v27 = vpop.f32.mrf.mxu1  ;;  %6089 = vmatprep.subr.bf16.mxu0 %v11638_v32  ;;  %6202 = vmatprep.subr.bf16.mxu1 %v11641_v22 }
 0x939   : > { %v13690_v59 = vpack.c.bf16 %v3931_v33, %v3927_v3  ;;  %v13692_v10 = vpack.c.bf16 %v4044_v27, %v4040_v38  ;;  %v11671_v3 = vld [vmem:[#allocation11 + $0x7ac] ss:$16 sps:$4 sm:$0xff]  }
 0x93a   : > { %v3933_v53 = vpop.f32.mrf.mxu0  ;;  %v4046_v15 = vpop.f32.mrf.mxu1 }
 0x93b   : > { %v13686_v21 = vpack.c.bf16 %v3933_v53, %v3929_v17  ;;  %v13688_v11 = vpack.c.bf16 %v4046_v15, %v4042_v50  ;;  %6090 = vmatpush1.bf16.msra.mxu0 %v11636_v48  ;;  %6203 = vmatpush1.bf16.msra.mxu1 %v11639_v42  ;;  %v11666_v50 = vld [vmem:[#allocation11 + $0x5a8] ss:$16 sps:$4 sm:$0xff]   ;;  %v11677_v53 = vld [vmem:[#allocation11 + $0x78c] ss:$16 sps:$4 sm:$0xff]  }
 0x93c   : > { %v3937_v45 = vpop.f32.mrf.mxu0  ;;  %v4050_v18 = vpop.f32.mrf.mxu1  ;;  %6091 = vmatprep.subr.bf16.mxu0 %v11644_v5  ;;  %6204 = vmatprep.subr.bf16.mxu1 %v11647_v58  ;;  %v11669_v48 = vld [vmem:[#allocation11 + $0x7a8] ss:$16 sps:$4 sm:$0xff]   ;;  %v11674_v58 = vld [vmem:[#allocation11 + $0x58c] ss:$16 sps:$4 sm:$0xff]  }
 0x93d   : > { %5915 = vmatprep.mubr.bf16.mxu0 %v13686_v21  ;;  %6028 = vmatprep.mubr.bf16.mxu1 %v13688_v11 }
 0x93e   : > { %v3939_v23 = vpop.f32.mrf.mxu0  ;;  %v4052_v30 = vpop.f32.mrf.mxu1  ;;  %5916 = vmatmul.mubr.bf16.gmra.mxu0 %v13690_v59  ;;  %6029 = vmatmul.mubr.bf16.gmra.mxu1 %v13692_v10 }
 0x93f   : > { %6092 = vmatpush1.bf16.msra.mxu0 %v11642_v55  ;;  %6205 = vmatpush1.bf16.msra.mxu1 %v11645_v16  ;;  %v11672_v16 = vld [vmem:[#allocation11 + $0x588] ss:$16 sps:$4 sm:$0xff]  }
 0x940   : > { %v3941_v46 = vpop.f32.mrf.mxu0  ;;  %v4054_v9 = vpop.f32.mrf.mxu1  ;;  %6093 = vmatprep.subr.bf16.mxu0 %v11650_v6  ;;  %6206 = vmatprep.subr.bf16.mxu1 %v11653_v47  ;;  %v11680_v47 = vld [vmem:[#allocation11 + $0x56c] ss:$16 sps:$4 sm:$0xff]  }
 0x941   : > { %v13702_v34 = vpack.c.bf16 %v3941_v46, %v3937_v45  ;;  %v13704_v13 = vpack.c.bf16 %v4054_v9, %v4050_v18  ;;  %v11675_v45 = vld [vmem:[#allocation11 + $0x788] ss:$16 sps:$4 sm:$0xff]  }
 0x942   : > { %v3943_v35 = vpop.f32.mrf.mxu0  ;;  %v4056_v56 = vpop.f32.mrf.mxu1  ;;  %v11678_v9 = vld [vmem:[#allocation11 + $0x568] ss:$16 sps:$4 sm:$0xff]  }
 0x943   : > { %v13698_v12 = vpack.c.bf16 %v3943_v35, %v3939_v23  ;;  %v13700_v14 = vpack.c.bf16 %v4056_v56, %v4052_v30  ;;  %6094 = vmatpush1.bf16.msra.mxu0 %v11648_v25  ;;  %6207 = vmatpush1.bf16.msra.mxu1 %v11651_v4  ;;  %v11683_v23 = vld [vmem:[#allocation11 + $0x76c] ss:$16 sps:$4 sm:$0xff]  }
 0x944   : > { %v3947_v24 = vpop.f32.mrf.mxu0  ;;  %v4060_v0 = vpop.f32.mrf.mxu1  ;;  %6095 = vmatprep.subr.bf16.mxu0 %v11656_v62  ;;  %6208 = vmatprep.subr.bf16.mxu1 %v11659_v52  ;;  %v11681_v62 = vld [vmem:[#allocation11 + $0x768] ss:$16 sps:$4 sm:$0xff]  }
 0x945   : > { %5925 = vmatprep.mubr.bf16.mxu0 %v13698_v12  ;;  %6038 = vmatprep.mubr.bf16.mxu1 %v13700_v14 }
 0x946   : > { %v3949_v36 = vpop.f32.mrf.mxu0  ;;  %v4062_v41 = vpop.f32.mrf.mxu1  ;;  %5926 = vmatmul.mubr.bf16.gmra.mxu0 %v13702_v34  ;;  %6039 = vmatmul.mubr.bf16.gmra.mxu1 %v13704_v13 }
 0x947   : > { %6096 = vmatpush2.bf16.msra.mxu0 %v11654_v54  ;;  %6209 = vmatpush2.bf16.msra.mxu1 %v11657_v37  ;;  %v11686_v37 = vld [vmem:[#allocation11 + $0x54c] ss:$16 sps:$4 sm:$0xff]  }
 0x948   : > { %v3951_v49 = vpop.f32.mrf.mxu0  ;;  %v4064_v20 = vpop.f32.mrf.mxu1  ;;  %6097 = vmatprep.subr.bf16.mxu0 %v11662_v26  ;;  %6210 = vmatprep.subr.bf16.mxu1 %v11665_v60  ;;  %v11684_v60 = vld [vmem:[#allocation11 + $0x548] ss:$16 sps:$4 sm:$0xff]  }
 0x949   : > { %v13714_v42 = vpack.c.bf16 %v3951_v49, %v3947_v24  ;;  %v13716_v33 = vpack.c.bf16 %v4064_v20, %v4060_v0  ;;  %v11689_v24 = vld [vmem:[#allocation11 + $0x74c] ss:$16 sps:$4 sm:$0xff]  }
 0x94a   : > { %v3953_v38 = vpop.f32.mrf.mxu0  ;;  %v4066_v32 = vpop.f32.mrf.mxu1  ;;  %v11695_v49 = vld [vmem:[#allocation11 + $0x72c] ss:$16 sps:$4 sm:$0xff]  }
 0x94b   : > { %v13710_v22 = vpack.c.bf16 %v3953_v38, %v3949_v36  ;;  %v13712_v17 = vpack.c.bf16 %v4066_v32, %v4062_v41  ;;  %6098 = vmatpush2.bf16.msra.mxu0 %v11660_v29  ;;  %6211 = vmatpush2.bf16.msra.mxu1 %v11663_v2  ;;  %v11687_v36 = vld [vmem:[#allocation11 + $0x748] ss:$16 sps:$4 sm:$0xff]   ;;  %v11692_v2 = vld [vmem:[#allocation11 + $0x52c] ss:$16 sps:$4 sm:$0xff]  }
 0x94c   : > { %v3957_v27 = vpop.f32.mrf.mxu0  ;;  %v4070_v5 = vpop.f32.mrf.mxu1  ;;  %6099 = vmatprep.subr.bf16.mxu0 %v11668_v43  ;;  %6212 = vmatprep.subr.bf16.mxu1 %v11671_v3  ;;  %v11690_v32 = vld [vmem:[#allocation11 + $0x528] ss:$16 sps:$4 sm:$0xff]  }
 0x94d   : > { %5935 = vmatprep.mubr.bf16.mxu0 %v13710_v22  ;;  %6048 = vmatprep.mubr.bf16.mxu1 %v13712_v17 }
 0x94e   : > { %v3959_v15 = vpop.f32.mrf.mxu0  ;;  %v4072_v55 = vpop.f32.mrf.mxu1  ;;  %5936 = vmatmul.mubr.bf16.gmra.mxu0 %v13714_v42  ;;  %6049 = vmatmul.mubr.bf16.gmra.mxu1 %v13716_v33 }
 0x94f   : > { %6100 = vmatpush2.bf16.msra.mxu0 %v11666_v50  ;;  %6213 = vmatpush2.bf16.msra.mxu1 %v11669_v48 }
 0x950   : > { %v3961_v18 = vpop.f32.mrf.mxu0  ;;  %v4074_v6 = vpop.f32.mrf.mxu1  ;;  %6101 = vmatprep.subr.bf16.mxu0 %v11674_v58  ;;  %6214 = vmatprep.subr.bf16.mxu1 %v11677_v53  ;;  %v11698_v53 = vld [vmem:[#allocation11 + $0x50c] ss:$16 sps:$4 sm:$0xff]  }
 0x951   : > { %v13726_v52 = vpack.c.bf16 %v3961_v18, %v3957_v27  ;;  %v13728_v35 = vpack.c.bf16 %v4074_v6, %v4070_v5  ;;  %v11693_v5 = vld [vmem:[#allocation11 + $0x728] ss:$16 sps:$4 sm:$0xff]  }
 0x952   : > { %v3963_v30 = vpop.f32.mrf.mxu0  ;;  %v4076_v25 = vpop.f32.mrf.mxu1  ;;  %v11696_v18 = vld [vmem:[#allocation11 + $0x508] ss:$16 sps:$4 sm:$0xff]  }
 0x953   : > { %v13722_v4 = vpack.c.bf16 %v3963_v30, %v3959_v15  ;;  %v13724_v46 = vpack.c.bf16 %v4076_v25, %v4072_v55  ;;  %6102 = vmatpush2.bf16.msra.mxu0 %v11672_v16  ;;  %6215 = vmatpush2.bf16.msra.mxu1 %v11675_v45  ;;  %v11701_v15 = vld [vmem:[#allocation11 + $0x70c] ss:$16 sps:$4 sm:$0xff]  }
 0x954   : > { %v3967_v56 = vpop.f32.mrf.mxu0  ;;  %v4080_v54 = vpop.f32.mrf.mxu1  ;;  %6103 = vmatprep.subr.bf16.mxu0 %v11680_v47  ;;  %6216 = vmatprep.subr.bf16.mxu1 %v11683_v23  ;;  %v11699_v23 = vld [vmem:[#allocation11 + $0x708] ss:$16 sps:$4 sm:$0xff]  }
 0x955   : > { %5945 = vmatprep.mubr.bf16.mxu0 %v13722_v4  ;;  %6058 = vmatprep.mubr.bf16.mxu1 %v13724_v46 }
 0x956   : > { %v3969_v0 = vpop.f32.mrf.mxu0  ;;  %v4082_v26 = vpop.f32.mrf.mxu1  ;;  %5946 = vmatmul.mubr.bf16.gmra.mxu0 %v13726_v52  ;;  %6059 = vmatmul.mubr.bf16.gmra.mxu1 %v13728_v35 }
 0x957   : > { %6104 = vmatpush2.bf16.msra.mxu0 %v11678_v9  ;;  %6217 = vmatpush2.bf16.msra.mxu1 %v11681_v62 }
 0x958   : > { %v3971_v41 = vpop.f32.mrf.mxu0  ;;  %v4084_v29 = vpop.f32.mrf.mxu1  ;;  %6105 = vmatprep.subr.bf16.mxu0 %v11686_v37  ;;  %6218 = vmatprep.subr.bf16.mxu1 %v11689_v24 }
 0x959   : > { %v13738_v50 = vpack.c.bf16 %v3971_v41, %v3967_v56  ;;  %v13740_v48 = vpack.c.bf16 %v4084_v29, %v4080_v54 }
 0x95a   : > { %v3973_v20 = vpop.f32.mrf.mxu0  ;;  %v4086_v43 = vpop.f32.mrf.mxu1 }
 0x95b   : > { %v13734_v3 = vpack.c.bf16 %v3973_v20, %v3969_v0  ;;  %v13736_v38 = vpack.c.bf16 %v4086_v43, %v4082_v26  ;;  %6106 = vmatpush2.bf16.msra.mxu0 %v11684_v60  ;;  %6219 = vmatpush2.bf16.msra.mxu1 %v11687_v36 }
 0x95c   : > { %v4795_v27 = vpop.f32.mrf.mxu0  ;;  %6107 = vmatprep.subr.bf16.mxu0 %v11692_v2  ;;  %6220 = vmatprep.subr.bf16.mxu1 %v11695_v49 }
 0x95d   : > { %v4908_v58 = vpop.f32.mrf.mxu1  ;;  %5955 = vmatprep.mubr.bf16.mxu0 %v13734_v3  ;;  %6068 = vmatprep.mubr.bf16.mxu1 %v13736_v38 }
 0x95e   : > { %v13744_v55 = vadd.f32 %v4908_v58, %v4795_v27  ;;  %v4797_v16 = vpop.f32.mrf.mxu0  ;;  %5956 = vmatmul.mubr.bf16.gmra.mxu0 %v13738_v50  ;;  %6069 = vmatmul.mubr.bf16.gmra.mxu1 %v13740_v48 }
 0x95f   : > { %v4910_v45 = vpop.f32.mrf.mxu1  ;;  %6108 = vmatpush2.bf16.msra.mxu0 %v11690_v32  ;;  %6111 = vmatprep.mubr.bf16.mxu0 %v13650_v28 }
 0x960   : > { %v13749_v6 = vadd.f32 %v4910_v45, %v4797_v16  ;;  %6221 = vmatpush2.bf16.msra.mxu1 %v11693_v5  ;;  %6224 = vmatprep.mubr.bf16.mxu1 %v13652_v8  ;;  %v4799_v47 = vpop.f32.mrf.mxu0 }
 0x961   : > { %v4912_v30 = vpop.f32.mrf.mxu1  ;;  %6109 = vmatprep.subr.bf16.mxu0 %v11698_v53  ;;  %6222 = vmatprep.subr.bf16.mxu1 %v11701_v15 }
 0x962   : > { %v13752_v25 = vadd.f32 %v4912_v30, %v4799_v47  ;;  %v4801_v9 = vpop.f32.mrf.mxu0 }
 0x963   : > { %v4914_v62 = vpop.f32.mrf.mxu1  ;;  %6110 = vmatpush2.bf16.msra.mxu0 %v11696_v18 }
 0x964   : > { %v13754_v56 = vadd.f32 %v4914_v62, %v4801_v9  ;;  %6223 = vmatpush2.bf16.msra.mxu1 %v11699_v23  ;;  %v4805_v28 = vpop.f32.mrf.mxu0 }
 0x965   : > { %v4918_v54 = vpop.f32.mrf.mxu1 }
 0x966   : > { %v13756_v37 = vadd.f32 %v4918_v54, %v4805_v28  ;;  %v4807_v24 = vpop.f32.mrf.mxu0  ;;  %6112 = vmatmul.mubr.bf16.vlgmr.msra.gmra.mxu0 %v13654_v31 }
 0x967   : > { %v4920_v8 = vpop.f32.mrf.mxu1  ;;  %6225 = vmatmul.mubr.bf16.vlgmr.msra.gmra.mxu1 %v13656_v19  ;;  %6121 = vmatprep.mubr.bf16.mxu0 %v13662_v44 }
 0x968   : > { %v13761_v0 = vadd.f32 %v4920_v8, %v4807_v24  ;;  %6234 = vmatprep.mubr.bf16.mxu1 %v13664_v63  ;;  %v4809_v26 = vpop.f32.mrf.mxu0 }
 0x969   : > { %v4922_v60 = vpop.f32.mrf.mxu1 }
 0x96a   : > { %v13764_v36 = vadd.f32 %v4922_v60, %v4809_v26  ;;  %v4811_v41 = vpop.f32.mrf.mxu0 }
 0x96b   : > { %v4924_v29 = vpop.f32.mrf.mxu1 }
 0x96c   : > { %v13766_v2 = vadd.f32 %v4924_v29, %v4811_v41  ;;  %v4815_v49 = vpop.f32.mrf.mxu0 }
 0x96d   : > { %v4928_v20 = vpop.f32.mrf.mxu1 }
 0x96e   : > { %v13768_v31 = vadd.f32 %v4928_v20, %v4815_v49  ;;  %v4817_v43 = vpop.f32.mrf.mxu0  ;;  %6122 = vmatmul.mubr.bf16.gmra.mxu0 %v13666_v51 }
 0x96f   : > { %v4930_v19 = vpop.f32.mrf.mxu1  ;;  %6235 = vmatmul.mubr.bf16.gmra.mxu1 %v13668_v61  ;;  %6131 = vmatprep.mubr.bf16.mxu0 %v13674_v57 }
 0x970   : > { %v13773_v44 = vadd.f32 %v4930_v19, %v4817_v43  ;;  %6244 = vmatprep.mubr.bf16.mxu1 %v13676_v7  ;;  %v4819_v63 = vpop.f32.mrf.mxu0 }
 0x971   : > { %v4932_v32 = vpop.f32.mrf.mxu1 }
 0x972   : > { %v13776_v27 = vadd.f32 %v4932_v32, %v4819_v63  ;;  %v4821_v5 = vpop.f32.mrf.mxu0 }
 0x973   : > { %v4934_v58 = vpop.f32.mrf.mxu1 }
 0x974   : > { %v13778_v53 = vadd.f32 %v4934_v58, %v4821_v5  ;;  %v4825_v15 = vpop.f32.mrf.mxu0 }
 0x975   : > { %v4938_v16 = vpop.f32.mrf.mxu1 }
 0x976   : > { %v13780_v51 = vadd.f32 %v4938_v16, %v4825_v15  ;;  %v4827_v45 = vpop.f32.mrf.mxu0  ;;  %6132 = vmatmul.mubr.bf16.gmra.mxu0 %v13678_v40 }
 0x977   : > { %v4940_v61 = vpop.f32.mrf.mxu1  ;;  %6245 = vmatmul.mubr.bf16.gmra.mxu1 %v13680_v39  ;;  %6141 = vmatprep.mubr.bf16.mxu0 %v13686_v21 }
 0x978   : > { %v13785_v57 = vadd.f32 %v4940_v61, %v4827_v45  ;;  %6254 = vmatprep.mubr.bf16.mxu1 %v13688_v11  ;;  %v4829_v7 = vpop.f32.mrf.mxu0 }
 0x979   : > { %v4942_v18 = vpop.f32.mrf.mxu1 }
 0x97a   : > { %v13788_v47 = vadd.f32 %v4942_v18, %v4829_v7  ;;  %v4831_v23 = vpop.f32.mrf.mxu0 }
 0x97b   : > { %v4944_v30 = vpop.f32.mrf.mxu1 }
 0x97c   : > { %v13790_v9 = vadd.f32 %v4944_v30, %v4831_v23  ;;  %v4835_v62 = vpop.f32.mrf.mxu0 }
 0x97d   : > { %v4948_v28 = vpop.f32.mrf.mxu1 }
 0x97e   : > { %v13792_v40 = vadd.f32 %v4948_v28, %v4835_v62  ;;  %v4837_v54 = vpop.f32.mrf.mxu0  ;;  %6142 = vmatmul.mubr.bf16.gmra.mxu0 %v13690_v59 }
 0x97f   : > { %v4950_v39 = vpop.f32.mrf.mxu1  ;;  %6255 = vmatmul.mubr.bf16.gmra.mxu1 %v13692_v10  ;;  %6151 = vmatprep.mubr.bf16.mxu0 %v13698_v12 }
 0x980   : > { %v13797_v21 = vadd.f32 %v4950_v39, %v4837_v54  ;;  %6264 = vmatprep.mubr.bf16.mxu1 %v13700_v14  ;;  %v4839_v11 = vpop.f32.mrf.mxu0 }
 0x981   : > { %v4952_v24 = vpop.f32.mrf.mxu1 }
 0x982   : > { %v13800_v8 = vadd.f32 %v4952_v24, %v4839_v11  ;;  %v13802_v26 = vpop.f32.mrf.mxu0 }
 0x983   : > { %v13804_v60 = vpop.f32.mrf.mxu1 }
 0x984   : > { %v4845_v41 = vpop.f32.mrf.mxu0 }
 0x985   : > { %v4958_v29 = vpop.f32.mrf.mxu1 }
 0x986   : > { %v13806_v59 = vadd.f32 %v4958_v29, %v4845_v41  ;;  %v4847_v49 = vpop.f32.mrf.mxu0  ;;  %6152 = vmatmul.mubr.bf16.gmra.mxu0 %v13702_v34 }
 0x987   : > { %v4960_v10 = vpop.f32.mrf.mxu1  ;;  %6265 = vmatmul.mubr.bf16.gmra.mxu1 %v13704_v13  ;;  %6161 = vmatprep.mubr.bf16.mxu0 %v13710_v22 }
 0x988   : > { %v13811_v12 = vadd.f32 %v4960_v10, %v4847_v49  ;;  %6274 = vmatprep.mubr.bf16.mxu1 %v13712_v17  ;;  %v4849_v14 = vpop.f32.mrf.mxu0 }
 0x989   : > { %v4962_v20 = vpop.f32.mrf.mxu1 }
 0x98a   : > { %v13814_v43 = vadd.f32 %v4962_v20, %v4849_v14  ;;  %v13816_v19 = vpop.f32.mrf.mxu0 }
 0x98b   : > { %v13818_v63 = vpop.f32.mrf.mxu1 }
 0x98c   : > { %v4855_v32 = vpop.f32.mrf.mxu0 }
 0x98d   : > { %v4968_v5 = vpop.f32.mrf.mxu1 }
 0x98e   : > { %v13820_v34 = vadd.f32 %v4968_v5, %v4855_v32  ;;  %v4857_v58 = vpop.f32.mrf.mxu0  ;;  %6162 = vmatmul.mubr.bf16.gmra.mxu0 %v13714_v42 }
 0x98f   : > { %v4970_v13 = vpop.f32.mrf.mxu1  ;;  %6275 = vmatmul.mubr.bf16.gmra.mxu1 %v13716_v33  ;;  %6171 = vmatprep.mubr.bf16.mxu0 %v13722_v4 }
 0x990   : > { %v13825_v22 = vadd.f32 %v4970_v13, %v4857_v58  ;;  %6284 = vmatprep.mubr.bf16.mxu1 %v13724_v46  ;;  %v4859_v17 = vpop.f32.mrf.mxu0 }
 0x991   : > { %v4972_v15 = vpop.f32.mrf.mxu1 }
 0x992   : > { %v13828_v16 = vadd.f32 %v4972_v15, %v4859_v17  ;;  %v13830_v45 = vpop.f32.mrf.mxu0 }
 0x993   : > { %v13832_v61 = vpop.f32.mrf.mxu1 }
 0x994   : > { %v4865_v7 = vpop.f32.mrf.mxu0 }
 0x995   : > { %v4978_v18 = vpop.f32.mrf.mxu1 }
 0x996   : > { %v13834_v42 = vadd.f32 %v4978_v18, %v4865_v7  ;;  %v4867_v23 = vpop.f32.mrf.mxu0  ;;  %6172 = vmatmul.mubr.bf16.gmra.mxu0 %v13726_v52 }
 0x997   : > { %v4980_v33 = vpop.f32.mrf.mxu1  ;;  %6285 = vmatmul.mubr.bf16.gmra.mxu1 %v13728_v35  ;;  %6181 = vmatprep.mubr.bf16.mxu0 %v13734_v3 }
 0x998   : > { %v13839_v4 = vadd.f32 %v4980_v33, %v4867_v23  ;;  %6294 = vmatprep.mubr.bf16.mxu1 %v13736_v38  ;;  %v4869_v46 = vpop.f32.mrf.mxu0 }
 0x999   : > { %v4982_v30 = vpop.f32.mrf.mxu1 }
 0x99a   : > { %v13842_v62 = vadd.f32 %v4982_v30, %v4869_v46  ;;  %v13844_v28 = vpop.f32.mrf.mxu0 }
 0x99b   : > { %v13846_v54 = vpop.f32.mrf.mxu1 }
 0x99d   : > { %v5021_v39 = vpop.f32.mrf.mxu0 }
 0x99e   : > { %v5134_v11 = vpop.f32.mrf.mxu1  ;;  %6182 = vmatmul.mubr.bf16.gmra.mxu0 %v13738_v50 }
 0x99f   : > { %v13849_v52 = vadd.f32 %v5134_v11, %v5021_v39  ;;  %v5023_v35 = vpop.f32.mrf.mxu0  ;;  %6295 = vmatmul.mubr.bf16.gmra.mxu1 %v13740_v48  ;;  %6648 = vmatprep.mubr.bf16.mxu0 %v15088_v1 }
 0x9a0   : > { %v5136_v3 = vpop.f32.mrf.mxu1  ;;  %6761 = vmatprep.mubr.bf16.mxu1 %v15088_v1 }
 0x9a1   : > { %v13854_v38 = vadd.f32 %v5136_v3, %v5023_v35  ;;  %v5025_v24 = vpop.f32.mrf.mxu0 }
 0x9a2   : > { %v5138_v41 = vpop.f32.mrf.mxu1 }
 0x9a3   : > { %v13856_v29 = vadd.f32 %v5138_v41, %v5025_v24  ;;  %v13858_v49 = vpop.f32.mrf.mxu0 }
 0x9a4   : > { %15089 = vst [vmem:[#allocation28_spill] sm:$0xff] %v13858_v49  ;;  %v13860_v10 = vpop.f32.mrf.mxu1 }
 0x9a5   : > { %15090 = vst [vmem:[#allocation29_spill] sm:$0xff] %v13860_v10  ;;  %v5031_v50 = vpop.f32.mrf.mxu0 }
 0x9a6   : > { %v5144_v14 = vpop.f32.mrf.mxu1 }
 0x9a7   : > { %v13862_v20 = vadd.f32 %v5144_v14, %v5031_v50  ;;  %v5033_v48 = vpop.f32.mrf.mxu0 }
 0x9a8   : > { %v5146_v32 = vpop.f32.mrf.mxu1 }
 0x9a9   : > { %v13864_v5 = vadd.f32 %v5146_v32, %v5033_v48  ;;  %v5035_v58 = vpop.f32.mrf.mxu0 }
 0x9aa   : > { %v5148_v13 = vpop.f32.mrf.mxu1 }
 0x9ab   : > { %v13866_v17 = vadd.f32 %v5148_v13, %v5035_v58  ;;  %v13868_v15 = vpop.f32.mrf.mxu0 }
 0x9ac   : > { %15091 = vst [vmem:[#allocation32_spill] sm:$0xff] %v13868_v15  ;;  %v13870_v7 = vpop.f32.mrf.mxu1 }
 0x9ad   : > { %15092 = vst [vmem:[#allocation33_spill] sm:$0xff] %v13870_v7  ;;  %v5041_v18 = vpop.f32.mrf.mxu0 }
 0x9ae   : > { %v5154_v23 = vpop.f32.mrf.mxu1 }
 0x9af   : > { %v13872_v33 = vadd.f32 %v5154_v23, %v5041_v18  ;;  %v5043_v46 = vpop.f32.mrf.mxu0 }
 0x9b0   : > { %v5156_v30 = vpop.f32.mrf.mxu1 }
 0x9b1   : > { %15093 = vst [vmem:[#allocation36_spill] sm:$0xff] %v13872_v33  ;;  %v13874_v39 = vadd.f32 %v5156_v30, %v5043_v46  ;;  %v5045_v11 = vpop.f32.mrf.mxu0 }
 0x9b2   : > { %v5158_v35 = vpop.f32.mrf.mxu1 }
 0x9b3   : > { %15094 = vst [vmem:[#allocation37_spill] sm:$0xff] %v13874_v39  ;;  %v13876_v3 = vadd.f32 %v5158_v35, %v5045_v11  ;;  %v13878_v24 = vpop.f32.mrf.mxu0 }
 0x9b4   : > { %15096 = vst [vmem:[#allocation39_spill] sm:$0xff] %v13878_v24  ;;  %v13880_v41 = vpop.f32.mrf.mxu1 }
 0x9b5   : > { %15095 = vst [vmem:[#allocation38_spill] sm:$0xff] %v13876_v3  ;;  %15097 = vst [vmem:[#allocation26_spill] sm:$0xff] %v13880_v41  ;;  %v5051_v50 = vpop.f32.mrf.mxu0 }
 0x9b6   : > { %v5164_v14 = vpop.f32.mrf.mxu1 }
 0x9b7   : > { %v13882_v48 = vadd.f32 %v5164_v14, %v5051_v50  ;;  %v5053_v32 = vpop.f32.mrf.mxu0 }
 0x9b8   : > { %v5166_v58 = vpop.f32.mrf.mxu1 }
 0x9b9   : > { %15098 = vst [vmem:[#allocation64_spill] sm:$0xff] %v13882_v48  ;;  %v13884_v13 = vadd.f32 %v5166_v58, %v5053_v32  ;;  %v5055_v18 = vpop.f32.mrf.mxu0 }
 0x9ba   : > { %v5168_v23 = vpop.f32.mrf.mxu1 }
 0x9bb   : > { %15099 = vst [vmem:[#allocation27_spill] sm:$0xff] %v13884_v13  ;;  %v13886_v46 = vadd.f32 %v5168_v23, %v5055_v18  ;;  %v13888_v30 = vpop.f32.mrf.mxu0 }
 0x9bc   : > { %15101 = vst [vmem:[#allocation40_spill] sm:$0xff] %v13888_v30  ;;  %v13890_v11 = vpop.f32.mrf.mxu1 }
 0x9bd   : > { %15100 = vst [vmem:[#allocation65_spill] sm:$0xff] %v13886_v46  ;;  %15102 = vst [vmem:[#allocation41_spill] sm:$0xff] %v13890_v11  ;;  %v5061_v35 = vpop.f32.mrf.mxu0 }
 0x9be   : > { %v5174_v10 = vpop.f32.mrf.mxu1 }
 0x9bf   : > { %v13892_v49 = vadd.f32 %v5174_v10, %v5061_v35  ;;  %v5063_v39 = vpop.f32.mrf.mxu0 }
 0x9c0   : > { %v5176_v7 = vpop.f32.mrf.mxu1 }
 0x9c1   : > { %15103 = vst [vmem:[#allocation30_spill] sm:$0xff] %v13892_v49  ;;  %v13894_v50 = vadd.f32 %v5176_v7, %v5063_v39  ;;  %v5065_v14 = vpop.f32.mrf.mxu0 }
 0x9c2   : > { %v5178_v15 = vpop.f32.mrf.mxu1 }
 0x9c3   : > { %15104 = vst [vmem:[#allocation66_spill] sm:$0xff] %v13894_v50  ;;  %v13896_v32 = vadd.f32 %v5178_v15, %v5065_v14  ;;  %v13898_v58 = vpop.f32.mrf.mxu0 }
 0x9c4   : > { %15106 = vst [vmem:[#allocation67_spill] sm:$0xff] %v13898_v58  ;;  %v13900_v18 = vpop.f32.mrf.mxu1 }
 0x9c5   : > { %15105 = vst [vmem:[#allocation31_spill] sm:$0xff] %v13896_v32  ;;  %15107 = vst [vmem:[#allocation34_spill] sm:$0xff] %v13900_v18  ;;  %v5071_v23 = vpop.f32.mrf.mxu0 }
 0x9c6   : > { %v5184_v13 = vpop.f32.mrf.mxu1 }
 0x9c7   : > { %v13902_v41 = vadd.f32 %v5184_v13, %v5071_v23  ;;  %v5073_v24 = vpop.f32.mrf.mxu0 }
 0x9c8   : > { %v5186_v11 = vpop.f32.mrf.mxu1 }
 0x9c9   : > { %15108 = vst [vmem:[#allocation35_spill] sm:$0xff] %v13902_v41  ;;  %v13904_v10 = vadd.f32 %v5186_v11, %v5073_v24  ;;  %v5075_v35 = vpop.f32.mrf.mxu0 }
 0x9ca   : > { %v5188_v30 = vpop.f32.mrf.mxu1 }
 0x9cb   : > { %15109 = vst [vmem:[#allocation58_spill] sm:$0xff] %v13904_v10  ;;  %v13906_v7 = vadd.f32 %v5188_v30, %v5075_v35  ;;  %v13908_v39 = vpop.f32.mrf.mxu0 }
 0x9cc   : > { %15111 = vst [vmem:[#allocation48_spill] sm:$0xff] %v13908_v39  ;;  %v13910_v15 = vpop.f32.mrf.mxu1 }
 0x9cd   : > { %15110 = vst [vmem:[#allocation59_spill] sm:$0xff] %v13906_v7  ;;  %15112 = vst [vmem:[#allocation49_spill] sm:$0xff] %v13910_v15  ;;  %v5081_v14 = vpop.f32.mrf.mxu0 }
 0x9ce   : > { %v5194_v50 = vpop.f32.mrf.mxu1 }
 0x9cf   : > { %v13912_v58 = vadd.f32 %v5194_v50, %v5081_v14  ;;  %v5083_v18 = vpop.f32.mrf.mxu0 }
 0x9d0   : > { %v5196_v1 = vpop.f32.mrf.mxu1 }
 0x9d1   : > { %15113 = vst [vmem:[#allocation42_spill] sm:$0xff] %v13912_v58  ;;  %v13914_v13 = vadd.f32 %v5196_v1, %v5083_v18  ;;  %v5085_v23 = vpop.f32.mrf.mxu0 }
 0x9d2   : > { %v5198_v41 = vpop.f32.mrf.mxu1 }
 0x9d3   : > { %15114 = vst [vmem:[#allocation43_spill] sm:$0xff] %v13914_v13  ;;  %v13916_v24 = vadd.f32 %v5198_v41, %v5085_v23  ;;  %v13918_v11 = vpop.f32.mrf.mxu0  ;;  %v13932_v23 = vld [vmem:[#allocation13 + $0x4] ss:$8 sm:$0xf] }
 0x9d4   : > { %15116 = vst [vmem:[#allocation45_spill] sm:$0xff] %v13918_v11  ;;  %v13920_v30 = vpop.f32.mrf.mxu1 }
 0x9d5   : > { %15115 = vst [vmem:[#allocation44_spill] sm:$0xff] %v13916_v24  ;;  %15117 = vst [vmem:[#allocation50_spill] sm:$0xff] %v13920_v30  ;;  %v5091_v35 = vpop.f32.mrf.mxu0 }
 0x9d6   : > { %v5204_v10 = vpop.f32.mrf.mxu1 }
 0x9d7   : > { %v13922_v39 = vadd.f32 %v5204_v10, %v5091_v35  ;;  %v5093_v15 = vpop.f32.mrf.mxu0  ;;  %v15123_v10 = vld [vmem:[#allocation25_spill] sm:$0xff] }
 0x9d8   : > { %v5206_v7 = vpop.f32.mrf.mxu1  ;;  %v13937_v35 = vrot.slane %v13932_v23, %v15123_v10 }
 0x9d9   : > { %15118 = vst [vmem:[#allocation51_spill] sm:$0xff] %v13922_v39  ;;  %v13924_v50 = vadd.f32 %v5206_v7, %v5093_v15  ;;  %v5095_v14 = vpop.f32.mrf.mxu0  ;;  %v15124_v39 = vld [vmem:[#allocation24_spill] sm:$0xff] }
 0x9da   : > { %v5208_v58 = vpop.f32.mrf.mxu1 }
 0x9db   : > { %15119 = vst [vmem:[#allocation52_spill] sm:$0xff] %v13924_v50  ;;  %v13926_v1 = vadd.f32 %v5208_v58, %v5095_v14  ;;  %v13928_v18 = vpop.f32.mrf.mxu0 }
 0x9dc   : > { %15121 = vst [vmem:[#allocation46_spill] sm:$0xff] %v13928_v18  ;;  %v13930_v41 = vpop.f32.mrf.mxu1 }
 0x9dd   : > { %15120 = vst [vmem:[#allocation53_spill] sm:$0xff] %v13926_v1  ;;  %15122 = vst [vmem:[#allocation47_spill] sm:$0xff] %v13930_v41  ;;  %v13942_v41 = vrot.slane %v13932_v23, %v15124_v39 }
 0x9e6   : > { %v5887_v13 = vpop.f32.mrf.mxu0  ;;  %v6000_v30 = vpop.f32.mrf.mxu1 }
 0x9e7   : > { %v5888_v11 = vadd.f32 %v5887_v13, %v13744_v55 }
 0x9e8   : > { %v5889_v7 = vpop.f32.mrf.mxu0  ;;  %v6002_v15 = vpop.f32.mrf.mxu1 }
 0x9e9   : > { %v6001_v50 = vadd.f32 %v6000_v30, %v5888_v11  ;;  %v5890_v58 = vadd.f32 %v5889_v7, %v13749_v6 }
 0x9ea   : > { %v5891_v14 = vpop.f32.mrf.mxu0  ;;  %v6004_v1 = vpop.f32.mrf.mxu1 }
 0x9eb   : > { %v6003_v18 = vadd.f32 %v6002_v15, %v5890_v58  ;;  %v5892_v24 = vadd.f32 %v5891_v14, %v13752_v25  ;;  %v6326_v55 = vadd.f32 %v13937_v35, %v6001_v50 }
 0x9ec   : > { %v5893_v13 = vpop.f32.mrf.mxu0  ;;  %v6006_v32 = vpop.f32.mrf.mxu1 }
 0x9ed   : > { %v6005_v10 = vadd.f32 %v6004_v1, %v5892_v24  ;;  %v5894_v49 = vadd.f32 %v5893_v13, %v13754_v56  ;;  %v6327_v6 = vadd.f32 %v13942_v41, %v6003_v18  ;;  %v6390_v58 = vmax.f32 %v6326_v55, 0.0 }
 0x9ee   : > { %v5897_v46 = vpop.f32.mrf.mxu0  ;;  %v6010_v11 = vpop.f32.mrf.mxu1 }
 0x9ef   : > { %v6330_v30 = vadd.f32 %v13937_v35, %v6005_v10  ;;  %v6007_v7 = vadd.f32 %v6006_v32, %v5894_v49  ;;  %v5898_v15 = vadd.f32 %v5897_v46, %v13756_v37  ;;  %v6391_v13 = vmax.f32 %v6327_v6, 0.0 }
 0x9f0   : > { %v5899_v39 = vpop.f32.mrf.mxu0  ;;  %v6012_v48 = vpop.f32.mrf.mxu1 }
 0x9f1   : > { %v6394_v25 = vmax.f32 %v6330_v30, 0.0  ;;  %v6331_v50 = vadd.f32 %v13942_v41, %v6007_v7  ;;  %v6011_v14 = vadd.f32 %v6010_v11, %v5898_v15  ;;  %v5900_v24 = vadd.f32 %v5899_v39, %v13761_v0 }
 0x9f2   : > { %v5901_v1 = vpop.f32.mrf.mxu0  ;;  %v6014_v56 = vpop.f32.mrf.mxu1 }
 0x9f3   : > { %v13952_v3 = vpack.c.bf16 %v6394_v25, %v6390_v58  ;;  %v6395_v18 = vmax.f32 %v6331_v50, 0.0  ;;  %v6013_v33 = vadd.f32 %v6012_v48, %v5900_v24  ;;  %v5902_v49 = vadd.f32 %v5901_v1, %v13764_v36 }
 0x9f4   : > { %v5903_v32 = vpop.f32.mrf.mxu0  ;;  %v6016_v37 = vpop.f32.mrf.mxu1  ;;  %v6334_v55 = vadd.f32 %v13937_v35, %v6011_v14 }
 0x9f5   : > { %15125 = vst [vmem:[#allocation54_spill] sm:$0xff] %v13952_v3  ;;  %v5904_v46 = vadd.f32 %v5903_v32, %v13766_v2  ;;  %v13956_v10 = vpack.c.bf16 %v6395_v18, %v6391_v13  ;;  %v6015_v11 = vadd.f32 %v6014_v56, %v5902_v49  ;;  %v6335_v7 = vadd.f32 %v13942_v41, %v6013_v33 }
 0x9f6   : > { %v5907_v30 = vpop.f32.mrf.mxu0  ;;  %v6020_v0 = vpop.f32.mrf.mxu1  ;;  %v6398_v50 = vmax.f32 %v6334_v55, 0.0 }
 0x9f7   : > { %v6017_v39 = vadd.f32 %v6016_v37, %v5904_v46  ;;  %v5908_v6 = vadd.f32 %v5907_v30, %v13768_v31  ;;  %v6338_v48 = vadd.f32 %v13937_v35, %v6015_v11  ;;  %v6399_v31 = vmax.f32 %v6335_v7, 0.0 }
 0x9f8   : > { %v5909_v15 = vpop.f32.mrf.mxu0  ;;  %v6022_v36 = vpop.f32.mrf.mxu1 }
 0x9f9   : > { %v6339_v58 = vadd.f32 %v13942_v41, %v6017_v39  ;;  %v6021_v25 = vadd.f32 %v6020_v0, %v5908_v6  ;;  %v5910_v2 = vadd.f32 %v5909_v15, %v13773_v44  ;;  %v6402_v24 = vmax.f32 %v6338_v48, 0.0 }
 0x9fa   : > { %v5911_v14 = vpop.f32.mrf.mxu0  ;;  %v6024_v1 = vpop.f32.mrf.mxu1 }
 0x9fb   : > { %v6403_v56 = vmax.f32 %v6339_v58, 0.0  ;;  %v6023_v13 = vadd.f32 %v6022_v36, %v5910_v2  ;;  %v5912_v18 = vadd.f32 %v5911_v14, %v13776_v27  ;;  %v13965_v49 = vpack.c.bf16 %v6402_v24, %v6398_v50 }
 0x9fc   : > { %v5913_v33 = vpop.f32.mrf.mxu0  ;;  %v6026_v32 = vpop.f32.mrf.mxu1  ;;  %v6342_v37 = vadd.f32 %v13937_v35, %v6021_v25 }
 0x9fd   : > { %15126 = vst [vmem:[#allocation55_spill] sm:$0xff] %v13965_v49  ;;  %v6025_v46 = vadd.f32 %v6024_v1, %v5912_v18  ;;  %v5914_v11 = vadd.f32 %v5913_v33, %v13778_v53  ;;  %v13969_v55 = vpack.c.bf16 %v6403_v56, %v6399_v31  ;;  %v6343_v0 = vadd.f32 %v13942_v41, %v6023_v13 }
 0x9fe   : > { %v5917_v30 = vpop.f32.mrf.mxu0  ;;  %v6030_v44 = vpop.f32.mrf.mxu1  ;;  %v6406_v15 = vmax.f32 %v6342_v37, 0.0 }
 0x9ff   : > { %15127 = vst [vmem:[#allocation56_spill] sm:$0xff] %v13969_v55  ;;  %v6346_v39 = vadd.f32 %v13937_v35, %v6025_v46  ;;  %v6027_v6 = vadd.f32 %v6026_v32, %v5914_v11  ;;  %v5918_v27 = vadd.f32 %v5917_v30, %v13780_v51  ;;  %v6407_v24 = vmax.f32 %v6343_v0, 0.0 }
 0xa00   : > { %v5919_v7 = vpop.f32.mrf.mxu0  ;;  %v6032_v48 = vpop.f32.mrf.mxu1 }
 0xa01   : > { %v6410_v36 = vmax.f32 %v6346_v39, 0.0  ;;  %v6347_v58 = vadd.f32 %v13942_v41, %v6027_v6  ;;  %v5920_v25 = vadd.f32 %v5919_v7, %v13785_v57  ;;  %v6031_v53 = vadd.f32 %v6030_v44, %v5918_v27 }
 0xa02   : > { %v5921_v2 = vpop.f32.mrf.mxu0  ;;  %v6034_v50 = vpop.f32.mrf.mxu1 }
 0xa03   : > { %v13976_v14 = vpack.c.bf16 %v6410_v36, %v6406_v15  ;;  %v6411_v1 = vmax.f32 %v6347_v58, 0.0  ;;  %v6033_v56 = vadd.f32 %v6032_v48, %v5920_v25  ;;  %v5922_v13 = vadd.f32 %v5921_v2, %v13788_v47 }
 0xa04   : > { %v5923_v18 = vpop.f32.mrf.mxu0  ;;  %v6036_v51 = vpop.f32.mrf.mxu1  ;;  %v6350_v32 = vadd.f32 %v13937_v35, %v6031_v53 }
 0xa05   : > { %15128 = vst [vmem:[#allocation57_spill] sm:$0xff] %v13976_v14  ;;  %v5924_v31 = vadd.f32 %v5923_v18, %v13790_v9  ;;  %v13980_v33 = vpack.c.bf16 %v6411_v1, %v6407_v24  ;;  %v6035_v37 = vadd.f32 %v6034_v50, %v5922_v13  ;;  %v6351_v44 = vadd.f32 %v13942_v41, %v6033_v56 }
 0xa06   : > { %v5927_v57 = vpop.f32.mrf.mxu0  ;;  %v6040_v46 = vpop.f32.mrf.mxu1  ;;  %v6414_v27 = vmax.f32 %v6350_v32, 0.0 }
 0xa07   : > { %15129 = vst [vmem:[#allocation80_spill] sm:$0xff] %v13980_v33  ;;  %v6037_v11 = vadd.f32 %v6036_v51, %v5924_v31  ;;  %v5928_v30 = vadd.f32 %v5927_v57, %v13792_v40  ;;  %v6354_v0 = vadd.f32 %v13937_v35, %v6035_v37  ;;  %v6415_v25 = vmax.f32 %v6351_v44, 0.0 }
 0xa08   : > { %v13986_v39 = vpop.f32.mrf.mxu0  ;;  %v13988_v47 = vpop.f32.mrf.mxu1 }
 0xa09   : > { %v6355_v9 = vadd.f32 %v13942_v41, %v6037_v11  ;;  %v6041_v6 = vadd.f32 %v6040_v46, %v5928_v30  ;;  %v6418_v7 = vmax.f32 %v6354_v0, 0.0 }
 0xa0a   : > { %v5931_v48 = vpop.f32.mrf.mxu0  ;;  %v6044_v15 = vpop.f32.mrf.mxu1 }
 0xa0b   : > { %v6419_v36 = vmax.f32 %v6355_v9, 0.0  ;;  %v5932_v58 = vadd.f32 %v5931_v48, %v13800_v8  ;;  %v13992_v40 = vpack.c.bf16 %v6418_v7, %v6414_v27  ;;  %v6358_v50 = vadd.f32 %v13937_v35, %v6041_v6 }
 0xa0c   : > { %v13994_v53 = vpop.f32.mrf.mxu0  ;;  %v13996_v2 = vpop.f32.mrf.mxu1 }
 0xa0d   : > { %15130 = vst [vmem:[#allocation76_spill] sm:$0xff] %v13992_v40  ;;  %v6045_v24 = vadd.f32 %v6044_v15, %v5932_v58  ;;  %v13999_v13 = vpack.c.bf16 %v6419_v36, %v6415_v25  ;;  %v6422_v32 = vmax.f32 %v6358_v50, 0.0 }
 0xa0e   : > { %v5937_v1 = vpop.f32.mrf.mxu0  ;;  %v6050_v56 = vpop.f32.mrf.mxu1 }
 0xa0f   : > { %15131 = vst [vmem:[#allocation77_spill] sm:$0xff] %v13999_v13  ;;  %v6362_v18 = vadd.f32 %v13937_v35, %v6045_v24  ;;  %v5938_v51 = vadd.f32 %v5937_v1, %v13806_v59 }
 0xa10   : > { %v5939_v31 = vpop.f32.mrf.mxu0  ;;  %v14003_v8 = vpop.f32.mrf.mxu1 }
 0xa11   : > { %v6426_v37 = vmax.f32 %v6362_v18, 0.0  ;;  %v6051_v57 = vadd.f32 %v6050_v56, %v5938_v51 }
 0xa12   : > { %v5941_v46 = vpop.f32.mrf.mxu0  ;;  %v6054_v11 = vpop.f32.mrf.mxu1 }
 0xa13   : > { %v14005_v30 = vpack.c.bf16 %v6426_v37, %v6422_v32  ;;  %v5942_v44 = vadd.f32 %v5941_v46, %v13814_v43  ;;  %v6366_v6 = vadd.f32 %v13937_v35, %v6051_v57 }
 0xa14   : > { %v5943_v0 = vpop.f32.mrf.mxu0  ;;  %v6056_v9 = vpop.f32.mrf.mxu1 }
 0xa15   : > { %15132 = vst [vmem:[#allocation72_spill] sm:$0xff] %v14005_v30  ;;  %v6055_v27 = vadd.f32 %v6054_v11, %v5942_v44  ;;  %v6430_v50 = vmax.f32 %v6366_v6, 0.0 }
 0xa16   : > { %v5947_v7 = vpop.f32.mrf.mxu0  ;;  %v6060_v48 = vpop.f32.mrf.mxu1 }
 0xa17   : > { %v5948_v59 = vadd.f32 %v5947_v7, %v13820_v34  ;;  %v6370_v15 = vadd.f32 %v13937_v35, %v6055_v27  ;;  %v4975_v34 = vadd.f32 %v13832_v61, %v13830_v45 }
 0xa18   : > { %v5949_v36 = vpop.f32.mrf.mxu0  ;;  %v6062_v58 = vpop.f32.mrf.mxu1 }
 0xa19   : > { %v6061_v25 = vadd.f32 %v6060_v48, %v5948_v59  ;;  %v6434_v24 = vmax.f32 %v6370_v15, 0.0 }
 0xa1a   : > { %v5951_v1 = vpop.f32.mrf.mxu0  ;;  %v6064_v56 = vpop.f32.mrf.mxu1 }
 0xa1b   : > { %v5952_v43 = vadd.f32 %v5951_v1, %v13828_v16  ;;  %v14012_v18 = vpack.c.bf16 %v6434_v24, %v6430_v50  ;;  %v6374_v37 = vadd.f32 %v13937_v35, %v6061_v25  ;;  %v4965_v25 = vadd.f32 %v13818_v63, %v13816_v19 }
 0xa1c   : > { %v5953_v51 = vpop.f32.mrf.mxu0  ;;  %v6066_v32 = vpop.f32.mrf.mxu1  ;;  %v5950_v50 = vadd.f32 %v5949_v36, %v13825_v22  ;;  %v4955_v1 = vadd.f32 %v13804_v60, %v13802_v26  ;;  %v5940_v36 = vadd.f32 %v5939_v31, %v13811_v12 }
 0xa1d   : > { %15133 = vst [vmem:[#allocation73_spill] sm:$0xff] %v14012_v18  ;;  %v6065_v57 = vadd.f32 %v6064_v56, %v5952_v43  ;;  %v5954_v27 = vadd.f32 %v5953_v51, %v4975_v34  ;;  %v6438_v16 = vmax.f32 %v6374_v37, 0.0  ;;  %v5944_v43 = vadd.f32 %v5943_v0, %v4965_v25 }
 0xa1e   : > { %v5957_v46 = vpop.f32.mrf.mxu0  ;;  %v6070_v11 = vpop.f32.mrf.mxu1  ;;  %v5934_v63 = vadd.f32 %v13994_v53, %v4955_v1  ;;  %v6063_v34 = vadd.f32 %v6062_v58, %v5950_v50 }
 0xa1f   : > { %v6378_v44 = vadd.f32 %v13937_v35, %v6065_v57  ;;  %v5958_v6 = vadd.f32 %v5957_v46, %v13834_v42  ;;  %v4985_v42 = vadd.f32 %v13846_v54, %v13844_v28  ;;  %v6067_v51 = vadd.f32 %v6066_v32, %v5954_v27 }
 0xa20   : > { %v5959_v7 = vpop.f32.mrf.mxu0  ;;  %v6072_v48 = vpop.f32.mrf.mxu1  ;;  %v5930_v28 = vadd.f32 %v13986_v39, %v13797_v21  ;;  %v6057_v53 = vadd.f32 %v6056_v9, %v5944_v43  ;;  %v6047_v27 = vadd.f32 %v13996_v2, %v5934_v63 }
 0xa21   : > { %v6442_v59 = vmax.f32 %v6378_v44, 0.0  ;;  %v5960_v15 = vadd.f32 %v5959_v7, %v13839_v4  ;;  %v6071_v24 = vadd.f32 %v6070_v11, %v5958_v6  ;;  %v6379_v12 = vadd.f32 %v13942_v41, %v6067_v51 }
 0xa22   : > { %v5961_v45 = vpop.f32.mrf.mxu0  ;;  %v6074_v61 = vpop.f32.mrf.mxu1  ;;  %v6043_v51 = vadd.f32 %v13988_v47, %v5930_v28 }
 0xa23   : > { %v14027_v56 = vpack.c.bf16 %v6442_v59, %v6438_v16  ;;  %v6073_v37 = vadd.f32 %v6072_v48, %v5960_v15  ;;  %v5962_v4 = vadd.f32 %v5961_v45, %v13842_v62  ;;  %v6382_v26 = vadd.f32 %v13937_v35, %v6071_v24  ;;  %v15135_v62 = vld [vmem:[#allocation23_spill] sm:$0xff] }
 0xa24   : > { %v5963_v57 = vpop.f32.mrf.mxu0  ;;  %v6076_v19 = vpop.f32.mrf.mxu1  ;;  %v15136_v11 = vsub.s32 2, %v15135_v62  ;;  %v6053_v48 = vadd.f32 %v14003_v8, %v5940_v36  ;;  %v6375_v16 = vadd.f32 %v13942_v41, %v6063_v34  ;;  %v6371_v45 = vadd.f32 %v13942_v41, %v6057_v53 }
 0xa25   : > { %15134 = vst [vmem:[#allocation78_spill] sm:$0xff] %v14027_v56  ;;  %v5964_v22 = vadd.f32 %v5963_v57, %v4985_v42  ;;  %v6075_v60 = vadd.f32 %v6074_v61, %v5962_v4  ;;  %v6383_v31 = vadd.f32 %v13942_v41, %v6073_v37  ;;  %v6446_v9 = vmax.f32 %v6382_v26, 0.0 }
 0xa26   : > { %v6113_v46 = vpop.f32.mrf.mxu0  ;;  %v14039_v44 = vrot.slane %v13932_v23, %v15136_v11  ;;  %v6443_v61 = vmax.f32 %v6379_v12, 0.0  ;;  %v6367_v37 = vadd.f32 %v13942_v41, %v6053_v48  ;;  %v6439_v4 = vmax.f32 %v6375_v16, 0.0  ;;  %v15141_v48 = vld [vmem:[#allocation36_spill] sm:$0xff] }
 0xa27   : > { %v6077_v54 = vadd.f32 %v6076_v19, %v5964_v22  ;;  %v6114_v0 = vadd.f32 %v6113_v46, %v13849_v52  ;;  %v6226_v32 = vpop.f32.mrf.mxu1  ;;  %v6386_v58 = vadd.f32 %v13937_v35, %v6075_v60  ;;  %v6363_v36 = vadd.f32 %v13942_v41, %v6047_v27 }
 0xa28   : > { %v6115_v6 = vpop.f32.mrf.mxu0  ;;  %v6435_v34 = vmax.f32 %v6371_v45, 0.0  ;;  %v14068_v60 = vpack.c.bf16 %v6443_v61, %v6439_v4 }
 0xa29   : > { %v6387_v21 = vadd.f32 %v13942_v41, %v6077_v54  ;;  %v6227_v39 = vadd.f32 %v6226_v32, %v6114_v0  ;;  %v6116_v52 = vadd.f32 %v6115_v6, %v13854_v38  ;;  %v6228_v7 = vpop.f32.mrf.mxu1  ;;  %v6450_v59 = vmax.f32 %v6386_v58, 0.0 }
 0xa2a   : > { %v6117_v15 = vpop.f32.mrf.mxu0  ;;  %v6447_v38 = vmax.f32 %v6383_v31, 0.0  ;;  %15139 = vst [vmem:[#allocation75_spill] sm:$0xff] %v14068_v60  ;;  %v6359_v32 = vadd.f32 %v13942_v41, %v6043_v51  ;;  %v6427_v6 = vmax.f32 %v6363_v36, 0.0  ;;  %v15144_v36 = vld [vmem:[#allocation64_spill] sm:$0xff] }
 0xa2b   : > { %v6451_v25 = vmax.f32 %v6387_v21, 0.0  ;;  %v6328_v50 = vadd.f32 %v14039_v44, %v6227_v39  ;;  %v14050_v35 = vadd.f32 %v6228_v7, %v6116_v52  ;;  %v6118_v2 = vadd.f32 %v6117_v15, %v13856_v29  ;;  %v6230_v24 = vpop.f32.mrf.mxu1 }
 0xa2c   : > { %v14054_v1 = vpack.c.bf16 %v6450_v59, %v6446_v9  ;;  %v14056_v8 = vpop.f32.mrf.mxu0  ;;  %v6423_v41 = vmax.f32 %v6359_v32, 0.0 }
 0xa2d   : > { %v6231_v42 = vadd.f32 %v6230_v24, %v6118_v2  ;;  %v14058_v43 = vpop.f32.mrf.mxu1  ;;  %v14062_v19 = vpack.c.bf16 %v6451_v25, %v6447_v38  ;;  %v6392_v47 = vmax.f32 %v6328_v50, 0.0  ;;  %v15143_v38 = vld [vmem:[#allocation38_spill] sm:$0xff] }
 0xa2e   : > { %15137 = vst [vmem:[#allocation79_spill] sm:$0xff] %v14054_v1  ;;  %v6123_v57 = vpop.f32.mrf.mxu0 }
 0xa2f   : > { %15138 = vst [vmem:[#allocation74_spill] sm:$0xff] %v14062_v19  ;;  %v6332_v29 = vadd.f32 %v14039_v44, %v6231_v42  ;;  %v6124_v63 = vadd.f32 %v6123_v57, %v13862_v20  ;;  %v6236_v22 = vpop.f32.mrf.mxu1  ;;  %6616 = vmatprep.subr.bf16.mxu0 %v14062_v19  ;;  %v6431_v20 = vmax.f32 %v6367_v37, 0.0  ;;  %v11711_v19 = vld [vmem:[#allocation10 + $0x340] ss:$8 sps:$4 sm:$0xff]  }
 0xa30   : > { %v6125_v26 = vpop.f32.mrf.mxu0  ;;  %6617 = vmatpush1.bf16.msra.mxu0 %v14054_v1 }
 0xa31   : > { %v6396_v46 = vmax.f32 %v6332_v29, 0.0  ;;  %v6237_v28 = vadd.f32 %v6236_v22, %v6124_v63  ;;  %v6126_v54 = vadd.f32 %v6125_v26, %v13864_v5  ;;  %v6238_v0 = vpop.f32.mrf.mxu1  ;;  %6618 = vmatprep.subr.bf16.mxu0 %v14068_v60  ;;  %v14082_v21 = vpack.c.bf16 %v6435_v34, %v6431_v20 }
 0xa32   : > { %v6127_v11 = vpop.f32.mrf.mxu0 }
 0xa33   : > { %v14074_v53 = vpack.c.bf16 %v6396_v46, %v6392_v47  ;;  %v6336_v12 = vadd.f32 %v14039_v44, %v6237_v28  ;;  %v14077_v31 = vadd.f32 %v6238_v0, %v6126_v54  ;;  %v6240_v58 = vpop.f32.mrf.mxu1  ;;  %v6128_v27 = vadd.f32 %v6127_v11, %v13866_v17  ;;  %15140 = vst [vmem:[#allocation68_spill] sm:$0xff] %v14082_v21 }
 0xa34   : > { %v14080_v5 = vpop.f32.mrf.mxu0  ;;  %6619 = vmatpush1.bf16.msra.mxu0 %v14027_v56  ;;  %v14092_v17 = vpack.c.bf16 %v6427_v6, %v6423_v41 }
 0xa35   : > { %v14084_v39 = vpop.f32.mrf.mxu1  ;;  %v6241_v52 = vadd.f32 %v6240_v58, %v6128_v27  ;;  %6620 = vmatprep.subr.bf16.mxu0 %v14082_v21  ;;  %v6400_v2 = vmax.f32 %v6336_v12, 0.0  ;;  %v15145_v58 = vld [vmem:[#allocation65_spill] sm:$0xff] }
 0xa36   : > { %v6133_v7 = vpop.f32.mrf.mxu0  ;;  %15142 = vst [vmem:[#allocation69_spill] sm:$0xff] %v14092_v17 }
 0xa37   : > { %v6134_v16 = vadd.f32 %v6133_v7, %v15141_v48  ;;  %v6246_v9 = vpop.f32.mrf.mxu1  ;;  %v6340_v59 = vadd.f32 %v14039_v44, %v6241_v52  ;;  %v15146_v48 = vld [vmem:[#allocation30_spill] sm:$0xff] }
 0xa38   : > { %v14090_v15 = vpop.f32.mrf.mxu0  ;;  %6621 = vmatpush1.bf16.msra.mxu0 %v14012_v18 }
 0xa39   : > { %v6247_v25 = vadd.f32 %v6246_v9, %v6134_v16  ;;  %v14094_v50 = vpop.f32.mrf.mxu1  ;;  %v6404_v24 = vmax.f32 %v6340_v59, 0.0  ;;  %6622 = vmatprep.subr.bf16.mxu0 %v14092_v17 }
 0xa3a   : > { %v6137_v45 = vpop.f32.mrf.mxu0 }
 0xa3b   : > { %v6344_v61 = vadd.f32 %v14039_v44, %v6247_v25  ;;  %v6138_v42 = vadd.f32 %v6137_v45, %v15143_v38  ;;  %v6250_v51 = vpop.f32.mrf.mxu1  ;;  %v14100_v37 = vpack.c.bf16 %v6404_v24, %v6400_v2 }
 0xa3c   : > { %v14102_v4 = vpop.f32.mrf.mxu0  ;;  %6623 = vmatpush1.bf16.msra.mxu0 %v14005_v30 }
 0xa3d   : > { %v6251_v57 = vadd.f32 %v6250_v51, %v6138_v42  ;;  %v14104_v29 = vpop.f32.mrf.mxu1  ;;  %6624 = vmatprep.subr.bf16.mxu0 %v13999_v13  ;;  %v6408_v46 = vmax.f32 %v6344_v61, 0.0  ;;  %v11704_v42 = vld [vmem:[#allocation10 + $0x374] ss:$8 sps:$4 sm:$0xff]  }
 0xa3e   : > { %v6143_v63 = vpop.f32.mrf.mxu0 }
 0xa3f   : > { %v6348_v22 = vadd.f32 %v14039_v44, %v6251_v57  ;;  %v6144_v34 = vadd.f32 %v6143_v63, %v15144_v36  ;;  %v6256_v26 = vpop.f32.mrf.mxu1  ;;  %v15147_v57 = vld [vmem:[#allocation31_spill] sm:$0xff] }
 0xa40   : > { %v14110_v47 = vpop.f32.mrf.mxu0  ;;  %6625 = vmatpush1.bf16.msra.mxu0 %v13992_v40  ;;  %v15156_v40 = vld [vmem:[#allocation51_spill] sm:$0xff] }
 0xa41   : > { %v6412_v28 = vmax.f32 %v6348_v22, 0.0  ;;  %v6257_v54 = vadd.f32 %v6256_v26, %v6144_v34  ;;  %v14112_v0 = vpop.f32.mrf.mxu1  ;;  %6626 = vmatprep.subr.bf16.mxu0 %v13980_v33 }
 0xa42   : > { %v6147_v32 = vpop.f32.mrf.mxu0 }
 0xa43   : > { %v14116_v20 = vpack.c.bf16 %v6412_v28, %v6408_v46  ;;  %v6352_v11 = vadd.f32 %v14039_v44, %v6257_v54  ;;  %v6260_v12 = vpop.f32.mrf.mxu1  ;;  %v6148_v6 = vadd.f32 %v6147_v32, %v15145_v58  ;;  %v11702_v28 = vld [vmem:[#allocation10 + $0x370] ss:$8 sps:$4 sm:$0xff]   ;;  %v11707_v32 = vld [vmem:[#allocation10 + $0x364] ss:$8 sps:$4 sm:$0xff]  }
 0xa44   : > { %v14120_v27 = vpop.f32.mrf.mxu0  ;;  %6627 = vmatpush1.bf16.msra.mxu0 %v13976_v14  ;;  %v15159_v14 = vld [vmem:[#allocation43_spill] sm:$0xff] }
 0xa45   : > { %v14122_v41 = vpop.f32.mrf.mxu1  ;;  %v6261_v52 = vadd.f32 %v6260_v12, %v6148_v6  ;;  %6628 = vmatprep.subr.bf16.mxu0 %v13969_v55  ;;  %v6416_v45 = vmax.f32 %v6352_v11, 0.0  ;;  %v15148_v12 = vld [vmem:[#allocation35_spill] sm:$0xff] }
 0xa46   : > { %v6153_v7 = vpop.f32.mrf.mxu0 }
 0xa47   : > { %v6154_v16 = vadd.f32 %v6153_v7, %v15146_v48  ;;  %v6266_v9 = vpop.f32.mrf.mxu1  ;;  %v6356_v59 = vadd.f32 %v14039_v44, %v6261_v52  ;;  %v14146_v52 = vld [vmem:[%s12670_s17] sm:$0xff]  }
 0xa48   : > { %v14128_v25 = vpop.f32.mrf.mxu0  ;;  %6629 = vmatpush1.bf16.msra.mxu0 %v13965_v49  ;;  %v14179_v49 = vld [vmem:[%s12670_s17 + $0x10] sm:$0xff]  }
 0xa49   : > { %v6267_v2 = vadd.f32 %v6266_v9, %v6154_v16  ;;  %v14130_v24 = vpop.f32.mrf.mxu1  ;;  %v6420_v61 = vmax.f32 %v6356_v59, 0.0  ;;  %6630 = vmatprep.subr.bf16.mxu0 %v13956_v10  ;;  %15160 = vst [vmem:[#allocation71_spill] sm:$0xff] %v14179_v49 }
 0xa4a   : > { %v6157_v38 = vpop.f32.mrf.mxu0 }
 0xa4b   : > { %v6360_v51 = vadd.f32 %v14039_v44, %v6267_v2  ;;  %v6158_v63 = vadd.f32 %v6157_v38, %v15147_v57  ;;  %v6270_v22 = vpop.f32.mrf.mxu1  ;;  %v14136_v36 = vpack.c.bf16 %v6420_v61, %v6416_v45  ;;  %v11705_v2 = vld [vmem:[#allocation10 + $0x360] ss:$8 sps:$4 sm:$0xff]   ;;  %v15149_v45 = vmov 0   ;;  %v11710_v38 = vld [vmem:[#allocation10 + $0x354] ss:$8 sps:$4 sm:$0xff]  }
 0xa4c   : > { %v14138_v34 = vpop.f32.mrf.mxu0  ;;  %6631 = vmatpush1.bf16.msra.mxu0 %v13952_v3  ;;  %v15167_v3 = vsub.s32 3, %v15135_v62 }
 0xa4d   : > { %v6271_v26 = vadd.f32 %v6270_v22, %v6158_v63  ;;  %v14140_v46 = vpop.f32.mrf.mxu1  ;;  %7194 = vmatprep.subr.bf16.mxu0 %v11704_v42  ;;  %v6424_v48 = vmax.f32 %v6360_v51, 0.0  ;;  %v15150_v22 = vld [vmem:[#allocation59_spill] sm:$0xff] }
 0xa4e   : > { %v6163_v54 = vpop.f32.mrf.mxu0 }
 0xa4f   : > { %v6364_v11 = vadd.f32 %v14039_v44, %v6271_v26  ;;  %v6164_v58 = vadd.f32 %v6163_v54, %v15148_v12  ;;  %v6276_v6 = vpop.f32.mrf.mxu1  ;;  %6649 = vmatmul.mubr.bf16.vlgmr.msra.gmra.mxu0 %v14146_v52 }
 0xa50   : > { %v14149_v7 = vpop.f32.mrf.mxu0  ;;  %7195 = vmatpush1.bf16.msra.mxu0 %v11702_v28  ;;  %6658 = vmatprep.mubr.bf16.mxu0 %v15149_v45 }
 0xa51   : > { %v6428_v16 = vmax.f32 %v6364_v11, 0.0  ;;  %v6277_v9 = vadd.f32 %v6276_v6, %v6164_v58  ;;  %v14151_v59 = vpop.f32.mrf.mxu1  ;;  %7196 = vmatprep.subr.bf16.mxu0 %v11707_v32  ;;  %v11708_v11 = vld [vmem:[#allocation10 + $0x350] ss:$8 sps:$4 sm:$0xff]   ;;  %v11713_v58 = vld [vmem:[#allocation10 + $0x344] ss:$8 sps:$4 sm:$0xff]  }
 0xa52   : > { %v6167_v61 = vpop.f32.mrf.mxu0  ;;  %v15151_v6 = vld [vmem:[#allocation42_spill] sm:$0xff] }
 0xa53   : > { %v14154_v42 = vpack.c.bf16 %v6428_v16, %v6424_v48  ;;  %v6368_v57 = vadd.f32 %v14039_v44, %v6277_v9  ;;  %v6280_v63 = vpop.f32.mrf.mxu1  ;;  %v6168_v26 = vadd.f32 %v6167_v61, %v15150_v22  ;;  %v14163_v16 = vld [vmem:[%s12670_s17 + $0x8] sm:$0xff]  }
 0xa54   : > { %v6169_v51 = vpop.f32.mrf.mxu0  ;;  %7197 = vmatpush1.bf16.msra.mxu0 %v11705_v2  ;;  %15152 = vst [vmem:[#allocation70_spill] sm:$0xff] %v14163_v16 }
 0xa55   : > { %v14158_v54 = vpop.f32.mrf.mxu1  ;;  %v6281_v28 = vadd.f32 %v6280_v63, %v6168_v26  ;;  %7198 = vmatprep.subr.bf16.mxu0 %v11710_v38  ;;  %v6432_v2 = vmax.f32 %v6368_v57, 0.0  ;;  %v11716_v26 = vld [vmem:[#allocation10 + $0x334] ss:$8 sps:$4 sm:$0xff]   ;;  %v11714_v57 = vld [vmem:[#allocation10 + $0x330] ss:$8 sps:$4 sm:$0xff]  }
 0xa56   : > { %v6173_v12 = vpop.f32.mrf.mxu0 }
 0xa57   : > { %v6174_v32 = vadd.f32 %v6173_v12, %v15151_v6  ;;  %v6286_v1 = vpop.f32.mrf.mxu1  ;;  %v6372_v48 = vadd.f32 %v14039_v44, %v6281_v28  ;;  %6659 = vmatmul.mubr.bf16.gmra.mxu0 %v14163_v16  ;;  %v15153_v6 = vld [vmem:[#allocation44_spill] sm:$0xff] }
 0xa58   : > { %v6175_v9 = vpop.f32.mrf.mxu0  ;;  %7199 = vmatpush1.bf16.msra.mxu0 %v11708_v11  ;;  %6668 = vmatprep.mubr.bf16.mxu0 %v15149_v45 }
 0xa59   : > { %v6287_v61 = vadd.f32 %v6286_v1, %v6174_v32  ;;  %v6288_v22 = vpop.f32.mrf.mxu1  ;;  %v6436_v63 = vmax.f32 %v6372_v48, 0.0  ;;  %7200 = vmatprep.subr.bf16.mxu0 %v11713_v58  ;;  %v15154_v1 = vld [vmem:[#allocation45_spill] sm:$0xff]  ;;  %v15155_v32 = vld [vmem:[#allocation50_spill] sm:$0xff]  ;;  %v11719_v58 = vld [vmem:[#allocation10 + $0x324] ss:$8 sps:$4 sm:$0xff]   ;;  %v6176_v33 = vadd.f32 %v6175_v9, %v15159_v14 }
 0xa5a   : > { %v6177_v38 = vpop.f32.mrf.mxu0  ;;  %v5201_v11 = vadd.f32 %v15155_v32, %v15154_v1  ;;  %v15161_v1 = vld [vmem:[#allocation52_spill] sm:$0xff]  ;;  %v11722_v9 = vld [vmem:[#allocation10 + $0x314] ss:$8 sps:$4 sm:$0xff]  }
 0xa5b   : > { %v6376_v12 = vadd.f32 %v14039_v44, %v6287_v61  ;;  %v6178_v28 = vadd.f32 %v6177_v38, %v15153_v6  ;;  %v6290_v56 = vpop.f32.mrf.mxu1  ;;  %v14169_v60 = vpack.c.bf16 %v6436_v63, %v6432_v2  ;;  %v15157_v2 = vld [vmem:[#allocation48_spill] sm:$0xff]  ;;  %v15158_v63 = vld [vmem:[#allocation49_spill] sm:$0xff] }
 0xa5c   : > { %v6179_v18 = vpop.f32.mrf.mxu0  ;;  %7201 = vmatpush1.bf16.msra.mxu0 %v11711_v19  ;;  %v5191_v13 = vadd.f32 %v15158_v63, %v15157_v2 }
 0xa5d   : > { %v6291_v21 = vadd.f32 %v6290_v56, %v6178_v28  ;;  %v6292_v30 = vpop.f32.mrf.mxu1  ;;  %7202 = vmatprep.subr.bf16.mxu0 %v11716_v26  ;;  %v6180_v61 = vadd.f32 %v6179_v18, %v5201_v11  ;;  %v6440_v19 = vmax.f32 %v6376_v12, 0.0  ;;  %v11717_v18 = vld [vmem:[#allocation10 + $0x320] ss:$8 sps:$4 sm:$0xff]  }
 0xa5e   : > { %v6183_v48 = vpop.f32.mrf.mxu0  ;;  %v15163_v11 = vld [vmem:[#allocation47_spill] sm:$0xff]  ;;  %v6170_v2 = vadd.f32 %v6169_v51, %v5191_v13  ;;  %v14195_v13 = vrot.slane %v13932_v23, %v15167_v3  ;;  %v15168_v51 = vld [vmem:[#allocation58_spill] sm:$0xff] }
 0xa5f   : > { %v6380_v17 = vadd.f32 %v14039_v44, %v6291_v21  ;;  %v6184_v38 = vadd.f32 %v6183_v48, %v15156_v40  ;;  %v6296_v6 = vpop.f32.mrf.mxu1  ;;  %6669 = vmatmul.mubr.bf16.gmra.mxu0 %v14179_v49  ;;  %v15162_v40 = vld [vmem:[#allocation46_spill] sm:$0xff]  ;;  %v6293_v49 = vadd.f32 %v6292_v30, %v6180_v61 }
 0xa60   : > { %v6185_v56 = vpop.f32.mrf.mxu0  ;;  %7203 = vmatpush1.bf16.msra.mxu0 %v11714_v57  ;;  %6678 = vmatprep.mubr.bf16.mxu0 %v15149_v45  ;;  %v5211_v48 = vadd.f32 %v15163_v11, %v15162_v40  ;;  %v11720_v61 = vld [vmem:[#allocation10 + $0x310] ss:$8 sps:$4 sm:$0xff]   ;;  %v6283_v40 = vadd.f32 %v14158_v54, %v6170_v2  ;;  %v15169_v11 = vld [vmem:[#allocation40_spill] sm:$0xff] }
 0xa61   : > { %v6444_v28 = vmax.f32 %v6380_v17, 0.0  ;;  %v6297_v26 = vadd.f32 %v6296_v6, %v6184_v38  ;;  %v6186_v32 = vadd.f32 %v6185_v56, %v15161_v1  ;;  %v6298_v21 = vpop.f32.mrf.mxu1  ;;  %7204 = vmatprep.subr.bf16.mxu0 %v11719_v58  ;;  %v15164_v6 = vld [vmem:[#allocation67_spill] sm:$0xff]  ;;  %v15165_v56 = vld [vmem:[#allocation34_spill] sm:$0xff]  ;;  %v15166_v1 = vld [vmem:[#allocation53_spill] sm:$0xff]  ;;  %v6166_v58 = vadd.f32 %v14149_v7, %v15168_v51 }
 0xa62   : > { %v6187_v14 = vpop.f32.mrf.mxu0  ;;  %v5181_v57 = vadd.f32 %v15165_v56, %v15164_v6  ;;  %v6381_v62 = vadd.f32 %v14195_v13, %v6293_v49  ;;  %v15170_v7 = vld [vmem:[#allocation41_spill] sm:$0xff]  ;;  %v15172_v56 = vld [vmem:[#allocation39_spill] sm:$0xff] }
 0xa63   : > { %v14186_v63 = vpack.c.bf16 %v6444_v28, %v6440_v19  ;;  %v6384_v17 = vadd.f32 %v14039_v44, %v6297_v26  ;;  %v6299_v12 = vadd.f32 %v6298_v21, %v6186_v32  ;;  %v6300_v38 = vpop.f32.mrf.mxu1  ;;  %v6188_v16 = vadd.f32 %v6187_v14, %v15166_v1  ;;  %v11725_v21 = vld [vmem:[#allocation10 + $0x304] ss:$8 sps:$4 sm:$0xff]  }
 0xa64   : > { %v6189_v55 = vpop.f32.mrf.mxu0  ;;  %v6289_v19 = vadd.f32 %v6288_v22, %v6176_v33  ;;  %7205 = vmatpush1.bf16.msra.mxu0 %v11717_v18  ;;  %v6160_v28 = vadd.f32 %v14138_v34, %v5181_v57  ;;  %v5171_v33 = vadd.f32 %v15170_v7, %v15169_v11  ;;  %v15171_v22 = vld [vmem:[#allocation66_spill] sm:$0xff]  ;;  %v15174_v51 = vld [vmem:[#allocation27_spill] sm:$0xff] }
 0xa65   : > { %v6190_v30 = vadd.f32 %v6189_v55, %v5211_v48  ;;  %v6301_v26 = vadd.f32 %v6300_v38, %v6188_v16  ;;  %v6302_v32 = vpop.f32.mrf.mxu1  ;;  %7206 = vmatprep.subr.bf16.mxu0 %v11722_v9  ;;  %v6385_v3 = vadd.f32 %v14195_v13, %v6299_v12  ;;  %v6156_v55 = vadd.f32 %v14128_v25, %v15171_v22  ;;  %v14209_v34 = vld [vmem:[%s12670_s17 + $0x18] sm:$0xff]   ;;  %v11723_v48 = vld [vmem:[#allocation10 + $0x300] ss:$8 sps:$4 sm:$0xff]  }
 0xa66   : > { %v6279_v16 = vadd.f32 %v14151_v59, %v6166_v58  ;;  %v6377_v54 = vadd.f32 %v14195_v13, %v6289_v19  ;;  %v6150_v2 = vadd.f32 %v14120_v27, %v5171_v33  ;;  %v6273_v25 = vadd.f32 %v14140_v46, %v6160_v28  ;;  %v11728_v9 = vld [vmem:[#allocation10 + $0x3f4] ss:$8 sps:$4 sm:$0xff]   ;;  %v11729_v22 = vld [vmem:[#allocation10 + $0x3e0] ss:$8 sps:$4 sm:$0xff]  }
 0xa67   : > { %v6303_v23 = vadd.f32 %v6302_v32, %v6190_v30  ;;  %v6388_v18 = vadd.f32 %v14039_v44, %v6301_v26  ;;  %6679 = vmatmul.mubr.bf16.gmra.mxu0 %v14209_v34  ;;  %v6448_v14 = vmax.f32 %v6384_v17, 0.0  ;;  %v6373_v12 = vadd.f32 %v14195_v13, %v6283_v40  ;;  %v15173_v57 = vld [vmem:[#allocation26_spill] sm:$0xff]  ;;  %v11731_v26 = vld [vmem:[#allocation10 + $0x3e4] ss:$8 sps:$4 sm:$0xff]  }
 0xa68   : > { %7207 = vmatpush1.bf16.msra.mxu0 %v11720_v61  ;;  %6688 = vmatprep.mubr.bf16.mxu0 %v15149_v45  ;;  %v6445_v38 = vmax.f32 %v6381_v62, 0.0  ;;  %v6449_v59 = vmax.f32 %v6385_v3, 0.0  ;;  %v5161_v1 = vadd.f32 %v15173_v57, %v15172_v56  ;;  %v6146_v58 = vadd.f32 %v14110_v47, %v15174_v51  ;;  %v11726_v61 = vld [vmem:[#allocation10 + $0x3f0] ss:$8 sps:$4 sm:$0xff]  }
 0xa69   : > { %v6389_v49 = vadd.f32 %v14195_v13, %v6303_v23  ;;  %v6452_v44 = vmax.f32 %v6388_v18, 0.0  ;;  %7208 = vmatprep.subr.bf16.mxu0 %v11725_v21  ;;  %v6269_v27 = vadd.f32 %v14130_v24, %v6156_v55  ;;  %v6369_v46 = vadd.f32 %v14195_v13, %v6279_v16  ;;  %v15175_v24 = vld [vmem:[#allocation32_spill] sm:$0xff]  ;;  %v15176_v62 = vld [vmem:[#allocation33_spill] sm:$0xff]  ;;  %v14238_v23 = vld [vmem:[%s12670_s17 + $0x20] sm:$0xff]  }
 0xa6a   : > { %v6441_v17 = vmax.f32 %v6377_v54, 0.0  ;;  %v6140_v28 = vadd.f32 %v14102_v4, %v5161_v1  ;;  %v6263_v32 = vadd.f32 %v14122_v41, %v6150_v2  ;;  %v6365_v47 = vadd.f32 %v14195_v13, %v6273_v25  ;;  %v15177_v4 = vld [vmem:[#allocation37_spill] sm:$0xff]  ;;  %v15178_v25 = vld [vmem:[#allocation28_spill] sm:$0xff] }
 0xa6b   : > { %v6453_v6 = vmax.f32 %v6389_v49, 0.0  ;;  %v14223_v19 = vpack.c.bf16 %v6452_v44, %v6448_v14  ;;  %v6437_v21 = vmax.f32 %v6373_v12, 0.0  ;;  %v5151_v3 = vadd.f32 %v15176_v62, %v15175_v24  ;;  %v11734_v18 = vld [vmem:[#allocation10 + $0x3d4] ss:$8 sps:$4 sm:$0xff]   ;;  %v11737_v44 = vld [vmem:[#allocation10 + $0x3c4] ss:$8 sps:$4 sm:$0xff]  }
 0xa6c   : > { %7209 = vmatpush1.bf16.msra.mxu0 %v11723_v48  ;;  %v14233_v40 = vpack.c.bf16 %v6445_v38, %v6441_v17  ;;  %v6136_v11 = vadd.f32 %v14090_v15, %v15177_v4  ;;  %v6259_v41 = vadd.f32 %v14112_v0, %v6146_v58  ;;  %v6361_v7 = vadd.f32 %v14195_v13, %v6269_v27  ;;  %v15179_v14 = vld [vmem:[#allocation29_spill] sm:$0xff] }
 0xa6d   : > { %v14227_v30 = vpack.c.bf16 %v6453_v6, %v6449_v59  ;;  %7210 = vmatprep.subr.bf16.mxu0 %v11728_v9  ;;  %v6433_v33 = vmax.f32 %v6369_v46, 0.0  ;;  %v6130_v55 = vadd.f32 %v14080_v5, %v5151_v3  ;;  %v6253_v16 = vadd.f32 %v14104_v29, %v6140_v28  ;;  %v11732_v5 = vld [vmem:[#allocation10 + $0x3d0] ss:$8 sps:$4 sm:$0xff]   ;;  %v14265_v6 = vld [vmem:[%s12670_s17 + $0x28] sm:$0xff]   ;;  %v11740_v1 = vld [vmem:[#allocation10 + $0x3b4] ss:$8 sps:$4 sm:$0xff]  }
 0xa6e   : > { %v6357_v54 = vadd.f32 %v14195_v13, %v6263_v32  ;;  %v6429_v15 = vmax.f32 %v6365_v47, 0.0  ;;  %v6249_v0 = vadd.f32 %v14094_v50, %v6136_v11  ;;  %v6353_v48 = vadd.f32 %v14195_v13, %v6259_v41  ;;  %v11743_v28 = vld [vmem:[#allocation10 + $0x3a4] ss:$8 sps:$4 sm:$0xff]   ;;  %v11746_v62 = vld [vmem:[#allocation10 + $0x394] ss:$8 sps:$4 sm:$0xff]  }
 0xa6f   : > { %6729 = vmatprep.subr.bf16.mxu1 %v14227_v30  ;;  %6689 = vmatmul.mubr.bf16.gmra.mxu0 %v14238_v23  ;;  %v14251_v49 = vpack.c.bf16 %v6437_v21, %v6433_v33  ;;  %v6425_v2 = vmax.f32 %v6361_v7, 0.0  ;;  %v5141_v29 = vadd.f32 %v15179_v14, %v15178_v25  ;;  %v6243_v9 = vadd.f32 %v14084_v39, %v6130_v55  ;;  %v11735_v39 = vld [vmem:[#allocation10 + $0x3c0] ss:$8 sps:$4 sm:$0xff]   ;;  %v14284_v21 = vld [vmem:[%s12670_s17 + $0x30] sm:$0xff]   ;;  %v11749_v7 = vld [vmem:[#allocation10 + $0x384] ss:$8 sps:$4 sm:$0xff]  }
 0xa70   : > { %6730 = vmatpush1.bf16.msra.mxu1 %v14223_v19  ;;  %7211 = vmatpush2.bf16.msra.mxu0 %v11726_v61  ;;  %v6349_v12 = vadd.f32 %v14195_v13, %v6253_v16  ;;  %v6421_v38 = vmax.f32 %v6357_v54, 0.0  ;;  %v6345_v56 = vadd.f32 %v14195_v13, %v6249_v0  ;;  %v6417_v57 = vmax.f32 %v6353_v48, 0.0  ;;  %v11738_v61 = vld [vmem:[#allocation10 + $0x3b0] ss:$8 sps:$4 sm:$0xff]   ;;  %v11800_v55 = vld [vmem:[#allocation10 + $0x174] ss:$8 sps:$4 sm:$0xff]  }
 0xa71   : > { %6731 = vmatprep.subr.bf16.mxu1 %v14233_v40  ;;  %7212 = vmatprep.subr.bf16.mxu0 %v11731_v26  ;;  %v14261_v59 = vpack.c.bf16 %v6429_v15, %v6425_v2  ;;  %v6120_v50 = vadd.f32 %v14056_v8, %v5141_v29  ;;  %v6341_v8 = vadd.f32 %v14195_v13, %v6243_v9  ;;  %v11744_v11 = vld [vmem:[#allocation10 + $0x390] ss:$8 sps:$4 sm:$0xff]   ;;  %v11755_v16 = vld [vmem:[#allocation10 + $0x464] ss:$8 sps:$4 sm:$0xff]   ;;  %v11758_v2 = vld [vmem:[#allocation10 + $0x454] ss:$8 sps:$4 sm:$0xff]  }
 0xa72   : > { %6698 = vmatprep.mubr.bf16.mxu0 %v15149_v45  ;;  %v6413_v51 = vmax.f32 %v6349_v12, 0.0  ;;  %v14273_v58 = vpack.c.bf16 %v6421_v38, %v6417_v57  ;;  %v6337_v46 = vadd.f32 %v14195_v13, %v14077_v31  ;;  %v6409_v17 = vmax.f32 %v6345_v56, 0.0  ;;  %v11741_v31 = vld [vmem:[#allocation10 + $0x3a0] ss:$8 sps:$4 sm:$0xff]   ;;  %v14297_v33 = vld [vmem:[%s12670_s17 + $0x38] sm:$0xff]  }
 0xa73   : > { %v6233_v27 = vadd.f32 %v14058_v43, %v6120_v50  ;;  %v6405_v26 = vmax.f32 %v6341_v8, 0.0  ;;  %v6329_v24 = vadd.f32 %v14195_v13, %v14050_v35  ;;  %v11798_v54 = vld [vmem:[#allocation10 + $0x170] ss:$8 sps:$4 sm:$0xff]   ;;  %v11803_v15 = vld [vmem:[#allocation10 + $0x164] ss:$8 sps:$4 sm:$0xff]  }
 0xa74   : > { %6732 = vmatpush1.bf16.msra.mxu1 %v14186_v63  ;;  %7213 = vmatpush2.bf16.msra.mxu0 %v11729_v22  ;;  %v14280_v32 = vpack.c.bf16 %v6413_v51, %v6409_v17  ;;  %v6401_v43 = vmax.f32 %v6337_v46, 0.0  ;;  %v11752_v22 = vld [vmem:[#allocation10 + $0x474] ss:$8 sps:$4 sm:$0xff]   ;;  %v15181_v48 = vld [vmem:[#allocation56_spill] sm:$0xff]  ;;  %v11756_v14 = vld [vmem:[#allocation10 + $0x450] ss:$8 sps:$4 sm:$0xff]  }
 0xa75   : > { %6733 = vmatprep.subr.bf16.mxu1 %v14251_v49  ;;  %7214 = vmatprep.subr.bf16.mxu0 %v11734_v18  ;;  %v6333_v47 = vadd.f32 %v14195_v13, %v6233_v27  ;;  %v6393_v41 = vmax.f32 %v6329_v24, 0.0  ;;  %v11747_v13 = vld [vmem:[#allocation10 + $0x380] ss:$8 sps:$4 sm:$0xff]   ;;  %v11750_v18 = vld [vmem:[#allocation10 + $0x470] ss:$8 sps:$4 sm:$0xff]  }
 0xa76   : > { %v14292_v3 = vpack.c.bf16 %v6405_v26, %v6401_v43  ;;  %v15180_v0 = vld [vmem:[#allocation54_spill] sm:$0xff]  ;;  %v11761_v29 = vld [vmem:[#allocation10 + $0x444] ss:$8 sps:$4 sm:$0xff]   ;;  %v11759_v38 = vld [vmem:[#allocation10 + $0x440] ss:$8 sps:$4 sm:$0xff]  }
 0xa77   : > { %6699 = vmatmul.mubr.bf16.gmra.mxu0 %v14265_v6  ;;  %v6397_v4 = vmax.f32 %v6333_v47, 0.0  ;;  %v11806_v25 = vld [vmem:[#allocation10 + $0x154] ss:$8 sps:$4 sm:$0xff]   ;;  %v11809_v9 = vld [vmem:[#allocation10 + $0x144] ss:$8 sps:$4 sm:$0xff]  }
 0xa78   : > { %6734 = vmatpush1.bf16.msra.mxu1 %v14169_v60  ;;  %7215 = vmatpush2.bf16.msra.mxu0 %v11732_v5  ;;  %v11801_v5 = vld [vmem:[#allocation10 + $0x160] ss:$8 sps:$4 sm:$0xff]   ;;  %v11764_v56 = vld [vmem:[#allocation10 + $0x434] ss:$8 sps:$4 sm:$0xff]   ;;  %v11767_v8 = vld [vmem:[#allocation10 + $0x424] ss:$8 sps:$4 sm:$0xff]  }
 0xa79   : > { %6735 = vmatprep.subr.bf16.mxu1 %v14261_v59  ;;  %7216 = vmatprep.subr.bf16.mxu0 %v11737_v44  ;;  %v14301_v35 = vpack.c.bf16 %v6397_v4, %v6393_v41  ;;  %v15182_v44 = vld [vmem:[#allocation70_spill] sm:$0xff]  ;;  %v15183_v12 = vld [vmem:[#allocation55_spill] sm:$0xff]  ;;  %v15184_v50 = vld [vmem:[#allocation80_spill] sm:$0xff] }
 0xa7a   : > { %6708 = vmatprep.mubr.bf16.mxu0 %v15149_v45  ;;  %v11807_v57 = vld [vmem:[#allocation10 + $0x140] ss:$8 sps:$4 sm:$0xff]   ;;  %v11810_v51 = vld [vmem:[#allocation10 + $0x130] ss:$8 sps:$4 sm:$0xff]   ;;  %v11815_v46 = vld [vmem:[#allocation10 + $0x124] ss:$8 sps:$4 sm:$0xff]  }
 0xa7b   : > { %v15185_v27 = vld [vmem:[#allocation71_spill] sm:$0xff]  ;;  %v15186_v17 = vld [vmem:[#allocation57_spill] sm:$0xff] }
 0xa7c   : > { %6736 = vmatpush1.bf16.msra.mxu1 %v14154_v42  ;;  %7217 = vmatpush2.bf16.msra.mxu0 %v11735_v39  ;;  %v11812_v39 = vld [vmem:[#allocation10 + $0x134] ss:$8 sps:$4 sm:$0xff]   ;;  %v11813_v47 = vld [vmem:[#allocation10 + $0x120] ss:$8 sps:$4 sm:$0xff]   ;;  %v11773_v24 = vld [vmem:[#allocation10 + $0x404] ss:$8 sps:$4 sm:$0xff]  }
 0xa7d   : > { %6737 = vmatprep.subr.bf16.mxu1 %v14273_v58  ;;  %7218 = vmatprep.subr.bf16.mxu0 %v11740_v1  ;;  %v11762_v1 = vld [vmem:[#allocation10 + $0x430] ss:$8 sps:$4 sm:$0xff]   ;;  %v11770_v26 = vld [vmem:[#allocation10 + $0x414] ss:$8 sps:$4 sm:$0xff]   ;;  %v11821_v4 = vld [vmem:[#allocation10 + $0x104] ss:$8 sps:$4 sm:$0xff]  }
 0xa7e   : > { %v11818_v43 = vld [vmem:[#allocation10 + $0x114] ss:$8 sps:$4 sm:$0xff]   ;;  %v11771_v41 = vld [vmem:[#allocation10 + $0x400] ss:$8 sps:$4 sm:$0xff]  }
 0xa7f   : > { %6709 = vmatmul.mubr.bf16.gmra.mxu0 %v14284_v21 }
 0xa80   : > { %6738 = vmatpush1.bf16.msra.mxu1 %v14136_v36  ;;  %7219 = vmatpush2.bf16.msra.mxu0 %v11738_v61  ;;  %v11765_v61 = vld [vmem:[#allocation10 + $0x420] ss:$8 sps:$4 sm:$0xff]  }
 0xa81   : > { %6739 = vmatprep.subr.bf16.mxu1 %v14280_v32  ;;  %7220 = vmatprep.subr.bf16.mxu0 %v11743_v28  ;;  %v15187_v28 = vld [vmem:[#allocation77_spill] sm:$0xff] }
 0xa82   : > { %6718 = vmatprep.mubr.bf16.mxu0 %v15149_v45 }
 0xa84   : > { %6740 = vmatpush1.bf16.msra.mxu1 %v14116_v20  ;;  %7221 = vmatpush2.bf16.msra.mxu0 %v11741_v31  ;;  %v11768_v31 = vld [vmem:[#allocation10 + $0x410] ss:$8 sps:$4 sm:$0xff]  }
 0xa85   : > { %6741 = vmatprep.subr.bf16.mxu1 %v14292_v3  ;;  %7222 = vmatprep.subr.bf16.mxu0 %v11746_v62  ;;  %v11816_v62 = vld [vmem:[#allocation10 + $0x110] ss:$8 sps:$4 sm:$0xff]  }
 0xa87   : > { %6719 = vmatmul.mubr.bf16.gmra.mxu0 %v14297_v33 }
 0xa88   : > { %6742 = vmatpush1.bf16.msra.mxu1 %v14100_v37  ;;  %7223 = vmatpush2.bf16.msra.mxu0 %v11744_v11  ;;  %v15188_v11 = vld [vmem:[#allocation76_spill] sm:$0xff] }
 0xa89   : > { %7226 = vmatprep.mubr.bf16.mxu0 %v13956_v10  ;;  %6743 = vmatprep.subr.bf16.mxu1 %v14301_v35  ;;  %v11753_v10 = vld [vmem:[#allocation10 + $0x460] ss:$8 sps:$4 sm:$0xff]  }
 0xa8a   : > { %7224 = vmatprep.subr.bf16.mxu0 %v11749_v7  ;;  %v15189_v7 = vld [vmem:[#allocation69_spill] sm:$0xff] }
 0xa8c   : > { %6744 = vmatpush1.bf16.msra.mxu1 %v14074_v53  ;;  %7225 = vmatpush2.bf16.msra.mxu0 %v11747_v13  ;;  %v11776_v13 = vld [vmem:[#allocation10 + $0x4f4] ss:$8 sps:$4 sm:$0xff]  }
 0xa8d   : > { %7307 = vmatprep.subr.bf16.mxu1 %v11752_v22  ;;  %7740 = vmatprep.subr.bf16.mxu0 %v11800_v55  ;;  %v11819_v22 = vld [vmem:[#allocation10 + $0x100] ss:$8 sps:$4 sm:$0xff]   ;;  %v11824_v55 = vld [vmem:[#allocation10 + $0x1f4] ss:$8 sps:$4 sm:$0xff]  }
 0xa8f   : > { %6762 = vmatmul.mubr.bf16.vlgmr.msra.gmra.mxu1 %v14146_v52  ;;  %7227 = vmatmul.mubr.bf16.vlgmr.msra.gmra.mxu0 %v15180_v0  ;;  %v11804_v52 = vld [vmem:[#allocation10 + $0x150] ss:$8 sps:$4 sm:$0xff]   ;;  %v11777_v0 = vld [vmem:[#allocation10 + $0x4e0] ss:$8 sps:$4 sm:$0xff]  }
 0xa90   : > { %7308 = vmatpush1.bf16.msra.mxu1 %v11750_v18  ;;  %7236 = vmatprep.mubr.bf16.mxu0 %v15181_v48  ;;  %v11774_v18 = vld [vmem:[#allocation10 + $0x4f0] ss:$8 sps:$4 sm:$0xff]   ;;  %v11782_v48 = vld [vmem:[#allocation10 + $0x4d4] ss:$8 sps:$4 sm:$0xff]  }
 0xa91   : > { %7309 = vmatprep.subr.bf16.mxu1 %v11755_v16  ;;  %6771 = vmatprep.mubr.bf16.mxu1 %v15149_v45  ;;  %v11822_v16 = vld [vmem:[#allocation10 + $0x1f0] ss:$8 sps:$4 sm:$0xff]  }
 0xa92   : > { %7741 = vmatpush1.bf16.msra.mxu0 %v11798_v54  ;;  %v11827_v54 = vld [vmem:[#allocation10 + $0x1e4] ss:$8 sps:$4 sm:$0xff]  }
 0xa93   : > { %7742 = vmatprep.subr.bf16.mxu0 %v11803_v15  ;;  %v15190_v15 = vld [vmem:[#allocation72_spill] sm:$0xff] }
 0xa94   : > { %7310 = vmatpush1.bf16.msra.mxu1 %v11753_v10  ;;  %v15191_v10 = vld [vmem:[#allocation68_spill] sm:$0xff] }
 0xa95   : > { %7311 = vmatprep.subr.bf16.mxu1 %v11758_v2  ;;  %v11825_v2 = vld [vmem:[#allocation10 + $0x1e0] ss:$8 sps:$4 sm:$0xff]  }
 0xa96   : > { %7743 = vmatpush1.bf16.msra.mxu0 %v11801_v5  ;;  %v11830_v5 = vld [vmem:[#allocation10 + $0x1d4] ss:$8 sps:$4 sm:$0xff]  }
 0xa97   : > { %6772 = vmatmul.mubr.bf16.gmra.mxu1 %v15182_v44  ;;  %7744 = vmatprep.subr.bf16.mxu0 %v11806_v25  ;;  %v11780_v25 = vld [vmem:[#allocation10 + $0x4d0] ss:$8 sps:$4 sm:$0xff]   ;;  %v11783_v44 = vld [vmem:[#allocation10 + $0x4c0] ss:$8 sps:$4 sm:$0xff]  }
 0xa98   : > { %7237 = vmatmul.mubr.bf16.gmra.mxu0 %v15183_v12  ;;  %7312 = vmatpush1.bf16.msra.mxu1 %v11756_v14  ;;  %v11828_v14 = vld [vmem:[#allocation10 + $0x1d0] ss:$8 sps:$4 sm:$0xff]   ;;  %v11788_v12 = vld [vmem:[#allocation10 + $0x4b4] ss:$8 sps:$4 sm:$0xff]  }
 0xa99   : > { %7246 = vmatprep.mubr.bf16.mxu0 %v15184_v50  ;;  %7313 = vmatprep.subr.bf16.mxu1 %v11761_v29  ;;  %v11833_v29 = vld [vmem:[#allocation10 + $0x1c4] ss:$8 sps:$4 sm:$0xff]   ;;  %v11836_v50 = vld [vmem:[#allocation10 + $0x1b4] ss:$8 sps:$4 sm:$0xff]  }
 0xa9a   : > { %6781 = vmatprep.mubr.bf16.mxu1 %v15149_v45  ;;  %7745 = vmatpush1.bf16.msra.mxu0 %v11804_v52  ;;  %v15192_v52 = vld [vmem:[#allocation73_spill] sm:$0xff] }
 0xa9b   : > { %7746 = vmatprep.subr.bf16.mxu0 %v11809_v9  ;;  %v15193_v9 = vld [vmem:[#allocation75_spill] sm:$0xff] }
 0xa9c   : > { %7314 = vmatpush1.bf16.msra.mxu1 %v11759_v38  ;;  %v11831_v38 = vld [vmem:[#allocation10 + $0x1c0] ss:$8 sps:$4 sm:$0xff]  }
 0xa9d   : > { %7315 = vmatprep.subr.bf16.mxu1 %v11764_v56  ;;  %v11786_v56 = vld [vmem:[#allocation10 + $0x4b0] ss:$8 sps:$4 sm:$0xff]  }
 0xa9e   : > { %7747 = vmatpush1.bf16.msra.mxu0 %v11807_v57  ;;  %v11834_v57 = vld [vmem:[#allocation10 + $0x1b0] ss:$8 sps:$4 sm:$0xff]  }
 0xa9f   : > { %6782 = vmatmul.mubr.bf16.gmra.mxu1 %v15185_v27  ;;  %7748 = vmatprep.subr.bf16.mxu0 %v11812_v39  ;;  %v11839_v39 = vld [vmem:[#allocation10 + $0x1a4] ss:$8 sps:$4 sm:$0xff]   ;;  %v11794_v27 = vld [vmem:[#allocation10 + $0x494] ss:$8 sps:$4 sm:$0xff]  }
 0xaa0   : > { %7247 = vmatmul.mubr.bf16.gmra.mxu0 %v15186_v17  ;;  %7316 = vmatpush1.bf16.msra.mxu1 %v11762_v1  ;;  %v15194_v1 = vld [vmem:[#allocation78_spill] sm:$0xff] }
 0xaa1   : > { %7256 = vmatprep.mubr.bf16.mxu0 %v15187_v28  ;;  %7317 = vmatprep.subr.bf16.mxu1 %v11767_v8  ;;  %v11789_v8 = vld [vmem:[#allocation10 + $0x4a0] ss:$8 sps:$4 sm:$0xff]   ;;  %v11842_v17 = vld [vmem:[#allocation10 + $0x194] ss:$8 sps:$4 sm:$0xff]   ;;  %v11840_v28 = vld [vmem:[#allocation10 + $0x190] ss:$8 sps:$4 sm:$0xff]  }
 0xaa2   : > { %6791 = vmatprep.mubr.bf16.mxu1 %v15149_v45  ;;  %7749 = vmatpush1.bf16.msra.mxu0 %v11810_v51  ;;  %v15195_v51 = vld [vmem:[#allocation74_spill] sm:$0xff] }
 0xaa3   : > { %7750 = vmatprep.subr.bf16.mxu0 %v11815_v46  ;;  %v11837_v46 = vld [vmem:[#allocation10 + $0x1a0] ss:$8 sps:$4 sm:$0xff]  }
 0xaa4   : > { %7318 = vmatpush1.bf16.msra.mxu1 %v11765_v61  ;;  %v11792_v61 = vld [vmem:[#allocation10 + $0x490] ss:$8 sps:$4 sm:$0xff]  }
 0xaa5   : > { %7319 = vmatprep.subr.bf16.mxu1 %v11770_v26  ;;  %v11845_v26 = vld [vmem:[#allocation10 + $0x184] ss:$8 sps:$4 sm:$0xff]  }
 0xaa6   : > { %7751 = vmatpush1.bf16.msra.mxu0 %v11813_v47  ;;  %v15196_v47 = vld [vmem:[#allocation79_spill] sm:$0xff] }
 0xaa7   : > { %6792 = vmatmul.mubr.bf16.gmra.mxu1 %v14209_v34  ;;  %7752 = vmatprep.subr.bf16.mxu0 %v11818_v43  ;;  %v11779_v34 = vld [vmem:[#allocation10 + $0x4e4] ss:$8 sps:$4 sm:$0xff]   ;;  %v11795_v43 = vld [vmem:[#allocation10 + $0x480] ss:$8 sps:$4 sm:$0xff]  }
 0xaa8   : > { %7257 = vmatmul.mubr.bf16.gmra.mxu0 %v15188_v11  ;;  %7320 = vmatpush1.bf16.msra.mxu1 %v11768_v31  ;;  %v11848_v31 = vld [vmem:[#allocation10 + $0x274] ss:$8 sps:$4 sm:$0xff]  }
 0xaa9   : > { %7266 = vmatprep.mubr.bf16.mxu0 %v15189_v7  ;;  %7321 = vmatprep.subr.bf16.mxu1 %v11773_v24  ;;  %v11843_v24 = vld [vmem:[#allocation10 + $0x180] ss:$8 sps:$4 sm:$0xff]   ;;  %v11854_v11 = vld [vmem:[#allocation10 + $0x254] ss:$8 sps:$4 sm:$0xff]  }
 0xaaa   : > { %6801 = vmatprep.mubr.bf16.mxu1 %v15149_v45  ;;  %7753 = vmatpush1.bf16.msra.mxu0 %v11816_v62  ;;  %v11846_v62 = vld [vmem:[#allocation10 + $0x270] ss:$8 sps:$4 sm:$0xff]   ;;  %v11855_v7 = vld [vmem:[#allocation10 + $0x240] ss:$8 sps:$4 sm:$0xff]  }
 0xaab   : > { %7754 = vmatprep.subr.bf16.mxu0 %v11821_v4  ;;  %v11851_v4 = vld [vmem:[#allocation10 + $0x264] ss:$8 sps:$4 sm:$0xff]  }
 0xaac   : > { %7322 = vmatpush1.bf16.msra.mxu1 %v11771_v41  ;;  %v11857_v41 = vld [vmem:[#allocation10 + $0x244] ss:$8 sps:$4 sm:$0xff]  }
 0xaad   : > { %7323 = vmatprep.subr.bf16.mxu1 %v11776_v13  ;;  %v11860_v13 = vld [vmem:[#allocation10 + $0x234] ss:$8 sps:$4 sm:$0xff]  }
 0xaae   : > { %7755 = vmatpush1.bf16.msra.mxu0 %v11819_v22  ;;  %v11861_v22 = vld [vmem:[#allocation10 + $0x220] ss:$8 sps:$4 sm:$0xff]  }
 0xaaf   : > { %6802 = vmatmul.mubr.bf16.gmra.mxu1 %v14238_v23  ;;  %7756 = vmatprep.subr.bf16.mxu0 %v11824_v55  ;;  %v11785_v23 = vld [vmem:[#allocation10 + $0x4c4] ss:$8 sps:$4 sm:$0xff]   ;;  %v11866_v55 = vld [vmem:[#allocation10 + $0x214] ss:$8 sps:$4 sm:$0xff]  }
 0xab0   : > { %7267 = vmatmul.mubr.bf16.gmra.mxu0 %v15190_v15  ;;  %7324 = vmatpush2.bf16.msra.mxu1 %v11774_v18  ;;  %v11867_v18 = vld [vmem:[#allocation10 + $0x200] ss:$8 sps:$4 sm:$0xff]  }
 0xab1   : > { %7276 = vmatprep.mubr.bf16.mxu0 %v15191_v10  ;;  %7325 = vmatprep.subr.bf16.mxu1 %v11779_v34  ;;  %v11872_v34 = vld [vmem:[#allocation10 + $0x2f4] ss:$8 sps:$4 sm:$0xff]   ;;  %v11879_v15 = vld [vmem:[#allocation10 + $0x2c0] ss:$8 sps:$4 sm:$0xff]  }
 0xab2   : > { %6811 = vmatprep.mubr.bf16.mxu1 %v15149_v45  ;;  %7757 = vmatpush2.bf16.msra.mxu0 %v11822_v16  ;;  %v11873_v16 = vld [vmem:[#allocation10 + $0x2e0] ss:$8 sps:$4 sm:$0xff]  }
 0xab3   : > { %7758 = vmatprep.subr.bf16.mxu0 %v11827_v54  ;;  %v11878_v54 = vld [vmem:[#allocation10 + $0x2d4] ss:$8 sps:$4 sm:$0xff]   ;;  %v11885_v10 = vld [vmem:[#allocation10 + $0x2a0] ss:$8 sps:$4 sm:$0xff]  }
 0xab4   : > { %7326 = vmatpush2.bf16.msra.mxu1 %v11777_v0  ;;  %v11884_v0 = vld [vmem:[#allocation10 + $0x2b4] ss:$8 sps:$4 sm:$0xff]  }
 0xab5   : > { %7327 = vmatprep.subr.bf16.mxu1 %v11782_v48  ;;  %v11890_v48 = vld [vmem:[#allocation10 + $0x294] ss:$8 sps:$4 sm:$0xff]  }
 0xab6   : > { %7759 = vmatpush2.bf16.msra.mxu0 %v11825_v2  ;;  %v11891_v2 = vld [vmem:[#allocation10 + $0x280] ss:$8 sps:$4 sm:$0xff]  }
 0xab7   : > { %6812 = vmatmul.mubr.bf16.gmra.mxu1 %v14265_v6  ;;  %7760 = vmatprep.subr.bf16.mxu0 %v11830_v5  ;;  %v11791_v6 = vld [vmem:[#allocation10 + $0x4a4] ss:$8 sps:$4 sm:$0xff]  }
 0xab8   : > { %7277 = vmatmul.mubr.bf16.gmra.mxu0 %v15192_v52  ;;  %7328 = vmatpush2.bf16.msra.mxu1 %v11780_v25 }
 0xab9   : > { %7286 = vmatprep.mubr.bf16.mxu0 %v15193_v9  ;;  %7329 = vmatprep.subr.bf16.mxu1 %v11785_v23 }
 0xaba   : > { %6821 = vmatprep.mubr.bf16.mxu1 %v15149_v45  ;;  %7761 = vmatpush2.bf16.msra.mxu0 %v11828_v14 }
 0xabb   : > { %7762 = vmatprep.subr.bf16.mxu0 %v11833_v29 }
 0xabc   : > { %7330 = vmatpush2.bf16.msra.mxu1 %v11783_v44 }
 0xabd   : > { %7331 = vmatprep.subr.bf16.mxu1 %v11788_v12 }
 0xabe   : > { %7763 = vmatpush2.bf16.msra.mxu0 %v11831_v38 }
 0xabf   : > { %6822 = vmatmul.mubr.bf16.gmra.mxu1 %v14284_v21  ;;  %7764 = vmatprep.subr.bf16.mxu0 %v11836_v50  ;;  %v11797_v21 = vld [vmem:[#allocation10 + $0x484] ss:$8 sps:$4 sm:$0xff]  }
 0xac0   : > { %7287 = vmatmul.mubr.bf16.gmra.mxu0 %v15194_v1  ;;  %7332 = vmatpush2.bf16.msra.mxu1 %v11786_v56 }
 0xac1   : > { %7296 = vmatprep.mubr.bf16.mxu0 %v15195_v51  ;;  %7333 = vmatprep.subr.bf16.mxu1 %v11791_v6 }
 0xac2   : > { %6831 = vmatprep.mubr.bf16.mxu1 %v15149_v45  ;;  %7765 = vmatpush2.bf16.msra.mxu0 %v11834_v57 }
 0xac3   : > { %7766 = vmatprep.subr.bf16.mxu0 %v11839_v39 }
 0xac4   : > { %7334 = vmatpush2.bf16.msra.mxu1 %v11789_v8 }
 0xac5   : > { %7335 = vmatprep.subr.bf16.mxu1 %v11794_v27 }
 0xac6   : > { %7767 = vmatpush2.bf16.msra.mxu0 %v11837_v46 }
 0xac7   : > { %6832 = vmatmul.mubr.bf16.gmra.mxu1 %v14297_v33  ;;  %7768 = vmatprep.subr.bf16.mxu0 %v11842_v17  ;;  %v11849_v33 = vld [vmem:[#allocation10 + $0x260] ss:$8 sps:$4 sm:$0xff]  }
 0xac8   : > { %7297 = vmatmul.mubr.bf16.gmra.mxu0 %v15196_v47  ;;  %7336 = vmatpush2.bf16.msra.mxu1 %v11792_v61 }
 0xac9   : > { %7339 = vmatprep.mubr.bf16.mxu1 %v14301_v35  ;;  %7337 = vmatprep.subr.bf16.mxu1 %v11797_v21  ;;  %v11852_v35 = vld [vmem:[#allocation10 + $0x250] ss:$8 sps:$4 sm:$0xff]  }
 0xaca   : > { %7769 = vmatpush2.bf16.msra.mxu0 %v11840_v28 }
 0xacb   : > { %7770 = vmatprep.subr.bf16.mxu0 %v11845_v26 }
 0xacc   : > { %7338 = vmatpush2.bf16.msra.mxu1 %v11795_v43 }
 0xacd   : > { %7853 = vmatprep.subr.bf16.mxu1 %v11848_v31 }
 0xace   : > { %7771 = vmatpush2.bf16.msra.mxu0 %v11843_v24 }
 0xacf   : > { %7340 = vmatmul.mubr.bf16.vlgmr.msra.gmra.mxu1 %v14074_v53  ;;  %v11858_v53 = vld [vmem:[#allocation10 + $0x230] ss:$8 sps:$4 sm:$0xff]  }
 0xad0   : > { %7349 = vmatprep.mubr.bf16.mxu1 %v14292_v3  ;;  %7854 = vmatpush1.bf16.msra.mxu1 %v11846_v62  ;;  %v11863_v3 = vld [vmem:[#allocation10 + $0x224] ss:$8 sps:$4 sm:$0xff]  }
 0xad1   : > { %7855 = vmatprep.subr.bf16.mxu1 %v11851_v4 }
 0xad4   : > { %7856 = vmatpush1.bf16.msra.mxu1 %v11849_v33 }
 0xad5   : > { %7857 = vmatprep.subr.bf16.mxu1 %v11854_v11 }
 0xad7   : > { %7350 = vmatmul.mubr.bf16.gmra.mxu1 %v14100_v37  ;;  %v11864_v37 = vld [vmem:[#allocation10 + $0x210] ss:$8 sps:$4 sm:$0xff]  }
 0xad8   : > { %7359 = vmatprep.mubr.bf16.mxu1 %v14280_v32  ;;  %7858 = vmatpush1.bf16.msra.mxu1 %v11852_v35  ;;  %v11869_v32 = vld [vmem:[#allocation10 + $0x204] ss:$8 sps:$4 sm:$0xff]  }
 0xad9   : > { %7859 = vmatprep.subr.bf16.mxu1 %v11857_v41 }
 0xadc   : > { %7860 = vmatpush1.bf16.msra.mxu1 %v11855_v7 }
 0xadd   : > { %7861 = vmatprep.subr.bf16.mxu1 %v11860_v13 }
 0xadf   : > { %7360 = vmatmul.mubr.bf16.gmra.mxu1 %v14116_v20  ;;  %v11870_v20 = vld [vmem:[#allocation10 + $0x2f0] ss:$8 sps:$4 sm:$0xff]  }
 0xae0   : > { %7369 = vmatprep.mubr.bf16.mxu1 %v14273_v58  ;;  %7862 = vmatpush1.bf16.msra.mxu1 %v11858_v53  ;;  %v11875_v58 = vld [vmem:[#allocation10 + $0x2e4] ss:$8 sps:$4 sm:$0xff]  }
 0xae1   : > { %7863 = vmatprep.subr.bf16.mxu1 %v11863_v3 }
 0xae4   : > { %7864 = vmatpush1.bf16.msra.mxu1 %v11861_v22 }
 0xae5   : > { %7865 = vmatprep.subr.bf16.mxu1 %v11866_v55 }
 0xae7   : > { %7370 = vmatmul.mubr.bf16.gmra.mxu1 %v14136_v36  ;;  %v11876_v36 = vld [vmem:[#allocation10 + $0x2d0] ss:$8 sps:$4 sm:$0xff]  }
 0xae8   : > { %7379 = vmatprep.mubr.bf16.mxu1 %v14261_v59  ;;  %7866 = vmatpush1.bf16.msra.mxu1 %v11864_v37  ;;  %v11881_v59 = vld [vmem:[#allocation10 + $0x2c4] ss:$8 sps:$4 sm:$0xff]  }
 0xae9   : > { %7867 = vmatprep.subr.bf16.mxu1 %v11869_v32 }
 0xaec   : > { %7868 = vmatpush1.bf16.msra.mxu1 %v11867_v18 }
 0xaed   : > { %7869 = vmatprep.subr.bf16.mxu1 %v11872_v34 }
 0xaef   : > { %7380 = vmatmul.mubr.bf16.gmra.mxu1 %v14154_v42  ;;  %v11882_v42 = vld [vmem:[#allocation10 + $0x2b0] ss:$8 sps:$4 sm:$0xff]  }
 0xaf0   : > { %7389 = vmatprep.mubr.bf16.mxu1 %v14251_v49  ;;  %7870 = vmatpush2.bf16.msra.mxu1 %v11870_v20  ;;  %v11887_v49 = vld [vmem:[#allocation10 + $0x2a4] ss:$8 sps:$4 sm:$0xff]  }
 0xaf1   : > { %7871 = vmatprep.subr.bf16.mxu1 %v11875_v58 }
 0xaf4   : > { %7872 = vmatpush2.bf16.msra.mxu1 %v11873_v16 }
 0xaf5   : > { %7873 = vmatprep.subr.bf16.mxu1 %v11878_v54 }
 0xaf7   : > { %7390 = vmatmul.mubr.bf16.gmra.mxu1 %v14169_v60  ;;  %v11888_v60 = vld [vmem:[#allocation10 + $0x290] ss:$8 sps:$4 sm:$0xff]  }
 0xaf8   : > { %7399 = vmatprep.mubr.bf16.mxu1 %v14233_v40  ;;  %7874 = vmatpush2.bf16.msra.mxu1 %v11876_v36  ;;  %v11893_v40 = vld [vmem:[#allocation10 + $0x284] ss:$8 sps:$4 sm:$0xff]  }
 0xaf9   : > { %7875 = vmatprep.subr.bf16.mxu1 %v11881_v59 }
 0xafc   : > { %7876 = vmatpush2.bf16.msra.mxu1 %v11879_v15 }
 0xafd   : > { %7877 = vmatprep.subr.bf16.mxu1 %v11884_v0 }
 0xaff   : > { %7400 = vmatmul.mubr.bf16.gmra.mxu1 %v14186_v63 }
 0xb00   : > { %7409 = vmatprep.mubr.bf16.mxu1 %v14227_v30  ;;  %7878 = vmatpush2.bf16.msra.mxu1 %v11882_v42 }
 0xb01   : > { %7879 = vmatprep.subr.bf16.mxu1 %v11887_v49 }
 0xb04   : > { %7880 = vmatpush2.bf16.msra.mxu1 %v11885_v10 }
 0xb05   : > { %7881 = vmatprep.subr.bf16.mxu1 %v11890_v48 }
 0xb07   : > { %7410 = vmatmul.mubr.bf16.gmra.mxu1 %v14223_v19 }
 0xb08   : > { %7882 = vmatpush2.bf16.msra.mxu1 %v11888_v60 }
 0xb09   : > { %7883 = vmatprep.subr.bf16.mxu1 %v11893_v40 }
 0xb0c   : > { %7884 = vmatpush2.bf16.msra.mxu1 %v11891_v2 }
 0xb0f   : > { %v6650_v5 = vpop.f32.mrf.mxu0 }
 0xb11   : > { %v6652_v25 = vpop.f32.mrf.mxu0 }
 0xb13   : > { %v6654_v23 = vpop.f32.mrf.mxu0 }
 0xb14   : > { %v6842_v63 = vpack.c.bf16 %v6654_v23, %v6650_v5 }
 0xb15   : > { %v6656_v14 = vpop.f32.mrf.mxu0 }
 0xb16   : > { %v6843_v30 = vpack.c.bf16 %v6656_v14, %v6652_v25 }
 0xb17   : > { %v6660_v29 = vpop.f32.mrf.mxu0 }
 0xb18   : > { %7772 = vmatprep.mubr.bf16.mxu0 %v6843_v30 }
 0xb19   : > { %v6662_v52 = vpop.f32.mrf.mxu0  ;;  %7773 = vmatmul.mubr.bf16.vlgmr.msra.gmra.mxu0 %v6842_v63 }
 0xb1b   : > { %v6664_v44 = vpop.f32.mrf.mxu0 }
 0xb1c   : > { %v6846_v9 = vpack.c.bf16 %v6664_v44, %v6660_v29 }
 0xb1d   : > { %v6666_v12 = vpop.f32.mrf.mxu0 }
 0xb1e   : > { %v6847_v38 = vpack.c.bf16 %v6666_v12, %v6662_v52 }
 0xb1f   : > { %v6670_v50 = vpop.f32.mrf.mxu0 }
 0xb20   : > { %7782 = vmatprep.mubr.bf16.mxu0 %v6847_v38  ;;  %v11896_v38 = vld [vmem:[#allocation10 + $0x674] ss:$8 sps:$4 sm:$0xff]  }
 0xb21   : > { %v6672_v19 = vpop.f32.mrf.mxu0  ;;  %7783 = vmatmul.mubr.bf16.gmra.mxu0 %v6846_v9  ;;  %8412 = vmatprep.subr.bf16.mxu1 %v11896_v38 }
 0xb23   : > { %v6674_v56 = vpop.f32.mrf.mxu0 }
 0xb24   : > { %v6850_v6 = vpack.c.bf16 %v6674_v56, %v6670_v50  ;;  %v11894_v50 = vld [vmem:[#allocation10 + $0x670] ss:$8 sps:$4 sm:$0xff]  }
 0xb25   : > { %v6676_v57 = vpop.f32.mrf.mxu0 }
 0xb26   : > { %v6851_v39 = vpack.c.bf16 %v6676_v57, %v6672_v19  ;;  %v11899_v57 = vld [vmem:[#allocation10 + $0x664] ss:$8 sps:$4 sm:$0xff]  }
 0xb27   : > { %v6680_v1 = vpop.f32.mrf.mxu0 }
 0xb28   : > { %7792 = vmatprep.mubr.bf16.mxu0 %v6851_v39 }
 0xb29   : > { %v6682_v8 = vpop.f32.mrf.mxu0  ;;  %7793 = vmatmul.mubr.bf16.gmra.mxu0 %v6850_v6 }
 0xb2b   : > { %v6684_v51 = vpop.f32.mrf.mxu0 }
 0xb2c   : > { %v6854_v27 = vpack.c.bf16 %v6684_v51, %v6680_v1  ;;  %v11897_v1 = vld [vmem:[#allocation10 + $0x660] ss:$8 sps:$4 sm:$0xff]  }
 0xb2d   : > { %v6686_v46 = vpop.f32.mrf.mxu0 }
 0xb2e   : > { %v6855_v17 = vpack.c.bf16 %v6686_v46, %v6682_v8 }
 0xb2f   : > { %v6690_v61 = vpop.f32.mrf.mxu0 }
 0xb30   : > { %7802 = vmatprep.mubr.bf16.mxu0 %v6855_v17  ;;  %v11902_v17 = vld [vmem:[#allocation10 + $0x654] ss:$8 sps:$4 sm:$0xff]  }
 0xb31   : > { %v6692_v21 = vpop.f32.mrf.mxu0  ;;  %7803 = vmatmul.mubr.bf16.gmra.mxu0 %v6854_v27 }
 0xb33   : > { %v6694_v28 = vpop.f32.mrf.mxu0 }
 0xb34   : > { %v6858_v26 = vpack.c.bf16 %v6694_v28, %v6690_v61  ;;  %v11900_v61 = vld [vmem:[#allocation10 + $0x650] ss:$8 sps:$4 sm:$0xff]  }
 0xb35   : > { %v6696_v47 = vpop.f32.mrf.mxu0 }
 0xb36   : > { %v6859_v43 = vpack.c.bf16 %v6696_v47, %v6692_v21  ;;  %v11905_v47 = vld [vmem:[#allocation10 + $0x644] ss:$8 sps:$4 sm:$0xff]  }
 0xb37   : > { %v6700_v31 = vpop.f32.mrf.mxu0 }
 0xb38   : > { %7812 = vmatprep.mubr.bf16.mxu0 %v6859_v43 }
 0xb39   : > { %v6702_v24 = vpop.f32.mrf.mxu0  ;;  %7813 = vmatmul.mubr.bf16.gmra.mxu0 %v6858_v26 }
 0xb3b   : > { %v6704_v62 = vpop.f32.mrf.mxu0 }
 0xb3c   : > { %v6862_v4 = vpack.c.bf16 %v6704_v62, %v6700_v31  ;;  %v11903_v31 = vld [vmem:[#allocation10 + $0x640] ss:$8 sps:$4 sm:$0xff]  }
 0xb3d   : > { %v6706_v33 = vpop.f32.mrf.mxu0 }
 0xb3e   : > { %v6863_v11 = vpack.c.bf16 %v6706_v33, %v6702_v24 }
 0xb3f   : > { %v6710_v35 = vpop.f32.mrf.mxu0 }
 0xb40   : > { %7822 = vmatprep.mubr.bf16.mxu0 %v6863_v11  ;;  %v11908_v11 = vld [vmem:[#allocation10 + $0x634] ss:$8 sps:$4 sm:$0xff]  }
 0xb41   : > { %v6712_v41 = vpop.f32.mrf.mxu0  ;;  %7823 = vmatmul.mubr.bf16.gmra.mxu0 %v6862_v4 }
 0xb43   : > { %v6714_v7 = vpop.f32.mrf.mxu0 }
 0xb44   : > { %v6866_v13 = vpack.c.bf16 %v6714_v7, %v6710_v35  ;;  %v11906_v35 = vld [vmem:[#allocation10 + $0x630] ss:$8 sps:$4 sm:$0xff]  }
 0xb45   : > { %v6716_v53 = vpop.f32.mrf.mxu0 }
 0xb46   : > { %v6867_v3 = vpack.c.bf16 %v6716_v53, %v6712_v41  ;;  %v11911_v53 = vld [vmem:[#allocation10 + $0x624] ss:$8 sps:$4 sm:$0xff]  }
 0xb47   : > { %v6720_v22 = vpop.f32.mrf.mxu0 }
 0xb48   : > { %7832 = vmatprep.mubr.bf16.mxu0 %v6867_v3 }
 0xb49   : > { %v6722_v55 = vpop.f32.mrf.mxu0  ;;  %7833 = vmatmul.mubr.bf16.gmra.mxu0 %v6866_v13 }
 0xb4b   : > { %v6724_v37 = vpop.f32.mrf.mxu0 }
 0xb4c   : > { %v6870_v32 = vpack.c.bf16 %v6724_v37, %v6720_v22  ;;  %v11909_v22 = vld [vmem:[#allocation10 + $0x620] ss:$8 sps:$4 sm:$0xff]  }
 0xb4d   : > { %v6726_v18 = vpop.f32.mrf.mxu0 }
 0xb4e   : > { %v6871_v34 = vpack.c.bf16 %v6726_v18, %v6722_v55 }
 0xb4f   : > { %v6763_v20 = vpop.f32.mrf.mxu1  ;;  %v14353_v54 = vpop.f32.mrf.mxu0 }
 0xb50   : > { %7842 = vmatprep.mubr.bf16.mxu0 %v6871_v34  ;;  %v11914_v34 = vld [vmem:[#allocation10 + $0x614] ss:$8 sps:$4 sm:$0xff]  }
 0xb51   : > { %v6765_v58 = vpop.f32.mrf.mxu1  ;;  %7843 = vmatmul.mubr.bf16.gmra.mxu0 %v6870_v32  ;;  %v14355_v42 = vpop.f32.mrf.mxu0 }
 0xb52   : > { %8155 = vmatprep.mubr.bf16.mxu0 %v15149_v45 }
 0xb53   : > { %v6767_v16 = vpop.f32.mrf.mxu1  ;;  %v14357_v48 = vpop.f32.mrf.mxu0 }
 0xb54   : > { %v6844_v15 = vpack.c.bf16 %v6767_v16, %v6763_v20  ;;  %v11912_v20 = vld [vmem:[#allocation10 + $0x610] ss:$8 sps:$4 sm:$0xff]  }
 0xb55   : > { %v6769_v36 = vpop.f32.mrf.mxu1  ;;  %v14359_v25 = vpop.f32.mrf.mxu0 }
 0xb56   : > { %v6845_v59 = vpack.c.bf16 %v6769_v36, %v6765_v58 }
 0xb57   : > { %v6773_v0 = vpop.f32.mrf.mxu1 }
 0xb58   : > { %7885 = vmatprep.mubr.bf16.mxu1 %v6845_v59  ;;  %v14361_v14 = vpop.f32.mrf.mxu0  ;;  %v11917_v59 = vld [vmem:[#allocation10 + $0x604] ss:$8 sps:$4 sm:$0xff]  }
 0xb59   : > { %v6775_v49 = vpop.f32.mrf.mxu1  ;;  %7886 = vmatmul.mubr.bf16.vlgmr.msra.gmra.mxu1 %v6844_v15 }
 0xb5a   : > { %v14363_v9 = vpop.f32.mrf.mxu0  ;;  %8413 = vmatpush1.bf16.msra.mxu1 %v11894_v50 }
 0xb5b   : > { %v6777_v10 = vpop.f32.mrf.mxu1  ;;  %8414 = vmatprep.subr.bf16.mxu1 %v11899_v57  ;;  %v11926_v57 = vld [vmem:[#allocation10 + $0x6d4] ss:$8 sps:$4 sm:$0xff]  }
 0xb5c   : > { %v6848_v2 = vpack.c.bf16 %v6777_v10, %v6773_v0  ;;  %v14365_v56 = vpop.f32.mrf.mxu0  ;;  %v11915_v0 = vld [vmem:[#allocation10 + $0x600] ss:$8 sps:$4 sm:$0xff]  }
 0xb5d   : > { %v6779_v60 = vpop.f32.mrf.mxu1 }
 0xb5e   : > { %v6849_v40 = vpack.c.bf16 %v6779_v60, %v6775_v49  ;;  %8415 = vmatpush1.bf16.msra.mxu1 %v11897_v1  ;;  %v14367_v27 = vpop.f32.mrf.mxu0  ;;  %v11924_v1 = vld [vmem:[#allocation10 + $0x6d0] ss:$8 sps:$4 sm:$0xff]  }
 0xb5f   : > { %v6783_v5 = vpop.f32.mrf.mxu1  ;;  %8416 = vmatprep.subr.bf16.mxu1 %v11902_v17  ;;  %v11927_v17 = vld [vmem:[#allocation10 + $0x6c0] ss:$8 sps:$4 sm:$0xff]  }
 0xb60   : > { %7895 = vmatprep.mubr.bf16.mxu1 %v6849_v40  ;;  %v14369_v28 = vpop.f32.mrf.mxu0 }
 0xb61   : > { %v6785_v23 = vpop.f32.mrf.mxu1  ;;  %7896 = vmatmul.mubr.bf16.gmra.mxu1 %v6848_v2  ;;  %v11920_v2 = vld [vmem:[#allocation10 + $0x6f4] ss:$8 sps:$4 sm:$0xff]  }
 0xb62   : > { %8417 = vmatpush1.bf16.msra.mxu1 %v11900_v61  ;;  %v14371_v4 = vpop.f32.mrf.mxu0 }
 0xb63   : > { %v6787_v63 = vpop.f32.mrf.mxu1  ;;  %8418 = vmatprep.subr.bf16.mxu1 %v11905_v47 }
 0xb64   : > { %v6852_v52 = vpack.c.bf16 %v6787_v63, %v6783_v5  ;;  %v14373_v7 = vpop.f32.mrf.mxu0  ;;  %v11918_v5 = vld [vmem:[#allocation10 + $0x6f0] ss:$8 sps:$4 sm:$0xff]  }
 0xb65   : > { %v6789_v30 = vpop.f32.mrf.mxu1 }
 0xb66   : > { %v6853_v29 = vpack.c.bf16 %v6789_v30, %v6785_v23  ;;  %8419 = vmatpush1.bf16.msra.mxu1 %v11903_v31  ;;  %v14375_v32 = vpop.f32.mrf.mxu0  ;;  %v11930_v31 = vld [vmem:[#allocation10 + $0x6b0] ss:$8 sps:$4 sm:$0xff]  }
 0xb67   : > { %v6793_v44 = vpop.f32.mrf.mxu1  ;;  %8420 = vmatprep.subr.bf16.mxu1 %v11908_v11  ;;  %v11935_v11 = vld [vmem:[#allocation10 + $0x6a4] ss:$8 sps:$4 sm:$0xff]  }
 0xb68   : > { %7905 = vmatprep.mubr.bf16.mxu1 %v6853_v29  ;;  %v14377_v16 = vpop.f32.mrf.mxu0  ;;  %v11923_v29 = vld [vmem:[#allocation10 + $0x6e4] ss:$8 sps:$4 sm:$0xff]  }
 0xb69   : > { %v6795_v12 = vpop.f32.mrf.mxu1  ;;  %7906 = vmatmul.mubr.bf16.gmra.mxu1 %v6852_v52 }
 0xb6a   : > { %8421 = vmatpush1.bf16.msra.mxu1 %v11906_v35  ;;  %v14379_v60 = vpop.f32.mrf.mxu0  ;;  %v11933_v35 = vld [vmem:[#allocation10 + $0x6a0] ss:$8 sps:$4 sm:$0xff]  }
 0xb6b   : > { %v6797_v19 = vpop.f32.mrf.mxu1  ;;  %8422 = vmatprep.subr.bf16.mxu1 %v11911_v53  ;;  %v11938_v53 = vld [vmem:[#allocation10 + $0x694] ss:$8 sps:$4 sm:$0xff]  }
 0xb6c   : > { %v6856_v8 = vpack.c.bf16 %v6797_v19, %v6793_v44  ;;  %v14381_v63 = vpop.f32.mrf.mxu0  ;;  %v11921_v44 = vld [vmem:[#allocation10 + $0x6e0] ss:$8 sps:$4 sm:$0xff]  }
 0xb6d   : > { %v6799_v6 = vpop.f32.mrf.mxu1 }
 0xb6e   : > { %v6857_v39 = vpack.c.bf16 %v6799_v6, %v6795_v12  ;;  %8423 = vmatpush1.bf16.msra.mxu1 %v11909_v22  ;;  %v14386_v19 = vpop.f32.mrf.mxu0  ;;  %v11936_v22 = vld [vmem:[#allocation10 + $0x690] ss:$8 sps:$4 sm:$0xff]  }
 0xb6f   : > { %v6803_v51 = vpop.f32.mrf.mxu1  ;;  %8424 = vmatprep.subr.bf16.mxu1 %v11914_v34  ;;  %v11941_v34 = vld [vmem:[#allocation10 + $0x684] ss:$8 sps:$4 sm:$0xff]  }
 0xb70   : > { %7915 = vmatprep.mubr.bf16.mxu1 %v6857_v39 }
 0xb71   : > { %v6805_v46 = vpop.f32.mrf.mxu1  ;;  %7916 = vmatmul.mubr.bf16.gmra.mxu1 %v6856_v8 }
 0xb72   : > { %8425 = vmatpush1.bf16.msra.mxu1 %v11912_v20  ;;  %v11939_v20 = vld [vmem:[#allocation10 + $0x680] ss:$8 sps:$4 sm:$0xff]  }
 0xb73   : > { %v6807_v21 = vpop.f32.mrf.mxu1  ;;  %8426 = vmatprep.subr.bf16.mxu1 %v11917_v59 }
 0xb74   : > { %v6860_v24 = vpack.c.bf16 %v6807_v21, %v6803_v51  ;;  %v7268_v51 = vpop.f32.mrf.mxu0 }
 0xb75   : > { %v6809_v26 = vpop.f32.mrf.mxu1 }
 0xb76   : > { %v6861_v43 = vpack.c.bf16 %v6809_v26, %v6805_v46  ;;  %8427 = vmatpush1.bf16.msra.mxu1 %v11915_v0  ;;  %v7270_v26 = vpop.f32.mrf.mxu0 }
 0xb77   : > { %v6813_v62 = vpop.f32.mrf.mxu1  ;;  %8428 = vmatprep.subr.bf16.mxu1 %v11920_v2 }
 0xb78   : > { %7925 = vmatprep.mubr.bf16.mxu1 %v6861_v43 }
 0xb79   : > { %v6815_v33 = vpop.f32.mrf.mxu1  ;;  %7926 = vmatmul.mubr.bf16.gmra.mxu1 %v6860_v24 }
 0xb7a   : > { %8429 = vmatpush2.bf16.msra.mxu1 %v11918_v5 }
 0xb7b   : > { %v6817_v41 = vpop.f32.mrf.mxu1  ;;  %8430 = vmatprep.subr.bf16.mxu1 %v11923_v29 }
 0xb7c   : > { %v6864_v55 = vpack.c.bf16 %v6817_v41, %v6813_v62  ;;  %v14403_v62 = vpop.f32.mrf.mxu0 }
 0xb7d   : > { %v6819_v13 = vpop.f32.mrf.mxu1 }
 0xb7e   : > { %v6865_v3 = vpack.c.bf16 %v6819_v13, %v6815_v33  ;;  %8431 = vmatpush2.bf16.msra.mxu1 %v11921_v44  ;;  %v14410_v13 = vpop.f32.mrf.mxu0 }
 0xb7f   : > { %v6823_v37 = vpop.f32.mrf.mxu1  ;;  %8432 = vmatprep.subr.bf16.mxu1 %v11926_v57 }
 0xb80   : > { %7935 = vmatprep.mubr.bf16.mxu1 %v6865_v3 }
 0xb81   : > { %v6825_v18 = vpop.f32.mrf.mxu1  ;;  %7936 = vmatmul.mubr.bf16.gmra.mxu1 %v6864_v55 }
 0xb82   : > { %8433 = vmatpush2.bf16.msra.mxu1 %v11924_v1 }
 0xb83   : > { %v6827_v58 = vpop.f32.mrf.mxu1 }
 0xb84   : > { %v6868_v49 = vpack.c.bf16 %v6827_v58, %v6823_v37  ;;  %v7278_v37 = vpop.f32.mrf.mxu0 }
 0xb85   : > { %v6829_v36 = vpop.f32.mrf.mxu1 }
 0xb86   : > { %v6869_v15 = vpack.c.bf16 %v6829_v36, %v6825_v18  ;;  %v7280_v36 = vpop.f32.mrf.mxu0 }
 0xb87   : > { %v6833_v10 = vpop.f32.mrf.mxu1 }
 0xb88   : > { %7945 = vmatprep.mubr.bf16.mxu1 %v6869_v15  ;;  %v14427_v0 = vpop.f32.mrf.mxu0 }
 0xb89   : > { %v6835_v40 = vpop.f32.mrf.mxu1  ;;  %7946 = vmatmul.mubr.bf16.gmra.mxu1 %v6868_v49 }
 0xb8a   : > { %v14433_v2 = vpop.f32.mrf.mxu0 }
 0xb8b   : > { %v6837_v23 = vpop.f32.mrf.mxu1  ;;  %15197 = vst [vmem:[#allocation62_spill] sm:$0xff] %v14433_v2 }
 0xb8c   : > { %v6872_v12 = vpack.c.bf16 %v6837_v23, %v6833_v10 }
 0xb8d   : > { %v6839_v30 = vpop.f32.mrf.mxu1 }
 0xb8e   : > { %v6873_v52 = vpack.c.bf16 %v6839_v30, %v6835_v40  ;;  %v7288_v30 = vpop.f32.mrf.mxu0 }
 0xb8f   : > { %v7341_v38 = vpop.f32.mrf.mxu1 }
 0xb90   : > { %v14384_v50 = vadd.f32 %v7341_v38, %v14353_v54  ;;  %7955 = vmatprep.mubr.bf16.mxu1 %v6873_v52  ;;  %v11929_v54 = vld [vmem:[#allocation10 + $0x6c4] ss:$8 sps:$4 sm:$0xff]   ;;  %v7290_v44 = vpop.f32.mrf.mxu0 }
 0xb91   : > { %v7343_v6 = vpop.f32.mrf.mxu1  ;;  %7956 = vmatmul.mubr.bf16.gmra.mxu1 %v6872_v12  ;;  %8434 = vmatprep.subr.bf16.mxu1 %v11929_v54 }
 0xb92   : > { %v14389_v39 = vadd.f32 %v7343_v6, %v14355_v42  ;;  %8435 = vmatpush2.bf16.msra.mxu1 %v11927_v17  ;;  %v11932_v42 = vld [vmem:[#allocation10 + $0x6b4] ss:$8 sps:$4 sm:$0xff]   ;;  %v14447_v57 = vpop.f32.mrf.mxu0 }
 0xb93   : > { %v14391_v8 = vpop.f32.mrf.mxu1  ;;  %8436 = vmatprep.subr.bf16.mxu1 %v11932_v42  ;;  %15200 = vst [vmem:[#allocation61_spill] sm:$0xff] %v14447_v57 }
 0xb94   : > { %v14453_v17 = vpop.f32.mrf.mxu0 }
 0xb95   : > { %v14393_v46 = vpop.f32.mrf.mxu1  ;;  %15203 = vst [vmem:[#allocation38_spill] sm:$0xff] %v14453_v17 }
 0xb96   : > { %8437 = vmatpush2.bf16.msra.mxu1 %v11930_v31  ;;  %v7298_v42 = vpop.f32.mrf.mxu0 }
 0xb97   : > { %v7351_v61 = vpop.f32.mrf.mxu1  ;;  %8438 = vmatprep.subr.bf16.mxu1 %v11935_v11 }
 0xb98   : > { %v14396_v21 = vadd.f32 %v7351_v61, %v14361_v14 }
 0xb99   : > { %v7353_v47 = vpop.f32.mrf.mxu1 }
 0xb9a   : > { %v14399_v43 = vadd.f32 %v7353_v47, %v14363_v9  ;;  %8439 = vmatpush2.bf16.msra.mxu1 %v11933_v35 }
 0xb9b   : > { %v14401_v24 = vpop.f32.mrf.mxu1  ;;  %8440 = vmatprep.subr.bf16.mxu1 %v11938_v53 }
 0xb9d   : > { %v14405_v33 = vpop.f32.mrf.mxu1 }
 0xb9e   : > { %8441 = vmatpush2.bf16.msra.mxu1 %v11936_v22 }
 0xb9f   : > { %v7361_v14 = vpop.f32.mrf.mxu1  ;;  %8442 = vmatprep.subr.bf16.mxu1 %v11941_v34 }
 0xba0   : > { %v14408_v41 = vadd.f32 %v7361_v14, %v14369_v28  ;;  %v7300_v14 = vpop.f32.mrf.mxu0 }
 0xba1   : > { %v7363_v9 = vpop.f32.mrf.mxu1 }
 0xba2   : > { %v14413_v3 = vadd.f32 %v7363_v9, %v14371_v4  ;;  %8443 = vmatpush2.bf16.msra.mxu1 %v11939_v20  ;;  %v14465_v22 = vpop.f32.mrf.mxu0 }
 0xba3   : > { %v14415_v55 = vpop.f32.mrf.mxu1  ;;  %15209 = vst [vmem:[#allocation59_spill] sm:$0xff] %v14465_v22 }
 0xba5   : > { %v14417_v18 = vpop.f32.mrf.mxu1 }
 0xba7   : > { %v7371_v28 = vpop.f32.mrf.mxu1 }
 0xba8   : > { %v14420_v58 = vadd.f32 %v7371_v28, %v14377_v16 }
 0xba9   : > { %v7373_v59 = vpop.f32.mrf.mxu1 }
 0xbaa   : > { %v14423_v4 = vadd.f32 %v7373_v59, %v14379_v60 }
 0xbab   : > { %v14425_v15 = vpop.f32.mrf.mxu1 }
 0xbad   : > { %v14429_v49 = vpop.f32.mrf.mxu1 }
 0xbaf   : > { %v7381_v10 = vpop.f32.mrf.mxu1 }
 0xbb0   : > { %v14431_v40 = vadd.f32 %v7381_v10, %v7268_v51 }
 0xbb1   : > { %v7383_v5 = vpop.f32.mrf.mxu1 }
 0xbb2   : > { %v14435_v16 = vadd.f32 %v7383_v5, %v7270_v26 }
 0xbb3   : > { %v14437_v23 = vpop.f32.mrf.mxu1 }
 0xbb5   : > { %v14439_v29 = vpop.f32.mrf.mxu1 }
 0xbb7   : > { %v7391_v60 = vpop.f32.mrf.mxu1 }
 0xbb8   : > { %v14441_v52 = vadd.f32 %v7391_v60, %v7278_v37  ;;  %v14467_v37 = vpop.f32.mrf.mxu0 }
 0xbb9   : > { %v7393_v12 = vpop.f32.mrf.mxu1  ;;  %15210 = vst [vmem:[#allocation42_spill] sm:$0xff] %v14467_v37 }
 0xbba   : > { %v14443_v38 = vadd.f32 %v7393_v12, %v7280_v36 }
 0xbbb   : > { %v14445_v6 = vpop.f32.mrf.mxu1 }
 0xbbc   : > { %15198 = vst [vmem:[#allocation63_spill] sm:$0xff] %v14443_v38  ;;  %15199 = vst [vmem:[#allocation60_spill] sm:$0xff] %v14445_v6  ;;  %v15214_v38 = vld [vmem:[#allocation24_spill] sm:$0xff] }
 0xbbd   : > { %v14449_v1 = vpop.f32.mrf.mxu1 }
 0xbbe   : > { %15201 = vst [vmem:[#allocation23_spill] sm:$0xff] %v14449_v1 }
 0xbbf   : > { %v7401_v51 = vpop.f32.mrf.mxu1 }
 0xbc0   : > { %v14451_v54 = vadd.f32 %v7401_v51, %v7288_v30 }
 0xbc1   : > { %v7403_v61 = vpop.f32.mrf.mxu1 }
 0xbc2   : > { %15202 = vst [vmem:[#allocation36_spill] sm:$0xff] %v14451_v54  ;;  %v14455_v26 = vadd.f32 %v7403_v61, %v7290_v44 }
 0xbc3   : > { %v14457_v47 = vpop.f32.mrf.mxu1 }
 0xbc4   : > { %15204 = vst [vmem:[#allocation64_spill] sm:$0xff] %v14455_v26  ;;  %15205 = vst [vmem:[#allocation65_spill] sm:$0xff] %v14457_v47  ;;  %v15213_v47 = vld [vmem:[#allocation25_spill] sm:$0xff] }
 0xbc5   : > { %v14459_v31 = vpop.f32.mrf.mxu1 }
 0xbc6   : > { %15206 = vst [vmem:[#allocation30_spill] sm:$0xff] %v14459_v31  ;;  %v7346_v31 = vadd.f32 %v14391_v8, %v14357_v48 }
 0xbc7   : > { %v7411_v11 = vpop.f32.mrf.mxu1 }
 0xbc8   : > { %v14461_v35 = vadd.f32 %v7411_v11, %v7298_v42 }
 0xbc9   : > { %v7413_v9 = vpop.f32.mrf.mxu1 }
 0xbca   : > { %15207 = vst [vmem:[#allocation31_spill] sm:$0xff] %v14461_v35  ;;  %v14463_v53 = vadd.f32 %v7413_v9, %v7300_v14 }
 0xbcb   : > { %v14479_v14 = vpop.f32.mrf.mxu1 }
 0xbcc   : > { %15208 = vst [vmem:[#allocation35_spill] sm:$0xff] %v14463_v53  ;;  %15211 = vst [vmem:[#allocation44_spill] sm:$0xff] %v14479_v14  ;;  %v6583_v53 = vld [vmem:[#allocation13 + $0x5] ss:$8 sm:$0x3] }
 0xbcd   : > { %v14483_v45 = vpop.f32.mrf.mxu1  ;;  %v14492_v57 = vrot.slane %v6583_v53, %v15213_v47 }
 0xbce   : > { %15212 = vst [vmem:[#allocation45_spill] sm:$0xff] %v14483_v45  ;;  %v7348_v45 = vadd.f32 %v14393_v46, %v14359_v25  ;;  %v7356_v46 = vadd.f32 %v14401_v24, %v14365_v56 }
 0xbd9   : > { %v7774_v34 = vpop.f32.mrf.mxu0 }
 0xbda   : > { %v7775_v22 = vadd.f32 %v7774_v34, %v14384_v50  ;;  %v14499_v50 = vrot.slane %v6583_v53, %v15214_v38  ;;  %v7358_v53 = vadd.f32 %v14405_v33, %v14367_v27 }
 0xbdb   : > { %v7776_v20 = vpop.f32.mrf.mxu0 }
 0xbdc   : > { %v7777_v17 = vadd.f32 %v7776_v20, %v14389_v39 }
 0xbdd   : > { %v7778_v28 = vpop.f32.mrf.mxu0 }
 0xbde   : > { %v7779_v1 = vadd.f32 %v7778_v28, %v7346_v31 }
 0xbdf   : > { %v7780_v36 = vpop.f32.mrf.mxu0 }
 0xbe0   : > { %v7781_v6 = vadd.f32 %v7780_v36, %v7348_v45 }
 0xbe1   : > { %v7784_v59 = vpop.f32.mrf.mxu0 }
 0xbe3   : > { %v7786_v10 = vpop.f32.mrf.mxu0 }
 0xbe5   : > { %v7788_v5 = vpop.f32.mrf.mxu0 }
 0xbe7   : > { %v7790_v30 = vpop.f32.mrf.mxu0 }
 0xbe9   : > { %v7794_v60 = vpop.f32.mrf.mxu0 }
 0xbea   : > { %v7795_v27 = vadd.f32 %v7794_v60, %v14408_v41  ;;  %v7368_v60 = vadd.f32 %v14417_v18, %v14375_v32 }
 0xbeb   : > { %v7796_v44 = vpop.f32.mrf.mxu0 }
 0xbed   : > { %v14469_v12 = vpop.f32.mrf.mxu0 }
 0xbef   : > { %v14471_v51 = vpop.f32.mrf.mxu0 }
 0xbf1   : > { %v14473_v61 = vpop.f32.mrf.mxu0 }
 0xbf2   : > { %v7805_v18 = vadd.f32 %v14473_v61, %v14420_v58 }
 0xbf3   : > { %v14475_v42 = vpop.f32.mrf.mxu0 }
 0xbf5   : > { %v14477_v11 = vpop.f32.mrf.mxu0 }
 0xbf7   : > { %v14481_v9 = vpop.f32.mrf.mxu0 }
 0xbf9   : > { %v14485_v37 = vpop.f32.mrf.mxu0 }
 0xbfb   : > { %v14494_v14 = vpop.f32.mrf.mxu0 }
 0xbfd   : > { %v14502_v8 = vpop.f32.mrf.mxu0 }
 0xbff   : > { %v14513_v28 = vpop.f32.mrf.mxu0 }
 0xc19   : > { %v7887_v35 = vpop.f32.mrf.mxu1 }
 0xc1a   : > { %v7888_v26 = vadd.f32 %v7887_v35, %v7775_v22  ;;  %v7785_v22 = vadd.f32 %v7784_v59, %v14396_v21  ;;  %v7789_v21 = vadd.f32 %v7788_v5, %v7356_v46 }
 0xc1b   : > { %v7889_v54 = vpop.f32.mrf.mxu1 }
 0xc1c   : > { %v7890_v2 = vadd.f32 %v7889_v54, %v7777_v17  ;;  %v7977_v48 = vadd.f32 %v14492_v57, %v7888_v26  ;;  %v7787_v54 = vadd.f32 %v7786_v10, %v14399_v43  ;;  %v7791_v43 = vadd.f32 %v7790_v30, %v7358_v53 }
 0xc1d   : > { %v7891_v34 = vpop.f32.mrf.mxu1  ;;  %v7366_v30 = vadd.f32 %v14415_v55, %v14373_v7 }
 0xc1e   : > { %v7892_v39 = vadd.f32 %v7891_v34, %v7779_v1  ;;  %v7978_v20 = vadd.f32 %v14499_v50, %v7890_v2  ;;  %v8009_v45 = vmax.f32 %v7977_v48, 0.0  ;;  %v14520_v48 = vpop.f32.mrf.mxu0 }
 0xc1f   : > { %v7893_v35 = vpop.f32.mrf.mxu1 }
 0xc20   : > { %v7979_v47 = vadd.f32 %v14492_v57, %v7892_v39  ;;  %v7894_v25 = vadd.f32 %v7893_v35, %v7781_v6  ;;  %v8010_v36 = vmax.f32 %v7978_v20, 0.0 }
 0xc21   : > { %v7897_v17 = vpop.f32.mrf.mxu1 }
 0xc22   : > { %v8011_v31 = vmax.f32 %v7979_v47, 0.0  ;;  %v7980_v1 = vadd.f32 %v14499_v50, %v7894_v25  ;;  %v7898_v26 = vadd.f32 %v7897_v17, %v7785_v22  ;;  %v7797_v22 = vadd.f32 %v7796_v44, %v14413_v3 }
 0xc23   : > { %v7899_v2 = vpop.f32.mrf.mxu1  ;;  %v7799_v17 = vadd.f32 %v14469_v12, %v7366_v30 }
 0xc24   : > { %v14515_v6 = vpack.c.bf16 %v8011_v31, %v8009_v45  ;;  %v8012_v59 = vmax.f32 %v7980_v1, 0.0  ;;  %v7900_v56 = vadd.f32 %v7899_v2, %v7787_v54  ;;  %v7981_v10 = vadd.f32 %v14492_v57, %v7898_v26  ;;  %v14534_v45 = vpop.f32.mrf.mxu0 }
 0xc25   : > { %v7901_v24 = vpop.f32.mrf.mxu1  ;;  %v7801_v26 = vadd.f32 %v14471_v51, %v7368_v60  ;;  %v7376_v51 = vadd.f32 %v14425_v15, %v14381_v63  ;;  %v7817_v60 = vadd.f32 %v14494_v14, %v14435_v16 }
 0xc26   : > { %v7902_v47 = vadd.f32 %v7901_v24, %v7789_v21  ;;  %v14518_v34 = vpack.c.bf16 %v8012_v59, %v8010_v36  ;;  %v7982_v33 = vadd.f32 %v14499_v50, %v7900_v56  ;;  %v8013_v25 = vmax.f32 %v7981_v10, 0.0  ;;  %v14542_v36 = vpop.f32.mrf.mxu0 }
 0xc27   : > { %v7903_v39 = vpop.f32.mrf.mxu1  ;;  %v7807_v24 = vadd.f32 %v14475_v42, %v14423_v4 }
 0xc28   : > { %v7983_v5 = vadd.f32 %v14492_v57, %v7902_v47  ;;  %v7904_v35 = vadd.f32 %v7903_v39, %v7791_v43  ;;  %8444 = vmatprep.mubr.bf16.mxu1 %v14518_v34  ;;  %v8014_v1 = vmax.f32 %v7982_v33, 0.0  ;;  %v7378_v39 = vadd.f32 %v14429_v49, %v14386_v19  ;;  %v14558_v33 = vpop.f32.mrf.mxu0 }
 0xc29   : > { %v7907_v20 = vpop.f32.mrf.mxu1  ;;  %8445 = vmatmul.mubr.bf16.vlgmr.msra.gmra.mxu1 %v14515_v6  ;;  %v7815_v49 = vadd.f32 %v14485_v37, %v14431_v40 }
 0xc2a   : > { %v8015_v46 = vmax.f32 %v7983_v5, 0.0  ;;  %v7984_v54 = vadd.f32 %v14499_v50, %v7904_v35  ;;  %v7908_v41 = vadd.f32 %v7907_v20, %v7795_v27  ;;  %v7809_v27 = vadd.f32 %v14477_v11, %v7376_v51 }
 0xc2b   : > { %v7909_v31 = vpop.f32.mrf.mxu1  ;;  %v7811_v30 = vadd.f32 %v14481_v9, %v7378_v39  ;;  %v7386_v9 = vadd.f32 %v14437_v23, %v14403_v62  ;;  %v15217_v39 = vld [vmem:[#allocation62_spill] sm:$0xff] }
 0xc2c   : > { %v14536_v7 = vpack.c.bf16 %v8015_v46, %v8013_v25  ;;  %v8016_v3 = vmax.f32 %v7984_v54, 0.0  ;;  %v7910_v55 = vadd.f32 %v7909_v31, %v7797_v22  ;;  %v7985_v53 = vadd.f32 %v14492_v57, %v7908_v41  ;;  %v7834_v46 = vpop.f32.mrf.mxu0 }
 0xc2d   : > { %v7911_v44 = vpop.f32.mrf.mxu1 }
 0xc2e   : > { %v7912_v21 = vadd.f32 %v7911_v44, %v7799_v17  ;;  %v14540_v2 = vpack.c.bf16 %v8016_v3, %v8014_v1  ;;  %v7986_v12 = vadd.f32 %v14499_v50, %v7910_v55  ;;  %v8017_v10 = vmax.f32 %v7985_v53, 0.0  ;;  %v7836_v44 = vpop.f32.mrf.mxu0 }
 0xc2f   : > { %v7913_v32 = vpop.f32.mrf.mxu1  ;;  %v7388_v3 = vadd.f32 %v14439_v29, %v14410_v13  ;;  %v7819_v55 = vadd.f32 %v14502_v8, %v7386_v9  ;;  %v7825_v13 = vadd.f32 %v14520_v48, %v14441_v52  ;;  %v15219_v9 = vld [vmem:[#allocation36_spill] sm:$0xff] }
 0xc30   : > { %v7987_v59 = vadd.f32 %v14492_v57, %v7912_v21  ;;  %v7914_v56 = vadd.f32 %v7913_v32, %v7801_v26  ;;  %8454 = vmatprep.mubr.bf16.mxu1 %v14540_v2  ;;  %v8018_v63 = vmax.f32 %v7986_v12, 0.0 }
 0xc31   : > { %v7917_v43 = vpop.f32.mrf.mxu1  ;;  %8455 = vmatmul.mubr.bf16.gmra.mxu1 %v14536_v7  ;;  %v7821_v21 = vadd.f32 %v14513_v28, %v7388_v3 }
 0xc32   : > { %v8019_v47 = vmax.f32 %v7987_v59, 0.0  ;;  %v7988_v58 = vadd.f32 %v14499_v50, %v7914_v56  ;;  %v7918_v61 = vadd.f32 %v7917_v43, %v7805_v18  ;;  %v7838_v59 = vpop.f32.mrf.mxu0  ;;  %v15216_v43 = vld [vmem:[#allocation63_spill] sm:$0xff] }
 0xc33   : > { %v7919_v5 = vpop.f32.mrf.mxu1 }
 0xc34   : > { %v14560_v15 = vpack.c.bf16 %v8019_v47, %v8017_v10  ;;  %v8020_v4 = vmax.f32 %v7988_v58, 0.0  ;;  %v7920_v42 = vadd.f32 %v7919_v5, %v7807_v24  ;;  %v7989_v22 = vadd.f32 %v14492_v57, %v7918_v61  ;;  %v15215_v24 = vld [vmem:[#allocation60_spill] sm:$0xff] }
 0xc35   : > { %v7921_v35 = vpop.f32.mrf.mxu1  ;;  %v7396_v28 = vadd.f32 %v15215_v24, %v14427_v0  ;;  %v7827_v10 = vadd.f32 %v14534_v45, %v15216_v43 }
 0xc36   : > { %v7922_v20 = vadd.f32 %v7921_v35, %v7809_v27  ;;  %v14564_v25 = vpack.c.bf16 %v8020_v4, %v8018_v63  ;;  %v7990_v11 = vadd.f32 %v14499_v50, %v7920_v42  ;;  %v8021_v31 = vmax.f32 %v7989_v22, 0.0  ;;  %v15218_v27 = vld [vmem:[#allocation23_spill] sm:$0xff]  ;;  %v7840_v4 = vpop.f32.mrf.mxu0 }
 0xc37   : > { %v7923_v19 = vpop.f32.mrf.mxu1  ;;  %v7398_v5 = vadd.f32 %v15218_v27, %v15217_v39  ;;  %v7829_v63 = vadd.f32 %v14542_v36, %v7396_v28  ;;  %v15226_v27 = vld [vmem:[#allocation59_spill] sm:$0xff] }
 0xc38   : > { %v7991_v54 = vadd.f32 %v14492_v57, %v7922_v20  ;;  %v7924_v41 = vadd.f32 %v7923_v19, %v7811_v30  ;;  %8464 = vmatprep.mubr.bf16.mxu1 %v14564_v25  ;;  %v8022_v53 = vmax.f32 %v7990_v11, 0.0 }
 0xc39   : > { %v7927_v17 = vpop.f32.mrf.mxu1  ;;  %8465 = vmatmul.mubr.bf16.gmra.mxu1 %v14560_v15  ;;  %v7831_v20 = vadd.f32 %v14558_v33, %v7398_v5  ;;  %v15222_v33 = vld [vmem:[#allocation64_spill] sm:$0xff] }
 0xc3a   : > { %v8023_v1 = vmax.f32 %v7991_v54, 0.0  ;;  %v7992_v40 = vadd.f32 %v14499_v50, %v7924_v41  ;;  %v7928_v37 = vadd.f32 %v7927_v17, %v7815_v49  ;;  %v7844_v54 = vpop.f32.mrf.mxu0  ;;  %v7837_v3 = vadd.f32 %v7836_v44, %v15222_v33  ;;  %v15227_v5 = vld [vmem:[#allocation44_spill] sm:$0xff] }
 0xc3b   : > { %v7929_v26 = vpop.f32.mrf.mxu1 }
 0xc3c   : > { %v14580_v62 = vpack.c.bf16 %v8023_v1, %v8021_v31  ;;  %v8024_v23 = vmax.f32 %v7992_v40, 0.0  ;;  %v7930_v16 = vadd.f32 %v7929_v26, %v7817_v60  ;;  %v7993_v32 = vadd.f32 %v14492_v57, %v7928_v37  ;;  %v15220_v1 = vld [vmem:[#allocation61_spill] sm:$0xff] }
 0xc3d   : > { %v7931_v14 = vpop.f32.mrf.mxu1  ;;  %v7835_v60 = vadd.f32 %v7834_v46, %v15219_v9  ;;  %v15221_v40 = vld [vmem:[#allocation65_spill] sm:$0xff] }
 0xc3e   : > { %v7932_v18 = vadd.f32 %v7931_v14, %v7819_v55  ;;  %v14584_v12 = vpack.c.bf16 %v8024_v23, %v8022_v53  ;;  %v7994_v29 = vadd.f32 %v14499_v50, %v7930_v16  ;;  %v8025_v58 = vmax.f32 %v7993_v32, 0.0  ;;  %v15223_v16 = vld [vmem:[#allocation38_spill] sm:$0xff] }
 0xc3f   : > { %v7933_v56 = vpop.f32.mrf.mxu1  ;;  %v7406_v37 = vadd.f32 %v15221_v40, %v15220_v1  ;;  %v15224_v14 = vld [vmem:[#allocation30_spill] sm:$0xff] }
 0xc40   : > { %v7995_v8 = vadd.f32 %v14492_v57, %v7932_v18  ;;  %v7934_v51 = vadd.f32 %v7933_v56, %v7821_v21  ;;  %8474 = vmatprep.mubr.bf16.mxu1 %v14584_v12  ;;  %v8026_v35 = vmax.f32 %v7994_v29, 0.0  ;;  %v7408_v21 = vadd.f32 %v15224_v14, %v15223_v16  ;;  %v7846_v18 = vpop.f32.mrf.mxu0 }
 0xc41   : > { %v7937_v47 = vpop.f32.mrf.mxu1  ;;  %8475 = vmatmul.mubr.bf16.gmra.mxu1 %v14580_v62  ;;  %v7839_v32 = vadd.f32 %v7838_v59, %v7406_v37 }
 0xc42   : > { %v8027_v61 = vmax.f32 %v7995_v8, 0.0  ;;  %v7996_v52 = vadd.f32 %v14499_v50, %v7934_v51  ;;  %v7938_v48 = vadd.f32 %v7937_v47, %v7825_v13  ;;  %v7841_v44 = vadd.f32 %v7840_v4, %v7408_v21  ;;  %v7848_v47 = vpop.f32.mrf.mxu0 }
 0xc43   : > { %v7939_v42 = vpop.f32.mrf.mxu1 }
 0xc44   : > { %v14600_v0 = vpack.c.bf16 %v8027_v61, %v8025_v58  ;;  %v8028_v30 = vmax.f32 %v7996_v52, 0.0  ;;  %v7940_v45 = vadd.f32 %v7939_v42, %v7827_v10  ;;  %v7997_v19 = vadd.f32 %v14492_v57, %v7938_v48  ;;  %v15225_v61 = vld [vmem:[#allocation31_spill] sm:$0xff]  ;;  %v7850_v9 = vpop.f32.mrf.mxu0 }
 0xc45   : > { %v7941_v22 = vpop.f32.mrf.mxu1  ;;  %v7845_v52 = vadd.f32 %v7844_v54, %v15225_v61  ;;  %v15228_v42 = vld [vmem:[#allocation35_spill] sm:$0xff]  ;;  %v11968_v61 = vld [vmem:[#allocation10 + $0x5f4] ss:$8 sps:$4 sm:$0xff]  }
 0xc46   : > { %v7942_v49 = vadd.f32 %v7941_v22, %v7829_v63  ;;  %v14604_v11 = vpack.c.bf16 %v8028_v30, %v8026_v35  ;;  %v7998_v36 = vadd.f32 %v14499_v50, %v7940_v45  ;;  %v8029_v26 = vmax.f32 %v7997_v19, 0.0  ;;  %v15229_v19 = vld [vmem:[#allocation42_spill] sm:$0xff] }
 0xc47   : > { %v7943_v41 = vpop.f32.mrf.mxu1  ;;  %v7416_v63 = vadd.f32 %v15227_v5, %v15226_v27  ;;  %v7847_v35 = vadd.f32 %v7846_v18, %v15228_v42  ;;  %v11974_v27 = vld [vmem:[#allocation10 + $0x5d4] ss:$8 sps:$4 sm:$0xff]   ;;  %v11977_v42 = vld [vmem:[#allocation10 + $0x5c4] ss:$8 sps:$4 sm:$0xff]  }
 0xc48   : > { %v7999_v17 = vadd.f32 %v14492_v57, %v7942_v49  ;;  %v7944_v31 = vadd.f32 %v7943_v41, %v7831_v20  ;;  %8484 = vmatprep.mubr.bf16.mxu1 %v14604_v11  ;;  %v8030_v13 = vmax.f32 %v7998_v36, 0.0  ;;  %v15230_v49 = vld [vmem:[#allocation45_spill] sm:$0xff] }
 0xc49   : > { %v7947_v55 = vpop.f32.mrf.mxu1  ;;  %8485 = vmatmul.mubr.bf16.gmra.mxu1 %v14600_v0  ;;  %v7418_v54 = vadd.f32 %v15230_v49, %v15229_v19  ;;  %v7849_v41 = vadd.f32 %v7848_v47, %v7416_v63  ;;  %v11963_v47 = vld [vmem:[#allocation10 + $0x500] ss:$8 sps:$4 sm:$0xff]   ;;  %v12108_v5 = vld [vmem:[%s12670_s17 + $0x30] sm:$0xff]  }
 0xc4a   : > { %v8031_v53 = vmax.f32 %v7999_v17, 0.0  ;;  %v8000_v23 = vadd.f32 %v14499_v50, %v7944_v31  ;;  %v7948_v46 = vadd.f32 %v7947_v55, %v7835_v60  ;;  %v11972_v63 = vld [vmem:[#allocation10 + $0x5d0] ss:$8 sps:$4 sm:$0xff]   ;;  %v11986_v49 = vld [vmem:[#allocation10 + $0x594] ss:$8 sps:$4 sm:$0xff]  }
 0xc4b   : > { %v7949_v56 = vpop.f32.mrf.mxu1  ;;  %v7851_v37 = vadd.f32 %v7850_v9, %v7418_v54  ;;  %v11984_v19 = vld [vmem:[#allocation10 + $0x590] ss:$8 sps:$4 sm:$0xff]   ;;  %v11989_v54 = vld [vmem:[#allocation10 + $0x584] ss:$8 sps:$4 sm:$0xff]  }
 0xc4c   : > { %v8117_v29 = vpack.c.bf16 %v8031_v53, %v8029_v26  ;;  %v8032_v8 = vmax.f32 %v8000_v23, 0.0  ;;  %v7950_v51 = vadd.f32 %v7949_v56, %v7837_v3  ;;  %v8001_v28 = vadd.f32 %v14492_v57, %v7948_v46 }
 0xc4d   : > { %v7951_v24 = vpop.f32.mrf.mxu1 }
 0xc4e   : > { %v7952_v43 = vadd.f32 %v7951_v24, %v7839_v32  ;;  %v8118_v10 = vpack.c.bf16 %v8032_v8, %v8030_v13  ;;  %v8002_v48 = vadd.f32 %v14499_v50, %v7950_v51  ;;  %v8033_v30 = vmax.f32 %v8001_v28, 0.0  ;;  %v11954_v8 = vld [vmem:[#allocation10 + $0x530] ss:$8 sps:$4 sm:$0xff]   ;;  %v11956_v51 = vld [vmem:[#allocation10 + $0x534] ss:$8 sps:$4 sm:$0xff]   ;;  %v12106_v28 = vld [vmem:[%s12670_s17 + $0x20] sm:$0xff]  }
 0xc4f   : > { %v7953_v58 = vpop.f32.mrf.mxu1  ;;  %v11957_v24 = vld [vmem:[#allocation10 + $0x520] ss:$8 sps:$4 sm:$0xff]  }
 0xc50   : > { %v8003_v59 = vadd.f32 %v14492_v57, %v7952_v43  ;;  %v7954_v39 = vadd.f32 %v7953_v58, %v7841_v44  ;;  %8494 = vmatprep.mubr.bf16.mxu1 %v8118_v10  ;;  %v8034_v36 = vmax.f32 %v8002_v48, 0.0  ;;  %v11959_v44 = vld [vmem:[#allocation10 + $0x524] ss:$8 sps:$4 sm:$0xff]   ;;  %v11960_v43 = vld [vmem:[#allocation10 + $0x510] ss:$8 sps:$4 sm:$0xff]  }
 0xc51   : > { %v7957_v4 = vpop.f32.mrf.mxu1  ;;  %8495 = vmatmul.mubr.bf16.gmra.mxu1 %v8117_v29  ;;  %v11965_v58 = vld [vmem:[#allocation10 + $0x504] ss:$8 sps:$4 sm:$0xff]   ;;  %v11966_v48 = vld [vmem:[#allocation10 + $0x5f0] ss:$8 sps:$4 sm:$0xff]  }
 0xc52   : > { %v8035_v45 = vmax.f32 %v8003_v59, 0.0  ;;  %v8004_v22 = vadd.f32 %v14499_v50, %v7954_v39  ;;  %v7958_v20 = vadd.f32 %v7957_v4, %v7845_v52  ;;  %v12107_v52 = vld [vmem:[%s12670_s17 + $0x28] sm:$0xff]   ;;  %v11980_v4 = vld [vmem:[#allocation10 + $0x5b4] ss:$8 sps:$4 sm:$0xff]  }
 0xc53   : > { %v7959_v60 = vpop.f32.mrf.mxu1  ;;  %v11971_v59 = vld [vmem:[#allocation10 + $0x5e4] ss:$8 sps:$4 sm:$0xff]   ;;  %v11969_v39 = vld [vmem:[#allocation10 + $0x5e0] ss:$8 sps:$4 sm:$0xff]  }
 0xc54   : > { %v8119_v17 = vpack.c.bf16 %v8035_v45, %v8033_v30  ;;  %v8036_v31 = vmax.f32 %v8004_v22, 0.0  ;;  %v7960_v1 = vadd.f32 %v7959_v60, %v7847_v35  ;;  %v8005_v33 = vadd.f32 %v14492_v57, %v7958_v20  ;;  %v11975_v35 = vld [vmem:[#allocation10 + $0x5c0] ss:$8 sps:$4 sm:$0xff]   ;;  %v12109_v30 = vld [vmem:[%s12670_s17 + $0x38] sm:$0xff]   ;;  %v11983_v22 = vld [vmem:[#allocation10 + $0x5a4] ss:$8 sps:$4 sm:$0xff]  }
 0xc55   : > { %v7961_v40 = vpop.f32.mrf.mxu1  ;;  %v11978_v45 = vld [vmem:[#allocation10 + $0x5b0] ss:$8 sps:$4 sm:$0xff]   ;;  %v11981_v20 = vld [vmem:[#allocation10 + $0x5a0] ss:$8 sps:$4 sm:$0xff]  }
 0xc56   : > { %v7962_v3 = vadd.f32 %v7961_v40, %v7849_v41  ;;  %v8120_v55 = vpack.c.bf16 %v8036_v31, %v8034_v36  ;;  %v8006_v53 = vadd.f32 %v14499_v50, %v7960_v1  ;;  %v8037_v16 = vmax.f32 %v8005_v33, 0.0  ;;  %v11987_v41 = vld [vmem:[#allocation10 + $0x580] ss:$8 sps:$4 sm:$0xff]  }
 0xc57   : > { %v7963_v26 = vpop.f32.mrf.mxu1 }
 0xc58   : > { %v8007_v23 = vadd.f32 %v14492_v57, %v7962_v3  ;;  %v7964_v46 = vadd.f32 %v7963_v26, %v7851_v37  ;;  %8504 = vmatprep.mubr.bf16.mxu1 %v8120_v55  ;;  %v8038_v32 = vmax.f32 %v8006_v53, 0.0  ;;  %v12102_v57 = vld [vmem:[%s12670_s17] sm:$0xff]  }
 0xc59   : > { %8505 = vmatmul.mubr.bf16.gmra.mxu1 %v8119_v17 }
 0xc5a   : > { %v8039_v14 = vmax.f32 %v8007_v23, 0.0  ;;  %v8008_v21 = vadd.f32 %v14499_v50, %v7964_v46  ;;  %v15231_v50 = vmov 0  }
 0xc5c   : > { %v8121_v18 = vpack.c.bf16 %v8039_v14, %v8037_v16  ;;  %v8040_v56 = vmax.f32 %v8008_v21, 0.0 }
 0xc5e   : > { %v8122_v13 = vpack.c.bf16 %v8040_v56, %v8038_v32 }
 0xc60   : > { %8123 = vmatprep.subr.bf16.mxu0 %v8122_v13  ;;  %8514 = vmatprep.mubr.bf16.mxu1 %v8122_v13 }
 0xc61   : > { %8124 = vmatpush1.bf16.msra.mxu0 %v8121_v18  ;;  %8515 = vmatmul.mubr.bf16.gmra.mxu1 %v8121_v18 }
 0xc62   : > { %8125 = vmatprep.subr.bf16.mxu0 %v8120_v55 }
 0xc65   : > { %8126 = vmatpush1.bf16.msra.mxu0 %v8119_v17 }
 0xc66   : > { %8127 = vmatprep.subr.bf16.mxu0 %v8118_v10  ;;  %v11962_v10 = vld [vmem:[#allocation10 + $0x514] ss:$8 sps:$4 sm:$0xff]  }
 0xc69   : > { %8128 = vmatpush1.bf16.msra.mxu0 %v8117_v29  ;;  %v12105_v29 = vld [vmem:[%s12670_s17 + $0x18] sm:$0xff]  }
 0xc6a   : > { %8129 = vmatprep.subr.bf16.mxu0 %v14604_v11  ;;  %v11953_v11 = vld [vmem:[#allocation10 + $0x544] ss:$8 sps:$4 sm:$0xff]  }
 0xc6d   : > { %8130 = vmatpush1.bf16.msra.mxu0 %v14600_v0  ;;  %v11951_v0 = vld [vmem:[#allocation10 + $0x540] ss:$8 sps:$4 sm:$0xff]  }
 0xc6e   : > { %8131 = vmatprep.subr.bf16.mxu0 %v14584_v12  ;;  %v12103_v12 = vld [vmem:[%s12670_s17 + $0x8] sm:$0xff]  }
 0xc71   : > { %8132 = vmatpush1.bf16.msra.mxu0 %v14580_v62  ;;  %v11944_v62 = vld [vmem:[#allocation10 + $0x574] ss:$8 sps:$4 sm:$0xff]  }
 0xc72   : > { %8133 = vmatprep.subr.bf16.mxu0 %v14564_v25  ;;  %v11942_v25 = vld [vmem:[#allocation10 + $0x570] ss:$8 sps:$4 sm:$0xff]  }
 0xc75   : > { %8134 = vmatpush1.bf16.msra.mxu0 %v14560_v15  ;;  %v12104_v15 = vld [vmem:[%s12670_s17 + $0x10] sm:$0xff]  }
 0xc76   : > { %8135 = vmatprep.subr.bf16.mxu0 %v14540_v2  ;;  %v11945_v2 = vld [vmem:[#allocation10 + $0x560] ss:$8 sps:$4 sm:$0xff]  }
 0xc79   : > { %8136 = vmatpush1.bf16.msra.mxu0 %v14536_v7  ;;  %v11947_v7 = vld [vmem:[#allocation10 + $0x564] ss:$8 sps:$4 sm:$0xff]  }
 0xc7a   : > { %8137 = vmatprep.subr.bf16.mxu0 %v14518_v34  ;;  %v11950_v34 = vld [vmem:[#allocation10 + $0x554] ss:$8 sps:$4 sm:$0xff]  }
 0xc7d   : > { %8138 = vmatpush1.bf16.msra.mxu0 %v14515_v6  ;;  %v11948_v6 = vld [vmem:[#allocation10 + $0x550] ss:$8 sps:$4 sm:$0xff]  }
 0xc7e   : > { %8685 = vmatprep.subr.bf16.mxu0 %v11944_v62 }
 0xc80   : > { %8156 = vmatmul.mubr.bf16.vlgmr.msra.gmra.mxu0 %v12102_v57 }
 0xc81   : > { %8165 = vmatprep.mubr.bf16.mxu0 %v15231_v50  ;;  %8686 = vmatpush1.bf16.msra.mxu0 %v11942_v25 }
 0xc82   : > { %8687 = vmatprep.subr.bf16.mxu0 %v11947_v7 }
 0xc85   : > { %8688 = vmatpush1.bf16.msra.mxu0 %v11945_v2 }
 0xc86   : > { %8689 = vmatprep.subr.bf16.mxu0 %v11950_v34 }
 0xc88   : > { %8166 = vmatmul.mubr.bf16.gmra.mxu0 %v12103_v12 }
 0xc89   : > { %8175 = vmatprep.mubr.bf16.mxu0 %v15231_v50  ;;  %8690 = vmatpush1.bf16.msra.mxu0 %v11948_v6 }
 0xc8a   : > { %8691 = vmatprep.subr.bf16.mxu0 %v11953_v11 }
 0xc8d   : > { %8692 = vmatpush1.bf16.msra.mxu0 %v11951_v0 }
 0xc8e   : > { %8693 = vmatprep.subr.bf16.mxu0 %v11956_v51 }
 0xc90   : > { %8176 = vmatmul.mubr.bf16.gmra.mxu0 %v12104_v15 }
 0xc91   : > { %8185 = vmatprep.mubr.bf16.mxu0 %v15231_v50  ;;  %8694 = vmatpush1.bf16.msra.mxu0 %v11954_v8 }
 0xc92   : > { %8695 = vmatprep.subr.bf16.mxu0 %v11959_v44 }
 0xc95   : > { %8696 = vmatpush1.bf16.msra.mxu0 %v11957_v24 }
 0xc96   : > { %8697 = vmatprep.subr.bf16.mxu0 %v11962_v10 }
 0xc98   : > { %8186 = vmatmul.mubr.bf16.gmra.mxu0 %v12105_v29 }
 0xc99   : > { %8195 = vmatprep.mubr.bf16.mxu0 %v15231_v50  ;;  %8698 = vmatpush1.bf16.msra.mxu0 %v11960_v43 }
 0xc9a   : > { %8699 = vmatprep.subr.bf16.mxu0 %v11965_v58 }
 0xc9d   : > { %8700 = vmatpush1.bf16.msra.mxu0 %v11963_v47 }
 0xc9e   : > { %8701 = vmatprep.subr.bf16.mxu0 %v11968_v61 }
 0xca0   : > { %8196 = vmatmul.mubr.bf16.gmra.mxu0 %v12106_v28 }
 0xca1   : > { %8205 = vmatprep.mubr.bf16.mxu0 %v15231_v50  ;;  %8702 = vmatpush2.bf16.msra.mxu0 %v11966_v48 }
 0xca2   : > { %8703 = vmatprep.subr.bf16.mxu0 %v11971_v59 }
 0xca5   : > { %8704 = vmatpush2.bf16.msra.mxu0 %v11969_v39 }
 0xca6   : > { %8705 = vmatprep.subr.bf16.mxu0 %v11974_v27 }
 0xca8   : > { %8206 = vmatmul.mubr.bf16.gmra.mxu0 %v12107_v52 }
 0xca9   : > { %8215 = vmatprep.mubr.bf16.mxu0 %v15231_v50  ;;  %8706 = vmatpush2.bf16.msra.mxu0 %v11972_v63 }
 0xcaa   : > { %8707 = vmatprep.subr.bf16.mxu0 %v11977_v42 }
 0xcad   : > { %8708 = vmatpush2.bf16.msra.mxu0 %v11975_v35 }
 0xcae   : > { %8709 = vmatprep.subr.bf16.mxu0 %v11980_v4 }
 0xcb0   : > { %8216 = vmatmul.mubr.bf16.gmra.mxu0 %v12108_v5 }
 0xcb1   : > { %8225 = vmatprep.mubr.bf16.mxu0 %v15231_v50  ;;  %8710 = vmatpush2.bf16.msra.mxu0 %v11978_v45 }
 0xcb2   : > { %8711 = vmatprep.subr.bf16.mxu0 %v11983_v22  ;;  %v14942_v22 = vmov 0.0  }
 0xcb3   : > { %8939 = vmatprep.mubr.f32.mxu1 %v14942_v22 }
 0xcb5   : > { %8712 = vmatpush2.bf16.msra.mxu0 %v11981_v20 }
 0xcb6   : > { %8713 = vmatprep.subr.bf16.mxu0 %v11986_v49  ;;  %v11992_v49 = vld [vmem:[#allocation10 + $0x774] ss:$8 sps:$4 sm:$0xff]  }
 0xcb8   : > { %8226 = vmatmul.mubr.bf16.gmra.mxu0 %v12109_v30 }
 0xcb9   : > { %8714 = vmatpush2.bf16.msra.mxu0 %v11984_v19  ;;  %v11990_v19 = vld [vmem:[#allocation10 + $0x770] ss:$8 sps:$4 sm:$0xff]  }
 0xcba   : > { %8715 = vmatprep.subr.bf16.mxu0 %v11989_v54 }
 0xcbd   : > { %8716 = vmatpush2.bf16.msra.mxu0 %v11987_v41  ;;  %v11995_v41 = vld [vmem:[#allocation10 + $0x764] ss:$8 sps:$4 sm:$0xff]  }
 0xcbe   : > { %9159 = vmatprep.subr.bf16.mxu0 %v11992_v49 }
 0xce9   : > { %v14656_v39 = vpop.f32.mrf.mxu1 }
 0xcea   : > { %15232 = vst [vmem:[#allocation50_spill] sm:$0xff] %v14656_v39 }
 0xceb   : > { %v14658_v27 = vpop.f32.mrf.mxu1 }
 0xcec   : > { %15233 = vst [vmem:[#allocation51_spill] sm:$0xff] %v14658_v27  ;;  %v15246_v27 = vld [vmem:[#allocation25_spill] sm:$0xff] }
 0xced   : > { %v14660_v5 = vpop.f32.mrf.mxu1 }
 0xcee   : > { %15234 = vst [vmem:[#allocation48_spill] sm:$0xff] %v14660_v5 }
 0xcef   : > { %v14662_v63 = vpop.f32.mrf.mxu1 }
 0xcf0   : > { %15235 = vst [vmem:[#allocation49_spill] sm:$0xff] %v14662_v63 }
 0xcf1   : > { %v14664_v42 = vpop.f32.mrf.mxu1 }
 0xcf2   : > { %15236 = vst [vmem:[#allocation43_spill] sm:$0xff] %v14664_v42 }
 0xcf3   : > { %v14666_v35 = vpop.f32.mrf.mxu1 }
 0xcf4   : > { %15237 = vst [vmem:[#allocation52_spill] sm:$0xff] %v14666_v35 }
 0xcf5   : > { %v14668_v4 = vpop.f32.mrf.mxu1 }
 0xcf6   : > { %15238 = vst [vmem:[#allocation46_spill] sm:$0xff] %v14668_v4 }
 0xcf7   : > { %v14670_v30 = vpop.f32.mrf.mxu1 }
 0xcf9   : > { %v14672_v45 = vpop.f32.mrf.mxu1 }
 0xcfb   : > { %v14675_v20 = vpop.f32.mrf.mxu1 }
 0xcfd   : > { %v14677_v54 = vpop.f32.mrf.mxu1 }
 0xd40   : > { %v8157_v9 = vpop.f32.mrf.mxu0 }
 0xd42   : > { %v8159_v60 = vpop.f32.mrf.mxu0 }
 0xd44   : > { %v8161_v36 = vpop.f32.mrf.mxu0 }
 0xd45   : > { %v8236_v1 = vpack.c.bf16 %v8161_v36, %v8157_v9  ;;  %v11993_v9 = vld [vmem:[#allocation10 + $0x760] ss:$8 sps:$4 sm:$0xff]   ;;  %v14679_v36 = vpop.f32.mrf.mxu1 }
 0xd46   : > { %v8163_v17 = vpop.f32.mrf.mxu0 }
 0xd47   : > { %v8237_v31 = vpack.c.bf16 %v8163_v17, %v8159_v60  ;;  %v11998_v60 = vld [vmem:[#allocation10 + $0x754] ss:$8 sps:$4 sm:$0xff]   ;;  %v11996_v17 = vld [vmem:[#allocation10 + $0x750] ss:$8 sps:$4 sm:$0xff]  }
 0xd48   : > { %v8167_v40 = vpop.f32.mrf.mxu0 }
 0xd49   : > { %8717 = vmatprep.mubr.bf16.mxu0 %v8237_v31  ;;  %v12001_v31 = vld [vmem:[#allocation10 + $0x744] ss:$8 sps:$4 sm:$0xff]  }
 0xd4a   : > { %v8169_v37 = vpop.f32.mrf.mxu0  ;;  %8718 = vmatmul.mubr.bf16.vlgmr.msra.gmra.mxu0 %v8236_v1  ;;  %v14681_v1 = vpop.f32.mrf.mxu1 }
 0xd4b   : > { %9160 = vmatpush1.bf16.msra.mxu0 %v11990_v19 }
 0xd4c   : > { %v8171_v33 = vpop.f32.mrf.mxu0  ;;  %9161 = vmatprep.subr.bf16.mxu0 %v11995_v41 }
 0xd4d   : > { %v8238_v26 = vpack.c.bf16 %v8171_v33, %v8167_v40  ;;  %v11999_v40 = vld [vmem:[#allocation10 + $0x740] ss:$8 sps:$4 sm:$0xff]   ;;  %v14683_v33 = vpop.f32.mrf.mxu1 }
 0xd4e   : > { %v8173_v3 = vpop.f32.mrf.mxu0 }
 0xd4f   : > { %v8239_v55 = vpack.c.bf16 %v8173_v3, %v8169_v37  ;;  %9162 = vmatpush1.bf16.msra.mxu0 %v11993_v9  ;;  %v12004_v37 = vld [vmem:[#allocation10 + $0x734] ss:$8 sps:$4 sm:$0xff]   ;;  %v12002_v3 = vld [vmem:[#allocation10 + $0x730] ss:$8 sps:$4 sm:$0xff]   ;;  %v12029_v9 = vld [vmem:[#allocation10 + $0x7a0] ss:$8 sps:$4 sm:$0xff]  }
 0xd50   : > { %v8177_v53 = vpop.f32.mrf.mxu0  ;;  %9163 = vmatprep.subr.bf16.mxu0 %v11998_v60 }
 0xd51   : > { %8727 = vmatprep.mubr.bf16.mxu0 %v8239_v55  ;;  %v12007_v55 = vld [vmem:[#allocation10 + $0x724] ss:$8 sps:$4 sm:$0xff]  }
 0xd52   : > { %v8179_v23 = vpop.f32.mrf.mxu0  ;;  %8728 = vmatmul.mubr.bf16.gmra.mxu0 %v8238_v26  ;;  %v14685_v26 = vpop.f32.mrf.mxu1 }
 0xd53   : > { %9164 = vmatpush1.bf16.msra.mxu0 %v11996_v17 }
 0xd54   : > { %v8181_v46 = vpop.f32.mrf.mxu0  ;;  %9165 = vmatprep.subr.bf16.mxu0 %v12001_v31 }
 0xd55   : > { %v8240_v21 = vpack.c.bf16 %v8181_v46, %v8177_v53  ;;  %v12005_v53 = vld [vmem:[#allocation10 + $0x720] ss:$8 sps:$4 sm:$0xff]   ;;  %v14687_v46 = vpop.f32.mrf.mxu1 }
 0xd56   : > { %v8183_v16 = vpop.f32.mrf.mxu0 }
 0xd57   : > { %v8241_v14 = vpack.c.bf16 %v8183_v16, %v8179_v23  ;;  %9166 = vmatpush1.bf16.msra.mxu0 %v11999_v40  ;;  %v12010_v23 = vld [vmem:[#allocation10 + $0x714] ss:$8 sps:$4 sm:$0xff]  }
 0xd58   : > { %v8187_v32 = vpop.f32.mrf.mxu0  ;;  %9167 = vmatprep.subr.bf16.mxu0 %v12004_v37 }
 0xd59   : > { %8737 = vmatprep.mubr.bf16.mxu0 %v8241_v14  ;;  %v12008_v14 = vld [vmem:[#allocation10 + $0x710] ss:$8 sps:$4 sm:$0xff]  }
 0xd5a   : > { %v8189_v18 = vpop.f32.mrf.mxu0  ;;  %8738 = vmatmul.mubr.bf16.gmra.mxu0 %v8240_v21  ;;  %v12013_v21 = vld [vmem:[#allocation10 + $0x704] ss:$8 sps:$4 sm:$0xff]  }
 0xd5b   : > { %9168 = vmatpush1.bf16.msra.mxu0 %v12002_v3 }
 0xd5c   : > { %v8191_v56 = vpop.f32.mrf.mxu0  ;;  %9169 = vmatprep.subr.bf16.mxu0 %v12007_v55 }
 0xd5d   : > { %v8242_v50 = vpack.c.bf16 %v8191_v56, %v8187_v32  ;;  %v14691_v32 = vpop.f32.mrf.mxu1 }
 0xd5e   : > { %v8193_v13 = vpop.f32.mrf.mxu0 }
 0xd5f   : > { %v8243_v57 = vpack.c.bf16 %v8193_v13, %v8189_v18  ;;  %9170 = vmatpush1.bf16.msra.mxu0 %v12005_v53  ;;  %v12011_v13 = vld [vmem:[#allocation10 + $0x700] ss:$8 sps:$4 sm:$0xff]  }
 0xd60   : > { %v8197_v12 = vpop.f32.mrf.mxu0  ;;  %9171 = vmatprep.subr.bf16.mxu0 %v12010_v23 }
 0xd61   : > { %8747 = vmatprep.mubr.bf16.mxu0 %v8243_v57  ;;  %v12016_v57 = vld [vmem:[#allocation10 + $0x7f4] ss:$8 sps:$4 sm:$0xff]  }
 0xd62   : > { %v8199_v25 = vpop.f32.mrf.mxu0  ;;  %8748 = vmatmul.mubr.bf16.gmra.mxu0 %v8242_v50  ;;  %v14697_v50 = vpop.f32.mrf.mxu1 }
 0xd63   : > { %9172 = vmatpush1.bf16.msra.mxu0 %v12008_v14 }
 0xd64   : > { %v8201_v62 = vpop.f32.mrf.mxu0  ;;  %9173 = vmatprep.subr.bf16.mxu0 %v12013_v21 }
 0xd65   : > { %v8244_v15 = vpack.c.bf16 %v8201_v62, %v8197_v12  ;;  %v12014_v62 = vld [vmem:[#allocation10 + $0x7f0] ss:$8 sps:$4 sm:$0xff]  }
 0xd66   : > { %v8203_v2 = vpop.f32.mrf.mxu0 }
 0xd67   : > { %v8245_v7 = vpack.c.bf16 %v8203_v2, %v8199_v25  ;;  %9174 = vmatpush1.bf16.msra.mxu0 %v12011_v13  ;;  %v12019_v2 = vld [vmem:[#allocation10 + $0x7e4] ss:$8 sps:$4 sm:$0xff]  }
 0xd68   : > { %v8207_v6 = vpop.f32.mrf.mxu0  ;;  %9175 = vmatprep.subr.bf16.mxu0 %v12016_v57 }
 0xd69   : > { %8757 = vmatprep.mubr.bf16.mxu0 %v8245_v7  ;;  %v14703_v7 = vpop.f32.mrf.mxu1 }
 0xd6a   : > { %v8209_v34 = vpop.f32.mrf.mxu0  ;;  %8758 = vmatmul.mubr.bf16.gmra.mxu0 %v8244_v15 }
 0xd6b   : > { %9176 = vmatpush2.bf16.msra.mxu0 %v12014_v62 }
 0xd6c   : > { %v8211_v0 = vpop.f32.mrf.mxu0  ;;  %9177 = vmatprep.subr.bf16.mxu0 %v12019_v2 }
 0xd6d   : > { %v8246_v8 = vpack.c.bf16 %v8211_v0, %v8207_v6  ;;  %v12022_v0 = vld [vmem:[#allocation10 + $0x7d4] ss:$8 sps:$4 sm:$0xff]  }
 0xd6e   : > { %v8213_v11 = vpop.f32.mrf.mxu0 }
 0xd6f   : > { %v8247_v29 = vpack.c.bf16 %v8213_v11, %v8209_v34  ;;  %v12017_v34 = vld [vmem:[#allocation10 + $0x7e0] ss:$8 sps:$4 sm:$0xff]   ;;  %v14709_v11 = vpop.f32.mrf.mxu1 }
 0xd70   : > { %v8217_v51 = vpop.f32.mrf.mxu0  ;;  %9178 = vmatpush2.bf16.msra.mxu0 %v12017_v34 }
 0xd71   : > { %8767 = vmatprep.mubr.bf16.mxu0 %v8247_v29  ;;  %9179 = vmatprep.subr.bf16.mxu0 %v12022_v0 }
 0xd72   : > { %v8219_v24 = vpop.f32.mrf.mxu0  ;;  %8768 = vmatmul.mubr.bf16.gmra.mxu0 %v8246_v8 }
 0xd74   : > { %v8221_v44 = vpop.f32.mrf.mxu0 }
 0xd75   : > { %v8248_v10 = vpack.c.bf16 %v8221_v44, %v8217_v51  ;;  %v12020_v51 = vld [vmem:[#allocation10 + $0x7d0] ss:$8 sps:$4 sm:$0xff]   ;;  %v14715_v44 = vpop.f32.mrf.mxu1 }
 0xd76   : > { %v8223_v28 = vpop.f32.mrf.mxu0  ;;  %9180 = vmatpush2.bf16.msra.mxu0 %v12020_v51 }
 0xd77   : > { %v8249_v43 = vpack.c.bf16 %v8223_v28, %v8219_v24  ;;  %v12025_v24 = vld [vmem:[#allocation10 + $0x7c4] ss:$8 sps:$4 sm:$0xff]  }
 0xd78   : > { %v8227_v47 = vpop.f32.mrf.mxu0  ;;  %9181 = vmatprep.subr.bf16.mxu0 %v12025_v24 }
 0xd79   : > { %8777 = vmatprep.mubr.bf16.mxu0 %v8249_v43 }
 0xd7a   : > { %v8229_v58 = vpop.f32.mrf.mxu0  ;;  %8778 = vmatmul.mubr.bf16.gmra.mxu0 %v8248_v10  ;;  %v12023_v10 = vld [vmem:[#allocation10 + $0x7c0] ss:$8 sps:$4 sm:$0xff]  }
 0xd7b   : > { %9182 = vmatpush2.bf16.msra.mxu0 %v12023_v10 }
 0xd7c   : > { %v8231_v61 = vpop.f32.mrf.mxu0 }
 0xd7d   : > { %v8250_v59 = vpack.c.bf16 %v8231_v61, %v8227_v47  ;;  %v12028_v47 = vld [vmem:[#allocation10 + $0x7b4] ss:$8 sps:$4 sm:$0xff]  }
 0xd7e   : > { %v8233_v52 = vpop.f32.mrf.mxu0  ;;  %9183 = vmatprep.subr.bf16.mxu0 %v12028_v47 }
 0xd7f   : > { %v8251_v48 = vpack.c.bf16 %v8233_v52, %v8229_v58  ;;  %v8498_v58 = vpop.f32.mrf.mxu1 }
 0xd81   : > { %8787 = vmatprep.mubr.bf16.mxu0 %v8251_v48  ;;  %v12026_v48 = vld [vmem:[#allocation10 + $0x7b0] ss:$8 sps:$4 sm:$0xff]   ;;  %v8500_v19 = vpop.f32.mrf.mxu1 }
 0xd82   : > { %8788 = vmatmul.mubr.bf16.gmra.mxu0 %v8250_v59  ;;  %v12031_v59 = vld [vmem:[#allocation10 + $0x7a4] ss:$8 sps:$4 sm:$0xff]  }
 0xd83   : > { %9184 = vmatpush2.bf16.msra.mxu0 %v12026_v48  ;;  %v8502_v60 = vpop.f32.mrf.mxu1 }
 0xd84   : > { %9185 = vmatprep.subr.bf16.mxu0 %v12031_v59 }
 0xd85   : > { %v8506_v40 = vpop.f32.mrf.mxu1 }
 0xd87   : > { %9186 = vmatpush2.bf16.msra.mxu0 %v12029_v9  ;;  %v8508_v55 = vpop.f32.mrf.mxu1  ;;  %v8106_v9 = vld [vmem:[#allocation13 + $0x6] ss:$8 sm:$0x3] }
 0xd88   : > { %v14737_v63 = vrot.slane %v8106_v9, %v15214_v38 }
 0xd89   : > { %v8510_v14 = vpop.f32.mrf.mxu1 }
 0xd8b   : > { %v8512_v57 = vpop.f32.mrf.mxu1 }
 0xd8d   : > { %v8516_v34 = vpop.f32.mrf.mxu1 }
 0xd8f   : > { %v8518_v24 = vpop.f32.mrf.mxu1 }
 0xd91   : > { %v8520_v48 = vpop.f32.mrf.mxu1 }
 0xe0a   : > { %v14689_v16 = vpop.f32.mrf.mxu0 }
 0xe0b   : > { %15239 = vst [vmem:[#allocation47_spill] sm:$0xff] %v14689_v16 }
 0xe0c   : > { %v14693_v18 = vpop.f32.mrf.mxu0 }
 0xe0d   : > { %15240 = vst [vmem:[#allocation67_spill] sm:$0xff] %v14693_v18  ;;  %v8522_v18 = vpop.f32.mrf.mxu1 }
 0xe0e   : > { %v14695_v56 = vpop.f32.mrf.mxu0 }
 0xe0f   : > { %15241 = vst [vmem:[#allocation34_spill] sm:$0xff] %v14695_v56  ;;  %v14734_v56 = vrot.slane %v8106_v9, %v15246_v27 }
 0xe10   : > { %v14699_v12 = vpop.f32.mrf.mxu0 }
 0xe11   : > { %15242 = vst [vmem:[#allocation53_spill] sm:$0xff] %v14699_v12 }
 0xe12   : > { %v14701_v25 = vpop.f32.mrf.mxu0 }
 0xe13   : > { %15243 = vst [vmem:[#allocation58_spill] sm:$0xff] %v14701_v25 }
 0xe14   : > { %v14705_v15 = vpop.f32.mrf.mxu0 }
 0xe15   : > { %15244 = vst [vmem:[#allocation40_spill] sm:$0xff] %v14705_v15 }
 0xe16   : > { %v14707_v6 = vpop.f32.mrf.mxu0 }
 0xe17   : > { %15245 = vst [vmem:[#allocation41_spill] sm:$0xff] %v14707_v6 }
 0xe18   : > { %v14711_v29 = vpop.f32.mrf.mxu0 }
 0xe1a   : > { %v14713_v8 = vpop.f32.mrf.mxu0 }
 0xe1c   : > { %v14717_v28 = vpop.f32.mrf.mxu0 }
 0xe1e   : > { %v14719_v43 = vpop.f32.mrf.mxu0 }
 0xe20   : > { %v14721_v61 = vpop.f32.mrf.mxu0 }
 0xe22   : > { %v14723_v52 = vpop.f32.mrf.mxu0 }
 0xe24   : > { %v14725_v49 = vpop.f32.mrf.mxu0 }
 0xe26   : > { %v14727_v41 = vpop.f32.mrf.mxu0 }
 0xe28   : > { %v14729_v17 = vpop.f32.mrf.mxu0 }
 0xe2a   : > { %v14731_v31 = vpop.f32.mrf.mxu0 }
 0xe2c   : > { %v8761_v37 = vpop.f32.mrf.mxu0 }
 0xe2e   : > { %v8763_v3 = vpop.f32.mrf.mxu0 }
 0xe30   : > { %v8765_v53 = vpop.f32.mrf.mxu0 }
 0xe32   : > { %v8769_v23 = vpop.f32.mrf.mxu0 }
 0xe34   : > { %v8771_v21 = vpop.f32.mrf.mxu0 }
 0xe36   : > { %v8773_v13 = vpop.f32.mrf.mxu0 }
 0xe37   : > { %v8774_v27 = vadd.f32 %v8773_v13, %v8500_v19  ;;  %v8760_v19 = vadd.f32 %v14731_v31, %v14691_v32  ;;  %v8752_v32 = vadd.f32 %v14725_v49, %v14683_v33  ;;  %v8744_v33 = vadd.f32 %v14719_v43, %v14677_v54 }
 0xe38   : > { %v8775_v62 = vpop.f32.mrf.mxu0  ;;  %v8736_v54 = vadd.f32 %v14711_v29, %v14670_v30  ;;  %v15252_v30 = vld [vmem:[#allocation58_spill] sm:$0xff] }
 0xe3a   : > { %v8779_v2 = vpop.f32.mrf.mxu0 }
 0xe3c   : > { %v8781_v0 = vpop.f32.mrf.mxu0 }
 0xe3d   : > { %v8782_v6 = vadd.f32 %v8781_v0, %v8508_v55 }
 0xe3e   : > { %v8783_v51 = vpop.f32.mrf.mxu0 }
 0xe3f   : > { %v8784_v15 = vadd.f32 %v8783_v51, %v8510_v14  ;;  %v15247_v51 = vld [vmem:[#allocation46_spill] sm:$0xff] }
 0xe40   : > { %v8785_v10 = vpop.f32.mrf.mxu0 }
 0xe41   : > { %v8786_v25 = vadd.f32 %v8785_v10, %v8512_v57  ;;  %v8835_v9 = vadd.f32 %v14734_v56, %v8784_v15  ;;  %v8764_v15 = vadd.f32 %v8763_v3, %v14703_v7  ;;  %v8756_v7 = vadd.f32 %v14729_v17, %v14687_v46 }
 0xe42   : > { %v8789_v47 = vpop.f32.mrf.mxu0  ;;  %v8750_v46 = vadd.f32 %v14723_v52, %v14681_v1  ;;  %v8825_v17 = vadd.f32 %v14734_v56, %v8760_v19  ;;  %v8742_v1 = vadd.f32 %v14717_v28, %v14675_v20  ;;  %v8822_v52 = vadd.f32 %v14737_v63, %v8752_v32  ;;  %v15248_v20 = vld [vmem:[#allocation41_spill] sm:$0xff]  ;;  %v15260_v19 = vld [vmem:[#allocation47_spill] sm:$0xff] }
 0xe43   : > { %v8790_v5 = vadd.f32 %v8789_v47, %v8516_v34  ;;  %v8836_v34 = vadd.f32 %v14737_v63, %v8786_v25  ;;  %v8734_v28 = vadd.f32 %v15248_v20, %v15247_v51  ;;  %v8819_v10 = vadd.f32 %v14734_v56, %v8744_v33  ;;  %v12034_v33 = vld [vmem:[#allocation10 + $0x794] ss:$8 sps:$4 sm:$0xff]  }
 0xe44   : > { %v8791_v59 = vpop.f32.mrf.mxu0  ;;  %9187 = vmatprep.subr.bf16.mxu0 %v12034_v33  ;;  %v12047_v51 = vld [vmem:[#allocation8 + $0x118] sm:$0xff]  }
 0xe45   : > { %v8792_v16 = vadd.f32 %v8791_v59, %v8518_v24  ;;  %v8776_v59 = vadd.f32 %v8775_v62, %v8502_v60  ;;  %v8868_v60 = vmax.f32 %v8836_v34, 0.0  ;;  %v15251_v34 = vld [vmem:[#allocation43_spill] sm:$0xff] }
 0xe46   : > { %v8793_v22 = vpop.f32.mrf.mxu0  ;;  %v8730_v29 = vadd.f32 %v15252_v30, %v15251_v34  ;;  %v12051_v34 = vld [vmem:[#allocation8 + $0x108] sm:$0xff]   ;;  %v12052_v30 = vld [vmem:[#allocation8 + $0x140] sm:$0xff]  }
 0xe47   : > { %v8794_v39 = vadd.f32 %v8793_v22, %v8520_v48  ;;  %v8838_v4 = vadd.f32 %v14737_v63, %v8792_v16  ;;  %v8780_v22 = vadd.f32 %v8779_v2, %v8506_v40  ;;  %v8837_v48 = vadd.f32 %v14734_v56, %v8790_v5 }
 0xe48   : > { %v8795_v12 = vpop.f32.mrf.mxu0  ;;  %v8770_v16 = vadd.f32 %v8769_v23, %v14715_v44  ;;  %v8766_v5 = vadd.f32 %v8765_v53, %v14709_v11  ;;  %v8832_v25 = vadd.f32 %v14737_v63, %v8776_v59  ;;  %v8857_v2 = vmax.f32 %v8825_v17, 0.0 }
 0xe49   : > { %v8796_v42 = vadd.f32 %v8795_v12, %v8522_v18  ;;  %v8839_v35 = vadd.f32 %v14734_v56, %v8794_v39  ;;  %v8772_v18 = vadd.f32 %v8771_v21, %v8498_v58  ;;  %v8834_v12 = vadd.f32 %v14737_v63, %v8782_v6 }
 0xe4a   : > { %v8870_v39 = vmax.f32 %v8838_v4, 0.0  ;;  %v8869_v40 = vmax.f32 %v8837_v48, 0.0  ;;  %v8867_v58 = vmax.f32 %v8835_v9, 0.0  ;;  %v8762_v4 = vadd.f32 %v8761_v37, %v14697_v50 }
 0xe4b   : > { %v8840_v24 = vadd.f32 %v14737_v63, %v8796_v42  ;;  %v8871_v57 = vmax.f32 %v8839_v35, 0.0  ;;  %v8833_v42 = vadd.f32 %v14734_v56, %v8780_v22  ;;  %v8831_v35 = vadd.f32 %v14734_v56, %v8774_v27  ;;  %v15249_v22 = vld [vmem:[#allocation52_spill] sm:$0xff] }
 0xe4c   : > { %v8830_v6 = vadd.f32 %v14737_v63, %v8772_v18  ;;  %v8866_v44 = vmax.f32 %v8834_v12, 0.0  ;;  %v8829_v11 = vadd.f32 %v14734_v56, %v8770_v16  ;;  %v8828_v27 = vadd.f32 %v14737_v63, %v8766_v5  ;;  %v15254_v18 = vld [vmem:[#allocation53_spill] sm:$0xff] }
 0xe4d   : > { %v8872_v47 = vmax.f32 %v8840_v24, 0.0  ;;  %v8865_v55 = vmax.f32 %v8833_v42, 0.0  ;;  %v8864_v3 = vmax.f32 %v8832_v25, 0.0  ;;  %v8754_v50 = vadd.f32 %v14727_v41, %v14685_v26  ;;  %v15255_v42 = vld [vmem:[#allocation48_spill] sm:$0xff] }
 0xe4e   : > { %v8827_v37 = vadd.f32 %v14734_v56, %v8764_v15  ;;  %v8863_v53 = vmax.f32 %v8831_v35, 0.0  ;;  %v8826_v31 = vadd.f32 %v14737_v63, %v8762_v4  ;;  %v8862_v23 = vmax.f32 %v8830_v6, 0.0  ;;  %v15257_v15 = vld [vmem:[#allocation51_spill] sm:$0xff] }
 0xe4f   : > { %8875 = vmatprep.subr.mxu1 %v8872_v47  ;;  %v8861_v14 = vmax.f32 %v8829_v11, 0.0  ;;  %v8746_v26 = vadd.f32 %v14721_v61, %v14679_v36  ;;  %v8824_v41 = vadd.f32 %v14737_v63, %v8756_v7  ;;  %v8860_v21 = vmax.f32 %v8828_v27, 0.0  ;;  %v15258_v35 = vld [vmem:[#allocation67_spill] sm:$0xff] }
 0xe50   : > { %8876 = vmatpush1.msra.mxu1 %v8871_v57  ;;  %v8823_v49 = vadd.f32 %v14734_v56, %v8754_v50  ;;  %v8859_v13 = vmax.f32 %v8827_v37, 0.0  ;;  %v8858_v62 = vmax.f32 %v8826_v31, 0.0  ;;  %v8740_v36 = vadd.f32 %v14713_v8, %v14672_v45  ;;  %v15250_v45 = vld [vmem:[#allocation40_spill] sm:$0xff]  ;;  %v15253_v57 = vld [vmem:[#allocation49_spill] sm:$0xff] }
 0xe51   : > { %8877 = vmatprep.subr.mxu1 %v8870_v39  ;;  %v8821_v61 = vadd.f32 %v14734_v56, %v8750_v46  ;;  %v8820_v43 = vadd.f32 %v14737_v63, %v8746_v26  ;;  %v8856_v0 = vmax.f32 %v8824_v41, 0.0  ;;  %v8732_v8 = vadd.f32 %v15250_v45, %v15249_v22  ;;  %v8873_v41 = vld [vmem:[%s12687_s14] sm:$0xff] }
 0xe52   : > { %8878 = vmatpush1.msra.mxu1 %v8869_v40  ;;  %v8855_v24 = vmax.f32 %v8823_v49, 0.0  ;;  %v8818_v48 = vadd.f32 %v14737_v63, %v8742_v1  ;;  %v8854_v59 = vmax.f32 %v8822_v52, 0.0  ;;  %v8817_v47 = vadd.f32 %v14734_v56, %v8740_v36  ;;  %v15256_v40 = vld [vmem:[#allocation34_spill] sm:$0xff]  ;;  %v12037_v49 = vld [vmem:[#allocation10 + $0x784] ss:$8 sps:$4 sm:$0xff]   ;;  %v12041_v36 = vld [vmem:[#allocation8 + $0x130] sm:$0xff]  }
 0xe53   : > { %8879 = vmatprep.subr.mxu1 %v8868_v60  ;;  %v8853_v9 = vmax.f32 %v8821_v61, 0.0  ;;  %v8726_v12 = vadd.f32 %v15254_v18, %v15253_v57  ;;  %v8816_v39 = vadd.f32 %v14737_v63, %v8736_v54  ;;  %v8852_v16 = vmax.f32 %v8820_v43, 0.0  ;;  %v12038_v1 = vld [vmem:[#allocation8 + $0x178] sm:$0xff]   ;;  %v12042_v61 = vld [vmem:[#allocation8 + $0x168] sm:$0xff]   ;;  %v12044_v54 = vld [vmem:[#allocation8 + $0x160] sm:$0xff]  }
 0xe54   : > { %8880 = vmatpush1.msra.mxu1 %v8867_v58  ;;  %v8724_v5 = vadd.f32 %v15256_v40, %v15255_v42  ;;  %v8815_v25 = vadd.f32 %v14734_v56, %v8734_v28  ;;  %v8851_v60 = vmax.f32 %v8819_v10, 0.0  ;;  %v8722_v58 = vadd.f32 %v15258_v35, %v15257_v15  ;;  %v12039_v52 = vld [vmem:[#allocation8 + $0x138] sm:$0xff]   ;;  %v12045_v43 = vld [vmem:[#allocation8 + $0x120] sm:$0xff]   ;;  %v12056_v57 = vld [vmem:[#allocation8 + $0x1a8] sm:$0xff]  }
 0xe55   : > { %8881 = vmatprep.subr.mxu1 %v8866_v44  ;;  %v8814_v4 = vadd.f32 %v14737_v63, %v8732_v8  ;;  %v8850_v6 = vmax.f32 %v8818_v48, 0.0  ;;  %v15259_v44 = vld [vmem:[#allocation50_spill] sm:$0xff]  ;;  %v8849_v7 = vmax.f32 %v8817_v47, 0.0  ;;  %v8812_v27 = vadd.f32 %v14737_v63, %v8726_v12  ;;  %v12048_v8 = vld [vmem:[#allocation8 + $0x150] sm:$0xff]   ;;  %v12057_v18 = vld [vmem:[#allocation8 + $0x1a0] sm:$0xff]  }
 0xe56   : > { %8882 = vmatpush1.msra.mxu1 %v8865_v55  ;;  %v8720_v11 = vadd.f32 %v15260_v19, %v15259_v44  ;;  %v8813_v55 = vadd.f32 %v14734_v56, %v8730_v29  ;;  %v8811_v50 = vadd.f32 %v14734_v56, %v8724_v5  ;;  %v8847_v37 = vmax.f32 %v8815_v25, 0.0  ;;  %v12049_v48 = vld [vmem:[#allocation8 + $0x110] sm:$0xff]   ;;  %v12053_v29 = vld [vmem:[#allocation8 + $0x100] sm:$0xff]   ;;  %v12054_v47 = vld [vmem:[#allocation8 + $0x1b8] sm:$0xff]  }
 0xe57   : > { %8883 = vmatprep.subr.mxu1 %v8864_v3  ;;  %v8848_v3 = vmax.f32 %v8816_v39, 0.0  ;;  %v8846_v32 = vmax.f32 %v8814_v4, 0.0  ;;  %v8844_v46 = vmax.f32 %v8812_v27, 0.0  ;;  %v8985_v12 = vld [vmem:[#allocation13 + $0x7] ss:$8 sm:$0x3] }
 0xe58   : > { %8884 = vmatpush1.msra.mxu1 %v8863_v53  ;;  %v8810_v53 = vadd.f32 %v14737_v63, %v8722_v58  ;;  %v8809_v31 = vadd.f32 %v14734_v56, %v8720_v11  ;;  %v8843_v17 = vmax.f32 %v8811_v50, 0.0  ;;  %v15261_v63 = vmov 0.0   ;;  %v12032_v56 = vld [vmem:[#allocation10 + $0x790] ss:$8 sps:$4 sm:$0xff]   ;;  %v12061_v50 = vld [vmem:[#allocation8 + $0x180] sm:$0xff]  }
 0xe59   : > { %8885 = vmatprep.subr.mxu1 %v8862_v23  ;;  %v8845_v23 = vmax.f32 %v8813_v55, 0.0  ;;  %9188 = vmatpush2.bf16.msra.mxu0 %v12032_v56  ;;  %v15262_v42 = vld [vmem:[#allocation25_spill] sm:$0xff]  ;;  %v12058_v27 = vld [vmem:[#allocation8 + $0x198] sm:$0xff]  }
 0xe5a   : > { %8886 = vmatpush1.msra.mxu1 %v8861_v14  ;;  %v8842_v14 = vmax.f32 %v8810_v53, 0.0  ;;  %v8841_v26 = vmax.f32 %v8809_v31, 0.0  ;;  %9189 = vmatprep.subr.bf16.mxu0 %v12037_v49  ;;  %v8992_v40 = vrot.slane %v8985_v12, %v15262_v42  ;;  %v12063_v53 = vld [vmem:[#allocation8 + $0x1f0] sm:$0xff]   ;;  %v12065_v31 = vld [vmem:[#allocation8 + $0x1e0] sm:$0xff]  }
 0xe5b   : > { %8887 = vmatprep.subr.mxu1 %v8860_v21  ;;  %v8874_v21 = vld [vmem:[%s12687_s14 + $0x8] sm:$0xff] }
 0xe5c   : > { %8888 = vmatpush1.msra.mxu1 %v8859_v13  ;;  %v12035_v13 = vld [vmem:[#allocation10 + $0x780] ss:$8 sps:$4 sm:$0xff]  }
 0xe5d   : > { %8889 = vmatprep.subr.mxu1 %v8858_v62  ;;  %9190 = vmatpush2.bf16.msra.mxu0 %v12035_v13  ;;  %v12040_v62 = vld [vmem:[#allocation8 + $0x170] sm:$0xff]  }
 0xe5e   : > { %8890 = vmatpush1.msra.mxu1 %v8857_v2  ;;  %10888 = vmatprep.subr.bf16.mxu0 %v15261_v63  ;;  %v12043_v2 = vld [vmem:[#allocation8 + $0x128] sm:$0xff]  }
 0xe5f   : > { %8891 = vmatprep.subr.mxu1 %v8856_v0  ;;  %v12046_v0 = vld [vmem:[#allocation8 + $0x158] sm:$0xff]  }
 0xe60   : > { %8892 = vmatpush1.msra.mxu1 %v8855_v24 }
 0xe61   : > { %8893 = vmatprep.subr.mxu1 %v8854_v59  ;;  %v12050_v59 = vld [vmem:[#allocation8 + $0x148] sm:$0xff]  }
 0xe62   : > { %8894 = vmatpush1.msra.mxu1 %v8853_v9  ;;  %v12055_v9 = vld [vmem:[#allocation8 + $0x1b0] sm:$0xff]  }
 0xe63   : > { %8895 = vmatprep.subr.mxu1 %v8852_v16  ;;  %v8996_v16 = vrot.slane %v8985_v12, %v15214_v38  ;;  %v12059_v38 = vld [vmem:[#allocation8 + $0x190] sm:$0xff]  }
 0xe64   : > { %8896 = vmatpush1.msra.mxu1 %v8851_v60 }
 0xe65   : > { %8897 = vmatprep.subr.mxu1 %v8850_v6 }
 0xe66   : > { %8898 = vmatpush1.msra.mxu1 %v8849_v7 }
 0xe67   : > { %8899 = vmatprep.subr.mxu1 %v8848_v3  ;;  %v12060_v3 = vld [vmem:[#allocation8 + $0x188] sm:$0xff]  }
 0xe68   : > { %8900 = vmatpush1.msra.mxu1 %v8847_v37  ;;  %v12062_v37 = vld [vmem:[#allocation8 + $0x1f8] sm:$0xff]  }
 0xe69   : > { %8901 = vmatprep.subr.mxu1 %v8846_v32  ;;  %v12064_v32 = vld [vmem:[#allocation8 + $0x1e8] sm:$0xff]  }
 0xe6a   : > { %8902 = vmatpush1.msra.mxu1 %v8845_v23  ;;  %v12066_v23 = vld [vmem:[#allocation8 + $0x1d8] sm:$0xff]  }
 0xe6b   : > { %8903 = vmatprep.subr.mxu1 %v8844_v46 }
 0xe6c   : > { %8904 = vmatpush1.msra.mxu1 %v8843_v17 }
 0xe6d   : > { %8905 = vmatprep.subr.mxu1 %v8842_v14 }
 0xe6e   : > { %8906 = vmatpush1.msra.mxu1 %v8841_v26  ;;  %v9238_v26 = vld [vmem:[#allocation13 + $0x20] ss:$0 sm:$0xff] }
 0xe6f   : > { %8940 = vmatmul.mubr.f32.vlgmr.msra.gmra.mxu1 %v8873_v41  ;;  %10624 = vmatprep.subr.bf16.mxu1 %v12038_v1 }
 0xe70   : > { %8945 = vmatprep.mubr.f32.mxu1 %v15261_v63  ;;  %10625 = vmatpush3.bf16.msra.mxu1 %v12039_v52 }
 0xe71   : > { %10626 = vmatprep.subr.bf16.mxu1 %v12040_v62  ;;  %v12067_v62 = vld [vmem:[#allocation8 + $0x1d0] sm:$0xff]  }
 0xe73   : > { %8946 = vmatmul.mubr.f32.gmra.mxu1 %v8874_v21 }
 0xe74   : > { %10627 = vmatpush3.bf16.msra.mxu1 %v12041_v36  ;;  %v12068_v36 = vld [vmem:[#allocation8 + $0x1c8] sm:$0xff]  }
 0xe75   : > { %10628 = vmatprep.subr.bf16.mxu1 %v12042_v61  ;;  %v12069_v61 = vld [vmem:[#allocation8 + $0x1c0] sm:$0xff]  }
 0xe78   : > { %10629 = vmatpush3.bf16.msra.mxu1 %v12043_v2  ;;  %v9396_v2 = vld [vmem:[#allocation13 + $0x21] ss:$0 sm:$0xff] }
 0xe79   : > { %10630 = vmatprep.subr.bf16.mxu1 %v12044_v54 }
 0xe7c   : > { %10631 = vmatpush3.bf16.msra.mxu1 %v12045_v43 }
 0xe7d   : > { %10632 = vmatprep.subr.bf16.mxu1 %v12046_v0 }
 0xe80   : > { %10633 = vmatpush3.bf16.msra.mxu1 %v12047_v51 }
 0xe81   : > { %10634 = vmatprep.subr.bf16.mxu1 %v12048_v8 }
 0xe84   : > { %10635 = vmatpush3.bf16.msra.mxu1 %v12049_v48 }
 0xe85   : > { %10636 = vmatprep.subr.bf16.mxu1 %v12050_v59 }
 0xe88   : > { %10637 = vmatpush3.bf16.msra.mxu1 %v12051_v34 }
 0xe89   : > { %10638 = vmatprep.subr.bf16.mxu1 %v12052_v30 }
 0xe8c   : > { %10639 = vmatpush3.bf16.msra.mxu1 %v12053_v29 }
 0xe8d   : > { %10908 = vmatprep.subr.bf16.mxu1 %v15261_v63 }
 0xf2f   : > { %v8941_v20 = vpop.f32.mrf.mxu1 }
 0xf31   : > { %v8943_v28 = vpop.f32.mrf.mxu1 }
 0xf33   : > { %v8947_v10 = vpop.f32.mrf.mxu1 }
 0xf34   : > { %v8986_v45 = vpack.c.bf16 %v8947_v10, %v8941_v20 }
 0xf35   : > { %v8949_v24 = vpop.f32.mrf.mxu1 }
 0xf36   : > { %v8987_v22 = vpack.c.bf16 %v8949_v24, %v8943_v28 }
 0xf38   : > { %9191 = vmatprep.mubr.bf16.mxu0 %v8987_v22 }
 0xf39   : > { %9192 = vmatmul.mubr.bf16.vlgmr.msra.gmra.mxu0 %v8986_v45  ;;  %v9505_v45 = vld [vmem:[#allocation13 + $0x22] ss:$0 sm:$0xff] }
 0xf3a   : > { %10889 = vmatpush3.bf16.msra.mxu0 %v12054_v47  ;;  %10904 = vmatprep.mubr.msk.bf16.mxu0 %vm12393_vm0, %v15261_v63 }
 0xf3b   : > { %10890 = vmatprep.subr.bf16.mxu0 %v15261_v63 }
 0xf3e   : > { %10891 = vmatpush3.bf16.msra.mxu0 %v12055_v9 }
 0xf3f   : > { %10892 = vmatprep.subr.bf16.mxu0 %v15261_v63 }
 0xf42   : > { %10893 = vmatpush3.bf16.msra.mxu0 %v12056_v57 }
 0xf43   : > { %10894 = vmatprep.subr.bf16.mxu0 %v15261_v63 }
 0xf46   : > { %10895 = vmatpush3.bf16.msra.mxu0 %v12057_v18 }
 0xf47   : > { %10896 = vmatprep.subr.bf16.mxu0 %v15261_v63 }
 0xf4a   : > { %10897 = vmatpush3.bf16.msra.mxu0 %v12058_v27 }
 0xf4b   : > { %10898 = vmatprep.subr.bf16.mxu0 %v15261_v63 }
 0xf4e   : > { %10899 = vmatpush3.bf16.msra.mxu0 %v12059_v38 }
 0xf4f   : > { %10900 = vmatprep.subr.bf16.mxu0 %v15261_v63 }
 0xf52   : > { %10901 = vmatpush3.bf16.msra.mxu0 %v12060_v3 }
 0xf53   : > { %10902 = vmatprep.subr.bf16.mxu0 %v15261_v63 }
 0xf56   : > { %10903 = vmatpush3.bf16.msra.mxu0 %v12061_v50 }
 0xff9   : > { %v9193_v39 = vpop.f32.mrf.mxu0 }
 0xffa   : > { %v9194_v35 = vadd.f32 %v9193_v39, %v8992_v40 }
 0xffb   : > { %v9195_v5 = vpop.f32.mrf.mxu0 }
 0xffc   : > { %v9196_v60 = vadd.f32 %v9195_v5, %v8996_v16  ;;  %v9202_v11 = vmax.f32 %v9194_v35, 0.0 }
 0xffd   : > { %v9197_v25 = vpop.f32.mrf.mxu0 }
 0xffe   : > { %v9198_v15 = vadd.f32 %v9197_v25, %v8992_v40  ;;  %v9203_v44 = vmax.f32 %v9196_v60, 0.0 }
 0xfff   : > { %v9199_v58 = vpop.f32.mrf.mxu0 }
0x1000   : > { %v9200_v4 = vadd.f32 %v9199_v58, %v8996_v16  ;;  %v9204_v6 = vmax.f32 %v9198_v15, 0.0 }
0x1002   : > { %v9205_v19 = vmax.f32 %v9200_v4, 0.0  ;;  %v9239_v7 = vpack.c.bf16 %v9204_v6, %v9202_v11 }
0x1004   : > { %v9240_v55 = vpack.c.bf16 %v9205_v19, %v9203_v44 }
0x1006   : > { %9369 = vmatprep.mubr.bf16.mxu1 %v9240_v55 }
0x1007   : > { %9370 = vmatmul.mubr.bf16.vlgmr.msra.gmra.mxu1 %v9239_v7 }
0x1008   : > { %10924 = vmatprep.mubr.msk.bf16.mxu1 %vm12393_vm0, %v15261_v63  ;;  %10909 = vmatpush3.bf16.msra.mxu1 %v12062_v37 }
0x1009   : > { %10910 = vmatprep.subr.bf16.mxu1 %v15261_v63 }
0x100c   : > { %10911 = vmatpush3.bf16.msra.mxu1 %v12063_v53 }
0x100d   : > { %10912 = vmatprep.subr.bf16.mxu1 %v15261_v63 }
0x1010   : > { %10913 = vmatpush3.bf16.msra.mxu1 %v12064_v32 }
0x1011   : > { %10914 = vmatprep.subr.bf16.mxu1 %v15261_v63 }
0x1014   : > { %10915 = vmatpush3.bf16.msra.mxu1 %v12065_v31 }
0x1015   : > { %10916 = vmatprep.subr.bf16.mxu1 %v15261_v63 }
0x1018   : > { %10917 = vmatpush3.bf16.msra.mxu1 %v12066_v23 }
0x1019   : > { %10918 = vmatprep.subr.bf16.mxu1 %v15261_v63 }
0x101c   : > { %10919 = vmatpush3.bf16.msra.mxu1 %v12067_v62 }
0x101d   : > { %10920 = vmatprep.subr.bf16.mxu1 %v15261_v63 }
0x1020   : > { %10921 = vmatpush3.bf16.msra.mxu1 %v12068_v36 }
0x1021   : > { %10922 = vmatprep.subr.bf16.mxu1 %v15261_v63 }
0x1024   : > { %10923 = vmatpush3.bf16.msra.mxu1 %v12069_v61 }
0x10c7   : > { %v10640_v46 = vpop.f32.mrf.mxu1 }
0x10c9   : > { %v10641_v17 = vpop.f32.mrf.mxu1 }
0x10ca   : > { %v10642_v14 = vadd.f32 %v10641_v17, %v10640_v46 }
0x10cb   : > { %v10643_v41 = vpop.f32.mrf.mxu1 }
0x10cc   : > { %v9372_v56 = vadd.f32 %v10642_v14, %v9238_v26 }
0x10cd   : > { %v10644_v21 = vpop.f32.mrf.mxu1 }
0x10ce   : > { %v10645_v33 = vadd.f32 %v10644_v21, %v10643_v41  ;;  %v9378_v13 = vmax.f32 %v9372_v56, 0.0 }
0x10d0   : > { %v9375_v49 = vadd.f32 %v10645_v33, %v9238_v26 }
0x10d2   : > { %v9379_v1 = vmax.f32 %v9375_v49, 0.0 }
0x10d4   : > { %v9397_v52 = vpack.c.bf16 %v9379_v1, %v9378_v13 }
0x10d6   : > { %10905 = vmatmul.mubr.bf16.vlgmr.msra.gmra.mxu0 %v9397_v52 }
0x1196   : > { %v9480_v54 = vpop.f32.mrf.mxu0 }
0x1197   : > { %v9481_v0 = vadd.f32 %v9480_v54, %v9396_v2 }
0x1198   : > { %v10906_v43 = vpop.f32.mrf.mxu0 }
0x1199   : > { %v9487_v10 = vmax.f32 %v9481_v0, 0.0 }
0x119a   : > { %v9483_v51 = vpop.f32.mrf.mxu0 }
0x119b   : > { %v9484_v20 = vadd.f32 %v9483_v51, %v9396_v2 }
0x119c   : > { %v10907_v28 = vpop.f32.mrf.mxu0 }
0x119d   : > { %v9488_v24 = vmax.f32 %v9484_v20, 0.0 }
0x119f   : > { %v9506_v22 = vpack.c.bf16 %v9488_v24, %v9487_v10 }
0x11a1   : > { %10925 = vmatmul.mubr.bf16.vlgmr.msra.gmra.mxu1 %v9506_v22 }
0x1261   : > { %v9589_v8 = vpop.f32.mrf.mxu1 }
0x1262   : > { %v9590_v63 = vadd.f32 %v9589_v8, %v9505_v45 }
0x1263   : > { %v10926_v48 = vpop.f32.mrf.mxu1 }
0x1264   : > { %9596 = vst [vmem:[%s431_s30] sm:$0xff] %v9590_v63 }
0x1265   : > { %v9592_v59 = vpop.f32.mrf.mxu1 }
0x1266   : > { %v9593_v34 = vadd.f32 %v9592_v59, %v9505_v45 }
0x1267   : > { %v10927_v30 = vpop.f32.mrf.mxu1 }
0x1268   : > { %9597 = vst [vmem:[%s431_s30 + $0x8] sm:$0xff] %v9593_v34 }
0x1269   : > { %12311 = shalt.err (!%p12308_p10)
}
0x126a   : > { %s12312_s20 = scalar_lea.hbm %s14840_s4, 256  ;;  %s12316_s17 = scalar_lea.hbm %s14890_s7, 512 }
0x126b   : > { %p12313_p13 = scmp.ne.s32.totalorder %s14840_s4, %s12312_s20  ;;  %p12317_p2 = scmp.lt.s32.totalorder %s14840_s4, %s14890_s7 }
0x126c   : > { %p12318_p0 = scmp.lt.s32.totalorder %s12316_s17, %s12312_s20 }
0x126d   : > { %p12314_p7 = pnand %p12313_p13, %p15263_p8 }
0x126e   : > { %p12319_p1 = por %p12318_p0, %p12317_p2 }
0x126f   : > { %p12315_p9 = pneg %p12314_p7 }
0x1271   : > { %p12320_p4 = pnand %p12319_p1, %p12315_p9 }
0x1273   : > { %12323 = shalt.err (!%p12320_p4)
}
0x1274   : > { %s12395_s21 = smov 128   ;;  %s12396_s22 = smov 8  }
0x1275   : > { %10950 = dma.vmem_to_hbm [thread:$0]  (%p15263_p8), %s14835_s1, 256, %s14840_s4, %s9599_s19, %s12395_s21, %s12395_s21, %s12396_s22  }
0x1276 PF: > { %s9627_s23 = sand.u32 1, %s12362_s24   ;;  %p15264_p11 = scmp.ne.s32.totalorder %s14950_s8, 0 }
0x1277   : > { %p15265_p12 = scmp.ge.s32.totalorder %s12374_s27, 2  ;;  %s9628_s14 = scalar_lea.sflag [#allocation4], %s9627_s23 }
0x1279   : > { %p10976_p3 = pnand %p15265_p12, %p15264_p11 }
0x127b   : > { %p10977_p6 = pneg %p10976_p3 }
0x127d   : > { %12357 = dma.done.wait (%p10977_p6), %s9628_s14, 256  }
0x127e   : > { %12359 = vsyncadd (%p10977_p6), %s9628_s14, 4294967040  ;;  %s15266_s27 = sld [smem:[#allocation21_spill]]  ;;  %s15269_s24 = smov %s12366_s25 }
0x127f   : > { %s15267_s30 = sld [smem:[#allocation20_spill]] }
0x1280   : > { %s15268_s26 = sld [smem:[#allocation22_spill]] }
0x1284   : > { %p25_p5 = scmp.ge.s32.totalorder %s15266_s27, 4  }
0x1285   : > { %s15270_s25 = smov %s15267_s30 }
0x1286   :  { %27 = sbr.rel (!%p25_p5) target bundleno = 14 (0xe), region = 139 }
0x128b   :  { %9633 = vsyncpa [#allocation3], 1 }
0x128c   :  { %9635 = vsyncpa [#allocation3 + $0x1], 1 }
0x128d   :  { %9636 = vsyncpa [#allocation6], 1 }
0x128e   :  { %9638 = vsyncpa [#allocation6 + $0x1], 1 }
0x128f   :  { %9639 = vsyncpa [#allocation9], 1 }
0x1290   :  { %9640 = vsyncpa [#allocation12], 1 }
0x1291   :  { %9641 = vsyncpa [#allocation4], 1 }
0x1292   :  { %9643 = vsyncpa [#allocation4 + $0x1], 1 }

</bundles_post_ra>
